<compile_context>
chip_gen: v5e
topology: v5e:2x2
jax: 0.10.0
libtpu: 0.0.40
codegen_flags: <defaults>
</compile_context>

<pallas_src>
import jax
import jax.numpy as jnp
import numpy as np
from jax import lax
from jax.experimental import pallas as pl
from jax.experimental.pallas import tpu as pltpu


def _round_up(x, m):
    return (x + m - 1) // m * m


# -----------------------------------------------------------------------------
# Pallas kernel: 5x5 conv (pad 2, stride 1) + bias + ReLU + 2x2 maxpool, per image.
# Input arrives as the 4 stride-2 phase planes of the zero-padded activation,
# flattened row-major to a lane-dense axis; every conv tap of every pool branch is
# then a contiguous static lane slice of one phase plane.
# -----------------------------------------------------------------------------
def _make_conv_pool_kernel(cin, cout, wq, l0):
    # Pool branch (i, j), tap (dy, dx): conv input pixel xpad[2u+i+dy, 2v+j+dx]
    # lives in phase plane (p, q) = ((i+dy)%2, (j+dx)%2) at flat lane offset
    # ((i+dy)//2)*wq + (j+dx)//2 relative to output position n = u*wq + v.
    branch_taps = []
    for i in (0, 1):
        for j in (0, 1):
            taps = []
            for dy in range(5):
                for dx in range(5):
                    p, a = (i + dy) % 2, (i + dy) // 2
                    q, e = (j + dx) % 2, (j + dx) // 2
                    taps.append((2 * p + q, a * wq + e))
            branch_taps.append(taps)

    def kernel(x_ref, w_ref, b_ref, o_ref):
        # x_ref: (1, 4, cin, l_in) bf16   phase planes (flattened, zero tail)
        # w_ref: (25, cout, cin)   bf16   per-tap weights (t = dy*5 + dx)
        # b_ref: (cout, 1)         f32    bias column
        # o_ref: (1, cout, l0)            pooled output (lane-dense)
        # HBM/DMA stays bf16; in-kernel math is upcast to f32 (no bf16 VPU on v5e).
        planes = [x_ref[0, k].astype(jnp.float32) for k in range(4)]
        w_all = w_ref[...].astype(jnp.float32)                     # (25, cout, cin)
        pooled = None
        for taps in branch_taps:                                   # 4 pool branches
            acc = jnp.zeros((cout, l0), jnp.float32)
            for t, (ph, off) in enumerate(taps):                   # 25 conv taps
                xsl = planes[ph][:, off:off + l0]                  # (cin, l0)
                wt = w_all[t]                                      # (cout, cin)
                if cin == 1:
                    acc = acc + wt * xsl                           # VPU broadcast-FMA
                else:
                    acc = acc + jnp.dot(wt, xsl,                   # MXU, f32 acc
                                        preferred_element_type=jnp.float32)
            pooled = acc if pooled is None else jnp.maximum(pooled, acc)
        # bias + ReLU AFTER the pool max (exact: both monotone) -> fewer VPU passes.
        o_ref[0] = jnp.maximum(pooled + b_ref[...], 0.0).astype(o_ref.dtype)

    return kernel


def conv_relu_pool_block(x, wgt, bias, *, out_dtype=jnp.float32):
    """Conv2d(k=5, s=1, p=2) + ReLU + MaxPool2d(2) via one Pallas call.

    x: (B, Cin, H, W) -> (B, Cout, H//2, W//2). H, W must be even
    (PyTorch MaxPool2d(2) floors odd dims; crop/pad beforehand if needed).
    """
    bsz, cin, h, w_img = x.shape
    cout = wgt.shape[0]
    assert h % 2 == 0 and w_img % 2 == 0, (h, w_img)
    h1, w1 = h // 2, w_img // 2
    hq, wq = h1 + 2, w1 + 2                        # padded phase-plane dims
    l0 = _round_up(hq * wq, 128)                   # lane-dense output width
    l_in = l0 + _round_up(2 * wq + 2, 128)         # + room for the largest tap shift

    # Stride-2 phase decomposition of the zero-padded input (no im2col inflation),
    # flattened per image and streamed as bf16.
    xp = jnp.pad(x, ((0, 0), (0, 0), (2, 2), (2, 2)))
    planes = [xp[:, :, p::2, q::2] for p in (0, 1) for q in (0, 1)]
    xph = jnp.stack(planes, axis=1).reshape(bsz, 4, cin, hq * wq)
    xph = jnp.pad(xph, ((0, 0), (0, 0), (0, 0), (0, l_in - hq * wq)))
    xph = xph.astype(jnp.bfloat16)

    # (Cout, Cin, 5, 5) -> (25, Cout, Cin) with tap index t = dy*5 + dx.
    w_taps = jnp.transpose(wgt, (2, 3, 0, 1)).reshape(25, cout, cin).astype(jnp.bfloat16)
    b_col = bias.reshape(cout, 1).astype(jnp.float32)

    out = pl.pallas_call(
        _make_conv_pool_kernel(cin, cout, wq, l0),
        out_shape=jax.ShapeDtypeStruct((bsz, cout, l0), out_dtype),
        grid=(bsz,),
        in_specs=[
            pl.BlockSpec((1, 4, cin, l_in), lambda bi: (bi, 0, 0, 0)),  # per-image planes
            pl.BlockSpec((25, cout, cin), lambda bi: (0, 0, 0)),        # weights (resident)
            pl.BlockSpec((cout, 1), lambda bi: (0, 0)),                 # bias (resident)
        ],
        out_specs=pl.BlockSpec((1, cout, l0), lambda bi: (bi, 0, 0)),
        compiler_params=pltpu.CompilerParams(
            dimension_semantics=("parallel",),
            vmem_limit_bytes=48 * 1024 * 1024,
        ),
    )(xph, w_taps, b_col)

    # Drop garbage lanes (positions with v >= W/2 or u >= H/2, plus the tail) and
    # un-flatten back to NCHW. Pure layout plumbing on the small output.
    out = out[:, :, :hq * wq].reshape(bsz, cout, hq, wq)[:, :, :h1, :w1]
    return out


# -----------------------------------------------------------------------------
# Forward pass (Pallas-backed), NCHW throughout -> Flatten is a plain reshape.
# -----------------------------------------------------------------------------
def image_embed_forward(x_nchw, params):
    w1, b1, w2, b2 = params
    # Block 1 writes its HBM intermediate in bf16 (halves the inter-block traffic).
    y1 = conv_relu_pool_block(x_nchw, w1, b1, out_dtype=jnp.bfloat16)
    y2 = conv_relu_pool_block(y1, w2, b2, out_dtype=jnp.float32)
    # nn.Flatten on NCHW == reshape (C-major, then H, then W per sample).
    return y2.reshape(y2.shape[0], -1)


# -----------------------------------------------------------------------------
# Pure-JAX reference (correctness check only)
# -----------------------------------------------------------------------------
def reference_forward(x_nchw, params):
    w1, b1, w2, b2 = params

    def conv(x, w):
        return lax.conv_general_dilated(
            x, w, window_strides=(1, 1), padding=((2, 2), (2, 2)),
            dimension_numbers=('NCHW', 'OIHW', 'NCHW'),
            precision=lax.Precision.HIGHEST)

    def pool(x):
        return lax.reduce_window(x, -jnp.inf, lax.max,
                                 (1, 1, 2, 2), (1, 1, 2, 2), 'VALID')

    y = pool(jnp.maximum(conv(x_nchw, w1) + b1[None, :, None, None], 0.0))
    y = pool(jnp.maximum(conv(y, w2) + b2[None, :, None, None], 0.0))
    return y.reshape(y.shape[0], -1)


# -----------------------------------------------------------------------------
# Deterministic parameters (shapes from the module's __init__)
# -----------------------------------------------------------------------------
def init_params(key):
    k1, k2, k3, k4 = jax.random.split(key, 4)
    w1 = 0.10 * jax.random.normal(k1, (16, 1, 5, 5), jnp.float32)   # Conv2d(1, 16, 5)
    b1 = 0.10 * jax.random.normal(k2, (16,), jnp.float32)
    w2 = 0.05 * jax.random.normal(k3, (32, 16, 5, 5), jnp.float32)  # Conv2d(16, 32, 5)
    b2 = 0.05 * jax.random.normal(k4, (32,), jnp.float32)
    return (w1, b1, w2, b2)


if __name__ == "__main__":
    root = jax.random.PRNGKey(0)
    kx, kp = jax.random.split(root)
    params = init_params(kp)
    x = jax.random.normal(kx, (2, 1, 16, 16), jnp.float32)          # NCHW, like PyTorch

    out = jax.block_until_ready(jax.jit(image_embed_forward)(x, params))
    assert out.shape == (2, 32 * 4 * 4), out.shape

    ref = jax.block_until_ready(reference_forward(x, params))
    # Tolerance accounts for bf16 activation/weight storage + single-pass bf16 MXU
    # (same effective precision as the previous DEFAULT-precision version) vs. the
    # HIGHEST-precision f32 reference.
    np.testing.assert_allclose(np.asarray(out), np.asarray(ref), rtol=2e-2, atol=2e-2)

    print("KERNEL_OK")
</pallas_src>

<mosaic_0001>
module attributes {stable_mosaic.version = 11 : i64} {
  func.func @kernel(%arg0: i32, %arg1: memref<1x4x1x256xbf16, #tpu.memory_space<vmem>>, %arg2: memref<25x16x1xbf16, #tpu.memory_space<vmem>>, %arg3: memref<16x1xf32, #tpu.memory_space<vmem>>, %arg4: memref<1x16x128xbf16, #tpu.memory_space<vmem>>) attributes {dimension_semantics = [#tpu.dimension_semantics<parallel>], iteration_bounds = array<i64: 2>, scalar_prefetch = 0 : i64, scratch_operands = 0 : i64, tpu.core_type = #tpu.core_type<tc>, window_params = [{transform_indices = @transform_0, window_bounds = array<i64: 1, 4, 1, 256>}, {pipeline_mode = #tpu.pipeline_mode<synchronous>, transform_indices = @transform_1, window_bounds = array<i64: 25, 16, 1>}, {pipeline_mode = #tpu.pipeline_mode<synchronous>, transform_indices = @transform_2, window_bounds = array<i64: 16, 1>}, {transform_indices = @transform_3, window_bounds = array<i64: 1, 16, 128>}]} {
    %c0 = arith.constant 0 : index
    %c0_0 = arith.constant 0 : index
    %c0_1 = arith.constant 0 : index
    %c0_2 = arith.constant 0 : index
    %0 = vector.load %arg1[%c0, %c0_0, %c0_1, %c0_2] : memref<1x4x1x256xbf16, #tpu.memory_space<vmem>>, vector<1x1x1x256xbf16>
    %1 = vector.shape_cast %0 : vector<1x1x1x256xbf16> to vector<1x256xbf16>
    %2 = arith.extf %1 : vector<1x256xbf16> to vector<1x256xf32>
    %c0_3 = arith.constant 0 : index
    %c1 = arith.constant 1 : index
    %c0_4 = arith.constant 0 : index
    %c0_5 = arith.constant 0 : index
    %3 = vector.load %arg1[%c0_3, %c1, %c0_4, %c0_5] : memref<1x4x1x256xbf16, #tpu.memory_space<vmem>>, vector<1x1x1x256xbf16>
    %4 = vector.shape_cast %3 : vector<1x1x1x256xbf16> to vector<1x256xbf16>
    %5 = arith.extf %4 : vector<1x256xbf16> to vector<1x256xf32>
    %c0_6 = arith.constant 0 : index
    %c2 = arith.constant 2 : index
    %c0_7 = arith.constant 0 : index
    %c0_8 = arith.constant 0 : index
    %6 = vector.load %arg1[%c0_6, %c2, %c0_7, %c0_8] : memref<1x4x1x256xbf16, #tpu.memory_space<vmem>>, vector<1x1x1x256xbf16>
    %7 = vector.shape_cast %6 : vector<1x1x1x256xbf16> to vector<1x256xbf16>
    %8 = arith.extf %7 : vector<1x256xbf16> to vector<1x256xf32>
    %c0_9 = arith.constant 0 : index
    %c3 = arith.constant 3 : index
    %c0_10 = arith.constant 0 : index
    %c0_11 = arith.constant 0 : index
    %9 = vector.load %arg1[%c0_9, %c3, %c0_10, %c0_11] : memref<1x4x1x256xbf16, #tpu.memory_space<vmem>>, vector<1x1x1x256xbf16>
    %10 = vector.shape_cast %9 : vector<1x1x1x256xbf16> to vector<1x256xbf16>
    %11 = arith.extf %10 : vector<1x256xbf16> to vector<1x256xf32>
    %c0_12 = arith.constant 0 : index
    %c0_13 = arith.constant 0 : index
    %c0_14 = arith.constant 0 : index
    %12 = vector.load %arg2[%c0_12, %c0_13, %c0_14] : memref<25x16x1xbf16, #tpu.memory_space<vmem>>, vector<25x16x1xbf16>
    %13 = arith.extf %12 : vector<25x16x1xbf16> to vector<25x16x1xf32>
    %cst = arith.constant 0.000000e+00 : f32
    %14 = vector.broadcast %cst : f32 to vector<16x128xf32>
    %15 = vector.extract_strided_slice %2 {offsets = [0, 0], sizes = [1, 128], strides = [1, 1]} : vector<1x256xf32> to vector<1x128xf32>
    %16 = vector.extract_strided_slice %13 {offsets = [0, 0, 0], sizes = [1, 16, 1], strides = [1, 1, 1]} : vector<25x16x1xf32> to vector<1x16x1xf32>
    %17 = vector.shape_cast %16 : vector<1x16x1xf32> to vector<16x1xf32>
    %18 = vector.broadcast %17 : vector<16x1xf32> to vector<16x128xf32>
    %19 = vector.broadcast %15 : vector<1x128xf32> to vector<16x128xf32>
    %20 = arith.mulf %18, %19 : vector<16x128xf32>
    %21 = arith.addf %14, %20 : vector<16x128xf32>
    %22 = vector.extract_strided_slice %5 {offsets = [0, 0], sizes = [1, 128], strides = [1, 1]} : vector<1x256xf32> to vector<1x128xf32>
    %23 = vector.extract_strided_slice %13 {offsets = [1, 0, 0], sizes = [1, 16, 1], strides = [1, 1, 1]} : vector<25x16x1xf32> to vector<1x16x1xf32>
    %24 = vector.shape_cast %23 : vector<1x16x1xf32> to vector<16x1xf32>
    %25 = vector.broadcast %24 : vector<16x1xf32> to vector<16x128xf32>
    %26 = vector.broadcast %22 : vector<1x128xf32> to vector<16x128xf32>
    %27 = arith.mulf %25, %26 : vector<16x128xf32>
    %28 = arith.addf %21, %27 : vector<16x128xf32>
    %29 = vector.extract_strided_slice %2 {offsets = [0, 1], sizes = [1, 128], strides = [1, 1]} : vector<1x256xf32> to vector<1x128xf32>
    %30 = vector.extract_strided_slice %13 {offsets = [2, 0, 0], sizes = [1, 16, 1], strides = [1, 1, 1]} : vector<25x16x1xf32> to vector<1x16x1xf32>
    %31 = vector.shape_cast %30 : vector<1x16x1xf32> to vector<16x1xf32>
    %32 = vector.broadcast %31 : vector<16x1xf32> to vector<16x128xf32>
    %33 = vector.broadcast %29 : vector<1x128xf32> to vector<16x128xf32>
    %34 = arith.mulf %32, %33 : vector<16x128xf32>
    %35 = arith.addf %28, %34 : vector<16x128xf32>
    %36 = vector.extract_strided_slice %5 {offsets = [0, 1], sizes = [1, 128], strides = [1, 1]} : vector<1x256xf32> to vector<1x128xf32>
    %37 = vector.extract_strided_slice %13 {offsets = [3, 0, 0], sizes = [1, 16, 1], strides = [1, 1, 1]} : vector<25x16x1xf32> to vector<1x16x1xf32>
    %38 = vector.shape_cast %37 : vector<1x16x1xf32> to vector<16x1xf32>
    %39 = vector.broadcast %38 : vector<16x1xf32> to vector<16x128xf32>
    %40 = vector.broadcast %36 : vector<1x128xf32> to vector<16x128xf32>
    %41 = arith.mulf %39, %40 : vector<16x128xf32>
    %42 = arith.addf %35, %41 : vector<16x128xf32>
    %43 = vector.extract_strided_slice %2 {offsets = [0, 2], sizes = [1, 128], strides = [1, 1]} : vector<1x256xf32> to vector<1x128xf32>
    %44 = vector.extract_strided_slice %13 {offsets = [4, 0, 0], sizes = [1, 16, 1], strides = [1, 1, 1]} : vector<25x16x1xf32> to vector<1x16x1xf32>
    %45 = vector.shape_cast %44 : vector<1x16x1xf32> to vector<16x1xf32>
    %46 = vector.broadcast %45 : vector<16x1xf32> to vector<16x128xf32>
    %47 = vector.broadcast %43 : vector<1x128xf32> to vector<16x128xf32>
    %48 = arith.mulf %46, %47 : vector<16x128xf32>
    %49 = arith.addf %42, %48 : vector<16x128xf32>
    %50 = vector.extract_strided_slice %8 {offsets = [0, 0], sizes = [1, 128], strides = [1, 1]} : vector<1x256xf32> to vector<1x128xf32>
    %51 = vector.extract_strided_slice %13 {offsets = [5, 0, 0], sizes = [1, 16, 1], strides = [1, 1, 1]} : vector<25x16x1xf32> to vector<1x16x1xf32>
    %52 = vector.shape_cast %51 : vector<1x16x1xf32> to vector<16x1xf32>
    %53 = vector.broadcast %52 : vector<16x1xf32> to vector<16x128xf32>
    %54 = vector.broadcast %50 : vector<1x128xf32> to vector<16x128xf32>
    %55 = arith.mulf %53, %54 : vector<16x128xf32>
    %56 = arith.addf %49, %55 : vector<16x128xf32>
    %57 = vector.extract_strided_slice %11 {offsets = [0, 0], sizes = [1, 128], strides = [1, 1]} : vector<1x256xf32> to vector<1x128xf32>
    %58 = vector.extract_strided_slice %13 {offsets = [6, 0, 0], sizes = [1, 16, 1], strides = [1, 1, 1]} : vector<25x16x1xf32> to vector<1x16x1xf32>
    %59 = vector.shape_cast %58 : vector<1x16x1xf32> to vector<16x1xf32>
    %60 = vector.broadcast %59 : vector<16x1xf32> to vector<16x128xf32>
    %61 = vector.broadcast %57 : vector<1x128xf32> to vector<16x128xf32>
    %62 = arith.mulf %60, %61 : vector<16x128xf32>
    %63 = arith.addf %56, %62 : vector<16x128xf32>
    %64 = vector.extract_strided_slice %8 {offsets = [0, 1], sizes = [1, 128], strides = [1, 1]} : vector<1x256xf32> to vector<1x128xf32>
    %65 = vector.extract_strided_slice %13 {offsets = [7, 0, 0], sizes = [1, 16, 1], strides = [1, 1, 1]} : vector<25x16x1xf32> to vector<1x16x1xf32>
    %66 = vector.shape_cast %65 : vector<1x16x1xf32> to vector<16x1xf32>
    %67 = vector.broadcast %66 : vector<16x1xf32> to vector<16x128xf32>
    %68 = vector.broadcast %64 : vector<1x128xf32> to vector<16x128xf32>
    %69 = arith.mulf %67, %68 : vector<16x128xf32>
    %70 = arith.addf %63, %69 : vector<16x128xf32>
    %71 = vector.extract_strided_slice %11 {offsets = [0, 1], sizes = [1, 128], strides = [1, 1]} : vector<1x256xf32> to vector<1x128xf32>
    %72 = vector.extract_strided_slice %13 {offsets = [8, 0, 0], sizes = [1, 16, 1], strides = [1, 1, 1]} : vector<25x16x1xf32> to vector<1x16x1xf32>
    %73 = vector.shape_cast %72 : vector<1x16x1xf32> to vector<16x1xf32>
    %74 = vector.broadcast %73 : vector<16x1xf32> to vector<16x128xf32>
    %75 = vector.broadcast %71 : vector<1x128xf32> to vector<16x128xf32>
    %76 = arith.mulf %74, %75 : vector<16x128xf32>
    %77 = arith.addf %70, %76 : vector<16x128xf32>
    %78 = vector.extract_strided_slice %8 {offsets = [0, 2], sizes = [1, 128], strides = [1, 1]} : vector<1x256xf32> to vector<1x128xf32>
    %79 = vector.extract_strided_slice %13 {offsets = [9, 0, 0], sizes = [1, 16, 1], strides = [1, 1, 1]} : vector<25x16x1xf32> to vector<1x16x1xf32>
    %80 = vector.shape_cast %79 : vector<1x16x1xf32> to vector<16x1xf32>
    %81 = vector.broadcast %80 : vector<16x1xf32> to vector<16x128xf32>
    %82 = vector.broadcast %78 : vector<1x128xf32> to vector<16x128xf32>
    %83 = arith.mulf %81, %82 : vector<16x128xf32>
    %84 = arith.addf %77, %83 : vector<16x128xf32>
    %85 = vector.extract_strided_slice %2 {offsets = [0, 10], sizes = [1, 128], strides = [1, 1]} : vector<1x256xf32> to vector<1x128xf32>
    %86 = vector.extract_strided_slice %13 {offsets = [10, 0, 0], sizes = [1, 16, 1], strides = [1, 1, 1]} : vector<25x16x1xf32> to vector<1x16x1xf32>
    %87 = vector.shape_cast %86 : vector<1x16x1xf32> to vector<16x1xf32>
    %88 = vector.broadcast %87 : vector<16x1xf32> to vector<16x128xf32>
    %89 = vector.broadcast %85 : vector<1x128xf32> to vector<16x128xf32>
    %90 = arith.mulf %88, %89 : vector<16x128xf32>
    %91 = arith.addf %84, %90 : vector<16x128xf32>
    %92 = vector.extract_strided_slice %5 {offsets = [0, 10], sizes = [1, 128], strides = [1, 1]} : vector<1x256xf32> to vector<1x128xf32>
    %93 = vector.extract_strided_slice %13 {offsets = [11, 0, 0], sizes = [1, 16, 1], strides = [1, 1, 1]} : vector<25x16x1xf32> to vector<1x16x1xf32>
    %94 = vector.shape_cast %93 : vector<1x16x1xf32> to vector<16x1xf32>
    %95 = vector.broadcast %94 : vector<16x1xf32> to vector<16x128xf32>
    %96 = vector.broadcast %92 : vector<1x128xf32> to vector<16x128xf32>
    %97 = arith.mulf %95, %96 : vector<16x128xf32>
    %98 = arith.addf %91, %97 : vector<16x128xf32>
    %99 = vector.extract_strided_slice %2 {offsets = [0, 11], sizes = [1, 128], strides = [1, 1]} : vector<1x256xf32> to vector<1x128xf32>
    %100 = vector.extract_strided_slice %13 {offsets = [12, 0, 0], sizes = [1, 16, 1], strides = [1, 1, 1]} : vector<25x16x1xf32> to vector<1x16x1xf32>
    %101 = vector.shape_cast %100 : vector<1x16x1xf32> to vector<16x1xf32>
    %102 = vector.broadcast %101 : vector<16x1xf32> to vector<16x128xf32>
    %103 = vector.broadcast %99 : vector<1x128xf32> to vector<16x128xf32>
    %104 = arith.mulf %102, %103 : vector<16x128xf32>
    %105 = arith.addf %98, %104 : vector<16x128xf32>
    %106 = vector.extract_strided_slice %5 {offsets = [0, 11], sizes = [1, 128], strides = [1, 1]} : vector<1x256xf32> to vector<1x128xf32>
    %107 = vector.extract_strided_slice %13 {offsets = [13, 0, 0], sizes = [1, 16, 1], strides = [1, 1, 1]} : vector<25x16x1xf32> to vector<1x16x1xf32>
    %108 = vector.shape_cast %107 : vector<1x16x1xf32> to vector<16x1xf32>
    %109 = vector.broadcast %108 : vector<16x1xf32> to vector<16x128xf32>
    %110 = vector.broadcast %106 : vector<1x128xf32> to vector<16x128xf32>
    %111 = arith.mulf %109, %110 : vector<16x128xf32>
    %112 = arith.addf %105, %111 : vector<16x128xf32>
    %113 = vector.extract_strided_slice %2 {offsets = [0, 12], sizes = [1, 128], strides = [1, 1]} : vector<1x256xf32> to vector<1x128xf32>
    %114 = vector.extract_strided_slice %13 {offsets = [14, 0, 0], sizes = [1, 16, 1], strides = [1, 1, 1]} : vector<25x16x1xf32> to vector<1x16x1xf32>
    %115 = vector.shape_cast %114 : vector<1x16x1xf32> to vector<16x1xf32>
    %116 = vector.broadcast %115 : vector<16x1xf32> to vector<16x128xf32>
    %117 = vector.broadcast %113 : vector<1x128xf32> to vector<16x128xf32>
    %118 = arith.mulf %116, %117 : vector<16x128xf32>
    %119 = arith.addf %112, %118 : vector<16x128xf32>
    %120 = vector.extract_strided_slice %8 {offsets = [0, 10], sizes = [1, 128], strides = [1, 1]} : vector<1x256xf32> to vector<1x128xf32>
    %121 = vector.extract_strided_slice %13 {offsets = [15, 0, 0], sizes = [1, 16, 1], strides = [1, 1, 1]} : vector<25x16x1xf32> to vector<1x16x1xf32>
    %122 = vector.shape_cast %121 : vector<1x16x1xf32> to vector<16x1xf32>
    %123 = vector.broadcast %122 : vector<16x1xf32> to vector<16x128xf32>
    %124 = vector.broadcast %120 : vector<1x128xf32> to vector<16x128xf32>
    %125 = arith.mulf %123, %124 : vector<16x128xf32>
    %126 = arith.addf %119, %125 : vector<16x128xf32>
    %127 = vector.extract_strided_slice %11 {offsets = [0, 10], sizes = [1, 128], strides = [1, 1]} : vector<1x256xf32> to vector<1x128xf32>
    %128 = vector.extract_strided_slice %13 {offsets = [16, 0, 0], sizes = [1, 16, 1], strides = [1, 1, 1]} : vector<25x16x1xf32> to vector<1x16x1xf32>
    %129 = vector.shape_cast %128 : vector<1x16x1xf32> to vector<16x1xf32>
    %130 = vector.broadcast %129 : vector<16x1xf32> to vector<16x128xf32>
    %131 = vector.broadcast %127 : vector<1x128xf32> to vector<16x128xf32>
    %132 = arith.mulf %130, %131 : vector<16x128xf32>
    %133 = arith.addf %126, %132 : vector<16x128xf32>
    %134 = vector.extract_strided_slice %8 {offsets = [0, 11], sizes = [1, 128], strides = [1, 1]} : vector<1x256xf32> to vector<1x128xf32>
    %135 = vector.extract_strided_slice %13 {offsets = [17, 0, 0], sizes = [1, 16, 1], strides = [1, 1, 1]} : vector<25x16x1xf32> to vector<1x16x1xf32>
    %136 = vector.shape_cast %135 : vector<1x16x1xf32> to vector<16x1xf32>
    %137 = vector.broadcast %136 : vector<16x1xf32> to vector<16x128xf32>
    %138 = vector.broadcast %134 : vector<1x128xf32> to vector<16x128xf32>
    %139 = arith.mulf %137, %138 : vector<16x128xf32>
    %140 = arith.addf %133, %139 : vector<16x128xf32>
    %141 = vector.extract_strided_slice %11 {offsets = [0, 11], sizes = [1, 128], strides = [1, 1]} : vector<1x256xf32> to vector<1x128xf32>
    %142 = vector.extract_strided_slice %13 {offsets = [18, 0, 0], sizes = [1, 16, 1], strides = [1, 1, 1]} : vector<25x16x1xf32> to vector<1x16x1xf32>
    %143 = vector.shape_cast %142 : vector<1x16x1xf32> to vector<16x1xf32>
    %144 = vector.broadcast %143 : vector<16x1xf32> to vector<16x128xf32>
    %145 = vector.broadcast %141 : vector<1x128xf32> to vector<16x128xf32>
    %146 = arith.mulf %144, %145 : vector<16x128xf32>
    %147 = arith.addf %140, %146 : vector<16x128xf32>
    %148 = vector.extract_strided_slice %8 {offsets = [0, 12], sizes = [1, 128], strides = [1, 1]} : vector<1x256xf32> to vector<1x128xf32>
    %149 = vector.extract_strided_slice %13 {offsets = [19, 0, 0], sizes = [1, 16, 1], strides = [1, 1, 1]} : vector<25x16x1xf32> to vector<1x16x1xf32>
    %150 = vector.shape_cast %149 : vector<1x16x1xf32> to vector<16x1xf32>
    %151 = vector.broadcast %150 : vector<16x1xf32> to vector<16x128xf32>
    %152 = vector.broadcast %148 : vector<1x128xf32> to vector<16x128xf32>
    %153 = arith.mulf %151, %152 : vector<16x128xf32>
    %154 = arith.addf %147, %153 : vector<16x128xf32>
    %155 = vector.extract_strided_slice %2 {offsets = [0, 20], sizes = [1, 128], strides = [1, 1]} : vector<1x256xf32> to vector<1x128xf32>
    %156 = vector.extract_strided_slice %13 {offsets = [20, 0, 0], sizes = [1, 16, 1], strides = [1, 1, 1]} : vector<25x16x1xf32> to vector<1x16x1xf32>
    %157 = vector.shape_cast %156 : vector<1x16x1xf32> to vector<16x1xf32>
    %158 = vector.broadcast %157 : vector<16x1xf32> to vector<16x128xf32>
    %159 = vector.broadcast %155 : vector<1x128xf32> to vector<16x128xf32>
    %160 = arith.mulf %158, %159 : vector<16x128xf32>
    %161 = arith.addf %154, %160 : vector<16x128xf32>
    %162 = vector.extract_strided_slice %5 {offsets = [0, 20], sizes = [1, 128], strides = [1, 1]} : vector<1x256xf32> to vector<1x128xf32>
    %163 = vector.extract_strided_slice %13 {offsets = [21, 0, 0], sizes = [1, 16, 1], strides = [1, 1, 1]} : vector<25x16x1xf32> to vector<1x16x1xf32>
    %164 = vector.shape_cast %163 : vector<1x16x1xf32> to vector<16x1xf32>
    %165 = vector.broadcast %164 : vector<16x1xf32> to vector<16x128xf32>
    %166 = vector.broadcast %162 : vector<1x128xf32> to vector<16x128xf32>
    %167 = arith.mulf %165, %166 : vector<16x128xf32>
    %168 = arith.addf %161, %167 : vector<16x128xf32>
    %169 = vector.extract_strided_slice %2 {offsets = [0, 21], sizes = [1, 128], strides = [1, 1]} : vector<1x256xf32> to vector<1x128xf32>
    %170 = vector.extract_strided_slice %13 {offsets = [22, 0, 0], sizes = [1, 16, 1], strides = [1, 1, 1]} : vector<25x16x1xf32> to vector<1x16x1xf32>
    %171 = vector.shape_cast %170 : vector<1x16x1xf32> to vector<16x1xf32>
    %172 = vector.broadcast %171 : vector<16x1xf32> to vector<16x128xf32>
    %173 = vector.broadcast %169 : vector<1x128xf32> to vector<16x128xf32>
    %174 = arith.mulf %172, %173 : vector<16x128xf32>
    %175 = arith.addf %168, %174 : vector<16x128xf32>
    %176 = vector.extract_strided_slice %5 {offsets = [0, 21], sizes = [1, 128], strides = [1, 1]} : vector<1x256xf32> to vector<1x128xf32>
    %177 = vector.extract_strided_slice %13 {offsets = [23, 0, 0], sizes = [1, 16, 1], strides = [1, 1, 1]} : vector<25x16x1xf32> to vector<1x16x1xf32>
    %178 = vector.shape_cast %177 : vector<1x16x1xf32> to vector<16x1xf32>
    %179 = vector.broadcast %178 : vector<16x1xf32> to vector<16x128xf32>
    %180 = vector.broadcast %176 : vector<1x128xf32> to vector<16x128xf32>
    %181 = arith.mulf %179, %180 : vector<16x128xf32>
    %182 = arith.addf %175, %181 : vector<16x128xf32>
    %183 = vector.extract_strided_slice %2 {offsets = [0, 22], sizes = [1, 128], strides = [1, 1]} : vector<1x256xf32> to vector<1x128xf32>
    %184 = vector.extract_strided_slice %13 {offsets = [24, 0, 0], sizes = [1, 16, 1], strides = [1, 1, 1]} : vector<25x16x1xf32> to vector<1x16x1xf32>
    %185 = vector.shape_cast %184 : vector<1x16x1xf32> to vector<16x1xf32>
    %186 = vector.broadcast %185 : vector<16x1xf32> to vector<16x128xf32>
    %187 = vector.broadcast %183 : vector<1x128xf32> to vector<16x128xf32>
    %188 = arith.mulf %186, %187 : vector<16x128xf32>
    %189 = arith.addf %182, %188 : vector<16x128xf32>
    %cst_15 = arith.constant 0.000000e+00 : f32
    %190 = vector.broadcast %cst_15 : f32 to vector<16x128xf32>
    %191 = vector.extract_strided_slice %5 {offsets = [0, 0], sizes = [1, 128], strides = [1, 1]} : vector<1x256xf32> to vector<1x128xf32>
    %192 = vector.extract_strided_slice %13 {offsets = [0, 0, 0], sizes = [1, 16, 1], strides = [1, 1, 1]} : vector<25x16x1xf32> to vector<1x16x1xf32>
    %193 = vector.shape_cast %192 : vector<1x16x1xf32> to vector<16x1xf32>
    %194 = vector.broadcast %193 : vector<16x1xf32> to vector<16x128xf32>
    %195 = vector.broadcast %191 : vector<1x128xf32> to vector<16x128xf32>
    %196 = arith.mulf %194, %195 : vector<16x128xf32>
    %197 = arith.addf %190, %196 : vector<16x128xf32>
    %198 = vector.extract_strided_slice %2 {offsets = [0, 1], sizes = [1, 128], strides = [1, 1]} : vector<1x256xf32> to vector<1x128xf32>
    %199 = vector.extract_strided_slice %13 {offsets = [1, 0, 0], sizes = [1, 16, 1], strides = [1, 1, 1]} : vector<25x16x1xf32> to vector<1x16x1xf32>
    %200 = vector.shape_cast %199 : vector<1x16x1xf32> to vector<16x1xf32>
    %201 = vector.broadcast %200 : vector<16x1xf32> to vector<16x128xf32>
    %202 = vector.broadcast %198 : vector<1x128xf32> to vector<16x128xf32>
    %203 = arith.mulf %201, %202 : vector<16x128xf32>
    %204 = arith.addf %197, %203 : vector<16x128xf32>
    %205 = vector.extract_strided_slice %5 {offsets = [0, 1], sizes = [1, 128], strides = [1, 1]} : vector<1x256xf32> to vector<1x128xf32>
    %206 = vector.extract_strided_slice %13 {offsets = [2, 0, 0], sizes = [1, 16, 1], strides = [1, 1, 1]} : vector<25x16x1xf32> to vector<1x16x1xf32>
    %207 = vector.shape_cast %206 : vector<1x16x1xf32> to vector<16x1xf32>
    %208 = vector.broadcast %207 : vector<16x1xf32> to vector<16x128xf32>
    %209 = vector.broadcast %205 : vector<1x128xf32> to vector<16x128xf32>
    %210 = arith.mulf %208, %209 : vector<16x128xf32>
    %211 = arith.addf %204, %210 : vector<16x128xf32>
    %212 = vector.extract_strided_slice %2 {offsets = [0, 2], sizes = [1, 128], strides = [1, 1]} : vector<1x256xf32> to vector<1x128xf32>
    %213 = vector.extract_strided_slice %13 {offsets = [3, 0, 0], sizes = [1, 16, 1], strides = [1, 1, 1]} : vector<25x16x1xf32> to vector<1x16x1xf32>
    %214 = vector.shape_cast %213 : vector<1x16x1xf32> to vector<16x1xf32>
    %215 = vector.broadcast %214 : vector<16x1xf32> to vector<16x128xf32>
    %216 = vector.broadcast %212 : vector<1x128xf32> to vector<16x128xf32>
    %217 = arith.mulf %215, %216 : vector<16x128xf32>
    %218 = arith.addf %211, %217 : vector<16x128xf32>
    %219 = vector.extract_strided_slice %5 {offsets = [0, 2], sizes = [1, 128], strides = [1, 1]} : vector<1x256xf32> to vector<1x128xf32>
    %220 = vector.extract_strided_slice %13 {offsets = [4, 0, 0], sizes = [1, 16, 1], strides = [1, 1, 1]} : vector<25x16x1xf32> to vector<1x16x1xf32>
    %221 = vector.shape_cast %220 : vector<1x16x1xf32> to vector<16x1xf32>
    %222 = vector.broadcast %221 : vector<16x1xf32> to vector<16x128xf32>
    %223 = vector.broadcast %219 : vector<1x128xf32> to vector<16x128xf32>
    %224 = arith.mulf %222, %223 : vector<16x128xf32>
    %225 = arith.addf %218, %224 : vector<16x128xf32>
    %226 = vector.extract_strided_slice %11 {offsets = [0, 0], sizes = [1, 128], strides = [1, 1]} : vector<1x256xf32> to vector<1x128xf32>
    %227 = vector.extract_strided_slice %13 {offsets = [5, 0, 0], sizes = [1, 16, 1], strides = [1, 1, 1]} : vector<25x16x1xf32> to vector<1x16x1xf32>
    %228 = vector.shape_cast %227 : vector<1x16x1xf32> to vector<16x1xf32>
    %229 = vector.broadcast %228 : vector<16x1xf32> to vector<16x128xf32>
    %230 = vector.broadcast %226 : vector<1x128xf32> to vector<16x128xf32>
    %231 = arith.mulf %229, %230 : vector<16x128xf32>
    %232 = arith.addf %225, %231 : vector<16x128xf32>
    %233 = vector.extract_strided_slice %8 {offsets = [0, 1], sizes = [1, 128], strides = [1, 1]} : vector<1x256xf32> to vector<1x128xf32>
    %234 = vector.extract_strided_slice %13 {offsets = [6, 0, 0], sizes = [1, 16, 1], strides = [1, 1, 1]} : vector<25x16x1xf32> to vector<1x16x1xf32>
    %235 = vector.shape_cast %234 : vector<1x16x1xf32> to vector<16x1xf32>
    %236 = vector.broadcast %235 : vector<16x1xf32> to vector<16x128xf32>
    %237 = vector.broadcast %233 : vector<1x128xf32> to vector<16x128xf32>
    %238 = arith.mulf %236, %237 : vector<16x128xf32>
    %239 = arith.addf %232, %238 : vector<16x128xf32>
    %240 = vector.extract_strided_slice %11 {offsets = [0, 1], sizes = [1, 128], strides = [1, 1]} : vector<1x256xf32> to vector<1x128xf32>
    %241 = vector.extract_strided_slice %13 {offsets = [7, 0, 0], sizes = [1, 16, 1], strides = [1, 1, 1]} : vector<25x16x1xf32> to vector<1x16x1xf32>
    %242 = vector.shape_cast %241 : vector<1x16x1xf32> to vector<16x1xf32>
    %243 = vector.broadcast %242 : vector<16x1xf32> to vector<16x128xf32>
    %244 = vector.broadcast %240 : vector<1x128xf32> to vector<16x128xf32>
    %245 = arith.mulf %243, %244 : vector<16x128xf32>
    %246 = arith.addf %239, %245 : vector<16x128xf32>
    %247 = vector.extract_strided_slice %8 {offsets = [0, 2], sizes = [1, 128], strides = [1, 1]} : vector<1x256xf32> to vector<1x128xf32>
    %248 = vector.extract_strided_slice %13 {offsets = [8, 0, 0], sizes = [1, 16, 1], strides = [1, 1, 1]} : vector<25x16x1xf32> to vector<1x16x1xf32>
    %249 = vector.shape_cast %248 : vector<1x16x1xf32> to vector<16x1xf32>
    %250 = vector.broadcast %249 : vector<16x1xf32> to vector<16x128xf32>
    %251 = vector.broadcast %247 : vector<1x128xf32> to vector<16x128xf32>
    %252 = arith.mulf %250, %251 : vector<16x128xf32>
    %253 = arith.addf %246, %252 : vector<16x128xf32>
    %254 = vector.extract_strided_slice %11 {offsets = [0, 2], sizes = [1, 128], strides = [1, 1]} : vector<1x256xf32> to vector<1x128xf32>
    %255 = vector.extract_strided_slice %13 {offsets = [9, 0, 0], sizes = [1, 16, 1], strides = [1, 1, 1]} : vector<25x16x1xf32> to vector<1x16x1xf32>
    %256 = vector.shape_cast %255 : vector<1x16x1xf32> to vector<16x1xf32>
    %257 = vector.broadcast %256 : vector<16x1xf32> to vector<16x128xf32>
    %258 = vector.broadcast %254 : vector<1x128xf32> to vector<16x128xf32>
    %259 = arith.mulf %257, %258 : vector<16x128xf32>
    %260 = arith.addf %253, %259 : vector<16x128xf32>
    %261 = vector.extract_strided_slice %5 {offsets = [0, 10], sizes = [1, 128], strides = [1, 1]} : vector<1x256xf32> to vector<1x128xf32>
    %262 = vector.extract_strided_slice %13 {offsets = [10, 0, 0], sizes = [1, 16, 1], strides = [1, 1, 1]} : vector<25x16x1xf32> to vector<1x16x1xf32>
    %263 = vector.shape_cast %262 : vector<1x16x1xf32> to vector<16x1xf32>
    %264 = vector.broadcast %263 : vector<16x1xf32> to vector<16x128xf32>
    %265 = vector.broadcast %261 : vector<1x128xf32> to vector<16x128xf32>
    %266 = arith.mulf %264, %265 : vector<16x128xf32>
    %267 = arith.addf %260, %266 : vector<16x128xf32>
    %268 = vector.extract_strided_slice %2 {offsets = [0, 11], sizes = [1, 128], strides = [1, 1]} : vector<1x256xf32> to vector<1x128xf32>
    %269 = vector.extract_strided_slice %13 {offsets = [11, 0, 0], sizes = [1, 16, 1], strides = [1, 1, 1]} : vector<25x16x1xf32> to vector<1x16x1xf32>
    %270 = vector.shape_cast %269 : vector<1x16x1xf32> to vector<16x1xf32>
    %271 = vector.broadcast %270 : vector<16x1xf32> to vector<16x128xf32>
    %272 = vector.broadcast %268 : vector<1x128xf32> to vector<16x128xf32>
    %273 = arith.mulf %271, %272 : vector<16x128xf32>
    %274 = arith.addf %267, %273 : vector<16x128xf32>
    %275 = vector.extract_strided_slice %5 {offsets = [0, 11], sizes = [1, 128], strides = [1, 1]} : vector<1x256xf32> to vector<1x128xf32>
    %276 = vector.extract_strided_slice %13 {offsets = [12, 0, 0], sizes = [1, 16, 1], strides = [1, 1, 1]} : vector<25x16x1xf32> to vector<1x16x1xf32>
    %277 = vector.shape_cast %276 : vector<1x16x1xf32> to vector<16x1xf32>
    %278 = vector.broadcast %277 : vector<16x1xf32> to vector<16x128xf32>
    %279 = vector.broadcast %275 : vector<1x128xf32> to vector<16x128xf32>
    %280 = arith.mulf %278, %279 : vector<16x128xf32>
    %281 = arith.addf %274, %280 : vector<16x128xf32>
    %282 = vector.extract_strided_slice %2 {offsets = [0, 12], sizes = [1, 128], strides = [1, 1]} : vector<1x256xf32> to vector<1x128xf32>
    %283 = vector.extract_strided_slice %13 {offsets = [13, 0, 0], sizes = [1, 16, 1], strides = [1, 1, 1]} : vector<25x16x1xf32> to vector<1x16x1xf32>
    %284 = vector.shape_cast %283 : vector<1x16x1xf32> to vector<16x1xf32>
    %285 = vector.broadcast %284 : vector<16x1xf32> to vector<16x128xf32>
    %286 = vector.broadcast %282 : vector<1x128xf32> to vector<16x128xf32>
    %287 = arith.mulf %285, %286 : vector<16x128xf32>
    %288 = arith.addf %281, %287 : vector<16x128xf32>
    %289 = vector.extract_strided_slice %5 {offsets = [0, 12], sizes = [1, 128], strides = [1, 1]} : vector<1x256xf32> to vector<1x128xf32>
    %290 = vector.extract_strided_slice %13 {offsets = [14, 0, 0], sizes = [1, 16, 1], strides = [1, 1, 1]} : vector<25x16x1xf32> to vector<1x16x1xf32>
    %291 = vector.shape_cast %290 : vector<1x16x1xf32> to vector<16x1xf32>
    %292 = vector.broadcast %291 : vector<16x1xf32> to vector<16x128xf32>
    %293 = vector.broadcast %289 : vector<1x128xf32> to vector<16x128xf32>
    %294 = arith.mulf %292, %293 : vector<16x128xf32>
    %295 = arith.addf %288, %294 : vector<16x128xf32>
    %296 = vector.extract_strided_slice %11 {offsets = [0, 10], sizes = [1, 128], strides = [1, 1]} : vector<1x256xf32> to vector<1x128xf32>
    %297 = vector.extract_strided_slice %13 {offsets = [15, 0, 0], sizes = [1, 16, 1], strides = [1, 1, 1]} : vector<25x16x1xf32> to vector<1x16x1xf32>
    %298 = vector.shape_cast %297 : vector<1x16x1xf32> to vector<16x1xf32>
    %299 = vector.broadcast %298 : vector<16x1xf32> to vector<16x128xf32>
    %300 = vector.broadcast %296 : vector<1x128xf32> to vector<16x128xf32>
    %301 = arith.mulf %299, %300 : vector<16x128xf32>
    %302 = arith.addf %295, %301 : vector<16x128xf32>
    %303 = vector.extract_strided_slice %8 {offsets = [0, 11], sizes = [1, 128], strides = [1, 1]} : vector<1x256xf32> to vector<1x128xf32>
    %304 = vector.extract_strided_slice %13 {offsets = [16, 0, 0], sizes = [1, 16, 1], strides = [1, 1, 1]} : vector<25x16x1xf32> to vector<1x16x1xf32>
    %305 = vector.shape_cast %304 : vector<1x16x1xf32> to vector<16x1xf32>
    %306 = vector.broadcast %305 : vector<16x1xf32> to vector<16x128xf32>
    %307 = vector.broadcast %303 : vector<1x128xf32> to vector<16x128xf32>
    %308 = arith.mulf %306, %307 : vector<16x128xf32>
    %309 = arith.addf %302, %308 : vector<16x128xf32>
    %310 = vector.extract_strided_slice %11 {offsets = [0, 11], sizes = [1, 128], strides = [1, 1]} : vector<1x256xf32> to vector<1x128xf32>
    %311 = vector.extract_strided_slice %13 {offsets = [17, 0, 0], sizes = [1, 16, 1], strides = [1, 1, 1]} : vector<25x16x1xf32> to vector<1x16x1xf32>
    %312 = vector.shape_cast %311 : vector<1x16x1xf32> to vector<16x1xf32>
    %313 = vector.broadcast %312 : vector<16x1xf32> to vector<16x128xf32>
    %314 = vector.broadcast %310 : vector<1x128xf32> to vector<16x128xf32>
    %315 = arith.mulf %313, %314 : vector<16x128xf32>
    %316 = arith.addf %309, %315 : vector<16x128xf32>
    %317 = vector.extract_strided_slice %8 {offsets = [0, 12], sizes = [1, 128], strides = [1, 1]} : vector<1x256xf32> to vector<1x128xf32>
    %318 = vector.extract_strided_slice %13 {offsets = [18, 0, 0], sizes = [1, 16, 1], strides = [1, 1, 1]} : vector<25x16x1xf32> to vector<1x16x1xf32>
    %319 = vector.shape_cast %318 : vector<1x16x1xf32> to vector<16x1xf32>
    %320 = vector.broadcast %319 : vector<16x1xf32> to vector<16x128xf32>
    %321 = vector.broadcast %317 : vector<1x128xf32> to vector<16x128xf32>
    %322 = arith.mulf %320, %321 : vector<16x128xf32>
    %323 = arith.addf %316, %322 : vector<16x128xf32>
    %324 = vector.extract_strided_slice %11 {offsets = [0, 12], sizes = [1, 128], strides = [1, 1]} : vector<1x256xf32> to vector<1x128xf32>
    %325 = vector.extract_strided_slice %13 {offsets = [19, 0, 0], sizes = [1, 16, 1], strides = [1, 1, 1]} : vector<25x16x1xf32> to vector<1x16x1xf32>
    %326 = vector.shape_cast %325 : vector<1x16x1xf32> to vector<16x1xf32>
    %327 = vector.broadcast %326 : vector<16x1xf32> to vector<16x128xf32>
    %328 = vector.broadcast %324 : vector<1x128xf32> to vector<16x128xf32>
    %329 = arith.mulf %327, %328 : vector<16x128xf32>
    %330 = arith.addf %323, %329 : vector<16x128xf32>
    %331 = vector.extract_strided_slice %5 {offsets = [0, 20], sizes = [1, 128], strides = [1, 1]} : vector<1x256xf32> to vector<1x128xf32>
    %332 = vector.extract_strided_slice %13 {offsets = [20, 0, 0], sizes = [1, 16, 1], strides = [1, 1, 1]} : vector<25x16x1xf32> to vector<1x16x1xf32>
    %333 = vector.shape_cast %332 : vector<1x16x1xf32> to vector<16x1xf32>
    %334 = vector.broadcast %333 : vector<16x1xf32> to vector<16x128xf32>
    %335 = vector.broadcast %331 : vector<1x128xf32> to vector<16x128xf32>
    %336 = arith.mulf %334, %335 : vector<16x128xf32>
    %337 = arith.addf %330, %336 : vector<16x128xf32>
    %338 = vector.extract_strided_slice %2 {offsets = [0, 21], sizes = [1, 128], strides = [1, 1]} : vector<1x256xf32> to vector<1x128xf32>
    %339 = vector.extract_strided_slice %13 {offsets = [21, 0, 0], sizes = [1, 16, 1], strides = [1, 1, 1]} : vector<25x16x1xf32> to vector<1x16x1xf32>
    %340 = vector.shape_cast %339 : vector<1x16x1xf32> to vector<16x1xf32>
    %341 = vector.broadcast %340 : vector<16x1xf32> to vector<16x128xf32>
    %342 = vector.broadcast %338 : vector<1x128xf32> to vector<16x128xf32>
    %343 = arith.mulf %341, %342 : vector<16x128xf32>
    %344 = arith.addf %337, %343 : vector<16x128xf32>
    %345 = vector.extract_strided_slice %5 {offsets = [0, 21], sizes = [1, 128], strides = [1, 1]} : vector<1x256xf32> to vector<1x128xf32>
    %346 = vector.extract_strided_slice %13 {offsets = [22, 0, 0], sizes = [1, 16, 1], strides = [1, 1, 1]} : vector<25x16x1xf32> to vector<1x16x1xf32>
    %347 = vector.shape_cast %346 : vector<1x16x1xf32> to vector<16x1xf32>
    %348 = vector.broadcast %347 : vector<16x1xf32> to vector<16x128xf32>
    %349 = vector.broadcast %345 : vector<1x128xf32> to vector<16x128xf32>
    %350 = arith.mulf %348, %349 : vector<16x128xf32>
    %351 = arith.addf %344, %350 : vector<16x128xf32>
    %352 = vector.extract_strided_slice %2 {offsets = [0, 22], sizes = [1, 128], strides = [1, 1]} : vector<1x256xf32> to vector<1x128xf32>
    %353 = vector.extract_strided_slice %13 {offsets = [23, 0, 0], sizes = [1, 16, 1], strides = [1, 1, 1]} : vector<25x16x1xf32> to vector<1x16x1xf32>
    %354 = vector.shape_cast %353 : vector<1x16x1xf32> to vector<16x1xf32>
    %355 = vector.broadcast %354 : vector<16x1xf32> to vector<16x128xf32>
    %356 = vector.broadcast %352 : vector<1x128xf32> to vector<16x128xf32>
    %357 = arith.mulf %355, %356 : vector<16x128xf32>
    %358 = arith.addf %351, %357 : vector<16x128xf32>
    %359 = vector.extract_strided_slice %5 {offsets = [0, 22], sizes = [1, 128], strides = [1, 1]} : vector<1x256xf32> to vector<1x128xf32>
    %360 = vector.extract_strided_slice %13 {offsets = [24, 0, 0], sizes = [1, 16, 1], strides = [1, 1, 1]} : vector<25x16x1xf32> to vector<1x16x1xf32>
    %361 = vector.shape_cast %360 : vector<1x16x1xf32> to vector<16x1xf32>
    %362 = vector.broadcast %361 : vector<16x1xf32> to vector<16x128xf32>
    %363 = vector.broadcast %359 : vector<1x128xf32> to vector<16x128xf32>
    %364 = arith.mulf %362, %363 : vector<16x128xf32>
    %365 = arith.addf %358, %364 : vector<16x128xf32>
    %366 = arith.maximumf %189, %365 : vector<16x128xf32>
    %cst_16 = arith.constant 0.000000e+00 : f32
    %367 = vector.broadcast %cst_16 : f32 to vector<16x128xf32>
    %368 = vector.extract_strided_slice %8 {offsets = [0, 0], sizes = [1, 128], strides = [1, 1]} : vector<1x256xf32> to vector<1x128xf32>
    %369 = vector.extract_strided_slice %13 {offsets = [0, 0, 0], sizes = [1, 16, 1], strides = [1, 1, 1]} : vector<25x16x1xf32> to vector<1x16x1xf32>
    %370 = vector.shape_cast %369 : vector<1x16x1xf32> to vector<16x1xf32>
    %371 = vector.broadcast %370 : vector<16x1xf32> to vector<16x128xf32>
    %372 = vector.broadcast %368 : vector<1x128xf32> to vector<16x128xf32>
    %373 = arith.mulf %371, %372 : vector<16x128xf32>
    %374 = arith.addf %367, %373 : vector<16x128xf32>
    %375 = vector.extract_strided_slice %11 {offsets = [0, 0], sizes = [1, 128], strides = [1, 1]} : vector<1x256xf32> to vector<1x128xf32>
    %376 = vector.extract_strided_slice %13 {offsets = [1, 0, 0], sizes = [1, 16, 1], strides = [1, 1, 1]} : vector<25x16x1xf32> to vector<1x16x1xf32>
    %377 = vector.shape_cast %376 : vector<1x16x1xf32> to vector<16x1xf32>
    %378 = vector.broadcast %377 : vector<16x1xf32> to vector<16x128xf32>
    %379 = vector.broadcast %375 : vector<1x128xf32> to vector<16x128xf32>
    %380 = arith.mulf %378, %379 : vector<16x128xf32>
    %381 = arith.addf %374, %380 : vector<16x128xf32>
    %382 = vector.extract_strided_slice %8 {offsets = [0, 1], sizes = [1, 128], strides = [1, 1]} : vector<1x256xf32> to vector<1x128xf32>
    %383 = vector.extract_strided_slice %13 {offsets = [2, 0, 0], sizes = [1, 16, 1], strides = [1, 1, 1]} : vector<25x16x1xf32> to vector<1x16x1xf32>
    %384 = vector.shape_cast %383 : vector<1x16x1xf32> to vector<16x1xf32>
    %385 = vector.broadcast %384 : vector<16x1xf32> to vector<16x128xf32>
    %386 = vector.broadcast %382 : vector<1x128xf32> to vector<16x128xf32>
    %387 = arith.mulf %385, %386 : vector<16x128xf32>
    %388 = arith.addf %381, %387 : vector<16x128xf32>
    %389 = vector.extract_strided_slice %11 {offsets = [0, 1], sizes = [1, 128], strides = [1, 1]} : vector<1x256xf32> to vector<1x128xf32>
    %390 = vector.extract_strided_slice %13 {offsets = [3, 0, 0], sizes = [1, 16, 1], strides = [1, 1, 1]} : vector<25x16x1xf32> to vector<1x16x1xf32>
    %391 = vector.shape_cast %390 : vector<1x16x1xf32> to vector<16x1xf32>
    %392 = vector.broadcast %391 : vector<16x1xf32> to vector<16x128xf32>
    %393 = vector.broadcast %389 : vector<1x128xf32> to vector<16x128xf32>
    %394 = arith.mulf %392, %393 : vector<16x128xf32>
    %395 = arith.addf %388, %394 : vector<16x128xf32>
    %396 = vector.extract_strided_slice %8 {offsets = [0, 2], sizes = [1, 128], strides = [1, 1]} : vector<1x256xf32> to vector<1x128xf32>
    %397 = vector.extract_strided_slice %13 {offsets = [4, 0, 0], sizes = [1, 16, 1], strides = [1, 1, 1]} : vector<25x16x1xf32> to vector<1x16x1xf32>
    %398 = vector.shape_cast %397 : vector<1x16x1xf32> to vector<16x1xf32>
    %399 = vector.broadcast %398 : vector<16x1xf32> to vector<16x128xf32>
    %400 = vector.broadcast %396 : vector<1x128xf32> to vector<16x128xf32>
    %401 = arith.mulf %399, %400 : vector<16x128xf32>
    %402 = arith.addf %395, %401 : vector<16x128xf32>
    %403 = vector.extract_strided_slice %2 {offsets = [0, 10], sizes = [1, 128], strides = [1, 1]} : vector<1x256xf32> to vector<1x128xf32>
    %404 = vector.extract_strided_slice %13 {offsets = [5, 0, 0], sizes = [1, 16, 1], strides = [1, 1, 1]} : vector<25x16x1xf32> to vector<1x16x1xf32>
    %405 = vector.shape_cast %404 : vector<1x16x1xf32> to vector<16x1xf32>
    %406 = vector.broadcast %405 : vector<16x1xf32> to vector<16x128xf32>
    %407 = vector.broadcast %403 : vector<1x128xf32> to vector<16x128xf32>
    %408 = arith.mulf %406, %407 : vector<16x128xf32>
    %409 = arith.addf %402, %408 : vector<16x128xf32>
    %410 = vector.extract_strided_slice %5 {offsets = [0, 10], sizes = [1, 128], strides = [1, 1]} : vector<1x256xf32> to vector<1x128xf32>
    %411 = vector.extract_strided_slice %13 {offsets = [6, 0, 0], sizes = [1, 16, 1], strides = [1, 1, 1]} : vector<25x16x1xf32> to vector<1x16x1xf32>
    %412 = vector.shape_cast %411 : vector<1x16x1xf32> to vector<16x1xf32>
    %413 = vector.broadcast %412 : vector<16x1xf32> to vector<16x128xf32>
    %414 = vector.broadcast %410 : vector<1x128xf32> to vector<16x128xf32>
    %415 = arith.mulf %413, %414 : vector<16x128xf32>
    %416 = arith.addf %409, %415 : vector<16x128xf32>
    %417 = vector.extract_strided_slice %2 {offsets = [0, 11], sizes = [1, 128], strides = [1, 1]} : vector<1x256xf32> to vector<1x128xf32>
    %418 = vector.extract_strided_slice %13 {offsets = [7, 0, 0], sizes = [1, 16, 1], strides = [1, 1, 1]} : vector<25x16x1xf32> to vector<1x16x1xf32>
    %419 = vector.shape_cast %418 : vector<1x16x1xf32> to vector<16x1xf32>
    %420 = vector.broadcast %419 : vector<16x1xf32> to vector<16x128xf32>
    %421 = vector.broadcast %417 : vector<1x128xf32> to vector<16x128xf32>
    %422 = arith.mulf %420, %421 : vector<16x128xf32>
    %423 = arith.addf %416, %422 : vector<16x128xf32>
    %424 = vector.extract_strided_slice %5 {offsets = [0, 11], sizes = [1, 128], strides = [1, 1]} : vector<1x256xf32> to vector<1x128xf32>
    %425 = vector.extract_strided_slice %13 {offsets = [8, 0, 0], sizes = [1, 16, 1], strides = [1, 1, 1]} : vector<25x16x1xf32> to vector<1x16x1xf32>
    %426 = vector.shape_cast %425 : vector<1x16x1xf32> to vector<16x1xf32>
    %427 = vector.broadcast %426 : vector<16x1xf32> to vector<16x128xf32>
    %428 = vector.broadcast %424 : vector<1x128xf32> to vector<16x128xf32>
    %429 = arith.mulf %427, %428 : vector<16x128xf32>
    %430 = arith.addf %423, %429 : vector<16x128xf32>
    %431 = vector.extract_strided_slice %2 {offsets = [0, 12], sizes = [1, 128], strides = [1, 1]} : vector<1x256xf32> to vector<1x128xf32>
    %432 = vector.extract_strided_slice %13 {offsets = [9, 0, 0], sizes = [1, 16, 1], strides = [1, 1, 1]} : vector<25x16x1xf32> to vector<1x16x1xf32>
    %433 = vector.shape_cast %432 : vector<1x16x1xf32> to vector<16x1xf32>
    %434 = vector.broadcast %433 : vector<16x1xf32> to vector<16x128xf32>
    %435 = vector.broadcast %431 : vector<1x128xf32> to vector<16x128xf32>
    %436 = arith.mulf %434, %435 : vector<16x128xf32>
    %437 = arith.addf %430, %436 : vector<16x128xf32>
    %438 = vector.extract_strided_slice %8 {offsets = [0, 10], sizes = [1, 128], strides = [1, 1]} : vector<1x256xf32> to vector<1x128xf32>
    %439 = vector.extract_strided_slice %13 {offsets = [10, 0, 0], sizes = [1, 16, 1], strides = [1, 1, 1]} : vector<25x16x1xf32> to vector<1x16x1xf32>
    %440 = vector.shape_cast %439 : vector<1x16x1xf32> to vector<16x1xf32>
    %441 = vector.broadcast %440 : vector<16x1xf32> to vector<16x128xf32>
    %442 = vector.broadcast %438 : vector<1x128xf32> to vector<16x128xf32>
    %443 = arith.mulf %441, %442 : vector<16x128xf32>
    %444 = arith.addf %437, %443 : vector<16x128xf32>
    %445 = vector.extract_strided_slice %11 {offsets = [0, 10], sizes = [1, 128], strides = [1, 1]} : vector<1x256xf32> to vector<1x128xf32>
    %446 = vector.extract_strided_slice %13 {offsets = [11, 0, 0], sizes = [1, 16, 1], strides = [1, 1, 1]} : vector<25x16x1xf32> to vector<1x16x1xf32>
    %447 = vector.shape_cast %446 : vector<1x16x1xf32> to vector<16x1xf32>
    %448 = vector.broadcast %447 : vector<16x1xf32> to vector<16x128xf32>
    %449 = vector.broadcast %445 : vector<1x128xf32> to vector<16x128xf32>
    %450 = arith.mulf %448, %449 : vector<16x128xf32>
    %451 = arith.addf %444, %450 : vector<16x128xf32>
    %452 = vector.extract_strided_slice %8 {offsets = [0, 11], sizes = [1, 128], strides = [1, 1]} : vector<1x256xf32> to vector<1x128xf32>
    %453 = vector.extract_strided_slice %13 {offsets = [12, 0, 0], sizes = [1, 16, 1], strides = [1, 1, 1]} : vector<25x16x1xf32> to vector<1x16x1xf32>
    %454 = vector.shape_cast %453 : vector<1x16x1xf32> to vector<16x1xf32>
    %455 = vector.broadcast %454 : vector<16x1xf32> to vector<16x128xf32>
    %456 = vector.broadcast %452 : vector<1x128xf32> to vector<16x128xf32>
    %457 = arith.mulf %455, %456 : vector<16x128xf32>
    %458 = arith.addf %451, %457 : vector<16x128xf32>
    %459 = vector.extract_strided_slice %11 {offsets = [0, 11], sizes = [1, 128], strides = [1, 1]} : vector<1x256xf32> to vector<1x128xf32>
    %460 = vector.extract_strided_slice %13 {offsets = [13, 0, 0], sizes = [1, 16, 1], strides = [1, 1, 1]} : vector<25x16x1xf32> to vector<1x16x1xf32>
    %461 = vector.shape_cast %460 : vector<1x16x1xf32> to vector<16x1xf32>
    %462 = vector.broadcast %461 : vector<16x1xf32> to vector<16x128xf32>
    %463 = vector.broadcast %459 : vector<1x128xf32> to vector<16x128xf32>
    %464 = arith.mulf %462, %463 : vector<16x128xf32>
    %465 = arith.addf %458, %464 : vector<16x128xf32>
    %466 = vector.extract_strided_slice %8 {offsets = [0, 12], sizes = [1, 128], strides = [1, 1]} : vector<1x256xf32> to vector<1x128xf32>
    %467 = vector.extract_strided_slice %13 {offsets = [14, 0, 0], sizes = [1, 16, 1], strides = [1, 1, 1]} : vector<25x16x1xf32> to vector<1x16x1xf32>
    %468 = vector.shape_cast %467 : vector<1x16x1xf32> to vector<16x1xf32>
    %469 = vector.broadcast %468 : vector<16x1xf32> to vector<16x128xf32>
    %470 = vector.broadcast %466 : vector<1x128xf32> to vector<16x128xf32>
    %471 = arith.mulf %469, %470 : vector<16x128xf32>
    %472 = arith.addf %465, %471 : vector<16x128xf32>
    %473 = vector.extract_strided_slice %2 {offsets = [0, 20], sizes = [1, 128], strides = [1, 1]} : vector<1x256xf32> to vector<1x128xf32>
    %474 = vector.extract_strided_slice %13 {offsets = [15, 0, 0], sizes = [1, 16, 1], strides = [1, 1, 1]} : vector<25x16x1xf32> to vector<1x16x1xf32>
    %475 = vector.shape_cast %474 : vector<1x16x1xf32> to vector<16x1xf32>
    %476 = vector.broadcast %475 : vector<16x1xf32> to vector<16x128xf32>
    %477 = vector.broadcast %473 : vector<1x128xf32> to vector<16x128xf32>
    %478 = arith.mulf %476, %477 : vector<16x128xf32>
    %479 = arith.addf %472, %478 : vector<16x128xf32>
    %480 = vector.extract_strided_slice %5 {offsets = [0, 20], sizes = [1, 128], strides = [1, 1]} : vector<1x256xf32> to vector<1x128xf32>
    %481 = vector.extract_strided_slice %13 {offsets = [16, 0, 0], sizes = [1, 16, 1], strides = [1, 1, 1]} : vector<25x16x1xf32> to vector<1x16x1xf32>
    %482 = vector.shape_cast %481 : vector<1x16x1xf32> to vector<16x1xf32>
    %483 = vector.broadcast %482 : vector<16x1xf32> to vector<16x128xf32>
    %484 = vector.broadcast %480 : vector<1x128xf32> to vector<16x128xf32>
    %485 = arith.mulf %483, %484 : vector<16x128xf32>
    %486 = arith.addf %479, %485 : vector<16x128xf32>
    %487 = vector.extract_strided_slice %2 {offsets = [0, 21], sizes = [1, 128], strides = [1, 1]} : vector<1x256xf32> to vector<1x128xf32>
    %488 = vector.extract_strided_slice %13 {offsets = [17, 0, 0], sizes = [1, 16, 1], strides = [1, 1, 1]} : vector<25x16x1xf32> to vector<1x16x1xf32>
    %489 = vector.shape_cast %488 : vector<1x16x1xf32> to vector<16x1xf32>
    %490 = vector.broadcast %489 : vector<16x1xf32> to vector<16x128xf32>
    %491 = vector.broadcast %487 : vector<1x128xf32> to vector<16x128xf32>
    %492 = arith.mulf %490, %491 : vector<16x128xf32>
    %493 = arith.addf %486, %492 : vector<16x128xf32>
    %494 = vector.extract_strided_slice %5 {offsets = [0, 21], sizes = [1, 128], strides = [1, 1]} : vector<1x256xf32> to vector<1x128xf32>
    %495 = vector.extract_strided_slice %13 {offsets = [18, 0, 0], sizes = [1, 16, 1], strides = [1, 1, 1]} : vector<25x16x1xf32> to vector<1x16x1xf32>
    %496 = vector.shape_cast %495 : vector<1x16x1xf32> to vector<16x1xf32>
    %497 = vector.broadcast %496 : vector<16x1xf32> to vector<16x128xf32>
    %498 = vector.broadcast %494 : vector<1x128xf32> to vector<16x128xf32>
    %499 = arith.mulf %497, %498 : vector<16x128xf32>
    %500 = arith.addf %493, %499 : vector<16x128xf32>
    %501 = vector.extract_strided_slice %2 {offsets = [0, 22], sizes = [1, 128], strides = [1, 1]} : vector<1x256xf32> to vector<1x128xf32>
    %502 = vector.extract_strided_slice %13 {offsets = [19, 0, 0], sizes = [1, 16, 1], strides = [1, 1, 1]} : vector<25x16x1xf32> to vector<1x16x1xf32>
    %503 = vector.shape_cast %502 : vector<1x16x1xf32> to vector<16x1xf32>
    %504 = vector.broadcast %503 : vector<16x1xf32> to vector<16x128xf32>
    %505 = vector.broadcast %501 : vector<1x128xf32> to vector<16x128xf32>
    %506 = arith.mulf %504, %505 : vector<16x128xf32>
    %507 = arith.addf %500, %506 : vector<16x128xf32>
    %508 = vector.extract_strided_slice %8 {offsets = [0, 20], sizes = [1, 128], strides = [1, 1]} : vector<1x256xf32> to vector<1x128xf32>
    %509 = vector.extract_strided_slice %13 {offsets = [20, 0, 0], sizes = [1, 16, 1], strides = [1, 1, 1]} : vector<25x16x1xf32> to vector<1x16x1xf32>
    %510 = vector.shape_cast %509 : vector<1x16x1xf32> to vector<16x1xf32>
    %511 = vector.broadcast %510 : vector<16x1xf32> to vector<16x128xf32>
    %512 = vector.broadcast %508 : vector<1x128xf32> to vector<16x128xf32>
    %513 = arith.mulf %511, %512 : vector<16x128xf32>
    %514 = arith.addf %507, %513 : vector<16x128xf32>
    %515 = vector.extract_strided_slice %11 {offsets = [0, 20], sizes = [1, 128], strides = [1, 1]} : vector<1x256xf32> to vector<1x128xf32>
    %516 = vector.extract_strided_slice %13 {offsets = [21, 0, 0], sizes = [1, 16, 1], strides = [1, 1, 1]} : vector<25x16x1xf32> to vector<1x16x1xf32>
    %517 = vector.shape_cast %516 : vector<1x16x1xf32> to vector<16x1xf32>
    %518 = vector.broadcast %517 : vector<16x1xf32> to vector<16x128xf32>
    %519 = vector.broadcast %515 : vector<1x128xf32> to vector<16x128xf32>
    %520 = arith.mulf %518, %519 : vector<16x128xf32>
    %521 = arith.addf %514, %520 : vector<16x128xf32>
    %522 = vector.extract_strided_slice %8 {offsets = [0, 21], sizes = [1, 128], strides = [1, 1]} : vector<1x256xf32> to vector<1x128xf32>
    %523 = vector.extract_strided_slice %13 {offsets = [22, 0, 0], sizes = [1, 16, 1], strides = [1, 1, 1]} : vector<25x16x1xf32> to vector<1x16x1xf32>
    %524 = vector.shape_cast %523 : vector<1x16x1xf32> to vector<16x1xf32>
    %525 = vector.broadcast %524 : vector<16x1xf32> to vector<16x128xf32>
    %526 = vector.broadcast %522 : vector<1x128xf32> to vector<16x128xf32>
    %527 = arith.mulf %525, %526 : vector<16x128xf32>
    %528 = arith.addf %521, %527 : vector<16x128xf32>
    %529 = vector.extract_strided_slice %11 {offsets = [0, 21], sizes = [1, 128], strides = [1, 1]} : vector<1x256xf32> to vector<1x128xf32>
    %530 = vector.extract_strided_slice %13 {offsets = [23, 0, 0], sizes = [1, 16, 1], strides = [1, 1, 1]} : vector<25x16x1xf32> to vector<1x16x1xf32>
    %531 = vector.shape_cast %530 : vector<1x16x1xf32> to vector<16x1xf32>
    %532 = vector.broadcast %531 : vector<16x1xf32> to vector<16x128xf32>
    %533 = vector.broadcast %529 : vector<1x128xf32> to vector<16x128xf32>
    %534 = arith.mulf %532, %533 : vector<16x128xf32>
    %535 = arith.addf %528, %534 : vector<16x128xf32>
    %536 = vector.extract_strided_slice %8 {offsets = [0, 22], sizes = [1, 128], strides = [1, 1]} : vector<1x256xf32> to vector<1x128xf32>
    %537 = vector.extract_strided_slice %13 {offsets = [24, 0, 0], sizes = [1, 16, 1], strides = [1, 1, 1]} : vector<25x16x1xf32> to vector<1x16x1xf32>
    %538 = vector.shape_cast %537 : vector<1x16x1xf32> to vector<16x1xf32>
    %539 = vector.broadcast %538 : vector<16x1xf32> to vector<16x128xf32>
    %540 = vector.broadcast %536 : vector<1x128xf32> to vector<16x128xf32>
    %541 = arith.mulf %539, %540 : vector<16x128xf32>
    %542 = arith.addf %535, %541 : vector<16x128xf32>
    %543 = arith.maximumf %366, %542 : vector<16x128xf32>
    %cst_17 = arith.constant 0.000000e+00 : f32
    %544 = vector.broadcast %cst_17 : f32 to vector<16x128xf32>
    %545 = vector.extract_strided_slice %11 {offsets = [0, 0], sizes = [1, 128], strides = [1, 1]} : vector<1x256xf32> to vector<1x128xf32>
    %546 = vector.extract_strided_slice %13 {offsets = [0, 0, 0], sizes = [1, 16, 1], strides = [1, 1, 1]} : vector<25x16x1xf32> to vector<1x16x1xf32>
    %547 = vector.shape_cast %546 : vector<1x16x1xf32> to vector<16x1xf32>
    %548 = vector.broadcast %547 : vector<16x1xf32> to vector<16x128xf32>
    %549 = vector.broadcast %545 : vector<1x128xf32> to vector<16x128xf32>
    %550 = arith.mulf %548, %549 : vector<16x128xf32>
    %551 = arith.addf %544, %550 : vector<16x128xf32>
    %552 = vector.extract_strided_slice %8 {offsets = [0, 1], sizes = [1, 128], strides = [1, 1]} : vector<1x256xf32> to vector<1x128xf32>
    %553 = vector.extract_strided_slice %13 {offsets = [1, 0, 0], sizes = [1, 16, 1], strides = [1, 1, 1]} : vector<25x16x1xf32> to vector<1x16x1xf32>
    %554 = vector.shape_cast %553 : vector<1x16x1xf32> to vector<16x1xf32>
    %555 = vector.broadcast %554 : vector<16x1xf32> to vector<16x128xf32>
    %556 = vector.broadcast %552 : vector<1x128xf32> to vector<16x128xf32>
    %557 = arith.mulf %555, %556 : vector<16x128xf32>
    %558 = arith.addf %551, %557 : vector<16x128xf32>
    %559 = vector.extract_strided_slice %11 {offsets = [0, 1], sizes = [1, 128], strides = [1, 1]} : vector<1x256xf32> to vector<1x128xf32>
    %560 = vector.extract_strided_slice %13 {offsets = [2, 0, 0], sizes = [1, 16, 1], strides = [1, 1, 1]} : vector<25x16x1xf32> to vector<1x16x1xf32>
    %561 = vector.shape_cast %560 : vector<1x16x1xf32> to vector<16x1xf32>
    %562 = vector.broadcast %561 : vector<16x1xf32> to vector<16x128xf32>
    %563 = vector.broadcast %559 : vector<1x128xf32> to vector<16x128xf32>
    %564 = arith.mulf %562, %563 : vector<16x128xf32>
    %565 = arith.addf %558, %564 : vector<16x128xf32>
    %566 = vector.extract_strided_slice %8 {offsets = [0, 2], sizes = [1, 128], strides = [1, 1]} : vector<1x256xf32> to vector<1x128xf32>
    %567 = vector.extract_strided_slice %13 {offsets = [3, 0, 0], sizes = [1, 16, 1], strides = [1, 1, 1]} : vector<25x16x1xf32> to vector<1x16x1xf32>
    %568 = vector.shape_cast %567 : vector<1x16x1xf32> to vector<16x1xf32>
    %569 = vector.broadcast %568 : vector<16x1xf32> to vector<16x128xf32>
    %570 = vector.broadcast %566 : vector<1x128xf32> to vector<16x128xf32>
    %571 = arith.mulf %569, %570 : vector<16x128xf32>
    %572 = arith.addf %565, %571 : vector<16x128xf32>
    %573 = vector.extract_strided_slice %11 {offsets = [0, 2], sizes = [1, 128], strides = [1, 1]} : vector<1x256xf32> to vector<1x128xf32>
    %574 = vector.extract_strided_slice %13 {offsets = [4, 0, 0], sizes = [1, 16, 1], strides = [1, 1, 1]} : vector<25x16x1xf32> to vector<1x16x1xf32>
    %575 = vector.shape_cast %574 : vector<1x16x1xf32> to vector<16x1xf32>
    %576 = vector.broadcast %575 : vector<16x1xf32> to vector<16x128xf32>
    %577 = vector.broadcast %573 : vector<1x128xf32> to vector<16x128xf32>
    %578 = arith.mulf %576, %577 : vector<16x128xf32>
    %579 = arith.addf %572, %578 : vector<16x128xf32>
    %580 = vector.extract_strided_slice %5 {offsets = [0, 10], sizes = [1, 128], strides = [1, 1]} : vector<1x256xf32> to vector<1x128xf32>
    %581 = vector.extract_strided_slice %13 {offsets = [5, 0, 0], sizes = [1, 16, 1], strides = [1, 1, 1]} : vector<25x16x1xf32> to vector<1x16x1xf32>
    %582 = vector.shape_cast %581 : vector<1x16x1xf32> to vector<16x1xf32>
    %583 = vector.broadcast %582 : vector<16x1xf32> to vector<16x128xf32>
    %584 = vector.broadcast %580 : vector<1x128xf32> to vector<16x128xf32>
    %585 = arith.mulf %583, %584 : vector<16x128xf32>
    %586 = arith.addf %579, %585 : vector<16x128xf32>
    %587 = vector.extract_strided_slice %2 {offsets = [0, 11], sizes = [1, 128], strides = [1, 1]} : vector<1x256xf32> to vector<1x128xf32>
    %588 = vector.extract_strided_slice %13 {offsets = [6, 0, 0], sizes = [1, 16, 1], strides = [1, 1, 1]} : vector<25x16x1xf32> to vector<1x16x1xf32>
    %589 = vector.shape_cast %588 : vector<1x16x1xf32> to vector<16x1xf32>
    %590 = vector.broadcast %589 : vector<16x1xf32> to vector<16x128xf32>
    %591 = vector.broadcast %587 : vector<1x128xf32> to vector<16x128xf32>
    %592 = arith.mulf %590, %591 : vector<16x128xf32>
    %593 = arith.addf %586, %592 : vector<16x128xf32>
    %594 = vector.extract_strided_slice %5 {offsets = [0, 11], sizes = [1, 128], strides = [1, 1]} : vector<1x256xf32> to vector<1x128xf32>
    %595 = vector.extract_strided_slice %13 {offsets = [7, 0, 0], sizes = [1, 16, 1], strides = [1, 1, 1]} : vector<25x16x1xf32> to vector<1x16x1xf32>
    %596 = vector.shape_cast %595 : vector<1x16x1xf32> to vector<16x1xf32>
    %597 = vector.broadcast %596 : vector<16x1xf32> to vector<16x128xf32>
    %598 = vector.broadcast %594 : vector<1x128xf32> to vector<16x128xf32>
    %599 = arith.mulf %597, %598 : vector<16x128xf32>
    %600 = arith.addf %593, %599 : vector<16x128xf32>
    %601 = vector.extract_strided_slice %2 {offsets = [0, 12], sizes = [1, 128], strides = [1, 1]} : vector<1x256xf32> to vector<1x128xf32>
    %602 = vector.extract_strided_slice %13 {offsets = [8, 0, 0], sizes = [1, 16, 1], strides = [1, 1, 1]} : vector<25x16x1xf32> to vector<1x16x1xf32>
    %603 = vector.shape_cast %602 : vector<1x16x1xf32> to vector<16x1xf32>
    %604 = vector.broadcast %603 : vector<16x1xf32> to vector<16x128xf32>
    %605 = vector.broadcast %601 : vector<1x128xf32> to vector<16x128xf32>
    %606 = arith.mulf %604, %605 : vector<16x128xf32>
    %607 = arith.addf %600, %606 : vector<16x128xf32>
    %608 = vector.extract_strided_slice %5 {offsets = [0, 12], sizes = [1, 128], strides = [1, 1]} : vector<1x256xf32> to vector<1x128xf32>
    %609 = vector.extract_strided_slice %13 {offsets = [9, 0, 0], sizes = [1, 16, 1], strides = [1, 1, 1]} : vector<25x16x1xf32> to vector<1x16x1xf32>
    %610 = vector.shape_cast %609 : vector<1x16x1xf32> to vector<16x1xf32>
    %611 = vector.broadcast %610 : vector<16x1xf32> to vector<16x128xf32>
    %612 = vector.broadcast %608 : vector<1x128xf32> to vector<16x128xf32>
    %613 = arith.mulf %611, %612 : vector<16x128xf32>
    %614 = arith.addf %607, %613 : vector<16x128xf32>
    %615 = vector.extract_strided_slice %11 {offsets = [0, 10], sizes = [1, 128], strides = [1, 1]} : vector<1x256xf32> to vector<1x128xf32>
    %616 = vector.extract_strided_slice %13 {offsets = [10, 0, 0], sizes = [1, 16, 1], strides = [1, 1, 1]} : vector<25x16x1xf32> to vector<1x16x1xf32>
    %617 = vector.shape_cast %616 : vector<1x16x1xf32> to vector<16x1xf32>
    %618 = vector.broadcast %617 : vector<16x1xf32> to vector<16x128xf32>
    %619 = vector.broadcast %615 : vector<1x128xf32> to vector<16x128xf32>
    %620 = arith.mulf %618, %619 : vector<16x128xf32>
    %621 = arith.addf %614, %620 : vector<16x128xf32>
    %622 = vector.extract_strided_slice %8 {offsets = [0, 11], sizes = [1, 128], strides = [1, 1]} : vector<1x256xf32> to vector<1x128xf32>
    %623 = vector.extract_strided_slice %13 {offsets = [11, 0, 0], sizes = [1, 16, 1], strides = [1, 1, 1]} : vector<25x16x1xf32> to vector<1x16x1xf32>
    %624 = vector.shape_cast %623 : vector<1x16x1xf32> to vector<16x1xf32>
    %625 = vector.broadcast %624 : vector<16x1xf32> to vector<16x128xf32>
    %626 = vector.broadcast %622 : vector<1x128xf32> to vector<16x128xf32>
    %627 = arith.mulf %625, %626 : vector<16x128xf32>
    %628 = arith.addf %621, %627 : vector<16x128xf32>
    %629 = vector.extract_strided_slice %11 {offsets = [0, 11], sizes = [1, 128], strides = [1, 1]} : vector<1x256xf32> to vector<1x128xf32>
    %630 = vector.extract_strided_slice %13 {offsets = [12, 0, 0], sizes = [1, 16, 1], strides = [1, 1, 1]} : vector<25x16x1xf32> to vector<1x16x1xf32>
    %631 = vector.shape_cast %630 : vector<1x16x1xf32> to vector<16x1xf32>
    %632 = vector.broadcast %631 : vector<16x1xf32> to vector<16x128xf32>
    %633 = vector.broadcast %629 : vector<1x128xf32> to vector<16x128xf32>
    %634 = arith.mulf %632, %633 : vector<16x128xf32>
    %635 = arith.addf %628, %634 : vector<16x128xf32>
    %636 = vector.extract_strided_slice %8 {offsets = [0, 12], sizes = [1, 128], strides = [1, 1]} : vector<1x256xf32> to vector<1x128xf32>
    %637 = vector.extract_strided_slice %13 {offsets = [13, 0, 0], sizes = [1, 16, 1], strides = [1, 1, 1]} : vector<25x16x1xf32> to vector<1x16x1xf32>
    %638 = vector.shape_cast %637 : vector<1x16x1xf32> to vector<16x1xf32>
    %639 = vector.broadcast %638 : vector<16x1xf32> to vector<16x128xf32>
    %640 = vector.broadcast %636 : vector<1x128xf32> to vector<16x128xf32>
    %641 = arith.mulf %639, %640 : vector<16x128xf32>
    %642 = arith.addf %635, %641 : vector<16x128xf32>
    %643 = vector.extract_strided_slice %11 {offsets = [0, 12], sizes = [1, 128], strides = [1, 1]} : vector<1x256xf32> to vector<1x128xf32>
    %644 = vector.extract_strided_slice %13 {offsets = [14, 0, 0], sizes = [1, 16, 1], strides = [1, 1, 1]} : vector<25x16x1xf32> to vector<1x16x1xf32>
    %645 = vector.shape_cast %644 : vector<1x16x1xf32> to vector<16x1xf32>
    %646 = vector.broadcast %645 : vector<16x1xf32> to vector<16x128xf32>
    %647 = vector.broadcast %643 : vector<1x128xf32> to vector<16x128xf32>
    %648 = arith.mulf %646, %647 : vector<16x128xf32>
    %649 = arith.addf %642, %648 : vector<16x128xf32>
    %650 = vector.extract_strided_slice %5 {offsets = [0, 20], sizes = [1, 128], strides = [1, 1]} : vector<1x256xf32> to vector<1x128xf32>
    %651 = vector.extract_strided_slice %13 {offsets = [15, 0, 0], sizes = [1, 16, 1], strides = [1, 1, 1]} : vector<25x16x1xf32> to vector<1x16x1xf32>
    %652 = vector.shape_cast %651 : vector<1x16x1xf32> to vector<16x1xf32>
    %653 = vector.broadcast %652 : vector<16x1xf32> to vector<16x128xf32>
    %654 = vector.broadcast %650 : vector<1x128xf32> to vector<16x128xf32>
    %655 = arith.mulf %653, %654 : vector<16x128xf32>
    %656 = arith.addf %649, %655 : vector<16x128xf32>
    %657 = vector.extract_strided_slice %2 {offsets = [0, 21], sizes = [1, 128], strides = [1, 1]} : vector<1x256xf32> to vector<1x128xf32>
    %658 = vector.extract_strided_slice %13 {offsets = [16, 0, 0], sizes = [1, 16, 1], strides = [1, 1, 1]} : vector<25x16x1xf32> to vector<1x16x1xf32>
    %659 = vector.shape_cast %658 : vector<1x16x1xf32> to vector<16x1xf32>
    %660 = vector.broadcast %659 : vector<16x1xf32> to vector<16x128xf32>
    %661 = vector.broadcast %657 : vector<1x128xf32> to vector<16x128xf32>
    %662 = arith.mulf %660, %661 : vector<16x128xf32>
    %663 = arith.addf %656, %662 : vector<16x128xf32>
    %664 = vector.extract_strided_slice %5 {offsets = [0, 21], sizes = [1, 128], strides = [1, 1]} : vector<1x256xf32> to vector<1x128xf32>
    %665 = vector.extract_strided_slice %13 {offsets = [17, 0, 0], sizes = [1, 16, 1], strides = [1, 1, 1]} : vector<25x16x1xf32> to vector<1x16x1xf32>
    %666 = vector.shape_cast %665 : vector<1x16x1xf32> to vector<16x1xf32>
    %667 = vector.broadcast %666 : vector<16x1xf32> to vector<16x128xf32>
    %668 = vector.broadcast %664 : vector<1x128xf32> to vector<16x128xf32>
    %669 = arith.mulf %667, %668 : vector<16x128xf32>
    %670 = arith.addf %663, %669 : vector<16x128xf32>
    %671 = vector.extract_strided_slice %2 {offsets = [0, 22], sizes = [1, 128], strides = [1, 1]} : vector<1x256xf32> to vector<1x128xf32>
    %672 = vector.extract_strided_slice %13 {offsets = [18, 0, 0], sizes = [1, 16, 1], strides = [1, 1, 1]} : vector<25x16x1xf32> to vector<1x16x1xf32>
    %673 = vector.shape_cast %672 : vector<1x16x1xf32> to vector<16x1xf32>
    %674 = vector.broadcast %673 : vector<16x1xf32> to vector<16x128xf32>
    %675 = vector.broadcast %671 : vector<1x128xf32> to vector<16x128xf32>
    %676 = arith.mulf %674, %675 : vector<16x128xf32>
    %677 = arith.addf %670, %676 : vector<16x128xf32>
    %678 = vector.extract_strided_slice %5 {offsets = [0, 22], sizes = [1, 128], strides = [1, 1]} : vector<1x256xf32> to vector<1x128xf32>
    %679 = vector.extract_strided_slice %13 {offsets = [19, 0, 0], sizes = [1, 16, 1], strides = [1, 1, 1]} : vector<25x16x1xf32> to vector<1x16x1xf32>
    %680 = vector.shape_cast %679 : vector<1x16x1xf32> to vector<16x1xf32>
    %681 = vector.broadcast %680 : vector<16x1xf32> to vector<16x128xf32>
    %682 = vector.broadcast %678 : vector<1x128xf32> to vector<16x128xf32>
    %683 = arith.mulf %681, %682 : vector<16x128xf32>
    %684 = arith.addf %677, %683 : vector<16x128xf32>
    %685 = vector.extract_strided_slice %11 {offsets = [0, 20], sizes = [1, 128], strides = [1, 1]} : vector<1x256xf32> to vector<1x128xf32>
    %686 = vector.extract_strided_slice %13 {offsets = [20, 0, 0], sizes = [1, 16, 1], strides = [1, 1, 1]} : vector<25x16x1xf32> to vector<1x16x1xf32>
    %687 = vector.shape_cast %686 : vector<1x16x1xf32> to vector<16x1xf32>
    %688 = vector.broadcast %687 : vector<16x1xf32> to vector<16x128xf32>
    %689 = vector.broadcast %685 : vector<1x128xf32> to vector<16x128xf32>
    %690 = arith.mulf %688, %689 : vector<16x128xf32>
    %691 = arith.addf %684, %690 : vector<16x128xf32>
    %692 = vector.extract_strided_slice %8 {offsets = [0, 21], sizes = [1, 128], strides = [1, 1]} : vector<1x256xf32> to vector<1x128xf32>
    %693 = vector.extract_strided_slice %13 {offsets = [21, 0, 0], sizes = [1, 16, 1], strides = [1, 1, 1]} : vector<25x16x1xf32> to vector<1x16x1xf32>
    %694 = vector.shape_cast %693 : vector<1x16x1xf32> to vector<16x1xf32>
    %695 = vector.broadcast %694 : vector<16x1xf32> to vector<16x128xf32>
    %696 = vector.broadcast %692 : vector<1x128xf32> to vector<16x128xf32>
    %697 = arith.mulf %695, %696 : vector<16x128xf32>
    %698 = arith.addf %691, %697 : vector<16x128xf32>
    %699 = vector.extract_strided_slice %11 {offsets = [0, 21], sizes = [1, 128], strides = [1, 1]} : vector<1x256xf32> to vector<1x128xf32>
    %700 = vector.extract_strided_slice %13 {offsets = [22, 0, 0], sizes = [1, 16, 1], strides = [1, 1, 1]} : vector<25x16x1xf32> to vector<1x16x1xf32>
    %701 = vector.shape_cast %700 : vector<1x16x1xf32> to vector<16x1xf32>
    %702 = vector.broadcast %701 : vector<16x1xf32> to vector<16x128xf32>
    %703 = vector.broadcast %699 : vector<1x128xf32> to vector<16x128xf32>
    %704 = arith.mulf %702, %703 : vector<16x128xf32>
    %705 = arith.addf %698, %704 : vector<16x128xf32>
    %706 = vector.extract_strided_slice %8 {offsets = [0, 22], sizes = [1, 128], strides = [1, 1]} : vector<1x256xf32> to vector<1x128xf32>
    %707 = vector.extract_strided_slice %13 {offsets = [23, 0, 0], sizes = [1, 16, 1], strides = [1, 1, 1]} : vector<25x16x1xf32> to vector<1x16x1xf32>
    %708 = vector.shape_cast %707 : vector<1x16x1xf32> to vector<16x1xf32>
    %709 = vector.broadcast %708 : vector<16x1xf32> to vector<16x128xf32>
    %710 = vector.broadcast %706 : vector<1x128xf32> to vector<16x128xf32>
    %711 = arith.mulf %709, %710 : vector<16x128xf32>
    %712 = arith.addf %705, %711 : vector<16x128xf32>
    %713 = vector.extract_strided_slice %11 {offsets = [0, 22], sizes = [1, 128], strides = [1, 1]} : vector<1x256xf32> to vector<1x128xf32>
    %714 = vector.extract_strided_slice %13 {offsets = [24, 0, 0], sizes = [1, 16, 1], strides = [1, 1, 1]} : vector<25x16x1xf32> to vector<1x16x1xf32>
    %715 = vector.shape_cast %714 : vector<1x16x1xf32> to vector<16x1xf32>
    %716 = vector.broadcast %715 : vector<16x1xf32> to vector<16x128xf32>
    %717 = vector.broadcast %713 : vector<1x128xf32> to vector<16x128xf32>
    %718 = arith.mulf %716, %717 : vector<16x128xf32>
    %719 = arith.addf %712, %718 : vector<16x128xf32>
    %720 = arith.maximumf %543, %719 : vector<16x128xf32>
    %c0_18 = arith.constant 0 : index
    %c0_19 = arith.constant 0 : index
    %721 = vector.load %arg3[%c0_18, %c0_19] : memref<16x1xf32, #tpu.memory_space<vmem>>, vector<16x1xf32>
    %722 = vector.broadcast %721 : vector<16x1xf32> to vector<16x128xf32>
    %723 = arith.addf %720, %722 : vector<16x128xf32>
    %cst_20 = arith.constant 0.000000e+00 : f32
    %724 = vector.broadcast %cst_20 : f32 to vector<16x128xf32>
    %725 = arith.maximumf %723, %724 : vector<16x128xf32>
    %726 = arith.truncf %725 : vector<16x128xf32> to vector<16x128xbf16>
    %c0_21 = arith.constant 0 : index
    %c0_22 = arith.constant 0 : index
    %c0_23 = arith.constant 0 : index
    %727 = vector.load %arg4[%c0_21, %c0_22, %c0_23] : memref<1x16x128xbf16, #tpu.memory_space<vmem>>, vector<1x16x128xbf16>
    %728 = vector.shape_cast %727 : vector<1x16x128xbf16> to vector<16x128xbf16>
    %729 = vector.shape_cast %726 : vector<16x128xbf16> to vector<1x16x128xbf16>
    tpu.vector_store %arg4[%c0_21, %c0_22, %c0_23], %729 {strides = array<i32>} : memref<1x16x128xbf16, #tpu.memory_space<vmem>>, vector<1x16x128xbf16>,
    return
  }
  func.func @transform_0(%arg0: i32) -> (i32, i32, i32, i32) {
    %c0_i32 = arith.constant 0 : i32
    %c0_i32_0 = arith.constant 0 : i32
    %c0_i32_1 = arith.constant 0 : i32
    %c0_i32_2 = arith.constant 0 : i32
    return %arg0, %c0_i32, %c0_i32_0, %c0_i32_1 : i32, i32, i32, i32
  }
  func.func @transform_1(%arg0: i32) -> (i32, i32, i32) {
    %c0_i32 = arith.constant 0 : i32
    %c0_i32_0 = arith.constant 0 : i32
    %c0_i32_1 = arith.constant 0 : i32
    %c0_i32_2 = arith.constant 0 : i32
    return %c0_i32, %c0_i32_0, %c0_i32_1 : i32, i32, i32
  }
  func.func @transform_2(%arg0: i32) -> (i32, i32) {
    %c0_i32 = arith.constant 0 : i32
    %c0_i32_0 = arith.constant 0 : i32
    %c0_i32_1 = arith.constant 0 : i32
    return %c0_i32, %c0_i32_0 : i32, i32
  }
  func.func @transform_3(%arg0: i32) -> (i32, i32, i32) {
    %c0_i32 = arith.constant 0 : i32
    %c0_i32_0 = arith.constant 0 : i32
    %c0_i32_1 = arith.constant 0 : i32
    return %arg0, %c0_i32, %c0_i32_0 : i32, i32, i32
  }
}

module attributes {stable_mosaic.version = 11 : i64} {
  func.func @kernel(%arg0: i32, %arg1: memref<1x4x16x256xbf16, #tpu.memory_space<vmem>>, %arg2: memref<25x32x16xbf16, #tpu.memory_space<vmem>>, %arg3: memref<32x1xf32, #tpu.memory_space<vmem>>, %arg4: memref<1x32x128xf32, #tpu.memory_space<vmem>>) attributes {dimension_semantics = [#tpu.dimension_semantics<parallel>], iteration_bounds = array<i64: 2>, scalar_prefetch = 0 : i64, scratch_operands = 0 : i64, tpu.core_type = #tpu.core_type<tc>, window_params = [{transform_indices = @transform_0, window_bounds = array<i64: 1, 4, 16, 256>}, {pipeline_mode = #tpu.pipeline_mode<synchronous>, transform_indices = @transform_1, window_bounds = array<i64: 25, 32, 16>}, {pipeline_mode = #tpu.pipeline_mode<synchronous>, transform_indices = @transform_2, window_bounds = array<i64: 32, 1>}, {transform_indices = @transform_3, window_bounds = array<i64: 1, 32, 128>}]} {
    %c0 = arith.constant 0 : index
    %c0_0 = arith.constant 0 : index
    %c0_1 = arith.constant 0 : index
    %c0_2 = arith.constant 0 : index
    %0 = vector.load %arg1[%c0, %c0_0, %c0_1, %c0_2] : memref<1x4x16x256xbf16, #tpu.memory_space<vmem>>, vector<1x1x16x256xbf16>
    %1 = vector.shape_cast %0 : vector<1x1x16x256xbf16> to vector<16x256xbf16>
    %2 = arith.extf %1 : vector<16x256xbf16> to vector<16x256xf32>
    %c0_3 = arith.constant 0 : index
    %c1 = arith.constant 1 : index
    %c0_4 = arith.constant 0 : index
    %c0_5 = arith.constant 0 : index
    %3 = vector.load %arg1[%c0_3, %c1, %c0_4, %c0_5] : memref<1x4x16x256xbf16, #tpu.memory_space<vmem>>, vector<1x1x16x256xbf16>
    %4 = vector.shape_cast %3 : vector<1x1x16x256xbf16> to vector<16x256xbf16>
    %5 = arith.extf %4 : vector<16x256xbf16> to vector<16x256xf32>
    %c0_6 = arith.constant 0 : index
    %c2 = arith.constant 2 : index
    %c0_7 = arith.constant 0 : index
    %c0_8 = arith.constant 0 : index
    %6 = vector.load %arg1[%c0_6, %c2, %c0_7, %c0_8] : memref<1x4x16x256xbf16, #tpu.memory_space<vmem>>, vector<1x1x16x256xbf16>
    %7 = vector.shape_cast %6 : vector<1x1x16x256xbf16> to vector<16x256xbf16>
    %8 = arith.extf %7 : vector<16x256xbf16> to vector<16x256xf32>
    %c0_9 = arith.constant 0 : index
    %c3 = arith.constant 3 : index
    %c0_10 = arith.constant 0 : index
    %c0_11 = arith.constant 0 : index
    %9 = vector.load %arg1[%c0_9, %c3, %c0_10, %c0_11] : memref<1x4x16x256xbf16, #tpu.memory_space<vmem>>, vector<1x1x16x256xbf16>
    %10 = vector.shape_cast %9 : vector<1x1x16x256xbf16> to vector<16x256xbf16>
    %11 = arith.extf %10 : vector<16x256xbf16> to vector<16x256xf32>
    %c0_12 = arith.constant 0 : index
    %c0_13 = arith.constant 0 : index
    %c0_14 = arith.constant 0 : index
    %12 = vector.load %arg2[%c0_12, %c0_13, %c0_14] : memref<25x32x16xbf16, #tpu.memory_space<vmem>>, vector<25x32x16xbf16>
    %13 = arith.extf %12 : vector<25x32x16xbf16> to vector<25x32x16xf32>
    %cst = arith.constant 0.000000e+00 : f32
    %14 = vector.broadcast %cst : f32 to vector<32x128xf32>
    %15 = vector.extract_strided_slice %2 {offsets = [0, 0], sizes = [16, 128], strides = [1, 1]} : vector<16x256xf32> to vector<16x128xf32>
    %16 = vector.extract_strided_slice %13 {offsets = [0, 0, 0], sizes = [1, 32, 16], strides = [1, 1, 1]} : vector<25x32x16xf32> to vector<1x32x16xf32>
    %17 = vector.shape_cast %16 : vector<1x32x16xf32> to vector<32x16xf32>
    %cst_15 = arith.constant dense<0.000000e+00> : vector<32x128xf32>
    %18 = tpu.matmul %17, %15, %cst_15 {dimension_numbers = #tpu.dot_dimension_numbers<[1], [0], [0], [1], [0, 0, 1, 1], [], []>} : vector<32x16xf32>, vector<16x128xf32>, vector<32x128xf32> -> vector<32x128xf32>
    %19 = arith.addf %14, %18 : vector<32x128xf32>
    %20 = vector.extract_strided_slice %5 {offsets = [0, 0], sizes = [16, 128], strides = [1, 1]} : vector<16x256xf32> to vector<16x128xf32>
    %21 = vector.extract_strided_slice %13 {offsets = [1, 0, 0], sizes = [1, 32, 16], strides = [1, 1, 1]} : vector<25x32x16xf32> to vector<1x32x16xf32>
    %22 = vector.shape_cast %21 : vector<1x32x16xf32> to vector<32x16xf32>
    %cst_16 = arith.constant dense<0.000000e+00> : vector<32x128xf32>
    %23 = tpu.matmul %22, %20, %cst_16 {dimension_numbers = #tpu.dot_dimension_numbers<[1], [0], [0], [1], [0, 0, 1, 1], [], []>} : vector<32x16xf32>, vector<16x128xf32>, vector<32x128xf32> -> vector<32x128xf32>
    %24 = arith.addf %19, %23 : vector<32x128xf32>
    %25 = vector.extract_strided_slice %2 {offsets = [0, 1], sizes = [16, 128], strides = [1, 1]} : vector<16x256xf32> to vector<16x128xf32>
    %26 = vector.extract_strided_slice %13 {offsets = [2, 0, 0], sizes = [1, 32, 16], strides = [1, 1, 1]} : vector<25x32x16xf32> to vector<1x32x16xf32>
    %27 = vector.shape_cast %26 : vector<1x32x16xf32> to vector<32x16xf32>
    %cst_17 = arith.constant dense<0.000000e+00> : vector<32x128xf32>
    %28 = tpu.matmul %27, %25, %cst_17 {dimension_numbers = #tpu.dot_dimension_numbers<[1], [0], [0], [1], [0, 0, 1, 1], [], []>} : vector<32x16xf32>, vector<16x128xf32>, vector<32x128xf32> -> vector<32x128xf32>
    %29 = arith.addf %24, %28 : vector<32x128xf32>
    %30 = vector.extract_strided_slice %5 {offsets = [0, 1], sizes = [16, 128], strides = [1, 1]} : vector<16x256xf32> to vector<16x128xf32>
    %31 = vector.extract_strided_slice %13 {offsets = [3, 0, 0], sizes = [1, 32, 16], strides = [1, 1, 1]} : vector<25x32x16xf32> to vector<1x32x16xf32>
    %32 = vector.shape_cast %31 : vector<1x32x16xf32> to vector<32x16xf32>
    %cst_18 = arith.constant dense<0.000000e+00> : vector<32x128xf32>
    %33 = tpu.matmul %32, %30, %cst_18 {dimension_numbers = #tpu.dot_dimension_numbers<[1], [0], [0], [1], [0, 0, 1, 1], [], []>} : vector<32x16xf32>, vector<16x128xf32>, vector<32x128xf32> -> vector<32x128xf32>
    %34 = arith.addf %29, %33 : vector<32x128xf32>
    %35 = vector.extract_strided_slice %2 {offsets = [0, 2], sizes = [16, 128], strides = [1, 1]} : vector<16x256xf32> to vector<16x128xf32>
    %36 = vector.extract_strided_slice %13 {offsets = [4, 0, 0], sizes = [1, 32, 16], strides = [1, 1, 1]} : vector<25x32x16xf32> to vector<1x32x16xf32>
    %37 = vector.shape_cast %36 : vector<1x32x16xf32> to vector<32x16xf32>
    %cst_19 = arith.constant dense<0.000000e+00> : vector<32x128xf32>
    %38 = tpu.matmul %37, %35, %cst_19 {dimension_numbers = #tpu.dot_dimension_numbers<[1], [0], [0], [1], [0, 0, 1, 1], [], []>} : vector<32x16xf32>, vector<16x128xf32>, vector<32x128xf32> -> vector<32x128xf32>
    %39 = arith.addf %34, %38 : vector<32x128xf32>
    %40 = vector.extract_strided_slice %8 {offsets = [0, 0], sizes = [16, 128], strides = [1, 1]} : vector<16x256xf32> to vector<16x128xf32>
    %41 = vector.extract_strided_slice %13 {offsets = [5, 0, 0], sizes = [1, 32, 16], strides = [1, 1, 1]} : vector<25x32x16xf32> to vector<1x32x16xf32>
    %42 = vector.shape_cast %41 : vector<1x32x16xf32> to vector<32x16xf32>
    %cst_20 = arith.constant dense<0.000000e+00> : vector<32x128xf32>
    %43 = tpu.matmul %42, %40, %cst_20 {dimension_numbers = #tpu.dot_dimension_numbers<[1], [0], [0], [1], [0, 0, 1, 1], [], []>} : vector<32x16xf32>, vector<16x128xf32>, vector<32x128xf32> -> vector<32x128xf32>
    %44 = arith.addf %39, %43 : vector<32x128xf32>
    %45 = vector.extract_strided_slice %11 {offsets = [0, 0], sizes = [16, 128], strides = [1, 1]} : vector<16x256xf32> to vector<16x128xf32>
    %46 = vector.extract_strided_slice %13 {offsets = [6, 0, 0], sizes = [1, 32, 16], strides = [1, 1, 1]} : vector<25x32x16xf32> to vector<1x32x16xf32>
    %47 = vector.shape_cast %46 : vector<1x32x16xf32> to vector<32x16xf32>
    %cst_21 = arith.constant dense<0.000000e+00> : vector<32x128xf32>
    %48 = tpu.matmul %47, %45, %cst_21 {dimension_numbers = #tpu.dot_dimension_numbers<[1], [0], [0], [1], [0, 0, 1, 1], [], []>} : vector<32x16xf32>, vector<16x128xf32>, vector<32x128xf32> -> vector<32x128xf32>
    %49 = arith.addf %44, %48 : vector<32x128xf32>
    %50 = vector.extract_strided_slice %8 {offsets = [0, 1], sizes = [16, 128], strides = [1, 1]} : vector<16x256xf32> to vector<16x128xf32>
    %51 = vector.extract_strided_slice %13 {offsets = [7, 0, 0], sizes = [1, 32, 16], strides = [1, 1, 1]} : vector<25x32x16xf32> to vector<1x32x16xf32>
    %52 = vector.shape_cast %51 : vector<1x32x16xf32> to vector<32x16xf32>
    %cst_22 = arith.constant dense<0.000000e+00> : vector<32x128xf32>
    %53 = tpu.matmul %52, %50, %cst_22 {dimension_numbers = #tpu.dot_dimension_numbers<[1], [0], [0], [1], [0, 0, 1, 1], [], []>} : vector<32x16xf32>, vector<16x128xf32>, vector<32x128xf32> -> vector<32x128xf32>
    %54 = arith.addf %49, %53 : vector<32x128xf32>
    %55 = vector.extract_strided_slice %11 {offsets = [0, 1], sizes = [16, 128], strides = [1, 1]} : vector<16x256xf32> to vector<16x128xf32>
    %56 = vector.extract_strided_slice %13 {offsets = [8, 0, 0], sizes = [1, 32, 16], strides = [1, 1, 1]} : vector<25x32x16xf32> to vector<1x32x16xf32>
    %57 = vector.shape_cast %56 : vector<1x32x16xf32> to vector<32x16xf32>
    %cst_23 = arith.constant dense<0.000000e+00> : vector<32x128xf32>
    %58 = tpu.matmul %57, %55, %cst_23 {dimension_numbers = #tpu.dot_dimension_numbers<[1], [0], [0], [1], [0, 0, 1, 1], [], []>} : vector<32x16xf32>, vector<16x128xf32>, vector<32x128xf32> -> vector<32x128xf32>
    %59 = arith.addf %54, %58 : vector<32x128xf32>
    %60 = vector.extract_strided_slice %8 {offsets = [0, 2], sizes = [16, 128], strides = [1, 1]} : vector<16x256xf32> to vector<16x128xf32>
    %61 = vector.extract_strided_slice %13 {offsets = [9, 0, 0], sizes = [1, 32, 16], strides = [1, 1, 1]} : vector<25x32x16xf32> to vector<1x32x16xf32>
    %62 = vector.shape_cast %61 : vector<1x32x16xf32> to vector<32x16xf32>
    %cst_24 = arith.constant dense<0.000000e+00> : vector<32x128xf32>
    %63 = tpu.matmul %62, %60, %cst_24 {dimension_numbers = #tpu.dot_dimension_numbers<[1], [0], [0], [1], [0, 0, 1, 1], [], []>} : vector<32x16xf32>, vector<16x128xf32>, vector<32x128xf32> -> vector<32x128xf32>
    %64 = arith.addf %59, %63 : vector<32x128xf32>
    %65 = vector.extract_strided_slice %2 {offsets = [0, 6], sizes = [16, 128], strides = [1, 1]} : vector<16x256xf32> to vector<16x128xf32>
    %66 = vector.extract_strided_slice %13 {offsets = [10, 0, 0], sizes = [1, 32, 16], strides = [1, 1, 1]} : vector<25x32x16xf32> to vector<1x32x16xf32>
    %67 = vector.shape_cast %66 : vector<1x32x16xf32> to vector<32x16xf32>
    %cst_25 = arith.constant dense<0.000000e+00> : vector<32x128xf32>
    %68 = tpu.matmul %67, %65, %cst_25 {dimension_numbers = #tpu.dot_dimension_numbers<[1], [0], [0], [1], [0, 0, 1, 1], [], []>} : vector<32x16xf32>, vector<16x128xf32>, vector<32x128xf32> -> vector<32x128xf32>
    %69 = arith.addf %64, %68 : vector<32x128xf32>
    %70 = vector.extract_strided_slice %5 {offsets = [0, 6], sizes = [16, 128], strides = [1, 1]} : vector<16x256xf32> to vector<16x128xf32>
    %71 = vector.extract_strided_slice %13 {offsets = [11, 0, 0], sizes = [1, 32, 16], strides = [1, 1, 1]} : vector<25x32x16xf32> to vector<1x32x16xf32>
    %72 = vector.shape_cast %71 : vector<1x32x16xf32> to vector<32x16xf32>
    %cst_26 = arith.constant dense<0.000000e+00> : vector<32x128xf32>
    %73 = tpu.matmul %72, %70, %cst_26 {dimension_numbers = #tpu.dot_dimension_numbers<[1], [0], [0], [1], [0, 0, 1, 1], [], []>} : vector<32x16xf32>, vector<16x128xf32>, vector<32x128xf32> -> vector<32x128xf32>
    %74 = arith.addf %69, %73 : vector<32x128xf32>
    %75 = vector.extract_strided_slice %2 {offsets = [0, 7], sizes = [16, 128], strides = [1, 1]} : vector<16x256xf32> to vector<16x128xf32>
    %76 = vector.extract_strided_slice %13 {offsets = [12, 0, 0], sizes = [1, 32, 16], strides = [1, 1, 1]} : vector<25x32x16xf32> to vector<1x32x16xf32>
    %77 = vector.shape_cast %76 : vector<1x32x16xf32> to vector<32x16xf32>
    %cst_27 = arith.constant dense<0.000000e+00> : vector<32x128xf32>
    %78 = tpu.matmul %77, %75, %cst_27 {dimension_numbers = #tpu.dot_dimension_numbers<[1], [0], [0], [1], [0, 0, 1, 1], [], []>} : vector<32x16xf32>, vector<16x128xf32>, vector<32x128xf32> -> vector<32x128xf32>
    %79 = arith.addf %74, %78 : vector<32x128xf32>
    %80 = vector.extract_strided_slice %5 {offsets = [0, 7], sizes = [16, 128], strides = [1, 1]} : vector<16x256xf32> to vector<16x128xf32>
    %81 = vector.extract_strided_slice %13 {offsets = [13, 0, 0], sizes = [1, 32, 16], strides = [1, 1, 1]} : vector<25x32x16xf32> to vector<1x32x16xf32>
    %82 = vector.shape_cast %81 : vector<1x32x16xf32> to vector<32x16xf32>
    %cst_28 = arith.constant dense<0.000000e+00> : vector<32x128xf32>
    %83 = tpu.matmul %82, %80, %cst_28 {dimension_numbers = #tpu.dot_dimension_numbers<[1], [0], [0], [1], [0, 0, 1, 1], [], []>} : vector<32x16xf32>, vector<16x128xf32>, vector<32x128xf32> -> vector<32x128xf32>
    %84 = arith.addf %79, %83 : vector<32x128xf32>
    %85 = vector.extract_strided_slice %2 {offsets = [0, 8], sizes = [16, 128], strides = [1, 1]} : vector<16x256xf32> to vector<16x128xf32>
    %86 = vector.extract_strided_slice %13 {offsets = [14, 0, 0], sizes = [1, 32, 16], strides = [1, 1, 1]} : vector<25x32x16xf32> to vector<1x32x16xf32>
    %87 = vector.shape_cast %86 : vector<1x32x16xf32> to vector<32x16xf32>
    %cst_29 = arith.constant dense<0.000000e+00> : vector<32x128xf32>
    %88 = tpu.matmul %87, %85, %cst_29 {dimension_numbers = #tpu.dot_dimension_numbers<[1], [0], [0], [1], [0, 0, 1, 1], [], []>} : vector<32x16xf32>, vector<16x128xf32>, vector<32x128xf32> -> vector<32x128xf32>
    %89 = arith.addf %84, %88 : vector<32x128xf32>
    %90 = vector.extract_strided_slice %8 {offsets = [0, 6], sizes = [16, 128], strides = [1, 1]} : vector<16x256xf32> to vector<16x128xf32>
    %91 = vector.extract_strided_slice %13 {offsets = [15, 0, 0], sizes = [1, 32, 16], strides = [1, 1, 1]} : vector<25x32x16xf32> to vector<1x32x16xf32>
    %92 = vector.shape_cast %91 : vector<1x32x16xf32> to vector<32x16xf32>
    %cst_30 = arith.constant dense<0.000000e+00> : vector<32x128xf32>
    %93 = tpu.matmul %92, %90, %cst_30 {dimension_numbers = #tpu.dot_dimension_numbers<[1], [0], [0], [1], [0, 0, 1, 1], [], []>} : vector<32x16xf32>, vector<16x128xf32>, vector<32x128xf32> -> vector<32x128xf32>
    %94 = arith.addf %89, %93 : vector<32x128xf32>
    %95 = vector.extract_strided_slice %11 {offsets = [0, 6], sizes = [16, 128], strides = [1, 1]} : vector<16x256xf32> to vector<16x128xf32>
    %96 = vector.extract_strided_slice %13 {offsets = [16, 0, 0], sizes = [1, 32, 16], strides = [1, 1, 1]} : vector<25x32x16xf32> to vector<1x32x16xf32>
    %97 = vector.shape_cast %96 : vector<1x32x16xf32> to vector<32x16xf32>
    %cst_31 = arith.constant dense<0.000000e+00> : vector<32x128xf32>
    %98 = tpu.matmul %97, %95, %cst_31 {dimension_numbers = #tpu.dot_dimension_numbers<[1], [0], [0], [1], [0, 0, 1, 1], [], []>} : vector<32x16xf32>, vector<16x128xf32>, vector<32x128xf32> -> vector<32x128xf32>
    %99 = arith.addf %94, %98 : vector<32x128xf32>
    %100 = vector.extract_strided_slice %8 {offsets = [0, 7], sizes = [16, 128], strides = [1, 1]} : vector<16x256xf32> to vector<16x128xf32>
    %101 = vector.extract_strided_slice %13 {offsets = [17, 0, 0], sizes = [1, 32, 16], strides = [1, 1, 1]} : vector<25x32x16xf32> to vector<1x32x16xf32>
    %102 = vector.shape_cast %101 : vector<1x32x16xf32> to vector<32x16xf32>
    %cst_32 = arith.constant dense<0.000000e+00> : vector<32x128xf32>
    %103 = tpu.matmul %102, %100, %cst_32 {dimension_numbers = #tpu.dot_dimension_numbers<[1], [0], [0], [1], [0, 0, 1, 1], [], []>} : vector<32x16xf32>, vector<16x128xf32>, vector<32x128xf32> -> vector<32x128xf32>
    %104 = arith.addf %99, %103 : vector<32x128xf32>
    %105 = vector.extract_strided_slice %11 {offsets = [0, 7], sizes = [16, 128], strides = [1, 1]} : vector<16x256xf32> to vector<16x128xf32>
    %106 = vector.extract_strided_slice %13 {offsets = [18, 0, 0], sizes = [1, 32, 16], strides = [1, 1, 1]} : vector<25x32x16xf32> to vector<1x32x16xf32>
    %107 = vector.shape_cast %106 : vector<1x32x16xf32> to vector<32x16xf32>
    %cst_33 = arith.constant dense<0.000000e+00> : vector<32x128xf32>
    %108 = tpu.matmul %107, %105, %cst_33 {dimension_numbers = #tpu.dot_dimension_numbers<[1], [0], [0], [1], [0, 0, 1, 1], [], []>} : vector<32x16xf32>, vector<16x128xf32>, vector<32x128xf32> -> vector<32x128xf32>
    %109 = arith.addf %104, %108 : vector<32x128xf32>
    %110 = vector.extract_strided_slice %8 {offsets = [0, 8], sizes = [16, 128], strides = [1, 1]} : vector<16x256xf32> to vector<16x128xf32>
    %111 = vector.extract_strided_slice %13 {offsets = [19, 0, 0], sizes = [1, 32, 16], strides = [1, 1, 1]} : vector<25x32x16xf32> to vector<1x32x16xf32>
    %112 = vector.shape_cast %111 : vector<1x32x16xf32> to vector<32x16xf32>
    %cst_34 = arith.constant dense<0.000000e+00> : vector<32x128xf32>
    %113 = tpu.matmul %112, %110, %cst_34 {dimension_numbers = #tpu.dot_dimension_numbers<[1], [0], [0], [1], [0, 0, 1, 1], [], []>} : vector<32x16xf32>, vector<16x128xf32>, vector<32x128xf32> -> vector<32x128xf32>
    %114 = arith.addf %109, %113 : vector<32x128xf32>
    %115 = vector.extract_strided_slice %2 {offsets = [0, 12], sizes = [16, 128], strides = [1, 1]} : vector<16x256xf32> to vector<16x128xf32>
    %116 = vector.extract_strided_slice %13 {offsets = [20, 0, 0], sizes = [1, 32, 16], strides = [1, 1, 1]} : vector<25x32x16xf32> to vector<1x32x16xf32>
    %117 = vector.shape_cast %116 : vector<1x32x16xf32> to vector<32x16xf32>
    %cst_35 = arith.constant dense<0.000000e+00> : vector<32x128xf32>
    %118 = tpu.matmul %117, %115, %cst_35 {dimension_numbers = #tpu.dot_dimension_numbers<[1], [0], [0], [1], [0, 0, 1, 1], [], []>} : vector<32x16xf32>, vector<16x128xf32>, vector<32x128xf32> -> vector<32x128xf32>
    %119 = arith.addf %114, %118 : vector<32x128xf32>
    %120 = vector.extract_strided_slice %5 {offsets = [0, 12], sizes = [16, 128], strides = [1, 1]} : vector<16x256xf32> to vector<16x128xf32>
    %121 = vector.extract_strided_slice %13 {offsets = [21, 0, 0], sizes = [1, 32, 16], strides = [1, 1, 1]} : vector<25x32x16xf32> to vector<1x32x16xf32>
    %122 = vector.shape_cast %121 : vector<1x32x16xf32> to vector<32x16xf32>
    %cst_36 = arith.constant dense<0.000000e+00> : vector<32x128xf32>
    %123 = tpu.matmul %122, %120, %cst_36 {dimension_numbers = #tpu.dot_dimension_numbers<[1], [0], [0], [1], [0, 0, 1, 1], [], []>} : vector<32x16xf32>, vector<16x128xf32>, vector<32x128xf32> -> vector<32x128xf32>
    %124 = arith.addf %119, %123 : vector<32x128xf32>
    %125 = vector.extract_strided_slice %2 {offsets = [0, 13], sizes = [16, 128], strides = [1, 1]} : vector<16x256xf32> to vector<16x128xf32>
    %126 = vector.extract_strided_slice %13 {offsets = [22, 0, 0], sizes = [1, 32, 16], strides = [1, 1, 1]} : vector<25x32x16xf32> to vector<1x32x16xf32>
    %127 = vector.shape_cast %126 : vector<1x32x16xf32> to vector<32x16xf32>
    %cst_37 = arith.constant dense<0.000000e+00> : vector<32x128xf32>
    %128 = tpu.matmul %127, %125, %cst_37 {dimension_numbers = #tpu.dot_dimension_numbers<[1], [0], [0], [1], [0, 0, 1, 1], [], []>} : vector<32x16xf32>, vector<16x128xf32>, vector<32x128xf32> -> vector<32x128xf32>
    %129 = arith.addf %124, %128 : vector<32x128xf32>
    %130 = vector.extract_strided_slice %5 {offsets = [0, 13], sizes = [16, 128], strides = [1, 1]} : vector<16x256xf32> to vector<16x128xf32>
    %131 = vector.extract_strided_slice %13 {offsets = [23, 0, 0], sizes = [1, 32, 16], strides = [1, 1, 1]} : vector<25x32x16xf32> to vector<1x32x16xf32>
    %132 = vector.shape_cast %131 : vector<1x32x16xf32> to vector<32x16xf32>
    %cst_38 = arith.constant dense<0.000000e+00> : vector<32x128xf32>
    %133 = tpu.matmul %132, %130, %cst_38 {dimension_numbers = #tpu.dot_dimension_numbers<[1], [0], [0], [1], [0, 0, 1, 1], [], []>} : vector<32x16xf32>, vector<16x128xf32>, vector<32x128xf32> -> vector<32x128xf32>
    %134 = arith.addf %129, %133 : vector<32x128xf32>
    %135 = vector.extract_strided_slice %2 {offsets = [0, 14], sizes = [16, 128], strides = [1, 1]} : vector<16x256xf32> to vector<16x128xf32>
    %136 = vector.extract_strided_slice %13 {offsets = [24, 0, 0], sizes = [1, 32, 16], strides = [1, 1, 1]} : vector<25x32x16xf32> to vector<1x32x16xf32>
    %137 = vector.shape_cast %136 : vector<1x32x16xf32> to vector<32x16xf32>
    %cst_39 = arith.constant dense<0.000000e+00> : vector<32x128xf32>
    %138 = tpu.matmul %137, %135, %cst_39 {dimension_numbers = #tpu.dot_dimension_numbers<[1], [0], [0], [1], [0, 0, 1, 1], [], []>} : vector<32x16xf32>, vector<16x128xf32>, vector<32x128xf32> -> vector<32x128xf32>
    %139 = arith.addf %134, %138 : vector<32x128xf32>
    %cst_40 = arith.constant 0.000000e+00 : f32
    %140 = vector.broadcast %cst_40 : f32 to vector<32x128xf32>
    %141 = vector.extract_strided_slice %5 {offsets = [0, 0], sizes = [16, 128], strides = [1, 1]} : vector<16x256xf32> to vector<16x128xf32>
    %142 = vector.extract_strided_slice %13 {offsets = [0, 0, 0], sizes = [1, 32, 16], strides = [1, 1, 1]} : vector<25x32x16xf32> to vector<1x32x16xf32>
    %143 = vector.shape_cast %142 : vector<1x32x16xf32> to vector<32x16xf32>
    %cst_41 = arith.constant dense<0.000000e+00> : vector<32x128xf32>
    %144 = tpu.matmul %143, %141, %cst_41 {dimension_numbers = #tpu.dot_dimension_numbers<[1], [0], [0], [1], [0, 0, 1, 1], [], []>} : vector<32x16xf32>, vector<16x128xf32>, vector<32x128xf32> -> vector<32x128xf32>
    %145 = arith.addf %140, %144 : vector<32x128xf32>
    %146 = vector.extract_strided_slice %2 {offsets = [0, 1], sizes = [16, 128], strides = [1, 1]} : vector<16x256xf32> to vector<16x128xf32>
    %147 = vector.extract_strided_slice %13 {offsets = [1, 0, 0], sizes = [1, 32, 16], strides = [1, 1, 1]} : vector<25x32x16xf32> to vector<1x32x16xf32>
    %148 = vector.shape_cast %147 : vector<1x32x16xf32> to vector<32x16xf32>
    %cst_42 = arith.constant dense<0.000000e+00> : vector<32x128xf32>
    %149 = tpu.matmul %148, %146, %cst_42 {dimension_numbers = #tpu.dot_dimension_numbers<[1], [0], [0], [1], [0, 0, 1, 1], [], []>} : vector<32x16xf32>, vector<16x128xf32>, vector<32x128xf32> -> vector<32x128xf32>
    %150 = arith.addf %145, %149 : vector<32x128xf32>
    %151 = vector.extract_strided_slice %5 {offsets = [0, 1], sizes = [16, 128], strides = [1, 1]} : vector<16x256xf32> to vector<16x128xf32>
    %152 = vector.extract_strided_slice %13 {offsets = [2, 0, 0], sizes = [1, 32, 16], strides = [1, 1, 1]} : vector<25x32x16xf32> to vector<1x32x16xf32>
    %153 = vector.shape_cast %152 : vector<1x32x16xf32> to vector<32x16xf32>
    %cst_43 = arith.constant dense<0.000000e+00> : vector<32x128xf32>
    %154 = tpu.matmul %153, %151, %cst_43 {dimension_numbers = #tpu.dot_dimension_numbers<[1], [0], [0], [1], [0, 0, 1, 1], [], []>} : vector<32x16xf32>, vector<16x128xf32>, vector<32x128xf32> -> vector<32x128xf32>
    %155 = arith.addf %150, %154 : vector<32x128xf32>
    %156 = vector.extract_strided_slice %2 {offsets = [0, 2], sizes = [16, 128], strides = [1, 1]} : vector<16x256xf32> to vector<16x128xf32>
    %157 = vector.extract_strided_slice %13 {offsets = [3, 0, 0], sizes = [1, 32, 16], strides = [1, 1, 1]} : vector<25x32x16xf32> to vector<1x32x16xf32>
    %158 = vector.shape_cast %157 : vector<1x32x16xf32> to vector<32x16xf32>
    %cst_44 = arith.constant dense<0.000000e+00> : vector<32x128xf32>
    %159 = tpu.matmul %158, %156, %cst_44 {dimension_numbers = #tpu.dot_dimension_numbers<[1], [0], [0], [1], [0, 0, 1, 1], [], []>} : vector<32x16xf32>, vector<16x128xf32>, vector<32x128xf32> -> vector<32x128xf32>
    %160 = arith.addf %155, %159 : vector<32x128xf32>
    %161 = vector.extract_strided_slice %5 {offsets = [0, 2], sizes = [16, 128], strides = [1, 1]} : vector<16x256xf32> to vector<16x128xf32>
    %162 = vector.extract_strided_slice %13 {offsets = [4, 0, 0], sizes = [1, 32, 16], strides = [1, 1, 1]} : vector<25x32x16xf32> to vector<1x32x16xf32>
    %163 = vector.shape_cast %162 : vector<1x32x16xf32> to vector<32x16xf32>
    %cst_45 = arith.constant dense<0.000000e+00> : vector<32x128xf32>
    %164 = tpu.matmul %163, %161, %cst_45 {dimension_numbers = #tpu.dot_dimension_numbers<[1], [0], [0], [1], [0, 0, 1, 1], [], []>} : vector<32x16xf32>, vector<16x128xf32>, vector<32x128xf32> -> vector<32x128xf32>
    %165 = arith.addf %160, %164 : vector<32x128xf32>
    %166 = vector.extract_strided_slice %11 {offsets = [0, 0], sizes = [16, 128], strides = [1, 1]} : vector<16x256xf32> to vector<16x128xf32>
    %167 = vector.extract_strided_slice %13 {offsets = [5, 0, 0], sizes = [1, 32, 16], strides = [1, 1, 1]} : vector<25x32x16xf32> to vector<1x32x16xf32>
    %168 = vector.shape_cast %167 : vector<1x32x16xf32> to vector<32x16xf32>
    %cst_46 = arith.constant dense<0.000000e+00> : vector<32x128xf32>
    %169 = tpu.matmul %168, %166, %cst_46 {dimension_numbers = #tpu.dot_dimension_numbers<[1], [0], [0], [1], [0, 0, 1, 1], [], []>} : vector<32x16xf32>, vector<16x128xf32>, vector<32x128xf32> -> vector<32x128xf32>
    %170 = arith.addf %165, %169 : vector<32x128xf32>
    %171 = vector.extract_strided_slice %8 {offsets = [0, 1], sizes = [16, 128], strides = [1, 1]} : vector<16x256xf32> to vector<16x128xf32>
    %172 = vector.extract_strided_slice %13 {offsets = [6, 0, 0], sizes = [1, 32, 16], strides = [1, 1, 1]} : vector<25x32x16xf32> to vector<1x32x16xf32>
    %173 = vector.shape_cast %172 : vector<1x32x16xf32> to vector<32x16xf32>
    %cst_47 = arith.constant dense<0.000000e+00> : vector<32x128xf32>
    %174 = tpu.matmul %173, %171, %cst_47 {dimension_numbers = #tpu.dot_dimension_numbers<[1], [0], [0], [1], [0, 0, 1, 1], [], []>} : vector<32x16xf32>, vector<16x128xf32>, vector<32x128xf32> -> vector<32x128xf32>
    %175 = arith.addf %170, %174 : vector<32x128xf32>
    %176 = vector.extract_strided_slice %11 {offsets = [0, 1], sizes = [16, 128], strides = [1, 1]} : vector<16x256xf32> to vector<16x128xf32>
    %177 = vector.extract_strided_slice %13 {offsets = [7, 0, 0], sizes = [1, 32, 16], strides = [1, 1, 1]} : vector<25x32x16xf32> to vector<1x32x16xf32>
    %178 = vector.shape_cast %177 : vector<1x32x16xf32> to vector<32x16xf32>
    %cst_48 = arith.constant dense<0.000000e+00> : vector<32x128xf32>
    %179 = tpu.matmul %178, %176, %cst_48 {dimension_numbers = #tpu.dot_dimension_numbers<[1], [0], [0], [1], [0, 0, 1, 1], [], []>} : vector<32x16xf32>, vector<16x128xf32>, vector<32x128xf32> -> vector<32x128xf32>
    %180 = arith.addf %175, %179 : vector<32x128xf32>
    %181 = vector.extract_strided_slice %8 {offsets = [0, 2], sizes = [16, 128], strides = [1, 1]} : vector<16x256xf32> to vector<16x128xf32>
    %182 = vector.extract_strided_slice %13 {offsets = [8, 0, 0], sizes = [1, 32, 16], strides = [1, 1, 1]} : vector<25x32x16xf32> to vector<1x32x16xf32>
    %183 = vector.shape_cast %182 : vector<1x32x16xf32> to vector<32x16xf32>
    %cst_49 = arith.constant dense<0.000000e+00> : vector<32x128xf32>
    %184 = tpu.matmul %183, %181, %cst_49 {dimension_numbers = #tpu.dot_dimension_numbers<[1], [0], [0], [1], [0, 0, 1, 1], [], []>} : vector<32x16xf32>, vector<16x128xf32>, vector<32x128xf32> -> vector<32x128xf32>
    %185 = arith.addf %180, %184 : vector<32x128xf32>
    %186 = vector.extract_strided_slice %11 {offsets = [0, 2], sizes = [16, 128], strides = [1, 1]} : vector<16x256xf32> to vector<16x128xf32>
    %187 = vector.extract_strided_slice %13 {offsets = [9, 0, 0], sizes = [1, 32, 16], strides = [1, 1, 1]} : vector<25x32x16xf32> to vector<1x32x16xf32>
    %188 = vector.shape_cast %187 : vector<1x32x16xf32> to vector<32x16xf32>
    %cst_50 = arith.constant dense<0.000000e+00> : vector<32x128xf32>
    %189 = tpu.matmul %188, %186, %cst_50 {dimension_numbers = #tpu.dot_dimension_numbers<[1], [0], [0], [1], [0, 0, 1, 1], [], []>} : vector<32x16xf32>, vector<16x128xf32>, vector<32x128xf32> -> vector<32x128xf32>
    %190 = arith.addf %185, %189 : vector<32x128xf32>
    %191 = vector.extract_strided_slice %5 {offsets = [0, 6], sizes = [16, 128], strides = [1, 1]} : vector<16x256xf32> to vector<16x128xf32>
    %192 = vector.extract_strided_slice %13 {offsets = [10, 0, 0], sizes = [1, 32, 16], strides = [1, 1, 1]} : vector<25x32x16xf32> to vector<1x32x16xf32>
    %193 = vector.shape_cast %192 : vector<1x32x16xf32> to vector<32x16xf32>
    %cst_51 = arith.constant dense<0.000000e+00> : vector<32x128xf32>
    %194 = tpu.matmul %193, %191, %cst_51 {dimension_numbers = #tpu.dot_dimension_numbers<[1], [0], [0], [1], [0, 0, 1, 1], [], []>} : vector<32x16xf32>, vector<16x128xf32>, vector<32x128xf32> -> vector<32x128xf32>
    %195 = arith.addf %190, %194 : vector<32x128xf32>
    %196 = vector.extract_strided_slice %2 {offsets = [0, 7], sizes = [16, 128], strides = [1, 1]} : vector<16x256xf32> to vector<16x128xf32>
    %197 = vector.extract_strided_slice %13 {offsets = [11, 0, 0], sizes = [1, 32, 16], strides = [1, 1, 1]} : vector<25x32x16xf32> to vector<1x32x16xf32>
    %198 = vector.shape_cast %197 : vector<1x32x16xf32> to vector<32x16xf32>
    %cst_52 = arith.constant dense<0.000000e+00> : vector<32x128xf32>
    %199 = tpu.matmul %198, %196, %cst_52 {dimension_numbers = #tpu.dot_dimension_numbers<[1], [0], [0], [1], [0, 0, 1, 1], [], []>} : vector<32x16xf32>, vector<16x128xf32>, vector<32x128xf32> -> vector<32x128xf32>
    %200 = arith.addf %195, %199 : vector<32x128xf32>
    %201 = vector.extract_strided_slice %5 {offsets = [0, 7], sizes = [16, 128], strides = [1, 1]} : vector<16x256xf32> to vector<16x128xf32>
    %202 = vector.extract_strided_slice %13 {offsets = [12, 0, 0], sizes = [1, 32, 16], strides = [1, 1, 1]} : vector<25x32x16xf32> to vector<1x32x16xf32>
    %203 = vector.shape_cast %202 : vector<1x32x16xf32> to vector<32x16xf32>
    %cst_53 = arith.constant dense<0.000000e+00> : vector<32x128xf32>
    %204 = tpu.matmul %203, %201, %cst_53 {dimension_numbers = #tpu.dot_dimension_numbers<[1], [0], [0], [1], [0, 0, 1, 1], [], []>} : vector<32x16xf32>, vector<16x128xf32>, vector<32x128xf32> -> vector<32x128xf32>
    %205 = arith.addf %200, %204 : vector<32x128xf32>
    %206 = vector.extract_strided_slice %2 {offsets = [0, 8], sizes = [16, 128], strides = [1, 1]} : vector<16x256xf32> to vector<16x128xf32>
    %207 = vector.extract_strided_slice %13 {offsets = [13, 0, 0], sizes = [1, 32, 16], strides = [1, 1, 1]} : vector<25x32x16xf32> to vector<1x32x16xf32>
    %208 = vector.shape_cast %207 : vector<1x32x16xf32> to vector<32x16xf32>
    %cst_54 = arith.constant dense<0.000000e+00> : vector<32x128xf32>
    %209 = tpu.matmul %208, %206, %cst_54 {dimension_numbers = #tpu.dot_dimension_numbers<[1], [0], [0], [1], [0, 0, 1, 1], [], []>} : vector<32x16xf32>, vector<16x128xf32>, vector<32x128xf32> -> vector<32x128xf32>
    %210 = arith.addf %205, %209 : vector<32x128xf32>
    %211 = vector.extract_strided_slice %5 {offsets = [0, 8], sizes = [16, 128], strides = [1, 1]} : vector<16x256xf32> to vector<16x128xf32>
    %212 = vector.extract_strided_slice %13 {offsets = [14, 0, 0], sizes = [1, 32, 16], strides = [1, 1, 1]} : vector<25x32x16xf32> to vector<1x32x16xf32>
    %213 = vector.shape_cast %212 : vector<1x32x16xf32> to vector<32x16xf32>
    %cst_55 = arith.constant dense<0.000000e+00> : vector<32x128xf32>
    %214 = tpu.matmul %213, %211, %cst_55 {dimension_numbers = #tpu.dot_dimension_numbers<[1], [0], [0], [1], [0, 0, 1, 1], [], []>} : vector<32x16xf32>, vector<16x128xf32>, vector<32x128xf32> -> vector<32x128xf32>
    %215 = arith.addf %210, %214 : vector<32x128xf32>
    %216 = vector.extract_strided_slice %11 {offsets = [0, 6], sizes = [16, 128], strides = [1, 1]} : vector<16x256xf32> to vector<16x128xf32>
    %217 = vector.extract_strided_slice %13 {offsets = [15, 0, 0], sizes = [1, 32, 16], strides = [1, 1, 1]} : vector<25x32x16xf32> to vector<1x32x16xf32>
    %218 = vector.shape_cast %217 : vector<1x32x16xf32> to vector<32x16xf32>
    %cst_56 = arith.constant dense<0.000000e+00> : vector<32x128xf32>
    %219 = tpu.matmul %218, %216, %cst_56 {dimension_numbers = #tpu.dot_dimension_numbers<[1], [0], [0], [1], [0, 0, 1, 1], [], []>} : vector<32x16xf32>, vector<16x128xf32>, vector<32x128xf32> -> vector<32x128xf32>
    %220 = arith.addf %215, %219 : vector<32x128xf32>
    %221 = vector.extract_strided_slice %8 {offsets = [0, 7], sizes = [16, 128], strides = [1, 1]} : vector<16x256xf32> to vector<16x128xf32>
    %222 = vector.extract_strided_slice %13 {offsets = [16, 0, 0], sizes = [1, 32, 16], strides = [1, 1, 1]} : vector<25x32x16xf32> to vector<1x32x16xf32>
    %223 = vector.shape_cast %222 : vector<1x32x16xf32> to vector<32x16xf32>
    %cst_57 = arith.constant dense<0.000000e+00> : vector<32x128xf32>
    %224 = tpu.matmul %223, %221, %cst_57 {dimension_numbers = #tpu.dot_dimension_numbers<[1], [0], [0], [1], [0, 0, 1, 1], [], []>} : vector<32x16xf32>, vector<16x128xf32>, vector<32x128xf32> -> vector<32x128xf32>
    %225 = arith.addf %220, %224 : vector<32x128xf32>
    %226 = vector.extract_strided_slice %11 {offsets = [0, 7], sizes = [16, 128], strides = [1, 1]} : vector<16x256xf32> to vector<16x128xf32>
    %227 = vector.extract_strided_slice %13 {offsets = [17, 0, 0], sizes = [1, 32, 16], strides = [1, 1, 1]} : vector<25x32x16xf32> to vector<1x32x16xf32>
    %228 = vector.shape_cast %227 : vector<1x32x16xf32> to vector<32x16xf32>
    %cst_58 = arith.constant dense<0.000000e+00> : vector<32x128xf32>
    %229 = tpu.matmul %228, %226, %cst_58 {dimension_numbers = #tpu.dot_dimension_numbers<[1], [0], [0], [1], [0, 0, 1, 1], [], []>} : vector<32x16xf32>, vector<16x128xf32>, vector<32x128xf32> -> vector<32x128xf32>
    %230 = arith.addf %225, %229 : vector<32x128xf32>
    %231 = vector.extract_strided_slice %8 {offsets = [0, 8], sizes = [16, 128], strides = [1, 1]} : vector<16x256xf32> to vector<16x128xf32>
    %232 = vector.extract_strided_slice %13 {offsets = [18, 0, 0], sizes = [1, 32, 16], strides = [1, 1, 1]} : vector<25x32x16xf32> to vector<1x32x16xf32>
    %233 = vector.shape_cast %232 : vector<1x32x16xf32> to vector<32x16xf32>
    %cst_59 = arith.constant dense<0.000000e+00> : vector<32x128xf32>
    %234 = tpu.matmul %233, %231, %cst_59 {dimension_numbers = #tpu.dot_dimension_numbers<[1], [0], [0], [1], [0, 0, 1, 1], [], []>} : vector<32x16xf32>, vector<16x128xf32>, vector<32x128xf32> -> vector<32x128xf32>
    %235 = arith.addf %230, %234 : vector<32x128xf32>
    %236 = vector.extract_strided_slice %11 {offsets = [0, 8], sizes = [16, 128], strides = [1, 1]} : vector<16x256xf32> to vector<16x128xf32>
    %237 = vector.extract_strided_slice %13 {offsets = [19, 0, 0], sizes = [1, 32, 16], strides = [1, 1, 1]} : vector<25x32x16xf32> to vector<1x32x16xf32>
    %238 = vector.shape_cast %237 : vector<1x32x16xf32> to vector<32x16xf32>
    %cst_60 = arith.constant dense<0.000000e+00> : vector<32x128xf32>
    %239 = tpu.matmul %238, %236, %cst_60 {dimension_numbers = #tpu.dot_dimension_numbers<[1], [0], [0], [1], [0, 0, 1, 1], [], []>} : vector<32x16xf32>, vector<16x128xf32>, vector<32x128xf32> -> vector<32x128xf32>
    %240 = arith.addf %235, %239 : vector<32x128xf32>
    %241 = vector.extract_strided_slice %5 {offsets = [0, 12], sizes = [16, 128], strides = [1, 1]} : vector<16x256xf32> to vector<16x128xf32>
    %242 = vector.extract_strided_slice %13 {offsets = [20, 0, 0], sizes = [1, 32, 16], strides = [1, 1, 1]} : vector<25x32x16xf32> to vector<1x32x16xf32>
    %243 = vector.shape_cast %242 : vector<1x32x16xf32> to vector<32x16xf32>
    %cst_61 = arith.constant dense<0.000000e+00> : vector<32x128xf32>
    %244 = tpu.matmul %243, %241, %cst_61 {dimension_numbers = #tpu.dot_dimension_numbers<[1], [0], [0], [1], [0, 0, 1, 1], [], []>} : vector<32x16xf32>, vector<16x128xf32>, vector<32x128xf32> -> vector<32x128xf32>
    %245 = arith.addf %240, %244 : vector<32x128xf32>
    %246 = vector.extract_strided_slice %2 {offsets = [0, 13], sizes = [16, 128], strides = [1, 1]} : vector<16x256xf32> to vector<16x128xf32>
    %247 = vector.extract_strided_slice %13 {offsets = [21, 0, 0], sizes = [1, 32, 16], strides = [1, 1, 1]} : vector<25x32x16xf32> to vector<1x32x16xf32>
    %248 = vector.shape_cast %247 : vector<1x32x16xf32> to vector<32x16xf32>
    %cst_62 = arith.constant dense<0.000000e+00> : vector<32x128xf32>
    %249 = tpu.matmul %248, %246, %cst_62 {dimension_numbers = #tpu.dot_dimension_numbers<[1], [0], [0], [1], [0, 0, 1, 1], [], []>} : vector<32x16xf32>, vector<16x128xf32>, vector<32x128xf32> -> vector<32x128xf32>
    %250 = arith.addf %245, %249 : vector<32x128xf32>
    %251 = vector.extract_strided_slice %5 {offsets = [0, 13], sizes = [16, 128], strides = [1, 1]} : vector<16x256xf32> to vector<16x128xf32>
    %252 = vector.extract_strided_slice %13 {offsets = [22, 0, 0], sizes = [1, 32, 16], strides = [1, 1, 1]} : vector<25x32x16xf32> to vector<1x32x16xf32>
    %253 = vector.shape_cast %252 : vector<1x32x16xf32> to vector<32x16xf32>
    %cst_63 = arith.constant dense<0.000000e+00> : vector<32x128xf32>
    %254 = tpu.matmul %253, %251, %cst_63 {dimension_numbers = #tpu.dot_dimension_numbers<[1], [0], [0], [1], [0, 0, 1, 1], [], []>} : vector<32x16xf32>, vector<16x128xf32>, vector<32x128xf32> -> vector<32x128xf32>
    %255 = arith.addf %250, %254 : vector<32x128xf32>
    %256 = vector.extract_strided_slice %2 {offsets = [0, 14], sizes = [16, 128], strides = [1, 1]} : vector<16x256xf32> to vector<16x128xf32>
    %257 = vector.extract_strided_slice %13 {offsets = [23, 0, 0], sizes = [1, 32, 16], strides = [1, 1, 1]} : vector<25x32x16xf32> to vector<1x32x16xf32>
    %258 = vector.shape_cast %257 : vector<1x32x16xf32> to vector<32x16xf32>
    %cst_64 = arith.constant dense<0.000000e+00> : vector<32x128xf32>
    %259 = tpu.matmul %258, %256, %cst_64 {dimension_numbers = #tpu.dot_dimension_numbers<[1], [0], [0], [1], [0, 0, 1, 1], [], []>} : vector<32x16xf32>, vector<16x128xf32>, vector<32x128xf32> -> vector<32x128xf32>
    %260 = arith.addf %255, %259 : vector<32x128xf32>
    %261 = vector.extract_strided_slice %5 {offsets = [0, 14], sizes = [16, 128], strides = [1, 1]} : vector<16x256xf32> to vector<16x128xf32>
    %262 = vector.extract_strided_slice %13 {offsets = [24, 0, 0], sizes = [1, 32, 16], strides = [1, 1, 1]} : vector<25x32x16xf32> to vector<1x32x16xf32>
    %263 = vector.shape_cast %262 : vector<1x32x16xf32> to vector<32x16xf32>
    %cst_65 = arith.constant dense<0.000000e+00> : vector<32x128xf32>
    %264 = tpu.matmul %263, %261, %cst_65 {dimension_numbers = #tpu.dot_dimension_numbers<[1], [0], [0], [1], [0, 0, 1, 1], [], []>} : vector<32x16xf32>, vector<16x128xf32>, vector<32x128xf32> -> vector<32x128xf32>
    %265 = arith.addf %260, %264 : vector<32x128xf32>
    %266 = arith.maximumf %139, %265 : vector<32x128xf32>
    %cst_66 = arith.constant 0.000000e+00 : f32
    %267 = vector.broadcast %cst_66 : f32 to vector<32x128xf32>
    %268 = vector.extract_strided_slice %8 {offsets = [0, 0], sizes = [16, 128], strides = [1, 1]} : vector<16x256xf32> to vector<16x128xf32>
    %269 = vector.extract_strided_slice %13 {offsets = [0, 0, 0], sizes = [1, 32, 16], strides = [1, 1, 1]} : vector<25x32x16xf32> to vector<1x32x16xf32>
    %270 = vector.shape_cast %269 : vector<1x32x16xf32> to vector<32x16xf32>
    %cst_67 = arith.constant dense<0.000000e+00> : vector<32x128xf32>
    %271 = tpu.matmul %270, %268, %cst_67 {dimension_numbers = #tpu.dot_dimension_numbers<[1], [0], [0], [1], [0, 0, 1, 1], [], []>} : vector<32x16xf32>, vector<16x128xf32>, vector<32x128xf32> -> vector<32x128xf32>
    %272 = arith.addf %267, %271 : vector<32x128xf32>
    %273 = vector.extract_strided_slice %11 {offsets = [0, 0], sizes = [16, 128], strides = [1, 1]} : vector<16x256xf32> to vector<16x128xf32>
    %274 = vector.extract_strided_slice %13 {offsets = [1, 0, 0], sizes = [1, 32, 16], strides = [1, 1, 1]} : vector<25x32x16xf32> to vector<1x32x16xf32>
    %275 = vector.shape_cast %274 : vector<1x32x16xf32> to vector<32x16xf32>
    %cst_68 = arith.constant dense<0.000000e+00> : vector<32x128xf32>
    %276 = tpu.matmul %275, %273, %cst_68 {dimension_numbers = #tpu.dot_dimension_numbers<[1], [0], [0], [1], [0, 0, 1, 1], [], []>} : vector<32x16xf32>, vector<16x128xf32>, vector<32x128xf32> -> vector<32x128xf32>
    %277 = arith.addf %272, %276 : vector<32x128xf32>
    %278 = vector.extract_strided_slice %8 {offsets = [0, 1], sizes = [16, 128], strides = [1, 1]} : vector<16x256xf32> to vector<16x128xf32>
    %279 = vector.extract_strided_slice %13 {offsets = [2, 0, 0], sizes = [1, 32, 16], strides = [1, 1, 1]} : vector<25x32x16xf32> to vector<1x32x16xf32>
    %280 = vector.shape_cast %279 : vector<1x32x16xf32> to vector<32x16xf32>
    %cst_69 = arith.constant dense<0.000000e+00> : vector<32x128xf32>
    %281 = tpu.matmul %280, %278, %cst_69 {dimension_numbers = #tpu.dot_dimension_numbers<[1], [0], [0], [1], [0, 0, 1, 1], [], []>} : vector<32x16xf32>, vector<16x128xf32>, vector<32x128xf32> -> vector<32x128xf32>
    %282 = arith.addf %277, %281 : vector<32x128xf32>
    %283 = vector.extract_strided_slice %11 {offsets = [0, 1], sizes = [16, 128], strides = [1, 1]} : vector<16x256xf32> to vector<16x128xf32>
    %284 = vector.extract_strided_slice %13 {offsets = [3, 0, 0], sizes = [1, 32, 16], strides = [1, 1, 1]} : vector<25x32x16xf32> to vector<1x32x16xf32>
    %285 = vector.shape_cast %284 : vector<1x32x16xf32> to vector<32x16xf32>
    %cst_70 = arith.constant dense<0.000000e+00> : vector<32x128xf32>
    %286 = tpu.matmul %285, %283, %cst_70 {dimension_numbers = #tpu.dot_dimension_numbers<[1], [0], [0], [1], [0, 0, 1, 1], [], []>} : vector<32x16xf32>, vector<16x128xf32>, vector<32x128xf32> -> vector<32x128xf32>
    %287 = arith.addf %282, %286 : vector<32x128xf32>
    %288 = vector.extract_strided_slice %8 {offsets = [0, 2], sizes = [16, 128], strides = [1, 1]} : vector<16x256xf32> to vector<16x128xf32>
    %289 = vector.extract_strided_slice %13 {offsets = [4, 0, 0], sizes = [1, 32, 16], strides = [1, 1, 1]} : vector<25x32x16xf32> to vector<1x32x16xf32>
    %290 = vector.shape_cast %289 : vector<1x32x16xf32> to vector<32x16xf32>
    %cst_71 = arith.constant dense<0.000000e+00> : vector<32x128xf32>
    %291 = tpu.matmul %290, %288, %cst_71 {dimension_numbers = #tpu.dot_dimension_numbers<[1], [0], [0], [1], [0, 0, 1, 1], [], []>} : vector<32x16xf32>, vector<16x128xf32>, vector<32x128xf32> -> vector<32x128xf32>
    %292 = arith.addf %287, %291 : vector<32x128xf32>
    %293 = vector.extract_strided_slice %2 {offsets = [0, 6], sizes = [16, 128], strides = [1, 1]} : vector<16x256xf32> to vector<16x128xf32>
    %294 = vector.extract_strided_slice %13 {offsets = [5, 0, 0], sizes = [1, 32, 16], strides = [1, 1, 1]} : vector<25x32x16xf32> to vector<1x32x16xf32>
    %295 = vector.shape_cast %294 : vector<1x32x16xf32> to vector<32x16xf32>
    %cst_72 = arith.constant dense<0.000000e+00> : vector<32x128xf32>
    %296 = tpu.matmul %295, %293, %cst_72 {dimension_numbers = #tpu.dot_dimension_numbers<[1], [0], [0], [1], [0, 0, 1, 1], [], []>} : vector<32x16xf32>, vector<16x128xf32>, vector<32x128xf32> -> vector<32x128xf32>
    %297 = arith.addf %292, %296 : vector<32x128xf32>
    %298 = vector.extract_strided_slice %5 {offsets = [0, 6], sizes = [16, 128], strides = [1, 1]} : vector<16x256xf32> to vector<16x128xf32>
    %299 = vector.extract_strided_slice %13 {offsets = [6, 0, 0], sizes = [1, 32, 16], strides = [1, 1, 1]} : vector<25x32x16xf32> to vector<1x32x16xf32>
    %300 = vector.shape_cast %299 : vector<1x32x16xf32> to vector<32x16xf32>
    %cst_73 = arith.constant dense<0.000000e+00> : vector<32x128xf32>
    %301 = tpu.matmul %300, %298, %cst_73 {dimension_numbers = #tpu.dot_dimension_numbers<[1], [0], [0], [1], [0, 0, 1, 1], [], []>} : vector<32x16xf32>, vector<16x128xf32>, vector<32x128xf32> -> vector<32x128xf32>
    %302 = arith.addf %297, %301 : vector<32x128xf32>
    %303 = vector.extract_strided_slice %2 {offsets = [0, 7], sizes = [16, 128], strides = [1, 1]} : vector<16x256xf32> to vector<16x128xf32>
    %304 = vector.extract_strided_slice %13 {offsets = [7, 0, 0], sizes = [1, 32, 16], strides = [1, 1, 1]} : vector<25x32x16xf32> to vector<1x32x16xf32>
    %305 = vector.shape_cast %304 : vector<1x32x16xf32> to vector<32x16xf32>
    %cst_74 = arith.constant dense<0.000000e+00> : vector<32x128xf32>
    %306 = tpu.matmul %305, %303, %cst_74 {dimension_numbers = #tpu.dot_dimension_numbers<[1], [0], [0], [1], [0, 0, 1, 1], [], []>} : vector<32x16xf32>, vector<16x128xf32>, vector<32x128xf32> -> vector<32x128xf32>
    %307 = arith.addf %302, %306 : vector<32x128xf32>
    %308 = vector.extract_strided_slice %5 {offsets = [0, 7], sizes = [16, 128], strides = [1, 1]} : vector<16x256xf32> to vector<16x128xf32>
    %309 = vector.extract_strided_slice %13 {offsets = [8, 0, 0], sizes = [1, 32, 16], strides = [1, 1, 1]} : vector<25x32x16xf32> to vector<1x32x16xf32>
    %310 = vector.shape_cast %309 : vector<1x32x16xf32> to vector<32x16xf32>
    %cst_75 = arith.constant dense<0.000000e+00> : vector<32x128xf32>
    %311 = tpu.matmul %310, %308, %cst_75 {dimension_numbers = #tpu.dot_dimension_numbers<[1], [0], [0], [1], [0, 0, 1, 1], [], []>} : vector<32x16xf32>, vector<16x128xf32>, vector<32x128xf32> -> vector<32x128xf32>
    %312 = arith.addf %307, %311 : vector<32x128xf32>
    %313 = vector.extract_strided_slice %2 {offsets = [0, 8], sizes = [16, 128], strides = [1, 1]} : vector<16x256xf32> to vector<16x128xf32>
    %314 = vector.extract_strided_slice %13 {offsets = [9, 0, 0], sizes = [1, 32, 16], strides = [1, 1, 1]} : vector<25x32x16xf32> to vector<1x32x16xf32>
    %315 = vector.shape_cast %314 : vector<1x32x16xf32> to vector<32x16xf32>
    %cst_76 = arith.constant dense<0.000000e+00> : vector<32x128xf32>
    %316 = tpu.matmul %315, %313, %cst_76 {dimension_numbers = #tpu.dot_dimension_numbers<[1], [0], [0], [1], [0, 0, 1, 1], [], []>} : vector<32x16xf32>, vector<16x128xf32>, vector<32x128xf32> -> vector<32x128xf32>
    %317 = arith.addf %312, %316 : vector<32x128xf32>
    %318 = vector.extract_strided_slice %8 {offsets = [0, 6], sizes = [16, 128], strides = [1, 1]} : vector<16x256xf32> to vector<16x128xf32>
    %319 = vector.extract_strided_slice %13 {offsets = [10, 0, 0], sizes = [1, 32, 16], strides = [1, 1, 1]} : vector<25x32x16xf32> to vector<1x32x16xf32>
    %320 = vector.shape_cast %319 : vector<1x32x16xf32> to vector<32x16xf32>
    %cst_77 = arith.constant dense<0.000000e+00> : vector<32x128xf32>
    %321 = tpu.matmul %320, %318, %cst_77 {dimension_numbers = #tpu.dot_dimension_numbers<[1], [0], [0], [1], [0, 0, 1, 1], [], []>} : vector<32x16xf32>, vector<16x128xf32>, vector<32x128xf32> -> vector<32x128xf32>
    %322 = arith.addf %317, %321 : vector<32x128xf32>
    %323 = vector.extract_strided_slice %11 {offsets = [0, 6], sizes = [16, 128], strides = [1, 1]} : vector<16x256xf32> to vector<16x128xf32>
    %324 = vector.extract_strided_slice %13 {offsets = [11, 0, 0], sizes = [1, 32, 16], strides = [1, 1, 1]} : vector<25x32x16xf32> to vector<1x32x16xf32>
    %325 = vector.shape_cast %324 : vector<1x32x16xf32> to vector<32x16xf32>
    %cst_78 = arith.constant dense<0.000000e+00> : vector<32x128xf32>
    %326 = tpu.matmul %325, %323, %cst_78 {dimension_numbers = #tpu.dot_dimension_numbers<[1], [0], [0], [1], [0, 0, 1, 1], [], []>} : vector<32x16xf32>, vector<16x128xf32>, vector<32x128xf32> -> vector<32x128xf32>
    %327 = arith.addf %322, %326 : vector<32x128xf32>
    %328 = vector.extract_strided_slice %8 {offsets = [0, 7], sizes = [16, 128], strides = [1, 1]} : vector<16x256xf32> to vector<16x128xf32>
    %329 = vector.extract_strided_slice %13 {offsets = [12, 0, 0], sizes = [1, 32, 16], strides = [1, 1, 1]} : vector<25x32x16xf32> to vector<1x32x16xf32>
    %330 = vector.shape_cast %329 : vector<1x32x16xf32> to vector<32x16xf32>
    %cst_79 = arith.constant dense<0.000000e+00> : vector<32x128xf32>
    %331 = tpu.matmul %330, %328, %cst_79 {dimension_numbers = #tpu.dot_dimension_numbers<[1], [0], [0], [1], [0, 0, 1, 1], [], []>} : vector<32x16xf32>, vector<16x128xf32>, vector<32x128xf32> -> vector<32x128xf32>
    %332 = arith.addf %327, %331 : vector<32x128xf32>
    %333 = vector.extract_strided_slice %11 {offsets = [0, 7], sizes = [16, 128], strides = [1, 1]} : vector<16x256xf32> to vector<16x128xf32>
    %334 = vector.extract_strided_slice %13 {offsets = [13, 0, 0], sizes = [1, 32, 16], strides = [1, 1, 1]} : vector<25x32x16xf32> to vector<1x32x16xf32>
    %335 = vector.shape_cast %334 : vector<1x32x16xf32> to vector<32x16xf32>
    %cst_80 = arith.constant dense<0.000000e+00> : vector<32x128xf32>
    %336 = tpu.matmul %335, %333, %cst_80 {dimension_numbers = #tpu.dot_dimension_numbers<[1], [0], [0], [1], [0, 0, 1, 1], [], []>} : vector<32x16xf32>, vector<16x128xf32>, vector<32x128xf32> -> vector<32x128xf32>
    %337 = arith.addf %332, %336 : vector<32x128xf32>
    %338 = vector.extract_strided_slice %8 {offsets = [0, 8], sizes = [16, 128], strides = [1, 1]} : vector<16x256xf32> to vector<16x128xf32>
    %339 = vector.extract_strided_slice %13 {offsets = [14, 0, 0], sizes = [1, 32, 16], strides = [1, 1, 1]} : vector<25x32x16xf32> to vector<1x32x16xf32>
    %340 = vector.shape_cast %339 : vector<1x32x16xf32> to vector<32x16xf32>
    %cst_81 = arith.constant dense<0.000000e+00> : vector<32x128xf32>
    %341 = tpu.matmul %340, %338, %cst_81 {dimension_numbers = #tpu.dot_dimension_numbers<[1], [0], [0], [1], [0, 0, 1, 1], [], []>} : vector<32x16xf32>, vector<16x128xf32>, vector<32x128xf32> -> vector<32x128xf32>
    %342 = arith.addf %337, %341 : vector<32x128xf32>
    %343 = vector.extract_strided_slice %2 {offsets = [0, 12], sizes = [16, 128], strides = [1, 1]} : vector<16x256xf32> to vector<16x128xf32>
    %344 = vector.extract_strided_slice %13 {offsets = [15, 0, 0], sizes = [1, 32, 16], strides = [1, 1, 1]} : vector<25x32x16xf32> to vector<1x32x16xf32>
    %345 = vector.shape_cast %344 : vector<1x32x16xf32> to vector<32x16xf32>
    %cst_82 = arith.constant dense<0.000000e+00> : vector<32x128xf32>
    %346 = tpu.matmul %345, %343, %cst_82 {dimension_numbers = #tpu.dot_dimension_numbers<[1], [0], [0], [1], [0, 0, 1, 1], [], []>} : vector<32x16xf32>, vector<16x128xf32>, vector<32x128xf32> -> vector<32x128xf32>
    %347 = arith.addf %342, %346 : vector<32x128xf32>
    %348 = vector.extract_strided_slice %5 {offsets = [0, 12], sizes = [16, 128], strides = [1, 1]} : vector<16x256xf32> to vector<16x128xf32>
    %349 = vector.extract_strided_slice %13 {offsets = [16, 0, 0], sizes = [1, 32, 16], strides = [1, 1, 1]} : vector<25x32x16xf32> to vector<1x32x16xf32>
    %350 = vector.shape_cast %349 : vector<1x32x16xf32> to vector<32x16xf32>
    %cst_83 = arith.constant dense<0.000000e+00> : vector<32x128xf32>
    %351 = tpu.matmul %350, %348, %cst_83 {dimension_numbers = #tpu.dot_dimension_numbers<[1], [0], [0], [1], [0, 0, 1, 1], [], []>} : vector<32x16xf32>, vector<16x128xf32>, vector<32x128xf32> -> vector<32x128xf32>
    %352 = arith.addf %347, %351 : vector<32x128xf32>
    %353 = vector.extract_strided_slice %2 {offsets = [0, 13], sizes = [16, 128], strides = [1, 1]} : vector<16x256xf32> to vector<16x128xf32>
    %354 = vector.extract_strided_slice %13 {offsets = [17, 0, 0], sizes = [1, 32, 16], strides = [1, 1, 1]} : vector<25x32x16xf32> to vector<1x32x16xf32>
    %355 = vector.shape_cast %354 : vector<1x32x16xf32> to vector<32x16xf32>
    %cst_84 = arith.constant dense<0.000000e+00> : vector<32x128xf32>
    %356 = tpu.matmul %355, %353, %cst_84 {dimension_numbers = #tpu.dot_dimension_numbers<[1], [0], [0], [1], [0, 0, 1, 1], [], []>} : vector<32x16xf32>, vector<16x128xf32>, vector<32x128xf32> -> vector<32x128xf32>
    %357 = arith.addf %352, %356 : vector<32x128xf32>
    %358 = vector.extract_strided_slice %5 {offsets = [0, 13], sizes = [16, 128], strides = [1, 1]} : vector<16x256xf32> to vector<16x128xf32>
    %359 = vector.extract_strided_slice %13 {offsets = [18, 0, 0], sizes = [1, 32, 16], strides = [1, 1, 1]} : vector<25x32x16xf32> to vector<1x32x16xf32>
    %360 = vector.shape_cast %359 : vector<1x32x16xf32> to vector<32x16xf32>
    %cst_85 = arith.constant dense<0.000000e+00> : vector<32x128xf32>
    %361 = tpu.matmul %360, %358, %cst_85 {dimension_numbers = #tpu.dot_dimension_numbers<[1], [0], [0], [1], [0, 0, 1, 1], [], []>} : vector<32x16xf32>, vector<16x128xf32>, vector<32x128xf32> -> vector<32x128xf32>
    %362 = arith.addf %357, %361 : vector<32x128xf32>
    %363 = vector.extract_strided_slice %2 {offsets = [0, 14], sizes = [16, 128], strides = [1, 1]} : vector<16x256xf32> to vector<16x128xf32>
    %364 = vector.extract_strided_slice %13 {offsets = [19, 0, 0], sizes = [1, 32, 16], strides = [1, 1, 1]} : vector<25x32x16xf32> to vector<1x32x16xf32>
    %365 = vector.shape_cast %364 : vector<1x32x16xf32> to vector<32x16xf32>
    %cst_86 = arith.constant dense<0.000000e+00> : vector<32x128xf32>
    %366 = tpu.matmul %365, %363, %cst_86 {dimension_numbers = #tpu.dot_dimension_numbers<[1], [0], [0], [1], [0, 0, 1, 1], [], []>} : vector<32x16xf32>, vector<16x128xf32>, vector<32x128xf32> -> vector<32x128xf32>
    %367 = arith.addf %362, %366 : vector<32x128xf32>
    %368 = vector.extract_strided_slice %8 {offsets = [0, 12], sizes = [16, 128], strides = [1, 1]} : vector<16x256xf32> to vector<16x128xf32>
    %369 = vector.extract_strided_slice %13 {offsets = [20, 0, 0], sizes = [1, 32, 16], strides = [1, 1, 1]} : vector<25x32x16xf32> to vector<1x32x16xf32>
    %370 = vector.shape_cast %369 : vector<1x32x16xf32> to vector<32x16xf32>
    %cst_87 = arith.constant dense<0.000000e+00> : vector<32x128xf32>
    %371 = tpu.matmul %370, %368, %cst_87 {dimension_numbers = #tpu.dot_dimension_numbers<[1], [0], [0], [1], [0, 0, 1, 1], [], []>} : vector<32x16xf32>, vector<16x128xf32>, vector<32x128xf32> -> vector<32x128xf32>
    %372 = arith.addf %367, %371 : vector<32x128xf32>
    %373 = vector.extract_strided_slice %11 {offsets = [0, 12], sizes = [16, 128], strides = [1, 1]} : vector<16x256xf32> to vector<16x128xf32>
    %374 = vector.extract_strided_slice %13 {offsets = [21, 0, 0], sizes = [1, 32, 16], strides = [1, 1, 1]} : vector<25x32x16xf32> to vector<1x32x16xf32>
    %375 = vector.shape_cast %374 : vector<1x32x16xf32> to vector<32x16xf32>
    %cst_88 = arith.constant dense<0.000000e+00> : vector<32x128xf32>
    %376 = tpu.matmul %375, %373, %cst_88 {dimension_numbers = #tpu.dot_dimension_numbers<[1], [0], [0], [1], [0, 0, 1, 1], [], []>} : vector<32x16xf32>, vector<16x128xf32>, vector<32x128xf32> -> vector<32x128xf32>
    %377 = arith.addf %372, %376 : vector<32x128xf32>
    %378 = vector.extract_strided_slice %8 {offsets = [0, 13], sizes = [16, 128], strides = [1, 1]} : vector<16x256xf32> to vector<16x128xf32>
    %379 = vector.extract_strided_slice %13 {offsets = [22, 0, 0], sizes = [1, 32, 16], strides = [1, 1, 1]} : vector<25x32x16xf32> to vector<1x32x16xf32>
    %380 = vector.shape_cast %379 : vector<1x32x16xf32> to vector<32x16xf32>
    %cst_89 = arith.constant dense<0.000000e+00> : vector<32x128xf32>
    %381 = tpu.matmul %380, %378, %cst_89 {dimension_numbers = #tpu.dot_dimension_numbers<[1], [0], [0], [1], [0, 0, 1, 1], [], []>} : vector<32x16xf32>, vector<16x128xf32>, vector<32x128xf32> -> vector<32x128xf32>
    %382 = arith.addf %377, %381 : vector<32x128xf32>
    %383 = vector.extract_strided_slice %11 {offsets = [0, 13], sizes = [16, 128], strides = [1, 1]} : vector<16x256xf32> to vector<16x128xf32>
    %384 = vector.extract_strided_slice %13 {offsets = [23, 0, 0], sizes = [1, 32, 16], strides = [1, 1, 1]} : vector<25x32x16xf32> to vector<1x32x16xf32>
    %385 = vector.shape_cast %384 : vector<1x32x16xf32> to vector<32x16xf32>
    %cst_90 = arith.constant dense<0.000000e+00> : vector<32x128xf32>
    %386 = tpu.matmul %385, %383, %cst_90 {dimension_numbers = #tpu.dot_dimension_numbers<[1], [0], [0], [1], [0, 0, 1, 1], [], []>} : vector<32x16xf32>, vector<16x128xf32>, vector<32x128xf32> -> vector<32x128xf32>
    %387 = arith.addf %382, %386 : vector<32x128xf32>
    %388 = vector.extract_strided_slice %8 {offsets = [0, 14], sizes = [16, 128], strides = [1, 1]} : vector<16x256xf32> to vector<16x128xf32>
    %389 = vector.extract_strided_slice %13 {offsets = [24, 0, 0], sizes = [1, 32, 16], strides = [1, 1, 1]} : vector<25x32x16xf32> to vector<1x32x16xf32>
    %390 = vector.shape_cast %389 : vector<1x32x16xf32> to vector<32x16xf32>
    %cst_91 = arith.constant dense<0.000000e+00> : vector<32x128xf32>
    %391 = tpu.matmul %390, %388, %cst_91 {dimension_numbers = #tpu.dot_dimension_numbers<[1], [0], [0], [1], [0, 0, 1, 1], [], []>} : vector<32x16xf32>, vector<16x128xf32>, vector<32x128xf32> -> vector<32x128xf32>
    %392 = arith.addf %387, %391 : vector<32x128xf32>
    %393 = arith.maximumf %266, %392 : vector<32x128xf32>
    %cst_92 = arith.constant 0.000000e+00 : f32
    %394 = vector.broadcast %cst_92 : f32 to vector<32x128xf32>
    %395 = vector.extract_strided_slice %11 {offsets = [0, 0], sizes = [16, 128], strides = [1, 1]} : vector<16x256xf32> to vector<16x128xf32>
    %396 = vector.extract_strided_slice %13 {offsets = [0, 0, 0], sizes = [1, 32, 16], strides = [1, 1, 1]} : vector<25x32x16xf32> to vector<1x32x16xf32>
    %397 = vector.shape_cast %396 : vector<1x32x16xf32> to vector<32x16xf32>
    %cst_93 = arith.constant dense<0.000000e+00> : vector<32x128xf32>
    %398 = tpu.matmul %397, %395, %cst_93 {dimension_numbers = #tpu.dot_dimension_numbers<[1], [0], [0], [1], [0, 0, 1, 1], [], []>} : vector<32x16xf32>, vector<16x128xf32>, vector<32x128xf32> -> vector<32x128xf32>
    %399 = arith.addf %394, %398 : vector<32x128xf32>
    %400 = vector.extract_strided_slice %8 {offsets = [0, 1], sizes = [16, 128], strides = [1, 1]} : vector<16x256xf32> to vector<16x128xf32>
    %401 = vector.extract_strided_slice %13 {offsets = [1, 0, 0], sizes = [1, 32, 16], strides = [1, 1, 1]} : vector<25x32x16xf32> to vector<1x32x16xf32>
    %402 = vector.shape_cast %401 : vector<1x32x16xf32> to vector<32x16xf32>
    %cst_94 = arith.constant dense<0.000000e+00> : vector<32x128xf32>
    %403 = tpu.matmul %402, %400, %cst_94 {dimension_numbers = #tpu.dot_dimension_numbers<[1], [0], [0], [1], [0, 0, 1, 1], [], []>} : vector<32x16xf32>, vector<16x128xf32>, vector<32x128xf32> -> vector<32x128xf32>
    %404 = arith.addf %399, %403 : vector<32x128xf32>
    %405 = vector.extract_strided_slice %11 {offsets = [0, 1], sizes = [16, 128], strides = [1, 1]} : vector<16x256xf32> to vector<16x128xf32>
    %406 = vector.extract_strided_slice %13 {offsets = [2, 0, 0], sizes = [1, 32, 16], strides = [1, 1, 1]} : vector<25x32x16xf32> to vector<1x32x16xf32>
    %407 = vector.shape_cast %406 : vector<1x32x16xf32> to vector<32x16xf32>
    %cst_95 = arith.constant dense<0.000000e+00> : vector<32x128xf32>
    %408 = tpu.matmul %407, %405, %cst_95 {dimension_numbers = #tpu.dot_dimension_numbers<[1], [0], [0], [1], [0, 0, 1, 1], [], []>} : vector<32x16xf32>, vector<16x128xf32>, vector<32x128xf32> -> vector<32x128xf32>
    %409 = arith.addf %404, %408 : vector<32x128xf32>
    %410 = vector.extract_strided_slice %8 {offsets = [0, 2], sizes = [16, 128], strides = [1, 1]} : vector<16x256xf32> to vector<16x128xf32>
    %411 = vector.extract_strided_slice %13 {offsets = [3, 0, 0], sizes = [1, 32, 16], strides = [1, 1, 1]} : vector<25x32x16xf32> to vector<1x32x16xf32>
    %412 = vector.shape_cast %411 : vector<1x32x16xf32> to vector<32x16xf32>
    %cst_96 = arith.constant dense<0.000000e+00> : vector<32x128xf32>
    %413 = tpu.matmul %412, %410, %cst_96 {dimension_numbers = #tpu.dot_dimension_numbers<[1], [0], [0], [1], [0, 0, 1, 1], [], []>} : vector<32x16xf32>, vector<16x128xf32>, vector<32x128xf32> -> vector<32x128xf32>
    %414 = arith.addf %409, %413 : vector<32x128xf32>
    %415 = vector.extract_strided_slice %11 {offsets = [0, 2], sizes = [16, 128], strides = [1, 1]} : vector<16x256xf32> to vector<16x128xf32>
    %416 = vector.extract_strided_slice %13 {offsets = [4, 0, 0], sizes = [1, 32, 16], strides = [1, 1, 1]} : vector<25x32x16xf32> to vector<1x32x16xf32>
    %417 = vector.shape_cast %416 : vector<1x32x16xf32> to vector<32x16xf32>
    %cst_97 = arith.constant dense<0.000000e+00> : vector<32x128xf32>
    %418 = tpu.matmul %417, %415, %cst_97 {dimension_numbers = #tpu.dot_dimension_numbers<[1], [0], [0], [1], [0, 0, 1, 1], [], []>} : vector<32x16xf32>, vector<16x128xf32>, vector<32x128xf32> -> vector<32x128xf32>
    %419 = arith.addf %414, %418 : vector<32x128xf32>
    %420 = vector.extract_strided_slice %5 {offsets = [0, 6], sizes = [16, 128], strides = [1, 1]} : vector<16x256xf32> to vector<16x128xf32>
    %421 = vector.extract_strided_slice %13 {offsets = [5, 0, 0], sizes = [1, 32, 16], strides = [1, 1, 1]} : vector<25x32x16xf32> to vector<1x32x16xf32>
    %422 = vector.shape_cast %421 : vector<1x32x16xf32> to vector<32x16xf32>
    %cst_98 = arith.constant dense<0.000000e+00> : vector<32x128xf32>
    %423 = tpu.matmul %422, %420, %cst_98 {dimension_numbers = #tpu.dot_dimension_numbers<[1], [0], [0], [1], [0, 0, 1, 1], [], []>} : vector<32x16xf32>, vector<16x128xf32>, vector<32x128xf32> -> vector<32x128xf32>
    %424 = arith.addf %419, %423 : vector<32x128xf32>
    %425 = vector.extract_strided_slice %2 {offsets = [0, 7], sizes = [16, 128], strides = [1, 1]} : vector<16x256xf32> to vector<16x128xf32>
    %426 = vector.extract_strided_slice %13 {offsets = [6, 0, 0], sizes = [1, 32, 16], strides = [1, 1, 1]} : vector<25x32x16xf32> to vector<1x32x16xf32>
    %427 = vector.shape_cast %426 : vector<1x32x16xf32> to vector<32x16xf32>
    %cst_99 = arith.constant dense<0.000000e+00> : vector<32x128xf32>
    %428 = tpu.matmul %427, %425, %cst_99 {dimension_numbers = #tpu.dot_dimension_numbers<[1], [0], [0], [1], [0, 0, 1, 1], [], []>} : vector<32x16xf32>, vector<16x128xf32>, vector<32x128xf32> -> vector<32x128xf32>
    %429 = arith.addf %424, %428 : vector<32x128xf32>
    %430 = vector.extract_strided_slice %5 {offsets = [0, 7], sizes = [16, 128], strides = [1, 1]} : vector<16x256xf32> to vector<16x128xf32>
    %431 = vector.extract_strided_slice %13 {offsets = [7, 0, 0], sizes = [1, 32, 16], strides = [1, 1, 1]} : vector<25x32x16xf32> to vector<1x32x16xf32>
    %432 = vector.shape_cast %431 : vector<1x32x16xf32> to vector<32x16xf32>
    %cst_100 = arith.constant dense<0.000000e+00> : vector<32x128xf32>
    %433 = tpu.matmul %432, %430, %cst_100 {dimension_numbers = #tpu.dot_dimension_numbers<[1], [0], [0], [1], [0, 0, 1, 1], [], []>} : vector<32x16xf32>, vector<16x128xf32>, vector<32x128xf32> -> vector<32x128xf32>
    %434 = arith.addf %429, %433 : vector<32x128xf32>
    %435 = vector.extract_strided_slice %2 {offsets = [0, 8], sizes = [16, 128], strides = [1, 1]} : vector<16x256xf32> to vector<16x128xf32>
    %436 = vector.extract_strided_slice %13 {offsets = [8, 0, 0], sizes = [1, 32, 16], strides = [1, 1, 1]} : vector<25x32x16xf32> to vector<1x32x16xf32>
    %437 = vector.shape_cast %436 : vector<1x32x16xf32> to vector<32x16xf32>
    %cst_101 = arith.constant dense<0.000000e+00> : vector<32x128xf32>
    %438 = tpu.matmul %437, %435, %cst_101 {dimension_numbers = #tpu.dot_dimension_numbers<[1], [0], [0], [1], [0, 0, 1, 1], [], []>} : vector<32x16xf32>, vector<16x128xf32>, vector<32x128xf32> -> vector<32x128xf32>
    %439 = arith.addf %434, %438 : vector<32x128xf32>
    %440 = vector.extract_strided_slice %5 {offsets = [0, 8], sizes = [16, 128], strides = [1, 1]} : vector<16x256xf32> to vector<16x128xf32>
    %441 = vector.extract_strided_slice %13 {offsets = [9, 0, 0], sizes = [1, 32, 16], strides = [1, 1, 1]} : vector<25x32x16xf32> to vector<1x32x16xf32>
    %442 = vector.shape_cast %441 : vector<1x32x16xf32> to vector<32x16xf32>
    %cst_102 = arith.constant dense<0.000000e+00> : vector<32x128xf32>
    %443 = tpu.matmul %442, %440, %cst_102 {dimension_numbers = #tpu.dot_dimension_numbers<[1], [0], [0], [1], [0, 0, 1, 1], [], []>} : vector<32x16xf32>, vector<16x128xf32>, vector<32x128xf32> -> vector<32x128xf32>
    %444 = arith.addf %439, %443 : vector<32x128xf32>
    %445 = vector.extract_strided_slice %11 {offsets = [0, 6], sizes = [16, 128], strides = [1, 1]} : vector<16x256xf32> to vector<16x128xf32>
    %446 = vector.extract_strided_slice %13 {offsets = [10, 0, 0], sizes = [1, 32, 16], strides = [1, 1, 1]} : vector<25x32x16xf32> to vector<1x32x16xf32>
    %447 = vector.shape_cast %446 : vector<1x32x16xf32> to vector<32x16xf32>
    %cst_103 = arith.constant dense<0.000000e+00> : vector<32x128xf32>
    %448 = tpu.matmul %447, %445, %cst_103 {dimension_numbers = #tpu.dot_dimension_numbers<[1], [0], [0], [1], [0, 0, 1, 1], [], []>} : vector<32x16xf32>, vector<16x128xf32>, vector<32x128xf32> -> vector<32x128xf32>
    %449 = arith.addf %444, %448 : vector<32x128xf32>
    %450 = vector.extract_strided_slice %8 {offsets = [0, 7], sizes = [16, 128], strides = [1, 1]} : vector<16x256xf32> to vector<16x128xf32>
    %451 = vector.extract_strided_slice %13 {offsets = [11, 0, 0], sizes = [1, 32, 16], strides = [1, 1, 1]} : vector<25x32x16xf32> to vector<1x32x16xf32>
    %452 = vector.shape_cast %451 : vector<1x32x16xf32> to vector<32x16xf32>
    %cst_104 = arith.constant dense<0.000000e+00> : vector<32x128xf32>
    %453 = tpu.matmul %452, %450, %cst_104 {dimension_numbers = #tpu.dot_dimension_numbers<[1], [0], [0], [1], [0, 0, 1, 1], [], []>} : vector<32x16xf32>, vector<16x128xf32>, vector<32x128xf32> -> vector<32x128xf32>
    %454 = arith.addf %449, %453 : vector<32x128xf32>
    %455 = vector.extract_strided_slice %11 {offsets = [0, 7], sizes = [16, 128], strides = [1, 1]} : vector<16x256xf32> to vector<16x128xf32>
    %456 = vector.extract_strided_slice %13 {offsets = [12, 0, 0], sizes = [1, 32, 16], strides = [1, 1, 1]} : vector<25x32x16xf32> to vector<1x32x16xf32>
    %457 = vector.shape_cast %456 : vector<1x32x16xf32> to vector<32x16xf32>
    %cst_105 = arith.constant dense<0.000000e+00> : vector<32x128xf32>
    %458 = tpu.matmul %457, %455, %cst_105 {dimension_numbers = #tpu.dot_dimension_numbers<[1], [0], [0], [1], [0, 0, 1, 1], [], []>} : vector<32x16xf32>, vector<16x128xf32>, vector<32x128xf32> -> vector<32x128xf32>
    %459 = arith.addf %454, %458 : vector<32x128xf32>
    %460 = vector.extract_strided_slice %8 {offsets = [0, 8], sizes = [16, 128], strides = [1, 1]} : vector<16x256xf32> to vector<16x128xf32>
    %461 = vector.extract_strided_slice %13 {offsets = [13, 0, 0], sizes = [1, 32, 16], strides = [1, 1, 1]} : vector<25x32x16xf32> to vector<1x32x16xf32>
    %462 = vector.shape_cast %461 : vector<1x32x16xf32> to vector<32x16xf32>
    %cst_106 = arith.constant dense<0.000000e+00> : vector<32x128xf32>
    %463 = tpu.matmul %462, %460, %cst_106 {dimension_numbers = #tpu.dot_dimension_numbers<[1], [0], [0], [1], [0, 0, 1, 1], [], []>} : vector<32x16xf32>, vector<16x128xf32>, vector<32x128xf32> -> vector<32x128xf32>
    %464 = arith.addf %459, %463 : vector<32x128xf32>
    %465 = vector.extract_strided_slice %11 {offsets = [0, 8], sizes = [16, 128], strides = [1, 1]} : vector<16x256xf32> to vector<16x128xf32>
    %466 = vector.extract_strided_slice %13 {offsets = [14, 0, 0], sizes = [1, 32, 16], strides = [1, 1, 1]} : vector<25x32x16xf32> to vector<1x32x16xf32>
    %467 = vector.shape_cast %466 : vector<1x32x16xf32> to vector<32x16xf32>
    %cst_107 = arith.constant dense<0.000000e+00> : vector<32x128xf32>
    %468 = tpu.matmul %467, %465, %cst_107 {dimension_numbers = #tpu.dot_dimension_numbers<[1], [0], [0], [1], [0, 0, 1, 1], [], []>} : vector<32x16xf32>, vector<16x128xf32>, vector<32x128xf32> -> vector<32x128xf32>
    %469 = arith.addf %464, %468 : vector<32x128xf32>
    %470 = vector.extract_strided_slice %5 {offsets = [0, 12], sizes = [16, 128], strides = [1, 1]} : vector<16x256xf32> to vector<16x128xf32>
    %471 = vector.extract_strided_slice %13 {offsets = [15, 0, 0], sizes = [1, 32, 16], strides = [1, 1, 1]} : vector<25x32x16xf32> to vector<1x32x16xf32>
    %472 = vector.shape_cast %471 : vector<1x32x16xf32> to vector<32x16xf32>
    %cst_108 = arith.constant dense<0.000000e+00> : vector<32x128xf32>
    %473 = tpu.matmul %472, %470, %cst_108 {dimension_numbers = #tpu.dot_dimension_numbers<[1], [0], [0], [1], [0, 0, 1, 1], [], []>} : vector<32x16xf32>, vector<16x128xf32>, vector<32x128xf32> -> vector<32x128xf32>
    %474 = arith.addf %469, %473 : vector<32x128xf32>
    %475 = vector.extract_strided_slice %2 {offsets = [0, 13], sizes = [16, 128], strides = [1, 1]} : vector<16x256xf32> to vector<16x128xf32>
    %476 = vector.extract_strided_slice %13 {offsets = [16, 0, 0], sizes = [1, 32, 16], strides = [1, 1, 1]} : vector<25x32x16xf32> to vector<1x32x16xf32>
    %477 = vector.shape_cast %476 : vector<1x32x16xf32> to vector<32x16xf32>
    %cst_109 = arith.constant dense<0.000000e+00> : vector<32x128xf32>
    %478 = tpu.matmul %477, %475, %cst_109 {dimension_numbers = #tpu.dot_dimension_numbers<[1], [0], [0], [1], [0, 0, 1, 1], [], []>} : vector<32x16xf32>, vector<16x128xf32>, vector<32x128xf32> -> vector<32x128xf32>
    %479 = arith.addf %474, %478 : vector<32x128xf32>
    %480 = vector.extract_strided_slice %5 {offsets = [0, 13], sizes = [16, 128], strides = [1, 1]} : vector<16x256xf32> to vector<16x128xf32>
    %481 = vector.extract_strided_slice %13 {offsets = [17, 0, 0], sizes = [1, 32, 16], strides = [1, 1, 1]} : vector<25x32x16xf32> to vector<1x32x16xf32>
    %482 = vector.shape_cast %481 : vector<1x32x16xf32> to vector<32x16xf32>
    %cst_110 = arith.constant dense<0.000000e+00> : vector<32x128xf32>
    %483 = tpu.matmul %482, %480, %cst_110 {dimension_numbers = #tpu.dot_dimension_numbers<[1], [0], [0], [1], [0, 0, 1, 1], [], []>} : vector<32x16xf32>, vector<16x128xf32>, vector<32x128xf32> -> vector<32x128xf32>
    %484 = arith.addf %479, %483 : vector<32x128xf32>
    %485 = vector.extract_strided_slice %2 {offsets = [0, 14], sizes = [16, 128], strides = [1, 1]} : vector<16x256xf32> to vector<16x128xf32>
    %486 = vector.extract_strided_slice %13 {offsets = [18, 0, 0], sizes = [1, 32, 16], strides = [1, 1, 1]} : vector<25x32x16xf32> to vector<1x32x16xf32>
    %487 = vector.shape_cast %486 : vector<1x32x16xf32> to vector<32x16xf32>
    %cst_111 = arith.constant dense<0.000000e+00> : vector<32x128xf32>
    %488 = tpu.matmul %487, %485, %cst_111 {dimension_numbers = #tpu.dot_dimension_numbers<[1], [0], [0], [1], [0, 0, 1, 1], [], []>} : vector<32x16xf32>, vector<16x128xf32>, vector<32x128xf32> -> vector<32x128xf32>
    %489 = arith.addf %484, %488 : vector<32x128xf32>
    %490 = vector.extract_strided_slice %5 {offsets = [0, 14], sizes = [16, 128], strides = [1, 1]} : vector<16x256xf32> to vector<16x128xf32>
    %491 = vector.extract_strided_slice %13 {offsets = [19, 0, 0], sizes = [1, 32, 16], strides = [1, 1, 1]} : vector<25x32x16xf32> to vector<1x32x16xf32>
    %492 = vector.shape_cast %491 : vector<1x32x16xf32> to vector<32x16xf32>
    %cst_112 = arith.constant dense<0.000000e+00> : vector<32x128xf32>
    %493 = tpu.matmul %492, %490, %cst_112 {dimension_numbers = #tpu.dot_dimension_numbers<[1], [0], [0], [1], [0, 0, 1, 1], [], []>} : vector<32x16xf32>, vector<16x128xf32>, vector<32x128xf32> -> vector<32x128xf32>
    %494 = arith.addf %489, %493 : vector<32x128xf32>
    %495 = vector.extract_strided_slice %11 {offsets = [0, 12], sizes = [16, 128], strides = [1, 1]} : vector<16x256xf32> to vector<16x128xf32>
    %496 = vector.extract_strided_slice %13 {offsets = [20, 0, 0], sizes = [1, 32, 16], strides = [1, 1, 1]} : vector<25x32x16xf32> to vector<1x32x16xf32>
    %497 = vector.shape_cast %496 : vector<1x32x16xf32> to vector<32x16xf32>
    %cst_113 = arith.constant dense<0.000000e+00> : vector<32x128xf32>
    %498 = tpu.matmul %497, %495, %cst_113 {dimension_numbers = #tpu.dot_dimension_numbers<[1], [0], [0], [1], [0, 0, 1, 1], [], []>} : vector<32x16xf32>, vector<16x128xf32>, vector<32x128xf32> -> vector<32x128xf32>
    %499 = arith.addf %494, %498 : vector<32x128xf32>
    %500 = vector.extract_strided_slice %8 {offsets = [0, 13], sizes = [16, 128], strides = [1, 1]} : vector<16x256xf32> to vector<16x128xf32>
    %501 = vector.extract_strided_slice %13 {offsets = [21, 0, 0], sizes = [1, 32, 16], strides = [1, 1, 1]} : vector<25x32x16xf32> to vector<1x32x16xf32>
    %502 = vector.shape_cast %501 : vector<1x32x16xf32> to vector<32x16xf32>
    %cst_114 = arith.constant dense<0.000000e+00> : vector<32x128xf32>
    %503 = tpu.matmul %502, %500, %cst_114 {dimension_numbers = #tpu.dot_dimension_numbers<[1], [0], [0], [1], [0, 0, 1, 1], [], []>} : vector<32x16xf32>, vector<16x128xf32>, vector<32x128xf32> -> vector<32x128xf32>
    %504 = arith.addf %499, %503 : vector<32x128xf32>
    %505 = vector.extract_strided_slice %11 {offsets = [0, 13], sizes = [16, 128], strides = [1, 1]} : vector<16x256xf32> to vector<16x128xf32>
    %506 = vector.extract_strided_slice %13 {offsets = [22, 0, 0], sizes = [1, 32, 16], strides = [1, 1, 1]} : vector<25x32x16xf32> to vector<1x32x16xf32>
    %507 = vector.shape_cast %506 : vector<1x32x16xf32> to vector<32x16xf32>
    %cst_115 = arith.constant dense<0.000000e+00> : vector<32x128xf32>
    %508 = tpu.matmul %507, %505, %cst_115 {dimension_numbers = #tpu.dot_dimension_numbers<[1], [0], [0], [1], [0, 0, 1, 1], [], []>} : vector<32x16xf32>, vector<16x128xf32>, vector<32x128xf32> -> vector<32x128xf32>
    %509 = arith.addf %504, %508 : vector<32x128xf32>
    %510 = vector.extract_strided_slice %8 {offsets = [0, 14], sizes = [16, 128], strides = [1, 1]} : vector<16x256xf32> to vector<16x128xf32>
    %511 = vector.extract_strided_slice %13 {offsets = [23, 0, 0], sizes = [1, 32, 16], strides = [1, 1, 1]} : vector<25x32x16xf32> to vector<1x32x16xf32>
    %512 = vector.shape_cast %511 : vector<1x32x16xf32> to vector<32x16xf32>
    %cst_116 = arith.constant dense<0.000000e+00> : vector<32x128xf32>
    %513 = tpu.matmul %512, %510, %cst_116 {dimension_numbers = #tpu.dot_dimension_numbers<[1], [0], [0], [1], [0, 0, 1, 1], [], []>} : vector<32x16xf32>, vector<16x128xf32>, vector<32x128xf32> -> vector<32x128xf32>
    %514 = arith.addf %509, %513 : vector<32x128xf32>
    %515 = vector.extract_strided_slice %11 {offsets = [0, 14], sizes = [16, 128], strides = [1, 1]} : vector<16x256xf32> to vector<16x128xf32>
    %516 = vector.extract_strided_slice %13 {offsets = [24, 0, 0], sizes = [1, 32, 16], strides = [1, 1, 1]} : vector<25x32x16xf32> to vector<1x32x16xf32>
    %517 = vector.shape_cast %516 : vector<1x32x16xf32> to vector<32x16xf32>
    %cst_117 = arith.constant dense<0.000000e+00> : vector<32x128xf32>
    %518 = tpu.matmul %517, %515, %cst_117 {dimension_numbers = #tpu.dot_dimension_numbers<[1], [0], [0], [1], [0, 0, 1, 1], [], []>} : vector<32x16xf32>, vector<16x128xf32>, vector<32x128xf32> -> vector<32x128xf32>
    %519 = arith.addf %514, %518 : vector<32x128xf32>
    %520 = arith.maximumf %393, %519 : vector<32x128xf32>
    %c0_118 = arith.constant 0 : index
    %c0_119 = arith.constant 0 : index
    %521 = vector.load %arg3[%c0_118, %c0_119] : memref<32x1xf32, #tpu.memory_space<vmem>>, vector<32x1xf32>
    %522 = vector.broadcast %521 : vector<32x1xf32> to vector<32x128xf32>
    %523 = arith.addf %520, %522 : vector<32x128xf32>
    %cst_120 = arith.constant 0.000000e+00 : f32
    %524 = vector.broadcast %cst_120 : f32 to vector<32x128xf32>
    %525 = arith.maximumf %523, %524 : vector<32x128xf32>
    %c0_121 = arith.constant 0 : index
    %c0_122 = arith.constant 0 : index
    %c0_123 = arith.constant 0 : index
    %526 = vector.load %arg4[%c0_121, %c0_122, %c0_123] : memref<1x32x128xf32, #tpu.memory_space<vmem>>, vector<1x32x128xf32>
    %527 = vector.shape_cast %526 : vector<1x32x128xf32> to vector<32x128xf32>
    %528 = vector.shape_cast %525 : vector<32x128xf32> to vector<1x32x128xf32>
    tpu.vector_store %arg4[%c0_121, %c0_122, %c0_123], %528 {strides = array<i32>} : memref<1x32x128xf32, #tpu.memory_space<vmem>>, vector<1x32x128xf32>,
    return
  }
  func.func @transform_0(%arg0: i32) -> (i32, i32, i32, i32) {
    %c0_i32 = arith.constant 0 : i32
    %c0_i32_0 = arith.constant 0 : i32
    %c0_i32_1 = arith.constant 0 : i32
    %c0_i32_2 = arith.constant 0 : i32
    return %arg0, %c0_i32, %c0_i32_0, %c0_i32_1 : i32, i32, i32, i32
  }
  func.func @transform_1(%arg0: i32) -> (i32, i32, i32) {
    %c0_i32 = arith.constant 0 : i32
    %c0_i32_0 = arith.constant 0 : i32
    %c0_i32_1 = arith.constant 0 : i32
    %c0_i32_2 = arith.constant 0 : i32
    return %c0_i32, %c0_i32_0, %c0_i32_1 : i32, i32, i32
  }
  func.func @transform_2(%arg0: i32) -> (i32, i32) {
    %c0_i32 = arith.constant 0 : i32
    %c0_i32_0 = arith.constant 0 : i32
    %c0_i32_1 = arith.constant 0 : i32
    return %c0_i32, %c0_i32_0 : i32, i32
  }
  func.func @transform_3(%arg0: i32) -> (i32, i32, i32) {
    %c0_i32 = arith.constant 0 : i32
    %c0_i32_0 = arith.constant 0 : i32
    %c0_i32_1 = arith.constant 0 : i32
    return %arg0, %c0_i32, %c0_i32_0 : i32, i32, i32
  }
}

</mosaic_0001>

<bundles_post_ra>
// kernel: image_embed_forward.2
= control target key start
LH: loop header
LB: loop body
LE: loop exit
PB: predicated region body
PF: predicated region fallthrough
CT: control target
= control target key end

     0   :  { %s3013_s12 = smov 0   ;;  %s5179_s0 = inlined_call_operand.vmem [shape: bf16[2,4,1,256], index: 0, kind: input, shape index: {}]   ;;  %s5180_s1 = inlined_call_operand.vmem [shape: bf16[25,16,1], index: 1, kind: input, shape index: {}]   ;;  %s5181_s2 = inlined_call_operand.vmem [shape: f32[16,1], index: 2, kind: input, shape index: {}]   ;;  %s5182_s3 = inlined_call_operand.vmem [shape: bf16[2,16,128], index: 3, kind: output, shape index: {}]  }
   0x1 LB: > { %s2688_s13 = sadd.s32 4294967295, %s2982_s12   ;;  %p2692_p0 = scmp.ge.s32.totalorder %s2982_s12, 1  ;;  %s2982_s12 = sphi %s3013_s12, %s13_s12  }
   0x2   : > { %p136_p1 = scmp.lt.s32.totalorder %s2982_s12, 3 }
   0x4   : > { %p137_p2 = pnand %p2692_p0, %p136_p1 }
   0x6   : > { %140 = sbr.rel (%p137_p2) target bundleno = 2539 (0x9eb), region = 32 }
   0xb   : > { %v2808_v0 = vld [vmem:[%s5180_s1 + $0x10] sm:$0xff]   ;;  %v2703_v1 = vld [vmem:[%s5180_s1] sm:$0xff]   ;;  %v2984_v2 = vmov 0   ;;  %v2809_v7 = vld [vmem:[%s5180_s1 + $0x18] sm:$0xff]   ;;  %p159_p3 = scmp.lt.s32.totalorder %s2688_s13, 1  ;;  %s2985_s19 = smov 127  }
   0xc   : > { %2859 = vset.pattern.permute.xlu1 %v2984_v2  ;;  %2848 = vset.pattern.permute.xlu0 %v2984_v2  ;;  %v2712_v3 = vunpack.c.l.bf16 %v2808_v0  ;;  %v2713_v4 = vunpack.c.h.bf16 %v2808_v0  ;;  %v2704_v5 = vunpack.c.l.bf16 %v2703_v1  ;;  %v2705_v6 = vunpack.c.h.bf16 %v2703_v1  ;;  %v2807_v8 = vld [vmem:[%s5180_s1 + $0x8] sm:$0xff]   ;;  %v2813_v17 = vld [vmem:[%s5180_s1 + $0x38] sm:$0xff]   ;;  %v2810_v18 = vld [vmem:[%s5180_s1 + $0x20] sm:$0xff]   ;;  %s2986_s20 = smov 126   ;;  %s2987_s21 = smov 118  }
   0xd   : > { %2875 = vset.pattern.permute.xlu2 %v2984_v2  ;;  %v2716_v11 = vunpack.c.l.bf16 %v2809_v7  ;;  %v2717_v12 = vunpack.c.h.bf16 %v2809_v7  ;;  %v2708_v13 = vunpack.c.l.bf16 %v2807_v8  ;;  %v2709_v14 = vunpack.c.h.bf16 %v2807_v8  ;;  %v2811_v23 = vld [vmem:[%s5180_s1 + $0x28] sm:$0xff]   ;;  %v2816_v30 = vld [vmem:[%s5180_s1 + $0x50] sm:$0xff]   ;;  %v2818_v39 = vld [vmem:[%s5180_s1 + $0x60] sm:$0xff]   ;;  %s5668_s13 = smov (!%p159_p3, %s2688_s13), 1  ;;  %s2988_s22 = smov 117  }
   0xe   : > { %v2860_v9 = vpack.i.bf16 %v2713_v4, %v2712_v3  ;;  %v2849_v10 = vpack.i.bf16 %v2705_v6, %v2704_v5  ;;  %v2732_v19 = vunpack.c.l.bf16 %v2813_v17  ;;  %v2733_v20 = vunpack.c.h.bf16 %v2813_v17  ;;  %v2815_v26 = vld [vmem:[%s5180_s1 + $0x48] sm:$0xff]   ;;  %v2812_v31 = vld [vmem:[%s5180_s1 + $0x30] sm:$0xff]   ;;  %v2814_v42 = vld [vmem:[%s5180_s1 + $0x40] sm:$0xff]   ;;  %s2693_s15 = sshll.u32 %s5668_s13, 3  ;;  %s2989_s29 = smov 116  }
   0xf   : > { %v2865_v15 = vpack.i.bf16 %v2717_v12, %v2716_v11  ;;  %v2854_v16 = vpack.i.bf16 %v2709_v14, %v2708_v13  ;;  %v2720_v21 = vunpack.c.l.bf16 %v2810_v18  ;;  %v2721_v22 = vunpack.c.h.bf16 %v2810_v18  ;;  %v2817_v49 = vld [vmem:[%s5180_s1 + $0x58] sm:$0xff]   ;;  %s3072_s18 = scalar_lea.vmem %s5179_s0, %s2693_s15  ;;  %s2991_s27 = smov 107  }
  0x10   : > { %2861 = vperm.xlu1 %2859, %v2860_v9   ;;  %2850 = vperm.xlu0 %2848, %v2849_v10   ;;  %v2724_v24 = vunpack.c.l.bf16 %v2811_v23  ;;  %v2725_v25 = vunpack.c.h.bf16 %v2811_v23  ;;  %v2886_v28 = vpack.i.bf16 %v2733_v20, %v2732_v19  ;;  %v2740_v32 = vunpack.c.l.bf16 %v2815_v26  ;;  %v168_v53 = vld [vmem:[%s3072_s18] sm:$0x3]  ;;  %v2696_v57 = vld [vmem:[%s3072_s18 + $0x2] sm:$0x3]  ;;  %v3105_v12 = vld [vmem:[%s3072_s18 + $0x6] sm:$0x3]  ;;  %s167_s6 = scalar_lea.vmem %s5182_s3, %s2693_s15 }
  0x11   : > { %v2870_v29 = vpack.i.bf16 %v2721_v22, %v2720_v21  ;;  %v2741_v33 = vunpack.c.h.bf16 %v2815_v26  ;;  %v2744_v34 = vunpack.c.l.bf16 %v2816_v30  ;;  %v2745_v35 = vunpack.c.h.bf16 %v2816_v30  ;;  %s2992_s4 = smov 106  }
  0x12   : > { %v2876_v27 = vpack.i.bf16 %v2725_v25, %v2724_v24  ;;  %v2728_v36 = vunpack.c.l.bf16 %v2812_v31  ;;  %v2729_v37 = vunpack.c.h.bf16 %v2812_v31  ;;  %v2752_v43 = vunpack.c.l.bf16 %v2818_v39  ;;  %v2697_v25 = vld [vmem:[%s3072_s18 + $0x4] sm:$0x3]  ;;  %s2990_s18 = smov 108  }
  0x13   : > { %v2896_v38 = vpack.i.bf16 %v2741_v33, %v2740_v32  ;;  %v2901_v40 = vpack.i.bf16 %v2745_v35, %v2744_v34  ;;  %v2753_v44 = vunpack.c.h.bf16 %v2818_v39  ;;  %v2736_v45 = vunpack.c.l.bf16 %v2814_v42 }
  0x14   : > { %2877 = vperm.xlu2 %2875, %v2876_v27   ;;  %v2881_v41 = vpack.i.bf16 %v2729_v37, %v2728_v36  ;;  %v2737_v46 = vunpack.c.h.bf16 %v2814_v42  ;;  %v2748_v50 = vunpack.c.l.bf16 %v2817_v49  ;;  %v2749_v51 = vunpack.c.h.bf16 %v2817_v49 }
  0x15   : > { %v2911_v47 = vpack.i.bf16 %v2753_v44, %v2752_v43  ;;  %v169_v54 = vunpack.c.l.bf16 %v168_v53  ;;  %v172_v62 = vunpack.c.l.bf16 %v2696_v57  ;;  %v178_v20 = vunpack.c.l.bf16 %v3105_v12 }
  0x16   : > { %v2891_v48 = vpack.i.bf16 %v2737_v46, %v2736_v45  ;;  %v2906_v52 = vpack.i.bf16 %v2749_v51, %v2748_v50  ;;  %vm342_vm0 = vcmask 1039360   ;;  %vm414_vm1 = vcmask 1031168  }
  0x17   : > { %v321_v55 = vperm.slane %v169_v54, 2  ;;  %v289_v56 = vperm.slane %v169_v54, 0  ;;  %v3090_v4 = vperm.slane %v172_v62, 0  ;;  %v361_v5 = vperm.slane %v172_v62, 2 }
  0x18   : > { %2866 = vperm.xlu1 %2859, %v2865_v15   ;;  %2855 = vperm.xlu0 %2848, %v2854_v16   ;;  %v3138_v30 = vperm.slane %v178_v20, 0  ;;  %vm587_vm2 = vcmask 965632   ;;  %vm652_vm3 = vcmask 957440   ;;  %vm717_vm4 = vcmask 949248  }
  0x19   : > { %v3076_v58 = vperm.slane %v321_v55, 0  ;;  %v3078_v59 = vperm.slane %v289_v56, 0  ;;  %v3099_v10 = vperm.slane %v361_v5, 0  ;;  %v3102_v11 = vperm.slane %v3090_v4, 0 }
  0x1a   : > { %5327 = vst [vmem:[#allocation13_spill] sm:$0xff] %v3138_v30  ;;  %vm910_vm5 = vcmask 883712   ;;  %vm975_vm6 = vcmask 875520   ;;  %vm1040_vm7 = vcmask 867328  }
  0x1b   : > { %5316 = vst [vmem:[#allocation2_spill] sm:$0xff] %v3078_v59 }
  0x1c   : > { %2897 = vperm.xlu2 %2875, %v2896_v38   ;;  %5321 = vst [vmem:[#allocation7_spill] sm:$0xff] %v3099_v10 }
  0x1d   : > { %5322 = vst [vmem:[#allocation8_spill] sm:$0xff] %v3102_v11 }
  0x20   : > { %2887 = vperm.xlu1 %2859, %v2886_v28   ;;  %2871 = vperm.xlu0 %2848, %v2870_v29   ;;  %v175_v29 = vunpack.c.l.bf16 %v2697_v25 }
  0x22   : > { %v431_v42 = vperm.slane %v175_v29, 0  ;;  %v463_v43 = vperm.slane %v175_v29, 2 }
  0x24   : > { %2912 = vperm.xlu2 %2875, %v2911_v47   ;;  %v3173_v50 = vperm.slane %v463_v43, 0 }
  0x28   : > { %2902 = vperm.xlu1 %2859, %v2901_v40   ;;  %2882 = vperm.xlu0 %2848, %v2881_v41  }
  0x30   : > { %2892 = vperm.xlu0 %2848, %v2891_v48  }
  0x38   : > { %2907 = vperm.xlu0 %2848, %v2906_v52  }
  0x6e   : > { %v2878_v33 = vpop.permute.xlu2 %2877 }
  0x6f   : > { %v3144_v34 = vunpack.i.l.bf16 %v2878_v33  ;;  %v3156_v40 = vunpack.i.h.bf16 %v2878_v33 }
  0x71   : > { %5330 = vst [vmem:[#allocation16_spill] sm:$0xff] %v3144_v34  ;;  %v3162_v44 = vmul.f32 %v3144_v34, %v431_v42  ;;  %v3167_v46 = vmul.f32 %v3156_v40, %v431_v42 }
  0x72   : > { %5331 = vst [vmem:[#allocation17_spill] sm:$0xff] %v3156_v40 }
  0x82   : > { %v2862_v60 = vpop.permute.xlu1 %2861  ;;  %v2851_v61 = vpop.permute.xlu0 %2850 }
  0x83   : > { %v3080_v63 = vunpack.i.h.bf16 %v2862_v60  ;;  %v3082_v0 = vunpack.i.l.bf16 %v2862_v60  ;;  %v3095_v6 = vunpack.i.h.bf16 %v2851_v61  ;;  %v3097_v7 = vunpack.i.l.bf16 %v2851_v61 }
  0x84   : > { %v3196_v60 = vmul.f32 %v3144_v34, %v3138_v30  ;;  %v3200_v61 = vmul.f32 %v3156_v40, %v3138_v30 }
  0x85   : > { %5317 = vst [vmem:[#allocation3_spill] sm:$0xff] %v3080_v63  ;;  %v329_v1 = vmul.f32 %v3080_v63, %v3076_v58  ;;  %v327_v2 = vmul.f32 %v3082_v0, %v3076_v58  ;;  %v326_v3 = vmul.f32 %v3082_v0, %v3078_v59  ;;  %v328_v18 = vmul.f32 %v3080_v63, %v3078_v59 }
  0x86   : > { %5318 = vst [vmem:[#allocation4_spill] sm:$0xff] %v3082_v0  ;;  %v291_v22 = vmul.f32 %v3095_v6, %v289_v56  ;;  %v290_v24 = vmul.f32 %v3097_v7, %v289_v56  ;;  %v1564_v25 = vmul.f32 %v3095_v6, %v431_v42 }
  0x87   : > { %340 = vrot.lane.b32.xlu0 %v329_v1, %s2985_s19  ;;  %336 = vrot.lane.b32.xlu2 %v327_v2, %s2985_s19  ;;  %5319 = vst [vmem:[#allocation5_spill] sm:$0xff] %v3095_v6  ;;  %v3205_v1 = vperm.slane %v3138_v30, 0  ;;  %v3207_v2 = vperm.slane %v431_v42, 0 }
  0x88   : > { %334 = vrot.lane.b32.xlu1 %v326_v3, %s2985_s19  ;;  %5320 = vst [vmem:[#allocation6_spill] sm:$0xff] %v3097_v7  ;;  %v2898_v3 = vpop.permute.xlu2 %2897 }
  0x8a   : > { %v2867_v8 = vpop.permute.xlu1 %2866  ;;  %v2856_v9 = vpop.permute.xlu0 %2855 }
  0x8b   : > { %v3107_v13 = vunpack.i.h.bf16 %v2867_v8  ;;  %v3109_v14 = vunpack.i.l.bf16 %v2867_v8  ;;  %v3111_v15 = vunpack.i.h.bf16 %v2856_v9  ;;  %v3113_v16 = vunpack.i.l.bf16 %v2856_v9 }
  0x8d   : > { %5323 = vst [vmem:[#allocation9_spill] sm:$0xff] %v3107_v13  ;;  %v367_v17 = vmul.f32 %v3109_v14, %v3099_v10  ;;  %v368_v19 = vmul.f32 %v3107_v13, %v3102_v11  ;;  %v306_v21 = vmul.f32 %v3111_v15, %v3090_v4  ;;  %v305_v23 = vmul.f32 %v3113_v16, %v3090_v4 }
  0x8e   : > { %5324 = vst [vmem:[#allocation10_spill] sm:$0xff] %v3109_v14  ;;  %v1567_v35 = vmul.f32 %v3113_v16, %v3138_v30  ;;  %v1568_v36 = vmul.f32 %v3111_v15, %v3138_v30  ;;  %v366_v38 = vmul.f32 %v3109_v14, %v3102_v11  ;;  %v369_v52 = vmul.f32 %v3107_v13, %v3099_v10 }
  0x8f   : > { %5325 = vst [vmem:[#allocation11_spill] sm:$0xff] %v3111_v15  ;;  %376 = vrot.lane.b32.xlu0 %v367_v17, %s2985_s19  ;;  %338 = vrot.lane.b32.xlu2 %v328_v18, %s2985_s19  ;;  %v3132_v26 = vadd.f32 %v306_v21, %v291_v22  ;;  %v3134_v27 = vadd.f32 %v305_v23, %v290_v24  ;;  %v3217_v17 = vunpack.i.l.bf16 %v2898_v3  ;;  %v3228_v23 = vunpack.i.h.bf16 %v2898_v3 }
  0x90   : > { %5326 = vst [vmem:[#allocation12_spill] sm:$0xff] %v3113_v16  ;;  %378 = vrot.lane.b32.xlu1 %v368_v19, %s2985_s19  ;;  %v1563_v24 = vmul.f32 %v3097_v7, %v431_v42  ;;  %v3239_v33 = vadd.f32 %v1568_v36, %v1564_v25 }
  0x91   : > { %5337 = vst [vmem:[#allocation23_spill] sm:$0xff] %v3217_v17  ;;  %v539_v19 = vmul.f32 %v3217_v17, %v3207_v2  ;;  %v540_v43 = vmul.f32 %v3217_v17, %v3173_v50 }
  0x92   : > { %v2872_v28 = vpop.permute.xlu0 %2871  ;;  %v2888_v41 = vpop.permute.xlu1 %2887  ;;  %v3237_v29 = vadd.f32 %v1567_v35, %v1563_v24  ;;  %5340 = vst [vmem:[#allocation26_spill] sm:$0xff] %v3239_v33 }
  0x93   : > { %v3140_v31 = vunpack.i.h.bf16 %v2872_v28  ;;  %v3142_v32 = vunpack.i.l.bf16 %v2872_v28  ;;  %v3164_v45 = vunpack.i.l.bf16 %v2888_v41  ;;  %v3192_v56 = vunpack.i.h.bf16 %v2888_v41 }
  0x94   : > { %v502_v28 = vperm.slane %v178_v20, 2  ;;  %5339 = vst [vmem:[#allocation25_spill] sm:$0xff] %v3237_v29 }
  0x95   : > { %5328 = vst [vmem:[#allocation14_spill] sm:$0xff] %v3140_v31  ;;  %v400_v37 = vmul.f32 %v3140_v31, %v3078_v59  ;;  %v398_v39 = vmul.f32 %v3142_v32, %v3078_v59  ;;  %v469_v51 = vmul.f32 %v3164_v45, %v3173_v50  ;;  %v401_v53 = vmul.f32 %v3140_v31, %v3076_v58 }
  0x96   : > { %5329 = vst [vmem:[#allocation15_spill] sm:$0xff] %v3142_v32  ;;  %v399_v8 = vmul.f32 %v3142_v32, %v3076_v58  ;;  %v470_v9 = vmul.f32 %v3192_v56, %v3207_v2  ;;  %v468_v21 = vmul.f32 %v3164_v45, %v3207_v2 }
  0x97   : > { %410 = vrot.lane.b32.xlu0 %v400_v37, %s2986_s20  ;;  %374 = vrot.lane.b32.xlu2 %v366_v38, %s2985_s19  ;;  %5332 = vst [vmem:[#allocation18_spill] sm:$0xff] %v3164_v45  ;;  %v542_v37 = vmul.f32 %v3228_v23, %v3173_v50  ;;  %v3243_v38 = vperm.slane %v502_v28, 0 }
  0x98   : > { %406 = vrot.lane.b32.xlu1 %v398_v39, %s2986_s20  ;;  %5335 = vst [vmem:[#allocation21_spill] sm:$0xff] %v3192_v56  ;;  %v471_v39 = vmul.f32 %v3192_v56, %v3173_v50 }
  0x99   : > { %5341 = vst [vmem:[#allocation27_spill] sm:$0xff] %v3243_v38 }
  0x9a   : > { %v2883_v47 = vpop.permute.xlu0 %2882  ;;  %v2903_v41 = vpop.permute.xlu1 %2902 }
  0x9b   : > { %v3169_v48 = vunpack.i.h.bf16 %v2883_v47  ;;  %v3171_v49 = vunpack.i.l.bf16 %v2883_v47  ;;  %v3252_v12 = vunpack.i.l.bf16 %v2903_v41 }
  0x9d   : > { %5333 = vst [vmem:[#allocation19_spill] sm:$0xff] %v3169_v48  ;;  %v3183_v54 = vmul.f32 %v3171_v49, %v3138_v30  ;;  %v3187_v55 = vmul.f32 %v3169_v48, %v3138_v30  ;;  %v572_v20 = vmul.f32 %v3252_v12, %v3076_v58 }
  0x9e   : > { %5334 = vst [vmem:[#allocation20_spill] sm:$0xff] %v3171_v49 }
  0x9f   : > { %478 = vrot.lane.b32.xlu0 %v469_v51, %s2985_s19  ;;  %380 = vrot.lane.b32.xlu2 %v369_v52, %s2985_s19  ;;  %v3265_v51 = vunpack.i.h.bf16 %v2903_v41 }
  0xa0   : > { %412 = vrot.lane.b32.xlu1 %v401_v53, %s2986_s20  ;;  %v541_v53 = vmul.f32 %v3228_v23, %v3207_v2 }
  0xa1   : > { %5343 = vst [vmem:[#allocation29_spill] sm:$0xff] %v3265_v51  ;;  %v573_v3 = vmul.f32 %v3265_v51, %v3078_v59  ;;  %v574_v25 = vmul.f32 %v3265_v51, %v3076_v58 }
  0xa2   : > { %v2893_v57 = vpop.permute.xlu0 %2892 }
  0xa3   : > { %v3202_v62 = vunpack.i.h.bf16 %v2893_v57  ;;  %v3220_v18 = vunpack.i.l.bf16 %v2893_v57  ;;  %v2913_v57 = vpop.permute.xlu2 %2912 }
  0xa5   : > { %5336 = vst [vmem:[#allocation22_spill] sm:$0xff] %v3202_v62  ;;  %v509_v5 = vmul.f32 %v3202_v62, %v3205_v1  ;;  %v507_v22 = vmul.f32 %v3220_v18, %v3205_v1  ;;  %v510_v42 = vmul.f32 %v3202_v62, %v3243_v38  ;;  %v508_v35 = vmul.f32 %v3220_v18, %v3243_v38 }
  0xa6   : > { %5338 = vst [vmem:[#allocation24_spill] sm:$0xff] %v3220_v18 }
  0xa7   : > { %519 = vrot.lane.b32.xlu0 %v509_v5, %s2985_s19  ;;  %408 = vrot.lane.b32.xlu2 %v399_v8, %s2986_s20  ;;  %v3276_v5 = vunpack.i.l.bf16 %v2913_v57 }
  0xa8   : > { %480 = vrot.lane.b32.xlu1 %v470_v9, %s2985_s19 }
  0xa9   : > { %5344 = vst [vmem:[#allocation30_spill] sm:$0xff] %v3276_v5  ;;  %v636_v9 = vmul.f32 %v3276_v5, %v3078_v59  ;;  %v637_v41 = vmul.f32 %v3276_v5, %v3076_v58 }
  0xaa   : > { %v2908_v36 = vpop.permute.xlu0 %2907 }
  0xab   : > { %v3263_v47 = vunpack.i.h.bf16 %v2908_v36  ;;  %v3278_v8 = vunpack.i.l.bf16 %v2908_v36 }
  0xad   : > { %5342 = vst [vmem:[#allocation28_spill] sm:$0xff] %v3263_v47  ;;  %v606_v52 = vmul.f32 %v3263_v47, %v3102_v11  ;;  %v607_v28 = vmul.f32 %v3263_v47, %v3099_v10 }
  0xae   : > { %5345 = vst [vmem:[#allocation31_spill] sm:$0xff] %v3278_v8 }
  0xaf   : > { %547 = vrot.lane.b32.xlu0 %v539_v19, %s2986_s20  ;;  %476 = vrot.lane.b32.xlu2 %v468_v21, %s2985_s19  ;;  %v571_v19 = vmul.f32 %v3252_v12, %v3078_v59  ;;  %v604_v21 = vmul.f32 %v3278_v8, %v3102_v11 }
  0xb0   : > { %515 = vrot.lane.b32.xlu1 %v507_v22, %s2985_s19  ;;  %v3289_v22 = vunpack.i.h.bf16 %v2913_v57 }
  0xb2   : > { %5346 = vst [vmem:[#allocation32_spill] sm:$0xff] %v3289_v22  ;;  %v639_v24 = vmul.f32 %v3289_v22, %v3076_v58 }
  0xb7   : > { %553 = vrot.lane.b32.xlu0 %v542_v37, %s2986_s20  ;;  %482 = vrot.lane.b32.xlu2 %v471_v39, %s2985_s19  ;;  %v605_v37 = vmul.f32 %v3278_v8, %v3099_v10  ;;  %v2819_v39 = vld [vmem:[%s5180_s1 + $0x68] sm:$0xff]  }
  0xb8   : > { %521 = vrot.lane.b32.xlu1 %v510_v42, %s2985_s19  ;;  %v2756_v42 = vunpack.c.l.bf16 %v2819_v39 }
  0xbf   : > { %581 = vrot.lane.b32.xlu0 %v572_v20, %s2987_s21  ;;  %517 = vrot.lane.b32.xlu2 %v508_v35, %s2985_s19  ;;  %v2757_v20 = vunpack.c.h.bf16 %v2819_v39 }
  0xc0   : > { %549 = vrot.lane.b32.xlu1 %v540_v43, %s2986_s20  ;;  %v638_v43 = vmul.f32 %v3289_v22, %v3078_v59 }
  0xc1   : > { %v2916_v36 = vpack.i.bf16 %v2757_v20, %v2756_v42 }
  0xc7   : > { %616 = vrot.lane.b32.xlu0 %v606_v52, %s2987_s21  ;;  %551 = vrot.lane.b32.xlu2 %v541_v53, %s2986_s20 }
  0xc8   : > { %583 = vrot.lane.b32.xlu1 %v573_v3, %s2987_s21 }
  0xcf   : > { %644 = vrot.lane.b32.xlu0 %v636_v9, %s2988_s22  ;;  %579 = vrot.lane.b32.xlu2 %v571_v19, %s2987_s21 }
  0xd0   : > { %612 = vrot.lane.b32.xlu1 %v604_v21, %s2987_s21 }
  0xd7   : > { %650 = vrot.lane.b32.xlu0 %v639_v24, %s2988_s22  ;;  %585 = vrot.lane.b32.xlu2 %v574_v25, %s2987_s21 }
  0xd8   : > { %618 = vrot.lane.b32.xlu1 %v607_v28, %s2987_s21 }
  0xdf   : > { %614 = vrot.lane.b32.xlu2 %v605_v37, %s2987_s21 }
  0xe0   : > { %646 = vrot.lane.b32.xlu1 %v637_v41, %s2988_s22 }
  0xe1   : > { %v337_v35 = vpop.permute.xlu2 %336 }
  0xe7   : > { %648 = vrot.lane.b32.xlu2 %v638_v43, %s2988_s22 }
  0xe8   : > { %2917 = vperm.xlu1 %2859, %v2916_v36  }
  0xe9   : > { %v339_v52 = vpop.permute.xlu2 %338 }
  0xf1   : > { %v375_v53 = vpop.permute.xlu2 %374 }
  0xf9   : > { %v341_v57 = vpop.permute.xlu0 %340  ;;  %v381_v9 = vpop.permute.xlu2 %380 }
  0xfa   : > { %v335_v3 = vpop.permute.xlu1 %334  ;;  %v344_v36 = vsel %vm342_vm0, %v339_v52, %v341_v57 }
  0xfb   : > { %v343_v24 = vsel %vm342_vm0, %v335_v3, %v337_v35  ;;  %v348_v29 = vadd.f32 %v344_v36, %v3132_v26 }
  0xfc   : > { %v347_v28 = vadd.f32 %v343_v24, %v3134_v27 }
 0x101   : > { %v377_v21 = vpop.permute.xlu0 %376  ;;  %v409_v39 = vpop.permute.xlu2 %408 }
 0x102   : > { %v379_v19 = vpop.permute.xlu1 %378  ;;  %v382_v25 = vsel %vm342_vm0, %v375_v53, %v377_v21 }
 0x103   : > { %v386_v37 = vadd.f32 %v382_v25, %v347_v28  ;;  %v383_v30 = vsel %vm342_vm0, %v379_v19, %v381_v9 }
 0x104   : > { %v387_v53 = vadd.f32 %v383_v30, %v348_v29 }
 0x109   : > { %v411_v27 = vpop.permute.xlu0 %410 }
 0x10a   : > { %v407_v41 = vpop.permute.xlu1 %406 }
 0x10b   : > { %v415_v42 = vsel %vm414_vm1, %v407_v41, %v409_v39 }
 0x10c   : > { %v419_v20 = vadd.f32 %v415_v42, %v386_v37  ;;  %v2820_v37 = vld [vmem:[%s5180_s1 + $0x70] sm:$0xff]  }
 0x10d   : > { %v2761_v36 = vunpack.c.h.bf16 %v2820_v37 }
 0x10e   : > { %v434_v43 = vadd.f32 %v3162_v44, %v419_v20  ;;  %v2760_v20 = vunpack.c.l.bf16 %v2820_v37 }
 0x110   : > { %v3321_v35 = vadd.f32 %v3183_v54, %v434_v43  ;;  %v2921_v43 = vpack.i.bf16 %v2761_v36, %v2760_v20 }
 0x112   : > { %5347 = vst [vmem:[#allocation33_spill] sm:$0xff] %v3321_v35  ;;  %v413_v3 = vpop.permute.xlu1 %412 }
 0x113   : > { %v416_v21 = vsel %vm414_vm1, %v411_v27, %v413_v3  ;;  %v3363_v27 = vpop.permute.xlu0 %478 }
 0x114   : > { %v420_v24 = vadd.f32 %v416_v21, %v387_v53  ;;  %5359 = vst [vmem:[#allocation45_spill] sm:$0xff] %v3363_v27 }
 0x116   : > { %v435_v25 = vadd.f32 %v3167_v46, %v420_v24 }
 0x118   : > { %v3326_v28 = vadd.f32 %v3187_v55, %v435_v25 }
 0x11a   : > { %5348 = vst [vmem:[#allocation34_spill] sm:$0xff] %v3326_v28  ;;  %v3328_v52 = vpop.permute.xlu1 %480 }
 0x11b   : > { %5349 = vst [vmem:[#allocation35_spill] sm:$0xff] %v3328_v52  ;;  %v3365_v3 = vpop.permute.xlu0 %519 }
 0x11c   : > { %5360 = vst [vmem:[#allocation46_spill] sm:$0xff] %v3365_v3 }
 0x122   : > { %v3330_v44 = vpop.permute.xlu1 %515 }
 0x123   : > { %5350 = vst [vmem:[#allocation36_spill] sm:$0xff] %v3330_v44  ;;  %v3367_v21 = vpop.permute.xlu0 %547 }
 0x124   : > { %5361 = vst [vmem:[#allocation47_spill] sm:$0xff] %v3367_v21 }
 0x12a   : > { %v3332_v57 = vpop.permute.xlu1 %521 }
 0x12b   : > { %5351 = vst [vmem:[#allocation37_spill] sm:$0xff] %v3332_v57  ;;  %v3369_v24 = vpop.permute.xlu0 %553 }
 0x12c   : > { %5362 = vst [vmem:[#allocation48_spill] sm:$0xff] %v3369_v24 }
 0x132   : > { %v3334_v26 = vpop.permute.xlu1 %549 }
 0x133   : > { %5352 = vst [vmem:[#allocation38_spill] sm:$0xff] %v3334_v26  ;;  %v3371_v25 = vpop.permute.xlu0 %581 }
 0x134   : > { %5363 = vst [vmem:[#allocation49_spill] sm:$0xff] %v3371_v25 }
 0x13a   : > { %v3336_v54 = vpop.permute.xlu1 %583 }
 0x13b   : > { %5353 = vst [vmem:[#allocation39_spill] sm:$0xff] %v3336_v54 }
 0x142   : > { %v3338_v30 = vpop.permute.xlu1 %612 }
 0x143   : > { %5354 = vst [vmem:[#allocation40_spill] sm:$0xff] %v3338_v30 }
 0x14a   : > { %v3340_v29 = vpop.permute.xlu1 %618 }
 0x14b   : > { %5355 = vst [vmem:[#allocation41_spill] sm:$0xff] %v3340_v29 }
 0x152   : > { %v3342_v9 = vpop.permute.xlu1 %646 }
 0x153   : > { %5356 = vst [vmem:[#allocation42_spill] sm:$0xff] %v3342_v9 }
 0x15a   : > { %v2918_v46 = vpop.permute.xlu1 %2917 }
 0x15b   : > { %v3344_v19 = vunpack.i.h.bf16 %v2918_v46  ;;  %v3346_v55 = vunpack.i.l.bf16 %v2918_v46  ;;  %v3373_v46 = vpop.permute.xlu0 %616 }
 0x15c   : > { %5364 = vst [vmem:[#allocation50_spill] sm:$0xff] %v3373_v46 }
 0x15d   : > { %5357 = vst [vmem:[#allocation43_spill] sm:$0xff] %v3344_v19  ;;  %v671_v39 = vmul.f32 %v3344_v19, %v3102_v11  ;;  %v670_v41 = vmul.f32 %v3346_v55, %v3099_v10  ;;  %v669_v42 = vmul.f32 %v3346_v55, %v3102_v11  ;;  %v672_v53 = vmul.f32 %v3344_v19, %v3099_v10 }
 0x15e   : > { %5358 = vst [vmem:[#allocation44_spill] sm:$0xff] %v3346_v55 }
 0x15f   : > { %681 = vrot.lane.b32.xlu1 %v671_v39, %s2988_s22  ;;  %679 = vrot.lane.b32.xlu0 %v670_v41, %s2988_s22 }
 0x160   : > { %677 = vrot.lane.b32.xlu2 %v669_v42, %s2988_s22  ;;  %v3381_v42 = vpop.permute.xlu2 %476 }
 0x161   : > { %5368 = vst [vmem:[#allocation54_spill] sm:$0xff] %v3381_v42 }
 0x163   : > { %v3375_v37 = vpop.permute.xlu0 %644 }
 0x164   : > { %5365 = vst [vmem:[#allocation51_spill] sm:$0xff] %v3375_v37 }
 0x167   : > { %2922 = vperm.xlu0 %2848, %v2921_v43  }
 0x168   : > { %683 = vrot.lane.b32.xlu2 %v672_v53, %s2988_s22  ;;  %v3399_v9 = vpop.permute.xlu2 %482 }
 0x169   : > { %5371 = vst [vmem:[#allocation57_spill] sm:$0xff] %v3399_v9 }
 0x16b   : > { %v3377_v39 = vpop.permute.xlu0 %650 }
 0x16c   : > { %5366 = vst [vmem:[#allocation52_spill] sm:$0xff] %v3377_v39 }
 0x170   : > { %v3404_v46 = vpop.permute.xlu2 %517 }
 0x171   : > { %5372 = vst [vmem:[#allocation58_spill] sm:$0xff] %v3404_v46 }
 0x178   : > { %v3406_v29 = vpop.permute.xlu2 %551 }
 0x179   : > { %5373 = vst [vmem:[#allocation59_spill] sm:$0xff] %v3406_v29 }
 0x1d1   : > { %v3379_v41 = vpop.permute.xlu0 %679  ;;  %v3441_v29 = vpop.permute.xlu1 %681 }
 0x1d2   : > { %5367 = vst [vmem:[#allocation53_spill] sm:$0xff] %v3379_v41  ;;  %v2821_v41 = vld [vmem:[%s5180_s1 + $0x78] sm:$0xff]  }
 0x1d3   : > { %v2765_v39 = vunpack.c.h.bf16 %v2821_v41  ;;  %5383 = vst [vmem:[#allocation69_spill] sm:$0xff] %v3441_v29 }
 0x1d9   : > { %v2923_v20 = vpop.permute.xlu0 %2922 }
 0x1da   : > { %v3383_v36 = vunpack.i.h.bf16 %v2923_v20  ;;  %v3385_v43 = vunpack.i.l.bf16 %v2923_v20  ;;  %v2764_v20 = vunpack.c.l.bf16 %v2821_v41 }
 0x1dc   : > { %5369 = vst [vmem:[#allocation55_spill] sm:$0xff] %v3383_v36  ;;  %v703_v53 = vmul.f32 %v3383_v36, %v3078_v59  ;;  %v701_v33 = vmul.f32 %v3385_v43, %v3078_v59  ;;  %v702_v37 = vmul.f32 %v3385_v43, %v3076_v58  ;;  %v2926_v30 = vpack.i.bf16 %v2765_v39, %v2764_v20 }
 0x1dd   : > { %5370 = vst [vmem:[#allocation56_spill] sm:$0xff] %v3385_v43  ;;  %v704_v25 = vmul.f32 %v3383_v36, %v3076_v58 }
 0x1de   : > { %713 = vrot.lane.b32.xlu0 %v703_v53, %s2989_s29  ;;  %709 = vrot.lane.b32.xlu1 %v701_v33, %s2989_s29  ;;  %v3408_v53 = vpop.permute.xlu2 %579 }
 0x1df   : > { %711 = vrot.lane.b32.xlu2 %v702_v37, %s2989_s29  ;;  %5374 = vst [vmem:[#allocation60_spill] sm:$0xff] %v3408_v53  ;;  %v2822_v53 = vld [vmem:[%s5180_s1 + $0x80] sm:$0xff]  }
 0x1e6   : > { %715 = vrot.lane.b32.xlu1 %v704_v25, %s2989_s29  ;;  %v3410_v33 = vpop.permute.xlu2 %585 }
 0x1e7   : > { %2927 = vperm.xlu2 %2875, %v2926_v30   ;;  %5375 = vst [vmem:[#allocation61_spill] sm:$0xff] %v3410_v33 }
 0x1ee   : > { %v3412_v37 = vpop.permute.xlu2 %614 }
 0x1ef   : > { %5376 = vst [vmem:[#allocation62_spill] sm:$0xff] %v3412_v37 }
 0x1f6   : > { %v3414_v41 = vpop.permute.xlu2 %648 }
 0x1f7   : > { %5377 = vst [vmem:[#allocation63_spill] sm:$0xff] %v3414_v41 }
 0x1fe   : > { %v3416_v54 = vpop.permute.xlu2 %677 }
 0x1ff   : > { %5378 = vst [vmem:[#allocation64_spill] sm:$0xff] %v3416_v54 }
 0x206   : > { %v3418_v39 = vpop.permute.xlu2 %683 }
 0x207   : > { %5379 = vst [vmem:[#allocation65_spill] sm:$0xff] %v3418_v39 }
 0x239   : > { %v3420_v20 = vpop.permute.xlu2 %711 }
 0x23a   : > { %5380 = vst [vmem:[#allocation66_spill] sm:$0xff] %v3420_v20  ;;  %v2768_v20 = vunpack.c.l.bf16 %v2822_v53 }
 0x241   : > { %v2928_v25 = vpop.permute.xlu2 %2927 }
 0x242   : > { %v3422_v30 = vunpack.i.h.bf16 %v2928_v25  ;;  %v3424_v24 = vunpack.i.l.bf16 %v2928_v25  ;;  %v2769_v25 = vunpack.c.h.bf16 %v2822_v53 }
 0x244   : > { %5381 = vst [vmem:[#allocation67_spill] sm:$0xff] %v3422_v30  ;;  %v736_v37 = vmul.f32 %v3422_v30, %v3207_v2  ;;  %v735_v41 = vmul.f32 %v3424_v24, %v3173_v50  ;;  %v734_v39 = vmul.f32 %v3424_v24, %v3207_v2  ;;  %v2931_v54 = vpack.i.bf16 %v2769_v25, %v2768_v20  ;;  %v2823_v20 = vld [vmem:[%s5180_s1 + $0x88] sm:$0xff]  }
 0x245   : > { %5382 = vst [vmem:[#allocation68_spill] sm:$0xff] %v3424_v24  ;;  %v737_v33 = vmul.f32 %v3422_v30, %v3173_v50  ;;  %v2772_v25 = vunpack.c.l.bf16 %v2823_v20 }
 0x246   : > { %746 = vrot.lane.b32.xlu2 %v736_v37, %s2987_s21  ;;  %744 = vrot.lane.b32.xlu1 %v735_v41, %s2987_s21 }
 0x247   : > { %742 = vrot.lane.b32.xlu0 %v734_v39, %s2987_s21 }
 0x24e   : > { %2932 = vperm.xlu1 %2859, %v2931_v54  }
 0x24f   : > { %748 = vrot.lane.b32.xlu0 %v737_v33, %s2987_s21 }
 0x250   : > { %v3443_v21 = vpop.permute.xlu1 %709 }
 0x251   : > { %5384 = vst [vmem:[#allocation70_spill] sm:$0xff] %v3443_v21  ;;  %v3468_v21 = vpop.permute.xlu0 %713 }
 0x252   : > { %5389 = vst [vmem:[#allocation75_spill] sm:$0xff] %v3468_v21 }
 0x258   : > { %v3445_v26 = vpop.permute.xlu1 %715 }
 0x259   : > { %5385 = vst [vmem:[#allocation71_spill] sm:$0xff] %v3445_v26 }
 0x2b8   : > { %v3447_v37 = vpop.permute.xlu1 %744 }
 0x2b9   : > { %5386 = vst [vmem:[#allocation72_spill] sm:$0xff] %v3447_v37  ;;  %v3470_v29 = vpop.permute.xlu0 %742 }
 0x2ba   : > { %5390 = vst [vmem:[#allocation76_spill] sm:$0xff] %v3470_v29  ;;  %v3495_v29 = vpop.permute.xlu2 %746 }
 0x2bb   : > { %5395 = vst [vmem:[#allocation81_spill] sm:$0xff] %v3495_v29 }
 0x2c0   : > { %v2933_v41 = vpop.permute.xlu1 %2932 }
 0x2c1   : > { %v3449_v35 = vunpack.i.h.bf16 %v2933_v41  ;;  %v3451_v53 = vunpack.i.l.bf16 %v2933_v41  ;;  %v2773_v41 = vunpack.c.h.bf16 %v2823_v20  ;;  %v3472_v44 = vpop.permute.xlu0 %748  ;;  %v2824_v20 = vld [vmem:[%s5180_s1 + $0x90] sm:$0xff]  }
 0x2c2   : > { %5391 = vst [vmem:[#allocation77_spill] sm:$0xff] %v3472_v44 }
 0x2c3   : > { %5387 = vst [vmem:[#allocation73_spill] sm:$0xff] %v3449_v35  ;;  %v768_v39 = vmul.f32 %v3449_v35, %v3205_v1  ;;  %v766_v54 = vmul.f32 %v3451_v53, %v3205_v1  ;;  %v767_v33 = vmul.f32 %v3451_v53, %v3243_v38  ;;  %v2936_v37 = vpack.i.bf16 %v2773_v41, %v2772_v25 }
 0x2c4   : > { %5388 = vst [vmem:[#allocation74_spill] sm:$0xff] %v3451_v53  ;;  %v769_v26 = vmul.f32 %v3449_v35, %v3243_v38  ;;  %v2776_v41 = vunpack.c.l.bf16 %v2824_v20 }
 0x2c5   : > { %778 = vrot.lane.b32.xlu1 %v768_v39, %s2987_s21  ;;  %774 = vrot.lane.b32.xlu2 %v766_v54, %s2987_s21 }
 0x2c6   : > { %776 = vrot.lane.b32.xlu0 %v767_v33, %s2987_s21 }
 0x2cd   : > { %780 = vrot.lane.b32.xlu2 %v769_v26, %s2987_s21 }
 0x2ce   : > { %2937 = vperm.xlu0 %2848, %v2936_v37  }
 0x31f   : > { %v3497_v21 = vpop.permute.xlu2 %774 }
 0x320   : > { %5396 = vst [vmem:[#allocation82_spill] sm:$0xff] %v3497_v21 }
 0x327   : > { %v3499_v28 = vpop.permute.xlu2 %780 }
 0x328   : > { %5397 = vst [vmem:[#allocation83_spill] sm:$0xff] %v3499_v28 }
 0x337   : > { %v3522_v21 = vpop.permute.xlu1 %778 }
 0x338   : > { %v3474_v39 = vpop.permute.xlu0 %776  ;;  %5401 = vst [vmem:[#allocation87_spill] sm:$0xff] %v3522_v21 }
 0x339   : > { %5392 = vst [vmem:[#allocation78_spill] sm:$0xff] %v3474_v39 }
 0x340   : > { %v2938_v54 = vpop.permute.xlu0 %2937 }
 0x341   : > { %v3476_v46 = vunpack.i.h.bf16 %v2938_v54  ;;  %v3478_v33 = vunpack.i.l.bf16 %v2938_v54  ;;  %v2777_v54 = vunpack.c.h.bf16 %v2824_v20 }
 0x343   : > { %5393 = vst [vmem:[#allocation79_spill] sm:$0xff] %v3476_v46  ;;  %v800_v26 = vmul.f32 %v3476_v46, %v3207_v2  ;;  %v799_v37 = vmul.f32 %v3478_v33, %v3173_v50  ;;  %v798_v25 = vmul.f32 %v3478_v33, %v3207_v2  ;;  %v2941_v39 = vpack.i.bf16 %v2777_v54, %v2776_v41  ;;  %v2825_v41 = vld [vmem:[%s5180_s1 + $0x98] sm:$0xff]  }
 0x344   : > { %5394 = vst [vmem:[#allocation80_spill] sm:$0xff] %v3478_v33  ;;  %v801_v44 = vmul.f32 %v3476_v46, %v3173_v50  ;;  %v2780_v54 = vunpack.c.l.bf16 %v2825_v41 }
 0x345   : > { %810 = vrot.lane.b32.xlu0 %v800_v26, %s2988_s22  ;;  %808 = vrot.lane.b32.xlu2 %v799_v37, %s2988_s22 }
 0x346   : > { %806 = vrot.lane.b32.xlu1 %v798_v25, %s2988_s22 }
 0x34d   : > { %2942 = vperm.xlu2 %2875, %v2941_v39  }
 0x34e   : > { %812 = vrot.lane.b32.xlu1 %v801_v44, %s2988_s22 }
 0x39f   : > { %v3501_v26 = vpop.permute.xlu2 %808 }
 0x3a0   : > { %5398 = vst [vmem:[#allocation84_spill] sm:$0xff] %v3501_v26 }
 0x3a7   : > { %v2943_v37 = vpop.permute.xlu2 %2942 }
 0x3a8   : > { %v3503_v3 = vunpack.i.h.bf16 %v2943_v37  ;;  %v3505_v20 = vunpack.i.l.bf16 %v2943_v37  ;;  %v2781_v37 = vunpack.c.h.bf16 %v2825_v41  ;;  %v2826_v41 = vld [vmem:[%s5180_s1 + $0xa0] sm:$0xff]  }
 0x3aa   : > { %5399 = vst [vmem:[#allocation85_spill] sm:$0xff] %v3503_v3  ;;  %v832_v25 = vmul.f32 %v3503_v3, %v3205_v1  ;;  %v830_v39 = vmul.f32 %v3505_v20, %v3205_v1  ;;  %v831_v44 = vmul.f32 %v3505_v20, %v3243_v38  ;;  %v2946_v26 = vpack.i.bf16 %v2781_v37, %v2780_v54 }
 0x3ab   : > { %5400 = vst [vmem:[#allocation86_spill] sm:$0xff] %v3505_v20  ;;  %v833_v28 = vmul.f32 %v3503_v3, %v3243_v38  ;;  %v2784_v37 = vunpack.c.l.bf16 %v2826_v41 }
 0x3ac   : > { %842 = vrot.lane.b32.xlu2 %v832_v25, %s2988_s22  ;;  %838 = vrot.lane.b32.xlu0 %v830_v39, %s2988_s22 }
 0x3ad   : > { %840 = vrot.lane.b32.xlu1 %v831_v44, %s2988_s22 }
 0x3b4   : > { %844 = vrot.lane.b32.xlu0 %v833_v28, %s2988_s22 }
 0x3b5   : > { %2947 = vperm.xlu1 %2859, %v2946_v26  }
 0x3b8   : > { %v3524_v29 = vpop.permute.xlu1 %806 }
 0x3b9   : > { %5402 = vst [vmem:[#allocation88_spill] sm:$0xff] %v3524_v29  ;;  %v3549_v29 = vpop.permute.xlu0 %810 }
 0x3ba   : > { %5407 = vst [vmem:[#allocation93_spill] sm:$0xff] %v3549_v29 }
 0x3c0   : > { %v3526_v57 = vpop.permute.xlu1 %812 }
 0x3c1   : > { %5403 = vst [vmem:[#allocation89_spill] sm:$0xff] %v3526_v57 }
 0x41e   : > { %v3551_v21 = vpop.permute.xlu0 %838 }
 0x41f   : > { %v3528_v25 = vpop.permute.xlu1 %840  ;;  %5408 = vst [vmem:[#allocation94_spill] sm:$0xff] %v3551_v21 }
 0x420   : > { %5404 = vst [vmem:[#allocation90_spill] sm:$0xff] %v3528_v25 }
 0x426   : > { %v3553_v27 = vpop.permute.xlu0 %844 }
 0x427   : > { %v2948_v39 = vpop.permute.xlu1 %2947  ;;  %5409 = vst [vmem:[#allocation95_spill] sm:$0xff] %v3553_v27  ;;  %v3576_v27 = vpop.permute.xlu2 %842 }
 0x428   : > { %v3530_v42 = vunpack.i.h.bf16 %v2948_v39  ;;  %v3532_v44 = vunpack.i.l.bf16 %v2948_v39  ;;  %v2785_v39 = vunpack.c.h.bf16 %v2826_v41  ;;  %5413 = vst [vmem:[#allocation99_spill] sm:$0xff] %v3576_v27 }
 0x42a   : > { %5405 = vst [vmem:[#allocation91_spill] sm:$0xff] %v3530_v42  ;;  %v864_v28 = vmul.f32 %v3530_v42, %v3207_v2  ;;  %v863_v26 = vmul.f32 %v3532_v44, %v3173_v50  ;;  %v862_v54 = vmul.f32 %v3532_v44, %v3207_v2  ;;  %v2951_v25 = vpack.i.bf16 %v2785_v39, %v2784_v37  ;;  %v2827_v37 = vld [vmem:[%s5180_s1 + $0xa8] sm:$0xff]  }
 0x42b   : > { %5406 = vst [vmem:[#allocation92_spill] sm:$0xff] %v3532_v44  ;;  %v865_v57 = vmul.f32 %v3530_v42, %v3173_v50  ;;  %v2788_v39 = vunpack.c.l.bf16 %v2827_v37 }
 0x42c   : > { %874 = vrot.lane.b32.xlu1 %v864_v28, %s2989_s29  ;;  %872 = vrot.lane.b32.xlu0 %v863_v26, %s2989_s29 }
 0x42d   : > { %870 = vrot.lane.b32.xlu2 %v862_v54, %s2989_s29 }
 0x434   : > { %2952 = vperm.xlu0 %2848, %v2951_v25  }
 0x435   : > { %876 = vrot.lane.b32.xlu2 %v865_v57, %s2989_s29 }
 0x487   : > { %v3578_v29 = vpop.permute.xlu2 %870 }
 0x488   : > { %5414 = vst [vmem:[#allocation100_spill] sm:$0xff] %v3578_v29 }
 0x48f   : > { %v3580_v9 = vpop.permute.xlu2 %876 }
 0x490   : > { %5415 = vst [vmem:[#allocation101_spill] sm:$0xff] %v3580_v9 }
 0x49e   : > { %v3555_v28 = vpop.permute.xlu0 %872  ;;  %v3603_v9 = vpop.permute.xlu1 %874 }
 0x49f   : > { %5410 = vst [vmem:[#allocation96_spill] sm:$0xff] %v3555_v28 }
 0x4a0   : > { %5419 = vst [vmem:[#allocation105_spill] sm:$0xff] %v3603_v9 }
 0x4a6   : > { %v2953_v26 = vpop.permute.xlu0 %2952 }
 0x4a7   : > { %v3557_v52 = vunpack.i.h.bf16 %v2953_v26  ;;  %v3559_v41 = vunpack.i.l.bf16 %v2953_v26  ;;  %v2789_v26 = vunpack.c.h.bf16 %v2827_v37  ;;  %v2828_v37 = vld [vmem:[%s5180_s1 + $0xb0] sm:$0xff]  }
 0x4a9   : > { %5411 = vst [vmem:[#allocation97_spill] sm:$0xff] %v3557_v52  ;;  %v896_v54 = vmul.f32 %v3557_v52, %v3078_v59  ;;  %v894_v25 = vmul.f32 %v3559_v41, %v3078_v59  ;;  %v895_v57 = vmul.f32 %v3559_v41, %v3076_v58  ;;  %v2956_v28 = vpack.i.bf16 %v2789_v26, %v2788_v39 }
 0x4aa   : > { %5412 = vst [vmem:[#allocation98_spill] sm:$0xff] %v3559_v41  ;;  %v897_v21 = vmul.f32 %v3557_v52, %v3076_v58  ;;  %v2792_v26 = vunpack.c.l.bf16 %v2828_v37 }
 0x4ab   : > { %906 = vrot.lane.b32.xlu0 %v896_v54, %s2990_s18  ;;  %902 = vrot.lane.b32.xlu1 %v894_v25, %s2990_s18 }
 0x4ac   : > { %904 = vrot.lane.b32.xlu2 %v895_v57, %s2990_s18 }
 0x4b3   : > { %908 = vrot.lane.b32.xlu1 %v897_v21, %s2990_s18 }
 0x4b4   : > { %2957 = vperm.xlu2 %2875, %v2956_v28  }
 0x506   : > { %v3582_v54 = vpop.permute.xlu2 %904 }
 0x507   : > { %5416 = vst [vmem:[#allocation102_spill] sm:$0xff] %v3582_v54 }
 0x50e   : > { %v2958_v25 = vpop.permute.xlu2 %2957 }
 0x50f   : > { %v3584_v34 = vunpack.i.h.bf16 %v2958_v25  ;;  %v3586_v57 = vunpack.i.l.bf16 %v2958_v25  ;;  %v2793_v25 = vunpack.c.h.bf16 %v2828_v37 }
 0x511   : > { %5417 = vst [vmem:[#allocation103_spill] sm:$0xff] %v3584_v34  ;;  %v929_v21 = vmul.f32 %v3584_v34, %v3102_v11  ;;  %v928_v28 = vmul.f32 %v3586_v57, %v3099_v10  ;;  %v927_v39 = vmul.f32 %v3586_v57, %v3102_v11  ;;  %v2961_v54 = vpack.i.bf16 %v2793_v25, %v2792_v26  ;;  %v2829_v26 = vld [vmem:[%s5180_s1 + $0xb8] sm:$0xff]  }
 0x512   : > { %5418 = vst [vmem:[#allocation104_spill] sm:$0xff] %v3586_v57  ;;  %v930_v29 = vmul.f32 %v3584_v34, %v3099_v10  ;;  %v2796_v25 = vunpack.c.l.bf16 %v2829_v26 }
 0x513   : > { %939 = vrot.lane.b32.xlu2 %v929_v21, %s2990_s18  ;;  %937 = vrot.lane.b32.xlu1 %v928_v28, %s2990_s18 }
 0x514   : > { %935 = vrot.lane.b32.xlu0 %v927_v39, %s2990_s18 }
 0x51b   : > { %2962 = vperm.xlu1 %2859, %v2961_v54  }
 0x51c   : > { %941 = vrot.lane.b32.xlu0 %v930_v29, %s2990_s18 }
 0x51d   : > { %v3605_v27 = vpop.permute.xlu1 %902 }
 0x51e   : > { %5420 = vst [vmem:[#allocation106_spill] sm:$0xff] %v3605_v27  ;;  %v3630_v27 = vpop.permute.xlu0 %906 }
 0x51f   : > { %5425 = vst [vmem:[#allocation111_spill] sm:$0xff] %v3630_v27 }
 0x525   : > { %v3607_v40 = vpop.permute.xlu1 %908 }
 0x526   : > { %5421 = vst [vmem:[#allocation107_spill] sm:$0xff] %v3607_v40 }
 0x585   : > { %v3609_v21 = vpop.permute.xlu1 %937 }
 0x586   : > { %5422 = vst [vmem:[#allocation108_spill] sm:$0xff] %v3609_v21  ;;  %v3632_v9 = vpop.permute.xlu0 %935 }
 0x587   : > { %5426 = vst [vmem:[#allocation112_spill] sm:$0xff] %v3632_v9  ;;  %v3657_v9 = vpop.permute.xlu2 %939 }
 0x588   : > { %5431 = vst [vmem:[#allocation117_spill] sm:$0xff] %v3657_v9  ;;  %v1298_v9 = vmul.f32 %v3346_v55, %v3076_v58 }
 0x58d   : > { %v2963_v28 = vpop.permute.xlu1 %2962 }
 0x58e   : > { %v3611_v52 = vunpack.i.h.bf16 %v2963_v28  ;;  %v3613_v37 = vunpack.i.l.bf16 %v2963_v28  ;;  %v2797_v28 = vunpack.c.h.bf16 %v2829_v26  ;;  %v2830_v26 = vld [vmem:[%s5180_s1 + $0xc0] sm:$0xff]  }
 0x590   : > { %5423 = vst [vmem:[#allocation109_spill] sm:$0xff] %v3611_v52  ;;  %v961_v39 = vmul.f32 %v3611_v52, %v3078_v59  ;;  %v959_v54 = vmul.f32 %v3613_v37, %v3078_v59  ;;  %v960_v29 = vmul.f32 %v3613_v37, %v3076_v58  ;;  %v2966_v21 = vpack.i.bf16 %v2797_v28, %v2796_v25 }
 0x591   : > { %5424 = vst [vmem:[#allocation110_spill] sm:$0xff] %v3613_v37  ;;  %v962_v40 = vmul.f32 %v3611_v52, %v3076_v58  ;;  %v3634_v37 = vpop.permute.xlu0 %941  ;;  %v2800_v28 = vunpack.c.l.bf16 %v2830_v26 }
 0x592   : > { %971 = vrot.lane.b32.xlu1 %v961_v39, %s2991_s27  ;;  %967 = vrot.lane.b32.xlu2 %v959_v54, %s2991_s27  ;;  %5427 = vst [vmem:[#allocation113_spill] sm:$0xff] %v3634_v37 }
 0x593   : > { %969 = vrot.lane.b32.xlu0 %v960_v29, %s2991_s27 }
 0x59a   : > { %973 = vrot.lane.b32.xlu2 %v962_v40, %s2991_s27 }
 0x59b   : > { %2967 = vperm.xlu0 %2848, %v2966_v21  }
 0x5ec   : > { %v3659_v27 = vpop.permute.xlu2 %967 }
 0x5ed   : > { %5432 = vst [vmem:[#allocation118_spill] sm:$0xff] %v3659_v27  ;;  %v1277_v27 = vmul.f32 %v3289_v22, %v3102_v11 }
 0x605   : > { %v3636_v39 = vpop.permute.xlu0 %969 }
 0x606   : > { %5428 = vst [vmem:[#allocation114_spill] sm:$0xff] %v3636_v39 }
 0x60d   : > { %v2968_v54 = vpop.permute.xlu0 %2967 }
 0x60e   : > { %v3638_v34 = vunpack.i.h.bf16 %v2968_v54  ;;  %v3640_v29 = vunpack.i.l.bf16 %v2968_v54  ;;  %v2801_v54 = vunpack.c.h.bf16 %v2830_v26 }
 0x610   : > { %5429 = vst [vmem:[#allocation115_spill] sm:$0xff] %v3638_v34  ;;  %v994_v40 = vmul.f32 %v3638_v34, %v3102_v11  ;;  %v993_v21 = vmul.f32 %v3640_v29, %v3099_v10  ;;  %v992_v25 = vmul.f32 %v3640_v29, %v3102_v11  ;;  %v2971_v39 = vpack.i.bf16 %v2801_v54, %v2800_v28 }
 0x611   : > { %5430 = vst [vmem:[#allocation116_spill] sm:$0xff] %v3640_v29  ;;  %v995_v37 = vmul.f32 %v3638_v34, %v3099_v10  ;;  %v3661_v29 = vpop.permute.xlu2 %973  ;;  %v1052_v28 = vmul.f32 %v3113_v16, %v3076_v58 }
 0x612   : > { %1004 = vrot.lane.b32.xlu0 %v994_v40, %s2991_s27  ;;  %1002 = vrot.lane.b32.xlu2 %v993_v21, %s2991_s27  ;;  %5433 = vst [vmem:[#allocation119_spill] sm:$0xff] %v3661_v29  ;;  %v1256_v29 = vmul.f32 %v3263_v47, %v3076_v58 }
 0x613   : > { %1000 = vrot.lane.b32.xlu1 %v992_v25, %s2991_s27 }
 0x61a   : > { %2972 = vperm.xlu2 %2875, %v2971_v39  }
 0x61b   : > { %1006 = vrot.lane.b32.xlu1 %v995_v37, %s2991_s27 }
 0x66c   : > { %v3663_v40 = vpop.permute.xlu2 %1002 }
 0x66d   : > { %5434 = vst [vmem:[#allocation120_spill] sm:$0xff] %v3663_v40  ;;  %v1253_v40 = vmul.f32 %v3278_v8, %v3078_v59 }
 0x674   : > { %v2973_v21 = vpop.permute.xlu2 %2972 }
 0x675   : > { %v3665_v52 = vunpack.i.h.bf16 %v2973_v21  ;;  %v3667_v26 = vunpack.i.l.bf16 %v2973_v21  ;;  %v1051_v21 = vmul.f32 %v3113_v16, %v3078_v59  ;;  %v1232_v16 = vmul.f32 %v3252_v12, %v3099_v10 }
 0x677   : > { %5435 = vst [vmem:[#allocation121_spill] sm:$0xff] %v3665_v52  ;;  %v1026_v25 = vmul.f32 %v3665_v52, %v3078_v59  ;;  %v1024_v39 = vmul.f32 %v3667_v26, %v3078_v59  ;;  %v1025_v37 = vmul.f32 %v3667_v26, %v3076_v58  ;;  %v1027_v54 = vmul.f32 %v3665_v52, %v3076_v58 }
 0x678   : > { %5436 = vst [vmem:[#allocation122_spill] sm:$0xff] %v3667_v26 }
 0x679   : > { %1036 = vrot.lane.b32.xlu2 %v1026_v25, %s2992_s4  ;;  %1032 = vrot.lane.b32.xlu0 %v1024_v39, %s2992_s4  ;;  %v1073_v25 = vmul.f32 %v3082_v0, %v3102_v11  ;;  %v1053_v39 = vmul.f32 %v3111_v15, %v3078_v59 }
 0x67a   : > { %1034 = vrot.lane.b32.xlu1 %v1025_v37, %s2992_s4  ;;  %v1054_v37 = vmul.f32 %v3111_v15, %v3076_v58  ;;  %v3776_v15 = vpop.permute.xlu1 %971 }
 0x67b   : > { %5437 = vst [vmem:[#allocation123_spill] sm:$0xff] %v3776_v15  ;;  %v1255_v15 = vmul.f32 %v3263_v47, %v3078_v59  ;;  %v1047_v47 = vmul.f32 %v3097_v7, %v3090_v4 }
 0x681   : > { %1061 = vrot.lane.b32.xlu2 %v1052_v28, %s2985_s19  ;;  %1038 = vrot.lane.b32.xlu0 %v1027_v54, %s2992_s4  ;;  %v1076_v28 = vmul.f32 %v3080_v63, %v3099_v10  ;;  %v1074_v54 = vmul.f32 %v3082_v0, %v3099_v10 }
 0x682   : > { %1059 = vrot.lane.b32.xlu1 %v1051_v21, %s2985_s19  ;;  %v1075_v21 = vmul.f32 %v3080_v63, %v3102_v11 }
 0x689   : > { %1081 = vrot.lane.b32.xlu2 %v1073_v25, %s2985_s19  ;;  %1063 = vrot.lane.b32.xlu0 %v1053_v39, %s2985_s19  ;;  %v1097_v25 = vmul.f32 %v3107_v13, %v3078_v59  ;;  %v1095_v39 = vmul.f32 %v3109_v14, %v3078_v59 }
 0x68a   : > { %1065 = vrot.lane.b32.xlu1 %v1054_v37, %s2985_s19  ;;  %v1096_v37 = vmul.f32 %v3109_v14, %v3076_v58 }
 0x691   : > { %1087 = vrot.lane.b32.xlu2 %v1076_v28, %s2985_s19  ;;  %1083 = vrot.lane.b32.xlu0 %v1074_v54, %s2985_s19  ;;  %v1118_v28 = vmul.f32 %v3142_v32, %v3099_v10  ;;  %v1098_v54 = vmul.f32 %v3107_v13, %v3076_v58 }
 0x692   : > { %1085 = vrot.lane.b32.xlu1 %v1075_v21, %s2985_s19  ;;  %v1117_v21 = vmul.f32 %v3142_v32, %v3102_v11 }
 0x699   : > { %1107 = vrot.lane.b32.xlu2 %v1097_v25, %s2986_s20  ;;  %1103 = vrot.lane.b32.xlu0 %v1095_v39, %s2986_s20  ;;  %v1143_v25 = vmul.f32 %v3171_v49, %v3207_v2  ;;  %v1119_v39 = vmul.f32 %v3140_v31, %v3102_v11 }
 0x69a   : > { %1105 = vrot.lane.b32.xlu1 %v1096_v37, %s2986_s20  ;;  %v1120_v37 = vmul.f32 %v3140_v31, %v3099_v10 }
 0x6a1   : > { %1127 = vrot.lane.b32.xlu2 %v1118_v28, %s2986_s20  ;;  %1109 = vrot.lane.b32.xlu0 %v1098_v54, %s2986_s20  ;;  %v1146_v28 = vmul.f32 %v3169_v48, %v3173_v50  ;;  %v1144_v54 = vmul.f32 %v3171_v49, %v3173_v50 }
 0x6a2   : > { %1125 = vrot.lane.b32.xlu1 %v1117_v21, %s2986_s20  ;;  %v1145_v21 = vmul.f32 %v3169_v48, %v3207_v2 }
 0x6a9   : > { %1151 = vrot.lane.b32.xlu2 %v1143_v25, %s2985_s19  ;;  %1129 = vrot.lane.b32.xlu0 %v1119_v39, %s2986_s20  ;;  %v1167_v25 = vmul.f32 %v3192_v56, %v3205_v1  ;;  %v1165_v39 = vmul.f32 %v3164_v45, %v3205_v1 }
 0x6aa   : > { %1131 = vrot.lane.b32.xlu1 %v1120_v37, %s2986_s20  ;;  %v1166_v37 = vmul.f32 %v3164_v45, %v3243_v38 }
 0x6b1   : > { %1157 = vrot.lane.b32.xlu2 %v1146_v28, %s2985_s19  ;;  %1153 = vrot.lane.b32.xlu0 %v1144_v54, %s2985_s19  ;;  %v1188_v28 = vmul.f32 %v3220_v18, %v3173_v50  ;;  %v1168_v54 = vmul.f32 %v3192_v56, %v3243_v38 }
 0x6b2   : > { %1155 = vrot.lane.b32.xlu1 %v1145_v21, %s2985_s19  ;;  %v1187_v21 = vmul.f32 %v3220_v18, %v3207_v2 }
 0x6b9   : > { %1177 = vrot.lane.b32.xlu2 %v1167_v25, %s2985_s19  ;;  %1173 = vrot.lane.b32.xlu0 %v1165_v39, %s2985_s19  ;;  %v1209_v25 = vmul.f32 %v3217_v17, %v3205_v1  ;;  %v1189_v39 = vmul.f32 %v3202_v62, %v3207_v2 }
 0x6ba   : > { %1175 = vrot.lane.b32.xlu1 %v1166_v37, %s2985_s19  ;;  %v1190_v37 = vmul.f32 %v3202_v62, %v3173_v50 }
 0x6c1   : > { %1197 = vrot.lane.b32.xlu2 %v1188_v28, %s2986_s20  ;;  %1179 = vrot.lane.b32.xlu0 %v1168_v54, %s2985_s19  ;;  %v1212_v28 = vmul.f32 %v3228_v23, %v3243_v38  ;;  %v1210_v54 = vmul.f32 %v3217_v17, %v3243_v38 }
 0x6c2   : > { %1195 = vrot.lane.b32.xlu1 %v1187_v21, %s2986_s20  ;;  %v1211_v21 = vmul.f32 %v3228_v23, %v3205_v1 }
 0x6c9   : > { %1217 = vrot.lane.b32.xlu2 %v1209_v25, %s2986_s20  ;;  %1199 = vrot.lane.b32.xlu0 %v1189_v39, %s2986_s20  ;;  %v1233_v39 = vmul.f32 %v3265_v51, %v3102_v11 }
 0x6ca   : > { %1201 = vrot.lane.b32.xlu1 %v1190_v37, %s2986_s20  ;;  %v1231_v37 = vmul.f32 %v3252_v12, %v3102_v11 }
 0x6d1   : > { %1223 = vrot.lane.b32.xlu2 %v1212_v28, %s2986_s20  ;;  %1219 = vrot.lane.b32.xlu0 %v1210_v54, %s2986_s20  ;;  %v3789_v28 = vpop.permute.xlu1 %1000 }
 0x6d2   : > { %1221 = vrot.lane.b32.xlu1 %v1211_v21, %s2986_s20  ;;  %5439 = vst [vmem:[#allocation125_spill] sm:$0xff] %v3789_v28  ;;  %v1254_v21 = vmul.f32 %v3278_v8, %v3076_v58  ;;  %v1275_v28 = vmul.f32 %v3276_v5, %v3102_v11  ;;  %v1319_v8 = vmul.f32 %v3385_v43, %v3102_v11 }
 0x6d3   : > { %v3779_v25 = vpop.permute.xlu2 %1036 }
 0x6d4   : > { %5438 = vst [vmem:[#allocation124_spill] sm:$0xff] %v3779_v25  ;;  %v1234_v25 = vmul.f32 %v3265_v51, %v3099_v10 }
 0x6d9   : > { %1243 = vrot.lane.b32.xlu2 %v1233_v39, %s2987_s21  ;;  %1239 = vrot.lane.b32.xlu0 %v1231_v37, %s2987_s21  ;;  %v3801_v39 = vpop.permute.xlu0 %1004 }
 0x6da   : > { %1241 = vrot.lane.b32.xlu1 %v1232_v16, %s2987_s21  ;;  %5440 = vst [vmem:[#allocation126_spill] sm:$0xff] %v3801_v39  ;;  %v3803_v16 = vpop.permute.xlu1 %1006  ;;  %v1278_v39 = vmul.f32 %v3289_v22, %v3099_v10  ;;  %v1320_v22 = vmul.f32 %v3385_v43, %v3099_v10 }
 0x6db   : > { %v1062_v54 = vpop.permute.xlu2 %1061  ;;  %5441 = vst [vmem:[#allocation127_spill] sm:$0xff] %v3803_v16  ;;  %v1276_v16 = vmul.f32 %v3276_v5, %v3099_v10  ;;  %v1321_v5 = vmul.f32 %v3383_v36, %v3102_v11 }
 0x6e1   : > { %1263 = vrot.lane.b32.xlu2 %v1254_v21, %s2988_s22  ;;  %1245 = vrot.lane.b32.xlu0 %v1234_v25, %s2987_s21 }
 0x6e2   : > { %1261 = vrot.lane.b32.xlu1 %v1253_v40, %s2988_s22 }
 0x6e3   : > { %v1082_v37 = vpop.permute.xlu2 %1081 }
 0x6e9   : > { %1283 = vrot.lane.b32.xlu2 %v1275_v28, %s2988_s22  ;;  %1265 = vrot.lane.b32.xlu0 %v1255_v15, %s2988_s22 }
 0x6ea   : > { %1267 = vrot.lane.b32.xlu1 %v1256_v29, %s2988_s22 }
 0x6eb   : > { %v1088_v40 = vpop.permute.xlu2 %1087  ;;  %v3814_v25 = vpop.permute.xlu0 %1032 }
 0x6ec   : > { %5442 = vst [vmem:[#allocation128_spill] sm:$0xff] %v3814_v25  ;;  %v3816_v21 = vpop.permute.xlu1 %1034  ;;  %v1299_v25 = vmul.f32 %v3344_v19, %v3078_v59 }
 0x6ed   : > { %5443 = vst [vmem:[#allocation129_spill] sm:$0xff] %v3816_v21  ;;  %v1297_v21 = vmul.f32 %v3346_v55, %v3078_v59  ;;  %v1341_v55 = vmul.f32 %v3424_v24, %v3205_v1 }
 0x6f1   : > { %1289 = vrot.lane.b32.xlu2 %v1278_v39, %s2988_s22  ;;  %1285 = vrot.lane.b32.xlu0 %v1276_v16, %s2988_s22 }
 0x6f2   : > { %1287 = vrot.lane.b32.xlu1 %v1277_v27, %s2988_s22 }
 0x6f3   : > { %v1108_v15 = vpop.permute.xlu2 %1107  ;;  %v3827_v29 = vpop.permute.xlu0 %1038 }
 0x6f4   : > { %5444 = vst [vmem:[#allocation130_spill] sm:$0xff] %v3827_v29  ;;  %v1060_v28 = vpop.permute.xlu1 %1059  ;;  %v1300_v29 = vmul.f32 %v3344_v19, %v3076_v58  ;;  %v1322_v19 = vmul.f32 %v3383_v36, %v3099_v10  ;;  %v1344_v36 = vmul.f32 %v3422_v30, %v3243_v38 }
 0x6f5   : > { %v1067_v43 = vsel %vm342_vm0, %v1060_v28, %v1062_v54 }
 0x6f9   : > { %1309 = vrot.lane.b32.xlu2 %v1299_v25, %s2989_s29  ;;  %1305 = vrot.lane.b32.xlu0 %v1297_v21, %s2989_s29 }
 0x6fa   : > { %1307 = vrot.lane.b32.xlu1 %v1298_v9, %s2989_s29 }
 0x6fb   : > { %v1128_v27 = vpop.permute.xlu2 %1127  ;;  %v1064_v39 = vpop.permute.xlu0 %1063 }
 0x6fc   : > { %v1066_v16 = vpop.permute.xlu1 %1065 }
 0x701   : > { %1329 = vrot.lane.b32.xlu2 %v1320_v22, %s2989_s29  ;;  %1311 = vrot.lane.b32.xlu0 %v1300_v29, %s2989_s29 }
 0x702   : > { %1327 = vrot.lane.b32.xlu1 %v1319_v8, %s2989_s29 }
 0x703   : > { %v3847_v25 = vpop.permute.xlu2 %1151  ;;  %v1084_v9 = vpop.permute.xlu0 %1083 }
 0x704   : > { %v1086_v21 = vpop.permute.xlu1 %1085  ;;  %v1089_v51 = vsel %vm342_vm0, %v1082_v37, %v1084_v9 }
 0x709   : > { %1349 = vrot.lane.b32.xlu2 %v1341_v55, %s2987_s21  ;;  %1331 = vrot.lane.b32.xlu0 %v1321_v5, %s2989_s29  ;;  %v1342_v55 = vmul.f32 %v3424_v24, %v3243_v38  ;;  %v1071_v5 = vadd.f32 %v1067_v43, %v1047_v47  ;;  %v1068_v24 = vsel %vm342_vm0, %v1064_v39, %v1066_v16 }
 0x70a   : > { %1333 = vrot.lane.b32.xlu1 %v1322_v19, %s2989_s29  ;;  %v1343_v19 = vmul.f32 %v3422_v30, %v3205_v1  ;;  %v1048_v43 = vmul.f32 %v3095_v6, %v3090_v4 }
 0x70b   : > { %v3858_v8 = vpop.permute.xlu2 %1157  ;;  %v1104_v22 = vpop.permute.xlu0 %1103  ;;  %v1093_v54 = vadd.f32 %v1089_v51, %v1071_v5  ;;  %v1365_v51 = vmul.f32 %v3449_v35, %v3207_v2 }
 0x70c   : > { %5445 = vst [vmem:[#allocation131_spill] sm:$0xff] %v3858_v8  ;;  %v1106_v29 = vpop.permute.xlu1 %1105 }
 0x70d   : > { %v1111_v8 = vsel %vm414_vm1, %v1104_v22, %v1106_v29  ;;  %v1363_v29 = vmul.f32 %v3451_v53, %v3207_v2 }
 0x70e   : > { %v1115_v9 = vadd.f32 %v1111_v8, %v1093_v54  ;;  %v1364_v8 = vmul.f32 %v3451_v53, %v3173_v50  ;;  %v1539_v53 = vmul.f32 %v3667_v26, %v3102_v11 }
 0x711   : > { %1355 = vrot.lane.b32.xlu2 %v1344_v36, %s2987_s21  ;;  %1351 = vrot.lane.b32.xlu0 %v1342_v55, %s2987_s21  ;;  %v1090_v36 = vsel %vm342_vm0, %v1086_v21, %v1088_v40  ;;  %v1072_v55 = vadd.f32 %v1068_v24, %v1048_v43  ;;  %v1407_v43 = vmul.f32 %v3505_v20, %v3207_v2 }
 0x712   : > { %1353 = vrot.lane.b32.xlu1 %v1343_v19, %s2987_s21  ;;  %v1385_v19 = vmul.f32 %v3478_v33, %v3205_v1 }
 0x713   : > { %v3874_v37 = vpop.permute.xlu2 %1177  ;;  %v1110_v28 = vpop.permute.xlu0 %1109  ;;  %v1094_v4 = vadd.f32 %v1090_v36, %v1072_v55  ;;  %v1410_v55 = vmul.f32 %v3503_v3, %v3173_v50 }
 0x714   : > { %v1126_v7 = vpop.permute.xlu1 %1125 }
 0x715   : > { %v1133_v47 = vsel %vm414_vm1, %v1126_v7, %v1128_v27  ;;  %v1112_v7 = vsel %vm414_vm1, %v1108_v15, %v1110_v28  ;;  %v1366_v15 = vmul.f32 %v3449_v35, %v3173_v50 }
 0x716   : > { %v1137_v22 = vadd.f32 %v1133_v47, %v1115_v9  ;;  %v1116_v16 = vadd.f32 %v1112_v7, %v1094_v4  ;;  %v1409_v7 = vmul.f32 %v3503_v3, %v3207_v2  ;;  %v1474_v3 = vmul.f32 %v3586_v57, %v3076_v58 }
 0x718   : > { %v3888_v39 = vadd.f32 %v3196_v60, %v1137_v22  ;;  %v1386_v60 = vmul.f32 %v3478_v33, %v3243_v38  ;;  %v1387_v22 = vmul.f32 %v3476_v46, %v3205_v1 }
 0x719   : > { %1375 = vrot.lane.b32.xlu2 %v1365_v51, %s2988_s22  ;;  %1371 = vrot.lane.b32.xlu0 %v1363_v29, %s2988_s22 }
 0x71a   : > { %1373 = vrot.lane.b32.xlu1 %v1364_v8, %s2988_s22  ;;  %v1408_v8 = vmul.f32 %v3505_v20, %v3173_v50 }
 0x71b   : > { %v3894_v40 = vpop.permute.xlu2 %1197  ;;  %v1130_v27 = vpop.permute.xlu0 %1129 }
 0x71c   : > { %v1132_v24 = vpop.permute.xlu1 %1131 }
 0x71d   : > { %v1134_v21 = vsel %vm414_vm1, %v1130_v27, %v1132_v24  ;;  %v1431_v24 = vmul.f32 %v3530_v42, %v3205_v1 }
 0x71e   : > { %v1138_v5 = vadd.f32 %v1134_v21, %v1116_v16  ;;  %v1429_v21 = vmul.f32 %v3532_v44, %v3205_v1 }
 0x720   : > { %v3904_v54 = vadd.f32 %v3200_v61, %v1138_v5  ;;  %v1388_v61 = vmul.f32 %v3476_v46, %v3243_v38  ;;  %v1430_v5 = vmul.f32 %v3532_v44, %v3243_v38  ;;  %v5448_v44 = vld [vmem:[#allocation109_spill] sm:$0xff]  ;;  %v5451_v46 = vld [vmem:[#allocation116_spill] sm:$0xff] }
 0x721   : > { %1395 = vrot.lane.b32.xlu2 %v1386_v60, %s2988_s22  ;;  %1377 = vrot.lane.b32.xlu0 %v1366_v15, %s2988_s22  ;;  %v1497_v20 = vmul.f32 %v5448_v44, %v3102_v11  ;;  %v1518_v35 = vmul.f32 %v5451_v46, %v3076_v58  ;;  %v1498_v30 = vmul.f32 %v5448_v44, %v3099_v10 }
 0x722   : > { %1393 = vrot.lane.b32.xlu1 %v1385_v19, %s2988_s22  ;;  %v1519_v44 = vmul.f32 %v3638_v34, %v3078_v59 }
 0x723   : > { %v3909_v28 = vpop.permute.xlu2 %1217  ;;  %v3911_v9 = vpop.permute.xlu0 %1153 }
 0x724   : > { %v3913_v47 = vpop.permute.xlu1 %1155 }
 0x729   : > { %1415 = vrot.lane.b32.xlu2 %v1407_v43, %s2989_s29  ;;  %1397 = vrot.lane.b32.xlu0 %v1387_v22, %s2988_s22  ;;  %v1452_v43 = vmul.f32 %v3559_v41, %v3099_v10  ;;  %v1432_v22 = vmul.f32 %v3530_v42, %v3243_v38 }
 0x72a   : > { %1399 = vrot.lane.b32.xlu1 %v1388_v61, %s2988_s22  ;;  %v1451_v61 = vmul.f32 %v3559_v41, %v3102_v11  ;;  %v5447_v41 = vld [vmem:[#allocation103_spill] sm:$0xff] }
 0x72b   : > { %v3924_v36 = vpop.permute.xlu2 %1223  ;;  %v3926_v51 = vpop.permute.xlu0 %1173  ;;  %v1476_v42 = vmul.f32 %v5447_v41, %v3076_v58 }
 0x72c   : > { %v3928_v29 = vpop.permute.xlu1 %1175 }
 0x731   : > { %1421 = vrot.lane.b32.xlu2 %v1410_v55, %s2989_s29  ;;  %1417 = vrot.lane.b32.xlu0 %v1408_v8, %s2989_s29 }
 0x732   : > { %1419 = vrot.lane.b32.xlu1 %v1409_v7, %s2989_s29 }
 0x733   : > { %v3939_v4 = vpop.permute.xlu2 %1243  ;;  %v3941_v27 = vpop.permute.xlu0 %1179 }
 0x734   : > { %v3943_v16 = vpop.permute.xlu1 %1195 }
 0x739   : > { %1441 = vrot.lane.b32.xlu2 %v1431_v24, %s2989_s29  ;;  %1437 = vrot.lane.b32.xlu0 %v1429_v21, %s2989_s29  ;;  %v1473_v24 = vmul.f32 %v3586_v57, %v3078_v59  ;;  %v5446_v21 = vld [vmem:[#allocation97_spill] sm:$0xff]  ;;  %v5449_v57 = vld [vmem:[#allocation110_spill] sm:$0xff] }
 0x73a   : > { %1439 = vrot.lane.b32.xlu1 %v1430_v5, %s2989_s29  ;;  %v1453_v5 = vmul.f32 %v5446_v21, %v3102_v11  ;;  %v1454_v6 = vmul.f32 %v5446_v21, %v3099_v10  ;;  %v1475_v21 = vmul.f32 %v5447_v41, %v3078_v59  ;;  %v1495_v33 = vmul.f32 %v5449_v57, %v3102_v11 }
 0x73b   : > { %v3954_v60 = vpop.permute.xlu2 %1263  ;;  %v3956_v15 = vpop.permute.xlu0 %1199  ;;  %v1496_v41 = vmul.f32 %v5449_v57, %v3099_v10  ;;  %v1517_v57 = vmul.f32 %v5451_v46, %v3078_v59  ;;  %v1520_v46 = vmul.f32 %v3638_v34, %v3076_v58  ;;  %v1541_v34 = vmul.f32 %v3665_v52, %v3102_v11 }
 0x73c   : > { %v3958_v19 = vpop.permute.xlu1 %1201 }
 0x741   : > { %1461 = vrot.lane.b32.xlu2 %v1452_v43, %s2990_s18  ;;  %1443 = vrot.lane.b32.xlu0 %v1432_v22, %s2989_s29 }
 0x742   : > { %1459 = vrot.lane.b32.xlu1 %v1451_v61, %s2990_s18 }
 0x743   : > { %v3969_v55 = vpop.permute.xlu2 %1283  ;;  %v3971_v8 = vpop.permute.xlu0 %1219 }
 0x744   : > { %v3973_v7 = vpop.permute.xlu1 %1221 }
 0x749   : > { %1481 = vrot.lane.b32.xlu2 %v1473_v24, %s2991_s27  ;;  %1463 = vrot.lane.b32.xlu0 %v1453_v5, %s2990_s18 }
 0x74a   : > { %1465 = vrot.lane.b32.xlu1 %v1454_v6, %s2990_s18 }
 0x74b   : > { %v3984_v43 = vpop.permute.xlu2 %1289  ;;  %v3986_v22 = vpop.permute.xlu0 %1239 }
 0x74c   : > { %v3988_v61 = vpop.permute.xlu1 %1241 }
 0x751   : > { %1487 = vrot.lane.b32.xlu2 %v1476_v42, %s2991_s27  ;;  %1483 = vrot.lane.b32.xlu0 %v1474_v3, %s2991_s27 }
 0x752   : > { %1485 = vrot.lane.b32.xlu1 %v1475_v21, %s2991_s27 }
 0x753   : > { %v3999_v6 = vpop.permute.xlu2 %1309  ;;  %v4001_v24 = vpop.permute.xlu0 %1245 }
 0x754   : > { %v4003_v5 = vpop.permute.xlu1 %1261 }
 0x759   : > { %1507 = vrot.lane.b32.xlu2 %v1497_v20, %s2991_s27  ;;  %1503 = vrot.lane.b32.xlu0 %v1495_v33, %s2991_s27 }
 0x75a   : > { %1505 = vrot.lane.b32.xlu1 %v1496_v41, %s2991_s27 }
 0x75b   : > { %v4014_v3 = vpop.permute.xlu2 %1329  ;;  %v4016_v42 = vpop.permute.xlu0 %1265 }
 0x75c   : > { %5450 = vst [vmem:[#allocation132_spill] sm:$0xff] %v4014_v3  ;;  %v4018_v21 = vpop.permute.xlu1 %1267  ;;  %v1540_v3 = vmul.f32 %v3667_v26, %v3099_v10  ;;  %v1571_v26 = vmul.f32 %v3082_v0, %v3207_v2 }
 0x761   : > { %1527 = vrot.lane.b32.xlu2 %v1518_v35, %s2992_s4  ;;  %1509 = vrot.lane.b32.xlu0 %v1498_v30, %s2991_s27 }
 0x762   : > { %1525 = vrot.lane.b32.xlu1 %v1517_v57, %s2992_s4 }
 0x763   : > { %v4029_v33 = vpop.permute.xlu2 %1349  ;;  %v4031_v20 = vpop.permute.xlu0 %1285 }
 0x764   : > { %5452 = vst [vmem:[#allocation133_spill] sm:$0xff] %v4029_v33  ;;  %v4033_v41 = vpop.permute.xlu1 %1287  ;;  %v1542_v33 = vmul.f32 %v3665_v52, %v3099_v10  ;;  %v1572_v52 = vmul.f32 %v3082_v0, %v3173_v50  ;;  %v1593_v0 = vmul.f32 %v3109_v14, %v3205_v1 }
 0x769   : > { %1547 = vrot.lane.b32.xlu2 %v1539_v53, %s2992_s4  ;;  %1529 = vrot.lane.b32.xlu0 %v1519_v44, %s2992_s4 }
 0x76a   : > { %1531 = vrot.lane.b32.xlu1 %v1520_v46, %s2992_s4 }
 0x76b   : > { %v4044_v35 = vpop.permute.xlu2 %1355  ;;  %v4046_v30 = vpop.permute.xlu0 %1305 }
 0x76c   : > { %5453 = vst [vmem:[#allocation134_spill] sm:$0xff] %v4044_v35  ;;  %v4048_v57 = vpop.permute.xlu1 %1307  ;;  %v1573_v35 = vmul.f32 %v3080_v63, %v3207_v2 }
 0x771   : > { %1553 = vrot.lane.b32.xlu2 %v1542_v33, %s2992_s4  ;;  %1549 = vrot.lane.b32.xlu0 %v1540_v3, %s2992_s4 }
 0x772   : > { %1551 = vrot.lane.b32.xlu1 %v1541_v34, %s2992_s4 }
 0x773   : > { %v4059_v46 = vpop.permute.xlu2 %1375  ;;  %v4061_v53 = vpop.permute.xlu0 %1311 }
 0x774   : > { %5454 = vst [vmem:[#allocation135_spill] sm:$0xff] %v4059_v46  ;;  %v4063_v44 = vpop.permute.xlu1 %1327  ;;  %v1594_v46 = vmul.f32 %v3109_v14, %v3243_v38  ;;  %v1596_v14 = vmul.f32 %v3107_v13, %v3243_v38 }
 0x775   : > { %5455 = vst [vmem:[#allocation136_spill] sm:$0xff] %v4063_v44  ;;  %v1574_v44 = vmul.f32 %v3080_v63, %v3173_v50  ;;  %v1595_v63 = vmul.f32 %v3107_v13, %v3205_v1  ;;  %v1617_v13 = vmul.f32 %v3140_v31, %v3207_v2 }
 0x779   : > { %1583 = vrot.lane.b32.xlu2 %v1573_v35, %s2985_s19  ;;  %1579 = vrot.lane.b32.xlu0 %v1571_v26, %s2985_s19 }
 0x77a   : > { %1581 = vrot.lane.b32.xlu1 %v1572_v52, %s2985_s19 }
 0x77b   : > { %v4074_v34 = vpop.permute.xlu2 %1395  ;;  %v4076_v3 = vpop.permute.xlu0 %1331 }
 0x77c   : > { %5456 = vst [vmem:[#allocation137_spill] sm:$0xff] %v4074_v34  ;;  %v4078_v33 = vpop.permute.xlu1 %1333  ;;  %v1615_v34 = vmul.f32 %v3142_v32, %v3207_v2 }
 0x781   : > { %1603 = vrot.lane.b32.xlu2 %v1594_v46, %s2985_s19  ;;  %1585 = vrot.lane.b32.xlu0 %v1574_v44, %s2985_s19 }
 0x782   : > { %1601 = vrot.lane.b32.xlu1 %v1593_v0, %s2985_s19 }
 0x783   : > { %v4089_v52 = vpop.permute.xlu2 %1415  ;;  %v4091_v26 = vpop.permute.xlu0 %1351 }
 0x784   : > { %5457 = vst [vmem:[#allocation138_spill] sm:$0xff] %v4089_v52  ;;  %v4093_v35 = vpop.permute.xlu1 %1353  ;;  %v1618_v52 = vmul.f32 %v3140_v31, %v3173_v50 }
 0x785   : > { %5458 = vst [vmem:[#allocation139_spill] sm:$0xff] %v4093_v35  ;;  %v1616_v35 = vmul.f32 %v3142_v32, %v3173_v50  ;;  %v5466_v32 = vld [vmem:[#allocation16_spill] sm:$0xff] }
 0x786   : > { %v1638_v31 = vmul.f32 %v5466_v32, %v3076_v58 }
 0x789   : > { %1623 = vrot.lane.b32.xlu2 %v1615_v34, %s2986_s20  ;;  %1605 = vrot.lane.b32.xlu0 %v1595_v63, %s2985_s19 }
 0x78a   : > { %1607 = vrot.lane.b32.xlu1 %v1596_v14, %s2985_s19 }
 0x78b   : > { %v4104_v0 = vpop.permute.xlu2 %1421  ;;  %v4106_v46 = vpop.permute.xlu0 %1371 }
 0x78c   : > { %5459 = vst [vmem:[#allocation140_spill] sm:$0xff] %v4104_v0  ;;  %v4108_v44 = vpop.permute.xlu1 %1373  ;;  %v5465_v0 = vld [vmem:[#allocation17_spill] sm:$0xff] }
 0x78d   : > { %5460 = vst [vmem:[#allocation141_spill] sm:$0xff] %v4106_v46  ;;  %v1639_v38 = vmul.f32 %v5465_v0, %v3078_v59  ;;  %v1637_v46 = vmul.f32 %v5466_v32, %v3078_v59  ;;  %v1659_v32 = vmul.f32 %v3171_v49, %v3102_v11 }
 0x78e   : > { %5461 = vst [vmem:[#allocation142_spill] sm:$0xff] %v4108_v44 }
 0x791   : > { %1629 = vrot.lane.b32.xlu2 %v1618_v52, %s2986_s20  ;;  %1625 = vrot.lane.b32.xlu0 %v1616_v35, %s2986_s20 }
 0x792   : > { %1627 = vrot.lane.b32.xlu1 %v1617_v13, %s2986_s20 }
 0x793   : > { %v4119_v63 = vpop.permute.xlu2 %1441  ;;  %v4121_v14 = vpop.permute.xlu0 %1377 }
 0x794   : > { %5462 = vst [vmem:[#allocation143_spill] sm:$0xff] %v4119_v63  ;;  %v4123_v34 = vpop.permute.xlu1 %1393  ;;  %v1660_v63 = vmul.f32 %v3171_v49, %v3099_v10  ;;  %v1662_v49 = vmul.f32 %v3169_v48, %v3099_v10 }
 0x795   : > { %5463 = vst [vmem:[#allocation144_spill] sm:$0xff] %v4121_v14 }
 0x796   : > { %5464 = vst [vmem:[#allocation145_spill] sm:$0xff] %v4123_v34  ;;  %v1640_v34 = vmul.f32 %v5465_v0, %v3076_v58  ;;  %v1661_v0 = vmul.f32 %v3169_v48, %v3102_v11  ;;  %v1683_v48 = vmul.f32 %v3192_v56, %v3078_v59 }
 0x799   : > { %1649 = vrot.lane.b32.xlu2 %v1639_v38, %s2987_s21  ;;  %1645 = vrot.lane.b32.xlu0 %v1637_v46, %s2987_s21 }
 0x79a   : > { %1647 = vrot.lane.b32.xlu1 %v1638_v31, %s2987_s21 }
 0x79b   : > { %v4134_v13 = vpop.permute.xlu2 %1461  ;;  %v4136_v52 = vpop.permute.xlu0 %1397 }
 0x79c   : > { %5467 = vst [vmem:[#allocation146_spill] sm:$0xff] %v4134_v13  ;;  %v4138_v35 = vpop.permute.xlu1 %1399  ;;  %v1681_v13 = vmul.f32 %v3164_v45, %v3078_v59 }
 0x79d   : > { %5468 = vst [vmem:[#allocation147_spill] sm:$0xff] %v4136_v52  ;;  %v5485_v52 = vld [vmem:[#allocation34_spill] sm:$0xff] }
 0x79e   : > { %5469 = vst [vmem:[#allocation148_spill] sm:$0xff] %v4138_v35 }
 0x7a1   : > { %1669 = vrot.lane.b32.xlu2 %v1660_v63, %s2987_s21  ;;  %1651 = vrot.lane.b32.xlu0 %v1640_v34, %s2987_s21 }
 0x7a2   : > { %1667 = vrot.lane.b32.xlu1 %v1659_v32, %s2987_s21 }
 0x7a3   : > { %v4149_v31 = vpop.permute.xlu2 %1481  ;;  %v4151_v38 = vpop.permute.xlu0 %1417 }
 0x7a4   : > { %5470 = vst [vmem:[#allocation149_spill] sm:$0xff] %v4149_v31  ;;  %v4153_v46 = vpop.permute.xlu1 %1419  ;;  %v1684_v31 = vmul.f32 %v3192_v56, %v3076_v58  ;;  %v5481_v56 = vld [vmem:[#allocation45_spill] sm:$0xff] }
 0x7a5   : > { %5471 = vst [vmem:[#allocation150_spill] sm:$0xff] %v4151_v38  ;;  %v5483_v38 = vld [vmem:[#allocation37_spill] sm:$0xff] }
 0x7a6   : > { %5472 = vst [vmem:[#allocation151_spill] sm:$0xff] %v4153_v46  ;;  %v1682_v46 = vmul.f32 %v3164_v45, %v3076_v58  ;;  %v1705_v45 = vmul.f32 %v3202_v62, %v3102_v11 }
 0x7a9   : > { %1689 = vrot.lane.b32.xlu2 %v1681_v13, %s2988_s22  ;;  %1671 = vrot.lane.b32.xlu0 %v1661_v0, %s2987_s21 }
 0x7aa   : > { %1673 = vrot.lane.b32.xlu1 %v1662_v49, %s2987_s21 }
 0x7ab   : > { %v4164_v32 = vpop.permute.xlu2 %1487  ;;  %v4166_v63 = vpop.permute.xlu0 %1437 }
 0x7ac   : > { %5473 = vst [vmem:[#allocation152_spill] sm:$0xff] %v4164_v32  ;;  %v4168_v34 = vpop.permute.xlu1 %1439  ;;  %v5479_v32 = vld [vmem:[#allocation57_spill] sm:$0xff] }
 0x7ad   : > { %5474 = vst [vmem:[#allocation153_spill] sm:$0xff] %v4166_v63  ;;  %v5480_v63 = vld [vmem:[#allocation35_spill] sm:$0xff] }
 0x7ae   : > { %5475 = vst [vmem:[#allocation154_spill] sm:$0xff] %v4168_v34  ;;  %v485_v34 = vsel %vm342_vm0, %v5480_v63, %v5479_v32  ;;  %v5486_v32 = vld [vmem:[#allocation58_spill] sm:$0xff]  ;;  %v5487_v63 = vld [vmem:[#allocation36_spill] sm:$0xff] }
 0x7af   : > { %v489_v35 = vadd.f32 %v485_v34, %v5485_v52  ;;  %v1726_v34 = vmul.f32 %v3217_v17, %v3076_v58 }
 0x7b1   : > { %1695 = vrot.lane.b32.xlu2 %v1684_v31, %s2988_s22  ;;  %1691 = vrot.lane.b32.xlu0 %v1682_v46, %s2988_s22  ;;  %v1703_v31 = vmul.f32 %v3220_v18, %v3102_v11  ;;  %v5482_v46 = vld [vmem:[#allocation54_spill] sm:$0xff]  ;;  %v523_v11 = vsel %vm342_vm0, %v5487_v63, %v5486_v32  ;;  %v5495_v32 = vld [vmem:[#allocation59_spill] sm:$0xff] }
 0x7b2   : > { %1693 = vrot.lane.b32.xlu1 %v1683_v48, %s2988_s22  ;;  %v484_v48 = vsel %vm342_vm0, %v5482_v46, %v5481_v56  ;;  %v5488_v56 = vld [vmem:[#allocation33_spill] sm:$0xff] }
 0x7b3   : > { %v4179_v49 = vpop.permute.xlu2 %1507  ;;  %v4181_v0 = vpop.permute.xlu0 %1443  ;;  %v488_v46 = vadd.f32 %v484_v48, %v5488_v56  ;;  %v1727_v48 = vmul.f32 %v3228_v23, %v3078_v59  ;;  %v5496_v56 = vld [vmem:[#allocation61_spill] sm:$0xff] }
 0x7b4   : > { %5476 = vst [vmem:[#allocation155_spill] sm:$0xff] %v4179_v49  ;;  %v4183_v13 = vpop.permute.xlu1 %1459  ;;  %v5484_v49 = vld [vmem:[#allocation46_spill] sm:$0xff] }
 0x7b5   : > { %5477 = vst [vmem:[#allocation156_spill] sm:$0xff] %v4181_v0  ;;  %v524_v0 = vsel %vm342_vm0, %v5484_v49, %v5483_v38  ;;  %v5491_v49 = vld [vmem:[#allocation38_spill] sm:$0xff] }
 0x7b6   : > { %5478 = vst [vmem:[#allocation157_spill] sm:$0xff] %v4183_v13  ;;  %v1704_v13 = vmul.f32 %v3220_v18, %v3099_v10  ;;  %v528_v14 = vadd.f32 %v524_v0, %v489_v35  ;;  %v5492_v18 = vld [vmem:[#allocation47_spill] sm:$0xff]  ;;  %v527_v35 = vadd.f32 %v523_v11, %v488_v46  ;;  %v1747_v0 = vmul.f32 %v3252_v12, %v3207_v2 }
 0x7b7   : > { %v555_v52 = vsel %vm414_vm1, %v5492_v18, %v5491_v49  ;;  %v5494_v18 = vld [vmem:[#allocation48_spill] sm:$0xff]  ;;  %v5497_v49 = vld [vmem:[#allocation39_spill] sm:$0xff]  ;;  %v1728_v11 = vmul.f32 %v3228_v23, %v3076_v58 }
 0x7b8   : > { %v556_v63 = vsel %vm414_vm1, %v5495_v32, %v5494_v18  ;;  %v559_v46 = vadd.f32 %v555_v52, %v527_v35  ;;  %v5500_v32 = vld [vmem:[#allocation41_spill] sm:$0xff]  ;;  %v1182_v52 = vsel %vm342_vm0, %v3874_v37, %v3941_v27  ;;  %v5504_v35 = vld [vmem:[#allocation62_spill] sm:$0xff] }
 0x7b9   : > { %1715 = vrot.lane.b32.xlu2 %v1705_v45, %s2988_s22  ;;  %1711 = vrot.lane.b32.xlu0 %v1703_v31, %s2988_s22  ;;  %v1706_v31 = vmul.f32 %v3202_v62, %v3099_v10  ;;  %v560_v62 = vadd.f32 %v556_v63, %v528_v14  ;;  %v5498_v10 = vld [vmem:[#allocation131_spill] sm:$0xff]  ;;  %v5505_v63 = vld [vmem:[#allocation40_spill] sm:$0xff] }
 0x7ba   : > { %1713 = vrot.lane.b32.xlu1 %v1704_v13, %s2988_s22  ;;  %v1725_v13 = vmul.f32 %v3217_v17, %v3078_v59  ;;  %v1159_v17 = vsel %vm342_vm0, %v3847_v25, %v3911_v9  ;;  %v1160_v59 = vsel %vm342_vm0, %v3913_v47, %v5498_v10  ;;  %v1181_v25 = vsel %vm342_vm0, %v3926_v51, %v3928_v29  ;;  %v5502_v51 = vld [vmem:[#allocation49_spill] sm:$0xff]  ;;  %v5503_v29 = vld [vmem:[#allocation60_spill] sm:$0xff] }
 0x7bb   : > { %v4208_v44 = vpop.permute.xlu2 %1527  ;;  %v4210_v38 = vpop.permute.xlu0 %1463  ;;  %v4253_v9 = vmul.f32 %v3252_v12, %v3173_v50  ;;  %v1163_v47 = vadd.f32 %v1159_v17, %v3888_v39  ;;  %v1203_v17 = vsel %vm414_vm1, %v3943_v16, %v3894_v40  ;;  %v5506_v40 = vld [vmem:[#allocation28_spill] sm:$0xff] }
 0x7bc   : > { %5489 = vst [vmem:[#allocation57_spill] sm:$0xff] %v4208_v44  ;;  %v4215_v45 = vpop.permute.xlu1 %1465  ;;  %v589_v44 = vsel %vm587_vm2, %v5497_v49, %v5496_v56  ;;  %v620_v49 = vsel %vm587_vm2, %v5505_v63, %v5504_v35  ;;  %v4290_v16 = vmul.f32 %v5506_v40, %v3205_v1  ;;  %v5512_v35 = vld [vmem:[#allocation53_spill] sm:$0xff]  ;;  %v5513_v63 = vld [vmem:[#allocation64_spill] sm:$0xff] }
 0x7bd   : > { %5490 = vst [vmem:[#allocation35_spill] sm:$0xff] %v4210_v38  ;;  %v5499_v38 = vld [vmem:[#allocation29_spill] sm:$0xff]  ;;  %v593_v10 = vadd.f32 %v589_v44, %v560_v62  ;;  %v1164_v62 = vadd.f32 %v1160_v59, %v3904_v54  ;;  %v1185_v27 = vadd.f32 %v1181_v25, %v1163_v47  ;;  %v1204_v44 = vsel %vm414_vm1, %v3956_v15, %v3958_v19  ;;  %v5508_v19 = vld [vmem:[#allocation42_spill] sm:$0xff]  ;;  %v5511_v47 = vld [vmem:[#allocation63_spill] sm:$0xff] }
 0x7be   : > { %5493 = vst [vmem:[#allocation45_spill] sm:$0xff] %v4215_v45  ;;  %v4243_v18 = vmul.f32 %v5499_v38, %v3173_v50  ;;  %v5501_v45 = vld [vmem:[#allocation50_spill] sm:$0xff]  ;;  %v4257_v14 = vmul.f32 %v5499_v38, %v3207_v2  ;;  %v1225_v59 = vsel %vm414_vm1, %v3909_v28, %v3971_v8  ;;  %v1226_v28 = vsel %vm414_vm1, %v3973_v7, %v3924_v36  ;;  %v5510_v8 = vld [vmem:[#allocation52_spill] sm:$0xff] }
 0x7bf   : > { %v621_v56 = vsel %vm587_vm2, %v5501_v45, %v5500_v32  ;;  %v588_v45 = vsel %vm587_vm2, %v5503_v29, %v5502_v51  ;;  %v1186_v32 = vadd.f32 %v1182_v52, %v1164_v62  ;;  %v654_v52 = vsel %vm652_vm3, %v5511_v47, %v5510_v8 }
 0x7c0   : > { %v592_v37 = vadd.f32 %v588_v45, %v559_v46  ;;  %v625_v39 = vadd.f32 %v621_v56, %v593_v10  ;;  %v5509_v56 = vld [vmem:[#allocation51_spill] sm:$0xff]  ;;  %v1207_v10 = vadd.f32 %v1203_v17, %v1185_v27  ;;  %v1247_v29 = vsel %vm587_vm2, %v3986_v22, %v3988_v61  ;;  %v5514_v17 = vld [vmem:[#allocation65_spill] sm:$0xff]  ;;  %v5516_v61 = vld [vmem:[#allocation66_spill] sm:$0xff] }
 0x7c1   : > { %1735 = vrot.lane.b32.xlu2 %v1726_v34, %s2989_s29  ;;  %1717 = vrot.lane.b32.xlu0 %v1706_v31, %s2988_s22  ;;  %v653_v25 = vsel %vm652_vm3, %v5509_v56, %v5508_v19  ;;  %v1208_v51 = vadd.f32 %v1204_v44, %v1186_v32  ;;  %v1248_v36 = vsel %vm587_vm2, %v3939_v4, %v4001_v24  ;;  %v5518_v24 = vld [vmem:[#allocation71_spill] sm:$0xff] }
 0x7c2   : > { %1733 = vrot.lane.b32.xlu1 %v1725_v13, %s2989_s29  ;;  %v5507_v13 = vld [vmem:[#allocation30_spill] sm:$0xff]  ;;  %v624_v15 = vadd.f32 %v620_v49, %v592_v37  ;;  %v658_v45 = vadd.f32 %v654_v52, %v625_v39  ;;  %v685_v49 = vsel %vm652_vm3, %v5513_v63, %v5512_v35  ;;  %v1229_v62 = vadd.f32 %v1225_v59, %v1207_v10  ;;  %v5515_v37 = vld [vmem:[#allocation69_spill] sm:$0xff]  ;;  %v5520_v10 = vld [vmem:[#allocation72_spill] sm:$0xff] }
 0x7c3   : > { %v4279_v34 = vpop.permute.xlu2 %1547  ;;  %v4281_v31 = vpop.permute.xlu0 %1483  ;;  %v4294_v46 = vmul.f32 %v5507_v13, %v3173_v50  ;;  %v686_v27 = vsel %vm652_vm3, %v5515_v37, %v5514_v17  ;;  %v1230_v44 = vadd.f32 %v1226_v28, %v1208_v51  ;;  %v1269_v22 = vsel %vm652_vm3, %v4003_v5, %v3954_v60  ;;  %v5517_v39 = vld [vmem:[#allocation70_spill] sm:$0xff]  ;;  %v5521_v28 = vld [vmem:[#allocation76_spill] sm:$0xff]  ;;  %v5522_v52 = vld [vmem:[#allocation77_spill] sm:$0xff] }
 0x7c4   : > { %v4286_v54 = vpop.permute.xlu1 %1485  ;;  %v657_v7 = vadd.f32 %v653_v25, %v624_v15  ;;  %v718_v32 = vsel %vm717_vm4, %v5517_v39, %v5516_v61  ;;  %v1251_v19 = vadd.f32 %v1247_v29, %v1229_v62  ;;  %v1270_v59 = vsel %vm652_vm3, %v4016_v42, %v4018_v21  ;;  %v5519_v15 = vld [vmem:[#allocation75_spill] sm:$0xff]  ;;  %v5523_v51 = vld [vmem:[#allocation81_spill] sm:$0xff]  ;;  %v5524_v35 = vld [vmem:[#allocation78_spill] sm:$0xff] }
 0x7c5   : > { %v719_v56 = vsel %vm717_vm4, %v5519_v15, %v5518_v24  ;;  %v1252_v25 = vadd.f32 %v1248_v36, %v1230_v44  ;;  %v1291_v60 = vsel %vm652_vm3, %v3969_v55, %v4031_v20  ;;  %v690_v5 = vadd.f32 %v686_v27, %v658_v45  ;;  %v5525_v63 = vld [vmem:[#allocation82_spill] sm:$0xff]  ;;  %v5527_v17 = vld [vmem:[#allocation136_spill] sm:$0xff]  ;;  %v5529_v44 = vld [vmem:[#allocation83_spill] sm:$0xff] }
 0x7c6   : > { %v689_v4 = vadd.f32 %v685_v49, %v657_v7  ;;  %v750_v42 = vsel %vm587_vm2, %v5521_v28, %v5520_v10  ;;  %v1273_v21 = vadd.f32 %v1269_v22, %v1251_v19  ;;  %v751_v55 = vsel %vm587_vm2, %v5523_v51, %v5522_v52  ;;  %v5526_v7 = vld [vmem:[#allocation132_spill] sm:$0xff]  ;;  %v5530_v22 = vld [vmem:[#allocation87_spill] sm:$0xff]  ;;  %v5533_v24 = vld [vmem:[#allocation133_spill] sm:$0xff] }
 0x7c7   : > { %v1274_v20 = vadd.f32 %v1270_v59, %v1252_v25  ;;  %v723_v45 = vadd.f32 %v719_v56, %v690_v5  ;;  %v1314_v49 = vsel %vm717_vm4, %v3999_v6, %v4061_v53  ;;  %v1335_v37 = vsel %vm717_vm4, %v5527_v17, %v5526_v7  ;;  %v5531_v53 = vld [vmem:[#allocation84_spill] sm:$0xff]  ;;  %v5534_v56 = vld [vmem:[#allocation89_spill] sm:$0xff]  ;;  %v5536_v10 = vld [vmem:[#allocation134_spill] sm:$0xff] }
 0x7c8   : > { %v722_v47 = vadd.f32 %v718_v32, %v689_v4  ;;  %v783_v61 = vsel %vm587_vm2, %v5530_v22, %v5529_v44  ;;  %v1336_v32 = vsel %vm717_vm4, %v4076_v3, %v4078_v33  ;;  %v5532_v19 = vld [vmem:[#allocation88_spill] sm:$0xff]  ;;  %v1357_v15 = vsel %vm587_vm2, %v5533_v24, %v4091_v26  ;;  %v5535_v25 = vld [vmem:[#allocation93_spill] sm:$0xff]  ;;  %v5537_v28 = vld [vmem:[#allocation139_spill] sm:$0xff] }
 0x7c9   : > { %1755 = vrot.lane.b32.xlu2 %v1747_v0, %s2987_s21  ;;  %1737 = vrot.lane.b32.xlu0 %v1727_v48, %s2989_s29  ;;  %v1292_v0 = vsel %vm652_vm3, %v4033_v41, %v3984_v43  ;;  %v782_v43 = vsel %vm587_vm2, %v5525_v63, %v5524_v35  ;;  %v1295_v41 = vadd.f32 %v1291_v60, %v1273_v21  ;;  %v5538_v21 = vld [vmem:[#allocation142_spill] sm:$0xff]  ;;  %v5547_v7 = vld [vmem:[#allocation137_spill] sm:$0xff] }
 0x7ca   : > { %1739 = vrot.lane.b32.xlu1 %v1728_v11, %s2989_s29  ;;  %v1313_v11 = vsel %vm717_vm4, %v4046_v30, %v4048_v57  ;;  %v754_v62 = vadd.f32 %v750_v42, %v722_v47  ;;  %v1296_v36 = vadd.f32 %v1292_v0, %v1274_v20  ;;  %v5528_v30 = vld [vmem:[#allocation31_spill] sm:$0xff]  ;;  %v755_v27 = vadd.f32 %v751_v55, %v723_v45  ;;  %v5539_v0 = vld [vmem:[#allocation141_spill] sm:$0xff]  ;;  %v5543_v45 = vld [vmem:[#allocation144_spill] sm:$0xff] }
 0x7cb   : > { %v4341_v48 = vpop.permute.xlu2 %1553  ;;  %v4343_v8 = vpop.permute.xlu0 %1503  ;;  %v1769_v57 = vmul.f32 %v5528_v30, %v3205_v1  ;;  %v1317_v39 = vadd.f32 %v1313_v11, %v1295_v41  ;;  %v814_v59 = vsel %vm652_vm3, %v5532_v19, %v5531_v53  ;;  %v815_v60 = vsel %vm652_vm3, %v5535_v25, %v5534_v56  ;;  %v5540_v47 = vld [vmem:[#allocation27_spill] sm:$0xff]  ;;  %v5548_v17 = vld [vmem:[#allocation145_spill] sm:$0xff]  ;;  %v5554_v24 = vld [vmem:[#allocation138_spill] sm:$0xff] }
 0x7cc   : > { %v4351_v29 = vpop.permute.xlu1 %1505  ;;  %v786_v6 = vadd.f32 %v782_v43, %v754_v62  ;;  %v1318_v4 = vadd.f32 %v1314_v49, %v1296_v36  ;;  %v1358_v42 = vsel %vm587_vm2, %v5537_v28, %v5536_v10  ;;  %v787_v3 = vadd.f32 %v783_v61, %v755_v27  ;;  %v5541_v55 = vld [vmem:[#allocation95_spill] sm:$0xff]  ;;  %v5545_v49 = vld [vmem:[#allocation90_spill] sm:$0xff]  ;;  %v5549_v44 = vld [vmem:[#allocation101_spill] sm:$0xff] }
 0x7cd   : > { %v1339_v5 = vadd.f32 %v1335_v37, %v1317_v39  ;;  %v1379_v26 = vsel %vm652_vm3, %v5539_v0, %v5538_v21  ;;  %v1770_v52 = vmul.f32 %v5528_v30, %v5540_v47  ;;  %v5542_v20 = vld [vmem:[#allocation99_spill] sm:$0xff]  ;;  %v5546_v62 = vld [vmem:[#allocation94_spill] sm:$0xff]  ;;  %v1401_v37 = vsel %vm652_vm3, %v5548_v17, %v5547_v7  ;;  %v5550_v22 = vld [vmem:[#allocation105_spill] sm:$0xff] }
 0x7ce   : > { %v1340_v33 = vadd.f32 %v1336_v32, %v1318_v4  ;;  %v818_v51 = vadd.f32 %v814_v59, %v786_v6  ;;  %v819_v41 = vadd.f32 %v815_v60, %v787_v3  ;;  %v879_v61 = vsel %vm717_vm4, %v5550_v22, %v5549_v44  ;;  %v5551_v32 = vld [vmem:[#allocation148_spill] sm:$0xff]  ;;  %v5552_v6 = vld [vmem:[#allocation147_spill] sm:$0xff]  ;;  %v5553_v4 = vld [vmem:[#allocation150_spill] sm:$0xff] }
 0x7cf   : > { %v1361_v11 = vadd.f32 %v1357_v15, %v1339_v5  ;;  %v1402_v53 = vsel %vm652_vm3, %v5552_v6, %v5551_v32  ;;  %v1423_v15 = vsel %vm717_vm4, %v5554_v24, %v5553_v4  ;;  %v1772_v56 = vmul.f32 %v5506_v40, %v5540_v47  ;;  %v5555_v60 = vld [vmem:[#allocation96_spill] sm:$0xff]  ;;  %v5558_v3 = vld [vmem:[#allocation151_spill] sm:$0xff]  ;;  %v5559_v0 = vld [vmem:[#allocation102_spill] sm:$0xff] }
 0x7d0   : > { %v1362_v36 = vadd.f32 %v1358_v42, %v1340_v33  ;;  %v5556_v5 = vld [vmem:[#allocation100_spill] sm:$0xff]  ;;  %v5567_v17 = vld [vmem:[#allocation146_spill] sm:$0xff]  ;;  %v5571_v32 = vld [vmem:[#allocation113_spill] sm:$0xff] }
 0x7d1   : > { %1761 = vrot.lane.b32.xlu2 %v4243_v18, %s2987_s21  ;;  %1757 = vrot.lane.b32.xlu0 %v4253_v9, %s2987_s21  ;;  %v847_v18 = vsel %vm652_vm3, %v5542_v20, %v5541_v55  ;;  %v5544_v9 = vld [vmem:[#allocation135_spill] sm:$0xff]  ;;  %v1383_v39 = vadd.f32 %v1379_v26, %v1361_v11  ;;  %v878_v10 = vsel %vm717_vm4, %v5556_v5, %v5555_v60  ;;  %v5557_v42 = vld [vmem:[#allocation140_spill] sm:$0xff]  ;;  %v5560_v26 = vld [vmem:[#allocation106_spill] sm:$0xff] }
 0x7d2   : > { %1759 = vrot.lane.b32.xlu1 %v4257_v14, %s2987_s21  ;;  %v1380_v35 = vsel %vm652_vm3, %v5544_v9, %v5543_v45  ;;  %v846_v14 = vsel %vm652_vm3, %v5546_v62, %v5545_v49  ;;  %v851_v19 = vadd.f32 %v847_v18, %v819_v41  ;;  %v1424_v33 = vsel %vm717_vm4, %v5558_v3, %v5557_v42  ;;  %v5561_v18 = vld [vmem:[#allocation154_spill] sm:$0xff]  ;;  %v5562_v11 = vld [vmem:[#allocation153_spill] sm:$0xff]  ;;  %v5564_v9 = vld [vmem:[#allocation111_spill] sm:$0xff] }
 0x7d3   : > { %v4399_v63 = vpop.permute.xlu2 %1583  ;;  %v1510_v43 = vpop.permute.xlu0 %1509  ;;  %v1384_v59 = vadd.f32 %v1380_v35, %v1362_v36  ;;  %v850_v25 = vadd.f32 %v846_v14, %v818_v51  ;;  %v1405_v28 = vadd.f32 %v1401_v37, %v1383_v39  ;;  %v911_v55 = vsel %vm910_vm5, %v5560_v26, %v5559_v0  ;;  %v5563_v51 = vld [vmem:[#allocation107_spill] sm:$0xff]  ;;  %v5565_v49 = vld [vmem:[#allocation156_spill] sm:$0xff]  ;;  %v5568_v37 = vld [vmem:[#allocation157_spill] sm:$0xff] }
 0x7d4   : > { %v1526_v27 = vpop.permute.xlu1 %1525  ;;  %v883_v21 = vadd.f32 %v879_v61, %v851_v19  ;;  %v1445_v45 = vsel %vm717_vm4, %v5562_v11, %v5561_v18  ;;  %v912_v35 = vsel %vm910_vm5, %v5564_v9, %v5563_v51  ;;  %v5566_v62 = vld [vmem:[#allocation143_spill] sm:$0xff]  ;;  %v1467_v44 = vsel %vm910_vm5, %v5568_v37, %v5567_v17  ;;  %v5569_v22 = vld [vmem:[#allocation108_spill] sm:$0xff]  ;;  %v5572_v6 = vld [vmem:[#allocation117_spill] sm:$0xff] }
 0x7d5   : > { %v1406_v20 = vadd.f32 %v1402_v53, %v1384_v59  ;;  %v1427_v41 = vadd.f32 %v1423_v15, %v1405_v28  ;;  %v1446_v14 = vsel %vm717_vm4, %v5566_v62, %v5565_v49  ;;  %v882_v36 = vadd.f32 %v878_v10, %v850_v25  ;;  %v5570_v61 = vld [vmem:[#allocation112_spill] sm:$0xff]  ;;  %v5573_v19 = vld [vmem:[#allocation45_spill] sm:$0xff]  ;;  %v5576_v28 = vld [vmem:[#allocation114_spill] sm:$0xff] }
 0x7d6   : > { %v943_v39 = vsel %vm910_vm5, %v5570_v61, %v5569_v22  ;;  %v944_v53 = vsel %vm910_vm5, %v5572_v6, %v5571_v32  ;;  %v916_v25 = vadd.f32 %v912_v35, %v883_v21  ;;  %v5577_v42 = vld [vmem:[#allocation118_spill] sm:$0xff]  ;;  %v5578_v0 = vld [vmem:[#allocation152_spill] sm:$0xff]  ;;  %v5579_v11 = vld [vmem:[#allocation119_spill] sm:$0xff] }
 0x7d7   : > { %v1428_v7 = vadd.f32 %v1424_v33, %v1406_v20  ;;  %v915_v15 = vadd.f32 %v911_v55, %v882_v36  ;;  %v976_v3 = vsel %vm975_vm6, %v5577_v42, %v5576_v28  ;;  %v1490_v26 = vsel %vm975_vm6, %v4286_v54, %v5578_v0  ;;  %v5581_v35 = vld [vmem:[#allocation155_spill] sm:$0xff]  ;;  %v5582_v49 = vld [vmem:[#allocation120_spill] sm:$0xff]  ;;  %v5583_v62 = vld [vmem:[#allocation125_spill] sm:$0xff] }
 0x7d8   : > { %v1791_v20 = vmul.f32 %v5507_v13, %v3207_v2  ;;  %v948_v21 = vadd.f32 %v944_v53, %v916_v25  ;;  %v5585_v37 = vld [vmem:[#allocation127_spill] sm:$0xff]  ;;  %v5587_v61 = vld [vmem:[#allocation129_spill] sm:$0xff]  ;;  %v5589_v53 = vld [vmem:[#allocation130_spill] sm:$0xff] }
 0x7d9   : > { %1781 = vrot.lane.b32.xlu2 %v4290_v16, %s2987_s21  ;;  %1777 = vrot.lane.b32.xlu0 %v1769_v57, %s2987_s21  ;;  %v1449_v16 = vadd.f32 %v1445_v45, %v1427_v41  ;;  %v5574_v57 = vld [vmem:[#allocation35_spill] sm:$0xff]  ;;  %v1450_v60 = vadd.f32 %v1446_v14, %v1428_v7  ;;  %v947_v55 = vadd.f32 %v943_v39, %v915_v15  ;;  %v5584_v7 = vld [vmem:[#allocation57_spill] sm:$0xff]  ;;  %v5588_v39 = vld [vmem:[#allocation128_spill] sm:$0xff] }
 0x7da   : > { %1779 = vrot.lane.b32.xlu1 %v1770_v52, %s2987_s21  ;;  %v1468_v59 = vsel %vm910_vm5, %v5574_v57, %v5573_v19  ;;  %v5575_v52 = vld [vmem:[#allocation149_spill] sm:$0xff]  ;;  %v5580_v45 = vld [vmem:[#allocation123_spill] sm:$0xff]  ;;  %v1512_v41 = vsel %vm975_vm6, %v5581_v35, %v1510_v43  ;;  %v1008_v14 = vsel %vm975_vm6, %v5583_v62, %v5582_v49  ;;  %v1533_v17 = vsel %vm1040_vm7, %v1526_v27, %v5584_v7  ;;  %v5597_v49 = vld [vmem:[#allocation56_spill] sm:$0xff] }
 0x7db   : > { %v4452_v4 = vpop.permute.xlu2 %1603  ;;  %v1530_v24 = vpop.permute.xlu0 %1529  ;;  %v1489_v5 = vsel %vm975_vm6, %v5575_v52, %v4281_v31  ;;  %v1471_v33 = vadd.f32 %v1467_v44, %v1449_v16  ;;  %v1472_v18 = vadd.f32 %v1468_v59, %v1450_v60  ;;  %v1511_v31 = vsel %vm975_vm6, %v4343_v8, %v4351_v29  ;;  %v5586_v8 = vld [vmem:[#allocation126_spill] sm:$0xff]  ;;  %v5590_v16 = vld [vmem:[#allocation124_spill] sm:$0xff] }
 0x7dc   : > { %v1532_v10 = vpop.permute.xlu1 %1531  ;;  %v977_v51 = vsel %vm975_vm6, %v5580_v45, %v5579_v11  ;;  %v980_v54 = vadd.f32 %v976_v3, %v947_v55  ;;  %v1009_v29 = vsel %vm975_vm6, %v5586_v8, %v5585_v37  ;;  %v1041_v32 = vsel %vm1040_vm7, %v5588_v39, %v5587_v61  ;;  %v5593_v3 = vld [vmem:[#allocation44_spill] sm:$0xff] }
 0x7dd   : > { %v1493_v9 = vadd.f32 %v1489_v5, %v1471_v33  ;;  %v1494_v36 = vadd.f32 %v1490_v26, %v1472_v18  ;;  %v1534_v22 = vsel %vm1040_vm7, %v1530_v24, %v1532_v10  ;;  %v981_v43 = vadd.f32 %v977_v51, %v948_v21  ;;  %v5595_v18 = vld [vmem:[#allocation43_spill] sm:$0xff]  ;;  %v5598_v37 = vld [vmem:[#allocation68_spill] sm:$0xff]  ;;  %v5609_v26 = vld [vmem:[#allocation85_spill] sm:$0xff] }
 0x7de   : > { %v1012_v27 = vadd.f32 %v1008_v14, %v980_v54  ;;  %v1042_v19 = vsel %vm1040_vm7, %v5590_v16, %v5589_v53  ;;  %v1813_v33 = vmul.f32 %v5593_v3, %v3205_v1  ;;  %v1814_v11 = vmul.f32 %v5593_v3, %v5540_v47  ;;  %v5602_v53 = vld [vmem:[#allocation67_spill] sm:$0xff] }
 0x7df   : > { %v1515_v44 = vadd.f32 %v1511_v31, %v1493_v9  ;;  %v1516_v6 = vadd.f32 %v1512_v41, %v1494_v36  ;;  %v1816_v31 = vmul.f32 %v5595_v18, %v5540_v47  ;;  %v1815_v45 = vmul.f32 %v5595_v18, %v3205_v1  ;;  %v5596_v41 = vld [vmem:[#allocation55_spill] sm:$0xff] }
 0x7e0   : > { %v4496_v60 = vadd.f32 %v1041_v32, %v1012_v27  ;;  %v1837_v54 = vmul.f32 %v5596_v41, %v3207_v2  ;;  %v1835_v62 = vmul.f32 %v5597_v49, %v3207_v2  ;;  %v1836_v14 = vmul.f32 %v5597_v49, %v3173_v50  ;;  %v5600_v32 = vld [vmem:[#allocation8_spill] sm:$0xff] }
 0x7e1   : > { %1801 = vrot.lane.b32.xlu2 %v4294_v46, %s2988_s22  ;;  %1783 = vrot.lane.b32.xlu0 %v1772_v56, %s2987_s21  ;;  %v1537_v57 = vadd.f32 %v1533_v17, %v1515_v44  ;;  %v1013_v46 = vadd.f32 %v1009_v29, %v981_v43  ;;  %v1538_v15 = vadd.f32 %v1534_v22, %v1516_v6  ;;  %v5599_v44 = vld [vmem:[#allocation2_spill] sm:$0xff]  ;;  %v5613_v49 = vld [vmem:[#allocation104_spill] sm:$0xff] }
 0x7e2   : > { %1799 = vrot.lane.b32.xlu1 %v1791_v20, %s2988_s22  ;;  %v1858_v8 = vmul.f32 %v5598_v37, %v3076_v58  ;;  %v1838_v29 = vmul.f32 %v5596_v41, %v3173_v50  ;;  %v1857_v22 = vmul.f32 %v5598_v37, %v5599_v44  ;;  %v5601_v6 = vld [vmem:[#allocation74_spill] sm:$0xff]  ;;  %v1859_v16 = vmul.f32 %v5602_v53, %v5599_v44 }
 0x7e3   : > { %v4492_v59 = vpop.permute.xlu2 %1623  ;;  %v1550_v24 = vpop.permute.xlu0 %1549  ;;  %v4502_v10 = vadd.f32 %v1042_v19, %v1013_v46  ;;  %v1879_v27 = vmul.f32 %v5601_v6, %v5600_v32  ;;  %v1860_v19 = vmul.f32 %v5602_v53, %v3076_v58  ;;  %v1925_v42 = vmul.f32 %v5609_v26, %v5600_v32  ;;  %v5611_v53 = vld [vmem:[#allocation97_spill] sm:$0xff]  ;;  %v5612_v37 = vld [vmem:[#allocation98_spill] sm:$0xff] }
 0x7e4   : > { %v1555_v56 = vsel %vm1040_vm7, %v4279_v34, %v1550_v24  ;;  %v1552_v25 = vpop.permute.xlu1 %1551  ;;  %v5594_v34 = vld [vmem:[#allocation32_spill] sm:$0xff]  ;;  %v1990_v41 = vmul.f32 %v5613_v49, %v5540_v47  ;;  %v1970_v18 = vmul.f32 %v5611_v53, %v3173_v50 }
 0x7e5   : > { %v4498_v52 = vadd.f32 %v1555_v56, %v1537_v57  ;;  %v1556_v5 = vsel %vm1040_vm7, %v1552_v25, %v4341_v48  ;;  %5591 = vst [vmem:[#allocation54_spill] sm:$0xff] %v4502_v10  ;;  %v1793_v0 = vmul.f32 %v5594_v34, %v3207_v2  ;;  %v1794_v20 = vmul.f32 %v5594_v34, %v3173_v50  ;;  %v5604_v56 = vld [vmem:[#allocation73_spill] sm:$0xff] }
 0x7e6   : > { %v4504_v28 = vadd.f32 %v1556_v5, %v1538_v15  ;;  %v5603_v15 = vld [vmem:[#allocation7_spill] sm:$0xff]  ;;  %v1989_v34 = vmul.f32 %v5613_v49, %v3205_v1 }
 0x7e7   : > { %v1882_v25 = vmul.f32 %v5604_v56, %v5603_v15  ;;  %v1880_v5 = vmul.f32 %v5601_v6, %v5603_v15  ;;  %v1969_v6 = vmul.f32 %v5611_v53, %v3207_v2  ;;  %v5614_v53 = vld [vmem:[#allocation110_spill] sm:$0xff]  ;;  %v5615_v49 = vld [vmem:[#allocation103_spill] sm:$0xff] }
 0x7e8   : > { %5592 = vst [vmem:[#allocation37_spill] sm:$0xff] %v4504_v28  ;;  %v2011_v3 = vmul.f32 %v5614_v53, %v3207_v2  ;;  %v1991_v28 = vmul.f32 %v5615_v49, %v3205_v1 }
 0x7e9   : > { %1821 = vrot.lane.b32.xlu2 %v1813_v33, %s2988_s22  ;;  %1803 = vrot.lane.b32.xlu0 %v1793_v0, %s2988_s22  ;;  %v1881_v33 = vmul.f32 %v5604_v56, %v5600_v32 }
 0x7ea   : > { %1805 = vrot.lane.b32.xlu1 %v1794_v20, %s2988_s22 }
 0x7eb   : > { %v4519_v48 = vpop.permute.xlu2 %1629  ;;  %v4521_v55 = vpop.permute.xlu0 %1579 }
 0x7ec   : > { %v4523_v21 = vpop.permute.xlu1 %1581 }
 0x7f1   : > { %1827 = vrot.lane.b32.xlu2 %v1816_v31, %s2988_s22  ;;  %1823 = vrot.lane.b32.xlu0 %v1814_v11, %s2988_s22  ;;  %v5605_v11 = vld [vmem:[#allocation79_spill] sm:$0xff] }
 0x7f2   : > { %1825 = vrot.lane.b32.xlu1 %v1815_v45, %s2988_s22  ;;  %v1903_v45 = vmul.f32 %v5605_v11, %v5599_v44 }
 0x7f3   : > { %v4534_v51 = vpop.permute.xlu2 %1649  ;;  %v4536_v9 = vpop.permute.xlu0 %1585 }
 0x7f4   : > { %v4538_v35 = vpop.permute.xlu1 %1601 }
 0x7f9   : > { %1847 = vrot.lane.b32.xlu2 %v1837_v54, %s2989_s29  ;;  %1843 = vrot.lane.b32.xlu0 %v1835_v62, %s2989_s29  ;;  %v5606_v54 = vld [vmem:[#allocation80_spill] sm:$0xff] }
 0x7fa   : > { %1845 = vrot.lane.b32.xlu1 %v1836_v14, %s2989_s29  ;;  %v1901_v62 = vmul.f32 %v5606_v54, %v5599_v44  ;;  %v1902_v14 = vmul.f32 %v5606_v54, %v3076_v58  ;;  %v5610_v54 = vld [vmem:[#allocation91_spill] sm:$0xff] }
 0x7fb   : > { %v4549_v36 = vpop.permute.xlu2 %1669  ;;  %v4551_v7 = vpop.permute.xlu0 %1605 }
 0x7fc   : > { %v4553_v17 = vpop.permute.xlu1 %1607 }
 0x801   : > { %1867 = vrot.lane.b32.xlu2 %v1858_v8, %s2990_s18  ;;  %1849 = vrot.lane.b32.xlu0 %v1838_v29, %s2989_s29 }
 0x802   : > { %1865 = vrot.lane.b32.xlu1 %v1857_v22, %s2990_s18 }
 0x803   : > { %v4564_v43 = vpop.permute.xlu2 %1689  ;;  %v4566_v61 = vpop.permute.xlu0 %1625 }
 0x804   : > { %v4568_v39 = vpop.permute.xlu1 %1627 }
 0x809   : > { %1887 = vrot.lane.b32.xlu2 %v1879_v27, %s2990_s18  ;;  %1869 = vrot.lane.b32.xlu0 %v1859_v16, %s2990_s18  ;;  %v5607_v27 = vld [vmem:[#allocation86_spill] sm:$0xff] }
 0x80a   : > { %1871 = vrot.lane.b32.xlu1 %v1860_v19, %s2990_s18  ;;  %v1924_v16 = vmul.f32 %v5607_v27, %v5603_v15  ;;  %v1904_v19 = vmul.f32 %v5605_v11, %v3076_v58  ;;  %v1948_v11 = vmul.f32 %v5610_v54, %v3076_v58 }
 0x80b   : > { %v4579_v57 = vpop.permute.xlu2 %1695  ;;  %v4581_v24 = vpop.permute.xlu0 %1645 }
 0x80c   : > { %v4583_v46 = vpop.permute.xlu1 %1647 }
 0x811   : > { %1893 = vrot.lane.b32.xlu2 %v1882_v25, %s2990_s18  ;;  %1889 = vrot.lane.b32.xlu0 %v1880_v5, %s2990_s18  ;;  %v1923_v25 = vmul.f32 %v5607_v27, %v5600_v32  ;;  %v1926_v27 = vmul.f32 %v5609_v26, %v5603_v15  ;;  %v1947_v26 = vmul.f32 %v5610_v54, %v5599_v44 }
 0x812   : > { %1891 = vrot.lane.b32.xlu1 %v1881_v33, %s2990_s18  ;;  %v1968_v54 = vmul.f32 %v5612_v37, %v3173_v50 }
 0x813   : > { %v4594_v0 = vpop.permute.xlu2 %1715  ;;  %v4596_v20 = vpop.permute.xlu0 %1651 }
 0x814   : > { %v4598_v31 = vpop.permute.xlu1 %1667 }
 0x819   : > { %1913 = vrot.lane.b32.xlu2 %v1903_v45, %s2991_s27  ;;  %1909 = vrot.lane.b32.xlu0 %v1901_v62, %s2991_s27  ;;  %v5608_v62 = vld [vmem:[#allocation92_spill] sm:$0xff] }
 0x81a   : > { %1911 = vrot.lane.b32.xlu1 %v1902_v14, %s2991_s27  ;;  %v1945_v14 = vmul.f32 %v5608_v62, %v5599_v44  ;;  %v1946_v56 = vmul.f32 %v5608_v62, %v3076_v58  ;;  %v1967_v62 = vmul.f32 %v5612_v37, %v3207_v2  ;;  %v1588_v37 = vsel %vm342_vm0, %v4399_v63, %v4536_v9 }
 0x81b   : > { %v4609_v8 = vpop.permute.xlu2 %1735  ;;  %v4611_v29 = vpop.permute.xlu0 %1671  ;;  %v1632_v63 = vsel %vm414_vm1, %v4568_v39, %v4519_v48 }
 0x81c   : > { %v4613_v22 = vpop.permute.xlu1 %1673 }
 0x81d   : > { %v1676_v39 = vsel %vm587_vm2, %v4611_v29, %v4613_v22 }
 0x821   : > { %1933 = vrot.lane.b32.xlu2 %v1924_v16, %s2991_s27  ;;  %1915 = vrot.lane.b32.xlu0 %v1904_v19, %s2991_s27 }
 0x822   : > { %1931 = vrot.lane.b32.xlu1 %v1923_v25, %s2991_s27 }
 0x823   : > { %v4624_v5 = vpop.permute.xlu2 %1755  ;;  %v4626_v33 = vpop.permute.xlu0 %1691 }
 0x824   : > { %v4628_v45 = vpop.permute.xlu1 %1693 }
 0x829   : > { %1953 = vrot.lane.b32.xlu2 %v1945_v14, %s2992_s4  ;;  %1935 = vrot.lane.b32.xlu0 %v1925_v42, %s2991_s27 }
 0x82a   : > { %1937 = vrot.lane.b32.xlu1 %v1926_v27, %s2991_s27 }
 0x82b   : > { %v4639_v16 = vpop.permute.xlu2 %1761  ;;  %v4641_v19 = vpop.permute.xlu0 %1711 }
 0x82c   : > { %v4643_v25 = vpop.permute.xlu1 %1713 }
 0x831   : > { %1959 = vrot.lane.b32.xlu2 %v1948_v11, %s2992_s4  ;;  %1955 = vrot.lane.b32.xlu0 %v1946_v56, %s2992_s4 }
 0x832   : > { %1957 = vrot.lane.b32.xlu1 %v1947_v26, %s2992_s4 }
 0x833   : > { %v4654_v42 = vpop.permute.xlu2 %1781  ;;  %v1718_v27 = vpop.permute.xlu0 %1717 }
 0x834   : > { %v4656_v14 = vpop.permute.xlu1 %1733 }
 0x839   : > { %1979 = vrot.lane.b32.xlu2 %v1969_v6, %s2990_s18  ;;  %1975 = vrot.lane.b32.xlu0 %v1967_v62, %s2990_s18 }
 0x83a   : > { %1977 = vrot.lane.b32.xlu1 %v1968_v54, %s2990_s18 }
 0x83b   : > { %v4667_v26 = vpop.permute.xlu2 %1801  ;;  %v1738_v56 = vpop.permute.xlu0 %1737 }
 0x83c   : > { %v1740_v11 = vpop.permute.xlu1 %1739 }
 0x841   : > { %1999 = vrot.lane.b32.xlu2 %v1990_v41, %s2990_s18  ;;  %1981 = vrot.lane.b32.xlu0 %v1970_v18, %s2990_s18  ;;  %v1992_v18 = vmul.f32 %v5615_v49, %v5540_v47  ;;  %v5616_v41 = vld [vmem:[#allocation26_spill] sm:$0xff]  ;;  %v1587_v49 = vsel %vm342_vm0, %v4521_v55, %v4523_v21  ;;  %v1631_v21 = vsel %vm414_vm1, %v4492_v59, %v4566_v61 }
 0x842   : > { %1997 = vrot.lane.b32.xlu1 %v1989_v34, %s2990_s18  ;;  %v1610_v34 = vsel %vm342_vm0, %v4551_v7, %v4553_v17  ;;  %v1592_v10 = vadd.f32 %v1588_v37, %v5616_v41  ;;  %v5618_v41 = vld [vmem:[#allocation109_spill] sm:$0xff]  ;;  %v1720_v61 = vsel %vm652_vm3, %v4594_v0, %v1718_v27  ;;  %v5619_v27 = vld [vmem:[#allocation115_spill] sm:$0xff] }
 0x843   : > { %v4678_v6 = vpop.permute.xlu2 %1821  ;;  %v4680_v54 = vpop.permute.xlu0 %1757  ;;  %v2014_v55 = vmul.f32 %v5618_v41, %v3173_v50 }
 0x844   : > { %v1760_v62 = vpop.permute.xlu1 %1759  ;;  %v1614_v7 = vadd.f32 %v1610_v34, %v1592_v10  ;;  %v2012_v10 = vmul.f32 %v5614_v53, %v3173_v50 }
 0x845   : > { %v1764_v0 = vsel %vm587_vm2, %v1760_v62, %v4639_v16  ;;  %v1741_v16 = vsel %vm717_vm4, %v4656_v14, %v4609_v8  ;;  %v5621_v8 = vld [vmem:[#allocation122_spill] sm:$0xff] }
 0x846   : > { %v1636_v37 = vadd.f32 %v1632_v63, %v1614_v7  ;;  %v2056_v14 = vmul.f32 %v5621_v8, %v3173_v50 }
 0x849   : > { %2019 = vrot.lane.b32.xlu2 %v2011_v3, %s2991_s27  ;;  %2001 = vrot.lane.b32.xlu0 %v1991_v28, %s2990_s18  ;;  %v1654_v28 = vsel %vm587_vm2, %v4534_v51, %v4596_v20  ;;  %v1609_v3 = vsel %vm342_vm0, %v4538_v35, %v4452_v4  ;;  %v2013_v4 = vmul.f32 %v5618_v41, %v3207_v2 }
 0x84a   : > { %2003 = vrot.lane.b32.xlu1 %v1992_v18, %s2990_s18  ;;  %v5617_v18 = vld [vmem:[#allocation25_spill] sm:$0xff]  ;;  %v1658_v51 = vadd.f32 %v1654_v28, %v1636_v37  ;;  %v1653_v20 = vsel %vm587_vm2, %v4581_v24, %v4583_v46  ;;  %v1742_v28 = vsel %vm717_vm4, %v1738_v56, %v1740_v11  ;;  %v1697_v24 = vsel %vm652_vm3, %v4564_v43, %v4626_v33 }
 0x84b   : > { %v4701_v9 = vpop.permute.xlu2 %1827  ;;  %v1778_v13 = vpop.permute.xlu0 %1777  ;;  %v1591_v48 = vadd.f32 %v1587_v49, %v5617_v18  ;;  %v1698_v49 = vsel %vm652_vm3, %v4628_v45, %v4579_v57  ;;  %v1675_v57 = vsel %vm587_vm2, %v4598_v31, %v4549_v36  ;;  %v2035_v37 = vmul.f32 %v5619_v27, %v3205_v1  ;;  %v5620_v18 = vld [vmem:[#allocation116_spill] sm:$0xff] }
 0x84c   : > { %v1780_v17 = vpop.permute.xlu1 %1779  ;;  %v1680_v29 = vadd.f32 %v1676_v39, %v1658_v51  ;;  %v2033_v36 = vmul.f32 %v5620_v18, %v3205_v1  ;;  %v1719_v31 = vsel %vm652_vm3, %v4641_v19, %v4643_v25  ;;  %v2034_v11 = vmul.f32 %v5620_v18, %v5540_v47 }
 0x84d   : > { %v1613_v35 = vadd.f32 %v1609_v3, %v1591_v48  ;;  %v1763_v39 = vsel %vm587_vm2, %v4624_v5, %v4680_v54  ;;  %v1785_v51 = vsel %vm587_vm2, %v1778_v13, %v1780_v17  ;;  %v2055_v5 = vmul.f32 %v5621_v8, %v3207_v2 }
 0x84e   : > { %v1702_v45 = vadd.f32 %v1698_v49, %v1680_v29  ;;  %v2036_v49 = vmul.f32 %v5619_v27, %v5540_v47 }
 0x84f   : > { %v1635_v59 = vadd.f32 %v1631_v21, %v1613_v35 }
 0x850   : > { %v1724_v46 = vadd.f32 %v1720_v61, %v1702_v45  ;;  %v5622_v45 = vld [vmem:[#allocation12_spill] sm:$0xff] }
 0x851   : > { %2025 = vrot.lane.b32.xlu2 %v2014_v55, %s2991_s27  ;;  %2021 = vrot.lane.b32.xlu0 %v2012_v10, %s2991_s27  ;;  %v1657_v7 = vadd.f32 %v1653_v20, %v1635_v59 }
 0x852   : > { %2023 = vrot.lane.b32.xlu1 %v2013_v4, %s2991_s27  ;;  %v1746_v56 = vadd.f32 %v1742_v28, %v1724_v46 }
 0x853   : > { %v4736_v22 = vpop.permute.xlu2 %1847  ;;  %v1784_v34 = vpop.permute.xlu0 %1783  ;;  %v1679_v3 = vadd.f32 %v1675_v57, %v1657_v7  ;;  %v5623_v7 = vld [vmem:[#allocation121_spill] sm:$0xff] }
 0x854   : > { %v1800_v63 = vpop.permute.xlu1 %1799  ;;  %v1786_v33 = vsel %vm587_vm2, %v4654_v42, %v1784_v34  ;;  %v1768_v62 = vadd.f32 %v1764_v0, %v1746_v56  ;;  %v2057_v28 = vmul.f32 %v5623_v7, %v3207_v2 }
 0x855   : > { %v1701_v43 = vadd.f32 %v1697_v24, %v1679_v3  ;;  %v1807_v20 = vsel %vm652_vm3, %v1800_v63, %v4667_v26  ;;  %v2083_v63 = vmul.f32 %v5622_v45, %v3207_v2  ;;  %v2058_v24 = vmul.f32 %v5623_v7, %v3173_v50 }
 0x856   : > { %v1790_v55 = vadd.f32 %v1786_v33, %v1768_v62 }
 0x857   : > { %v1723_v19 = vadd.f32 %v1719_v31, %v1701_v43  ;;  %v2084_v31 = vmul.f32 %v5622_v45, %v3173_v50 }
 0x859   : > { %2045 = vrot.lane.b32.xlu2 %v2035_v37, %s2991_s27  ;;  %2041 = vrot.lane.b32.xlu0 %v2033_v36, %s2991_s27  ;;  %v1745_v10 = vadd.f32 %v1741_v16, %v1723_v19  ;;  %v5624_v37 = vld [vmem:[#allocation11_spill] sm:$0xff] }
 0x85a   : > { %2043 = vrot.lane.b32.xlu1 %v2034_v11, %s2991_s27  ;;  %v2086_v36 = vmul.f32 %v5624_v37, %v3173_v50  ;;  %v2085_v56 = vmul.f32 %v5624_v37, %v3207_v2 }
 0x85b   : > { %v1868_v25 = vpop.permute.xlu2 %1867  ;;  %v1804_v48 = vpop.permute.xlu0 %1803  ;;  %v1767_v35 = vadd.f32 %v1763_v39, %v1745_v10  ;;  %v5625_v39 = vld [vmem:[#allocation3_spill] sm:$0xff] }
 0x85c   : > { %v1806_v42 = vpop.permute.xlu1 %1805 }
 0x85d   : > { %v1808_v21 = vsel %vm652_vm3, %v1804_v48, %v1806_v42  ;;  %v1789_v54 = vadd.f32 %v1785_v51, %v1767_v35  ;;  %v5626_v42 = vld [vmem:[#allocation4_spill] sm:$0xff] }
 0x85e   : > { %v1812_v4 = vadd.f32 %v1808_v21, %v1790_v55  ;;  %v2107_v55 = vmul.f32 %v5625_v39, %v3205_v1  ;;  %v2105_v10 = vmul.f32 %v5626_v42, %v3205_v1  ;;  %v2106_v21 = vmul.f32 %v5626_v42, %v5540_v47  ;;  %v5632_v42 = vld [vmem:[#allocation16_spill] sm:$0xff] }
 0x85f   : > { %v1811_v13 = vadd.f32 %v1807_v20, %v1789_v54  ;;  %v2108_v20 = vmul.f32 %v5625_v39, %v5540_v47  ;;  %v5631_v39 = vld [vmem:[#allocation17_spill] sm:$0xff] }
 0x861   : > { %2065 = vrot.lane.b32.xlu2 %v2056_v14, %s2992_s4  ;;  %2047 = vrot.lane.b32.xlu0 %v2036_v49, %s2991_s27  ;;  %v5627_v14 = vld [vmem:[#allocation10_spill] sm:$0xff] }
 0x862   : > { %2063 = vrot.lane.b32.xlu1 %v2055_v5, %s2992_s4  ;;  %v2128_v49 = vmul.f32 %v5627_v14, %v3173_v50  ;;  %v2127_v5 = vmul.f32 %v5627_v14, %v3207_v2 }
 0x863   : > { %v1888_v17 = vpop.permute.xlu2 %1887  ;;  %v1824_v29 = vpop.permute.xlu0 %1823 }
 0x864   : > { %v1829_v59 = vsel %vm652_vm3, %v4678_v6, %v1824_v29  ;;  %v1826_v61 = vpop.permute.xlu1 %1825 }
 0x865   : > { %v1833_v34 = vadd.f32 %v1829_v59, %v1811_v13  ;;  %v1830_v26 = vsel %vm652_vm3, %v1826_v61, %v4701_v9 }
 0x866   : > { %v1834_v57 = vadd.f32 %v1830_v26, %v1812_v4 }
 0x869   : > { %2091 = vrot.lane.b32.xlu2 %v2083_v63, %s2985_s19  ;;  %2067 = vrot.lane.b32.xlu0 %v2057_v28, %s2992_s4  ;;  %v5629_v63 = vld [vmem:[#allocation9_spill] sm:$0xff] }
 0x86a   : > { %2069 = vrot.lane.b32.xlu1 %v2058_v24, %s2992_s4  ;;  %v2129_v28 = vmul.f32 %v5629_v63, %v3207_v2  ;;  %v2130_v24 = vmul.f32 %v5629_v63, %v3173_v50  ;;  %v5635_v63 = vld [vmem:[#allocation19_spill] sm:$0xff] }
 0x86b   : > { %v1894_v6 = vpop.permute.xlu2 %1893  ;;  %v1844_v46 = vpop.permute.xlu0 %1843 }
 0x86c   : > { %v1846_v3 = vpop.permute.xlu1 %1845 }
 0x86d   : > { %v1851_v9 = vsel %vm717_vm4, %v1844_v46, %v1846_v3 }
 0x86e   : > { %v1855_v0 = vadd.f32 %v1851_v9, %v1833_v34 }
 0x871   : > { %2097 = vrot.lane.b32.xlu2 %v2086_v36, %s2985_s19  ;;  %2093 = vrot.lane.b32.xlu0 %v2084_v31, %s2985_s19 }
 0x872   : > { %2095 = vrot.lane.b32.xlu1 %v2085_v56, %s2985_s19 }
 0x873   : > { %v1914_v11 = vpop.permute.xlu2 %1913  ;;  %v1850_v43 = vpop.permute.xlu0 %1849 }
 0x874   : > { %v1852_v33 = vsel %vm717_vm4, %v4736_v22, %v1850_v43  ;;  %v1866_v16 = vpop.permute.xlu1 %1865 }
 0x875   : > { %v1856_v62 = vadd.f32 %v1852_v33, %v1834_v57  ;;  %v1873_v19 = vsel %vm910_vm5, %v1866_v16, %v1868_v25  ;;  %v5628_v57 = vld [vmem:[#allocation15_spill] sm:$0xff] }
 0x876   : > { %v1877_v48 = vadd.f32 %v1873_v19, %v1855_v0  ;;  %v2149_v45 = vmul.f32 %v5628_v57, %v3205_v1  ;;  %v5630_v0 = vld [vmem:[#allocation14_spill] sm:$0xff]  ;;  %v2150_v36 = vmul.f32 %v5628_v57, %v5540_v47 }
 0x877   : > { %v2152_v37 = vmul.f32 %v5630_v0, %v5540_v47  ;;  %v2151_v31 = vmul.f32 %v5630_v0, %v3205_v1  ;;  %v5634_v57 = vld [vmem:[#allocation18_spill] sm:$0xff] }
 0x879   : > { %2117 = vrot.lane.b32.xlu2 %v2107_v55, %s2985_s19  ;;  %2113 = vrot.lane.b32.xlu0 %v2105_v10, %s2985_s19  ;;  %v2173_v55 = vmul.f32 %v5631_v39, %v5600_v32  ;;  %v2171_v10 = vmul.f32 %v5632_v42, %v5600_v32 }
 0x87a   : > { %2115 = vrot.lane.b32.xlu1 %v2106_v21, %s2985_s19  ;;  %v2172_v21 = vmul.f32 %v5632_v42, %v5603_v15  ;;  %v5638_v42 = vld [vmem:[#allocation24_spill] sm:$0xff] }
 0x87b   : > { %v1934_v22 = vpop.permute.xlu2 %1933  ;;  %v1870_v51 = vpop.permute.xlu0 %1869 }
 0x87c   : > { %v1872_v4 = vpop.permute.xlu1 %1871 }
 0x87d   : > { %v1874_v25 = vsel %vm910_vm5, %v1870_v51, %v1872_v4 }
 0x87e   : > { %v1878_v35 = vadd.f32 %v1874_v25, %v1856_v62 }
 0x881   : > { %2137 = vrot.lane.b32.xlu2 %v2128_v49, %s2986_s20  ;;  %2119 = vrot.lane.b32.xlu0 %v2108_v20, %s2985_s19  ;;  %v2174_v49 = vmul.f32 %v5631_v39, %v5603_v15  ;;  %v5637_v39 = vld [vmem:[#allocation22_spill] sm:$0xff] }
 0x882   : > { %2135 = vrot.lane.b32.xlu1 %v2127_v5, %s2986_s20 }
 0x883   : > { %v1954_v54 = vpop.permute.xlu2 %1953  ;;  %v1890_v13 = vpop.permute.xlu0 %1889 }
 0x884   : > { %v1895_v29 = vsel %vm910_vm5, %v1888_v17, %v1890_v13  ;;  %v1892_v59 = vpop.permute.xlu1 %1891 }
 0x885   : > { %v1899_v61 = vadd.f32 %v1895_v29, %v1877_v48  ;;  %v1896_v34 = vsel %vm910_vm5, %v1892_v59, %v1894_v6 }
 0x886   : > { %v1900_v26 = vadd.f32 %v1896_v34, %v1878_v35  ;;  %v5633_v35 = vld [vmem:[#allocation20_spill] sm:$0xff] }
 0x887   : > { %v2194_v14 = vmul.f32 %v5633_v35, %v3076_v58  ;;  %v2193_v20 = vmul.f32 %v5633_v35, %v5599_v44 }
 0x889   : > { %2157 = vrot.lane.b32.xlu2 %v2149_v45, %s2986_s20  ;;  %2139 = vrot.lane.b32.xlu0 %v2129_v28, %s2986_s20  ;;  %v2215_v45 = vmul.f32 %v5634_v57, %v5600_v32  ;;  %v2195_v28 = vmul.f32 %v5635_v63, %v5599_v44 }
 0x88a   : > { %2141 = vrot.lane.b32.xlu1 %v2130_v24, %s2986_s20  ;;  %v2196_v24 = vmul.f32 %v5635_v63, %v3076_v58  ;;  %v2262_v63 = vmul.f32 %v3228_v23, %v5603_v15 }
 0x88b   : > { %v1960_v17 = vpop.permute.xlu2 %1959  ;;  %v1910_v46 = vpop.permute.xlu0 %1909 }
 0x88c   : > { %v1912_v3 = vpop.permute.xlu1 %1911 }
 0x88d   : > { %v1917_v6 = vsel %vm975_vm6, %v1910_v46, %v1912_v3 }
 0x88e   : > { %v1921_v9 = vadd.f32 %v1917_v6, %v1899_v61 }
 0x891   : > { %2163 = vrot.lane.b32.xlu2 %v2152_v37, %s2986_s20  ;;  %2159 = vrot.lane.b32.xlu0 %v2150_v36, %s2986_s20  ;;  %v2216_v37 = vmul.f32 %v5634_v57, %v5603_v15  ;;  %v2281_v57 = vmul.f32 %v3252_v12, %v3205_v1 }
 0x892   : > { %2161 = vrot.lane.b32.xlu1 %v2151_v31, %s2986_s20 }
 0x893   : > { %v1980_v56 = vpop.permute.xlu2 %1979  ;;  %v1916_v43 = vpop.permute.xlu0 %1915 }
 0x894   : > { %v1918_v33 = vsel %vm975_vm6, %v1914_v11, %v1916_v43  ;;  %v1932_v16 = vpop.permute.xlu1 %1931 }
 0x895   : > { %v1922_v62 = vadd.f32 %v1918_v33, %v1900_v26  ;;  %v1939_v19 = vsel %vm975_vm6, %v1932_v16, %v1934_v22 }
 0x896   : > { %v1943_v48 = vadd.f32 %v1939_v19, %v1921_v9  ;;  %v5636_v9 = vld [vmem:[#allocation21_spill] sm:$0xff] }
 0x897   : > { %v2218_v0 = vmul.f32 %v5636_v9, %v5603_v15  ;;  %v2217_v36 = vmul.f32 %v5636_v9, %v5600_v32 }
 0x899   : > { %2183 = vrot.lane.b32.xlu2 %v2173_v55, %s2987_s21  ;;  %2179 = vrot.lane.b32.xlu0 %v2171_v10, %s2987_s21  ;;  %v2239_v55 = vmul.f32 %v5637_v39, %v5599_v44  ;;  %v2237_v10 = vmul.f32 %v5638_v42, %v5599_v44 }
 0x89a   : > { %2181 = vrot.lane.b32.xlu1 %v2172_v21, %s2987_s21  ;;  %v2238_v21 = vmul.f32 %v5638_v42, %v3076_v58 }
 0x89b   : > { %v2000_v11 = vpop.permute.xlu2 %1999  ;;  %v1936_v51 = vpop.permute.xlu0 %1935 }
 0x89c   : > { %v1938_v4 = vpop.permute.xlu1 %1937 }
 0x89d   : > { %v1940_v22 = vsel %vm975_vm6, %v1936_v51, %v1938_v4 }
 0x89e   : > { %v1944_v25 = vadd.f32 %v1940_v22, %v1922_v62 }
 0x8a1   : > { %2203 = vrot.lane.b32.xlu2 %v2194_v14, %s2988_s22  ;;  %2185 = vrot.lane.b32.xlu0 %v2174_v49, %s2987_s21  ;;  %v2240_v14 = vmul.f32 %v5637_v39, %v3076_v58 }
 0x8a2   : > { %2201 = vrot.lane.b32.xlu1 %v2193_v20, %s2988_s22 }
 0x8a3   : > { %v2020_v5 = vpop.permute.xlu2 %2019  ;;  %v1956_v13 = vpop.permute.xlu0 %1955 }
 0x8a4   : > { %v1961_v29 = vsel %vm1040_vm7, %v1954_v54, %v1956_v13  ;;  %v1958_v59 = vpop.permute.xlu1 %1957 }
 0x8a5   : > { %v1965_v61 = vadd.f32 %v1961_v29, %v1943_v48  ;;  %v1962_v34 = vsel %vm1040_vm7, %v1958_v59, %v1960_v17 }
 0x8a6   : > { %v1966_v26 = vadd.f32 %v1962_v34, %v1944_v25  ;;  %v5639_v25 = vld [vmem:[#allocation23_spill] sm:$0xff] }
 0x8a7   : > { %v2260_v35 = vmul.f32 %v5639_v25, %v5603_v15  ;;  %v2259_v49 = vmul.f32 %v5639_v25, %v5600_v32  ;;  %v5646_v25 = vld [vmem:[#allocation6_spill] sm:$0xff] }
 0x8a9   : > { %2223 = vrot.lane.b32.xlu2 %v2215_v45, %s2988_s22  ;;  %2205 = vrot.lane.b32.xlu0 %v2195_v28, %s2988_s22  ;;  %v2261_v45 = vmul.f32 %v3228_v23, %v5600_v32  ;;  %v2283_v23 = vmul.f32 %v5499_v38, %v3205_v1 }
 0x8aa   : > { %2207 = vrot.lane.b32.xlu1 %v2196_v24, %s2988_s22 }
 0x8ab   : > { %v2026_v54 = vpop.permute.xlu2 %2025  ;;  %v1976_v46 = vpop.permute.xlu0 %1975 }
 0x8ac   : > { %v1978_v3 = vpop.permute.xlu1 %1977 }
 0x8ad   : > { %v1983_v17 = vsel %vm910_vm5, %v1976_v46, %v1978_v3  ;;  %v2284_v3 = vmul.f32 %v5499_v38, %v5540_v47  ;;  %v2303_v38 = vmul.f32 %v5528_v30, %v3207_v2 }
 0x8ae   : > { %v1987_v6 = vadd.f32 %v1983_v17, %v1965_v61  ;;  %v2282_v17 = vmul.f32 %v3252_v12, %v5540_v47  ;;  %v2305_v12 = vmul.f32 %v5506_v40, %v3207_v2 }
 0x8b1   : > { %2229 = vrot.lane.b32.xlu2 %v2218_v0, %s2988_s22  ;;  %2225 = vrot.lane.b32.xlu0 %v2216_v37, %s2988_s22 }
 0x8b2   : > { %2227 = vrot.lane.b32.xlu1 %v2217_v36, %s2988_s22 }
 0x8b3   : > { %v2046_v31 = vpop.permute.xlu2 %2045  ;;  %v1982_v43 = vpop.permute.xlu0 %1981 }
 0x8b4   : > { %v1984_v33 = vsel %vm910_vm5, %v1980_v56, %v1982_v43  ;;  %v1998_v16 = vpop.permute.xlu1 %1997 }
 0x8b5   : > { %v1988_v62 = vadd.f32 %v1984_v33, %v1966_v26  ;;  %v2005_v19 = vsel %vm910_vm5, %v1998_v16, %v2000_v11  ;;  %v5640_v16 = vmax.f32 %v4496_v60, %v4498_v52  ;;  %v2306_v52 = vmul.f32 %v5506_v40, %v3173_v50 }
 0x8b6   : > { %v2009_v48 = vadd.f32 %v2005_v19, %v1987_v6  ;;  %v2304_v19 = vmul.f32 %v5528_v30, %v3173_v50 }
 0x8b9   : > { %2249 = vrot.lane.b32.xlu2 %v2239_v55, %s2989_s29  ;;  %2245 = vrot.lane.b32.xlu0 %v2237_v10, %s2989_s29  ;;  %v5641_v10 = vld [vmem:[#allocation30_spill] sm:$0xff] }
 0x8ba   : > { %2247 = vrot.lane.b32.xlu1 %v2238_v21, %s2989_s29  ;;  %v2326_v60 = vmul.f32 %v5641_v10, %v5540_v47  ;;  %v2325_v30 = vmul.f32 %v5641_v10, %v3205_v1  ;;  %v5642_v21 = vld [vmem:[#allocation54_spill] sm:$0xff] }
 0x8bb   : > { %v2066_v56 = vpop.permute.xlu2 %2065  ;;  %v2002_v51 = vpop.permute.xlu0 %2001 }
 0x8bc   : > { %v2004_v4 = vpop.permute.xlu1 %2003 }
 0x8bd   : > { %v2006_v11 = vsel %vm910_vm5, %v2002_v51, %v2004_v4 }
 0x8be   : > { %v2010_v22 = vadd.f32 %v2006_v11, %v1988_v62 }
 0x8c1   : > { %2269 = vrot.lane.b32.xlu2 %v2260_v35, %s2989_s29  ;;  %2251 = vrot.lane.b32.xlu0 %v2240_v14, %s2989_s29 }
 0x8c2   : > { %2267 = vrot.lane.b32.xlu1 %v2259_v49, %s2989_s29  ;;  %v5647_v49 = vld [vmem:[#allocation5_spill] sm:$0xff] }
 0x8c3   : > { %v2092_v20 = vpop.permute.xlu2 %2091  ;;  %v2022_v13 = vpop.permute.xlu0 %2021 }
 0x8c4   : > { %v2027_v29 = vsel %vm975_vm6, %v2020_v5, %v2022_v13  ;;  %v2024_v59 = vpop.permute.xlu1 %2023 }
 0x8c5   : > { %v2031_v61 = vadd.f32 %v2027_v29, %v2009_v48  ;;  %v2028_v34 = vsel %vm975_vm6, %v2024_v59, %v2026_v54 }
 0x8c6   : > { %v2032_v26 = vadd.f32 %v2028_v34, %v2010_v22  ;;  %v5645_v22 = vld [vmem:[#allocation13_spill] sm:$0xff] }
 0x8c7   : > { %v2079_v35 = vmul.f32 %v5646_v25, %v5645_v22  ;;  %v2080_v13 = vmul.f32 %v5647_v49, %v5645_v22 }
 0x8c9   : > { %2289 = vrot.lane.b32.xlu2 %v2281_v57, %s2987_s21  ;;  %2271 = vrot.lane.b32.xlu0 %v2261_v45, %s2989_s29  ;;  %v5649_v45 = vld [vmem:[#allocation32_spill] sm:$0xff] }
 0x8ca   : > { %2273 = vrot.lane.b32.xlu1 %v2262_v63, %s2989_s29  ;;  %v2327_v63 = vmul.f32 %v5649_v45, %v3205_v1 }
 0x8cb   : > { %v2098_v5 = vpop.permute.xlu2 %2097  ;;  %v2042_v28 = vpop.permute.xlu0 %2041 }
 0x8cc   : > { %v2044_v24 = vpop.permute.xlu1 %2043 }
 0x8cd   : > { %v2049_v54 = vsel %vm975_vm6, %v2042_v28, %v2044_v24  ;;  %v2328_v28 = vmul.f32 %v5649_v45, %v5540_v47 }
 0x8ce   : > { %v2053_v46 = vadd.f32 %v2049_v54, %v2031_v61 }
 0x8d1   : > { %2295 = vrot.lane.b32.xlu2 %v2284_v3, %s2987_s21  ;;  %2291 = vrot.lane.b32.xlu0 %v2282_v17, %s2987_s21  ;;  %v5650_v3 = vld [vmem:[#allocation43_spill] sm:$0xff] }
 0x8d2   : > { %2293 = vrot.lane.b32.xlu1 %v2283_v23, %s2987_s21  ;;  %v2350_v17 = vmul.f32 %v5650_v3, %v3173_v50 }
 0x8d3   : > { %v2118_v6 = vpop.permute.xlu2 %2117  ;;  %v2048_v9 = vpop.permute.xlu0 %2047 }
 0x8d4   : > { %v2050_v0 = vsel %vm975_vm6, %v2046_v31, %v2048_v9  ;;  %v2064_v37 = vpop.permute.xlu1 %2063  ;;  %v2349_v9 = vmul.f32 %v5650_v3, %v3207_v2 }
 0x8d5   : > { %v2054_v36 = vadd.f32 %v2050_v0, %v2032_v26  ;;  %v2071_v43 = vsel %vm1040_vm7, %v2064_v37, %v2066_v56  ;;  %v5643_v56 = vld [vmem:[#allocation37_spill] sm:$0xff]  ;;  %v5648_v26 = vld [vmem:[#allocation44_spill] sm:$0xff] }
 0x8d6   : > { %v2075_v33 = vadd.f32 %v2071_v43, %v2053_v46  ;;  %v5644_v51 = vmax.f32 %v5642_v21, %v5643_v56  ;;  %v2347_v57 = vmul.f32 %v5648_v26, %v3207_v2  ;;  %v2348_v23 = vmul.f32 %v5648_v26, %v3173_v50 }
 0x8d8   : > { %v4939_v62 = vmax.f32 %v5640_v16, %v2075_v33  ;;  %v5651_v16 = vld [vmem:[#allocation55_spill] sm:$0xff] }
 0x8d9   : > { %2315 = vrot.lane.b32.xlu2 %v2305_v12, %s2988_s22  ;;  %2311 = vrot.lane.b32.xlu0 %v2303_v38, %s2988_s22  ;;  %v2372_v21 = vmul.f32 %v5651_v16, %v5540_v47 }
 0x8da   : > { %2313 = vrot.lane.b32.xlu1 %v2304_v19, %s2988_s22  ;;  %v2371_v19 = vmul.f32 %v5651_v16, %v3205_v1 }
 0x8db   : > { %v2138_v31 = vpop.permute.xlu2 %2137  ;;  %v2068_v48 = vpop.permute.xlu0 %2067 }
 0x8dc   : > { %v2070_v39 = vpop.permute.xlu1 %2069 }
 0x8dd   : > { %v2072_v55 = vsel %vm1040_vm7, %v2068_v48, %v2070_v39  ;;  %v5652_v48 = vld [vmem:[#allocation56_spill] sm:$0xff] }
 0x8de   : > { %v2076_v42 = vadd.f32 %v2072_v55, %v2054_v36  ;;  %v2369_v39 = vmul.f32 %v5652_v48, %v3205_v1  ;;  %v2370_v55 = vmul.f32 %v5652_v48, %v5540_v47 }
 0x8e0   : > { %v4956_v4 = vmax.f32 %v5644_v51, %v2076_v42 }
 0x8e1   : > { %2335 = vrot.lane.b32.xlu2 %v2326_v60, %s2988_s22  ;;  %2317 = vrot.lane.b32.xlu0 %v2306_v52, %s2988_s22  ;;  %v5653_v52 = vld [vmem:[#allocation68_spill] sm:$0xff] }
 0x8e2   : > { %2333 = vrot.lane.b32.xlu1 %v2325_v30, %s2988_s22  ;;  %v2392_v30 = vmul.f32 %v5653_v52, %v5603_v15  ;;  %v2391_v56 = vmul.f32 %v5653_v52, %v5600_v32 }
 0x8e3   : > { %v2158_v11 = vpop.permute.xlu2 %2157  ;;  %v2094_v14 = vpop.permute.xlu0 %2093 }
 0x8e4   : > { %v2099_v40 = vsel %vm342_vm0, %v2092_v20, %v2094_v14  ;;  %v2096_v29 = vpop.permute.xlu1 %2095 }
 0x8e5   : > { %v2103_v59 = vadd.f32 %v2099_v40, %v2079_v35  ;;  %v2100_v61 = vsel %vm342_vm0, %v2096_v29, %v2098_v5 }
 0x8e6   : > { %v2104_v34 = vadd.f32 %v2100_v61, %v2080_v13  ;;  %v5654_v13 = vld [vmem:[#allocation74_spill] sm:$0xff] }
 0x8e7   : > { %v2413_v29 = vmul.f32 %v5654_v13, %v5599_v44 }
 0x8e9   : > { %2355 = vrot.lane.b32.xlu2 %v2347_v57, %s2989_s29  ;;  %2337 = vrot.lane.b32.xlu0 %v2327_v63, %s2988_s22 }
 0x8ea   : > { %2339 = vrot.lane.b32.xlu1 %v2328_v28, %s2988_s22  ;;  %v5656_v28 = vld [vmem:[#allocation73_spill] sm:$0xff] }
 0x8eb   : > { %v2164_v20 = vpop.permute.xlu2 %2163  ;;  %v2114_v24 = vpop.permute.xlu0 %2113 }
 0x8ec   : > { %v2116_v54 = vpop.permute.xlu1 %2115 }
 0x8ed   : > { %v2121_v5 = vsel %vm342_vm0, %v2114_v24, %v2116_v54  ;;  %v2414_v24 = vmul.f32 %v5654_v13, %v3076_v58  ;;  %v2415_v54 = vmul.f32 %v5656_v28, %v5599_v44 }
 0x8ee   : > { %v2125_v46 = vadd.f32 %v2121_v5, %v2103_v59  ;;  %v5655_v59 = vld [vmem:[#allocation67_spill] sm:$0xff] }
 0x8ef   : > { %v2393_v61 = vmul.f32 %v5655_v59, %v5600_v32 }
 0x8f1   : > { %2361 = vrot.lane.b32.xlu2 %v2350_v17, %s2989_s29  ;;  %2357 = vrot.lane.b32.xlu0 %v2348_v23, %s2989_s29 }
 0x8f2   : > { %2359 = vrot.lane.b32.xlu1 %v2349_v9, %s2989_s29 }
 0x8f3   : > { %v2184_v0 = vpop.permute.xlu2 %2183  ;;  %v2120_v37 = vpop.permute.xlu0 %2119 }
 0x8f4   : > { %v2122_v36 = vsel %vm342_vm0, %v2118_v6, %v2120_v37  ;;  %v2136_v43 = vpop.permute.xlu1 %2135 }
 0x8f5   : > { %v2126_v33 = vadd.f32 %v2122_v36, %v2104_v34  ;;  %v2143_v12 = vsel %vm414_vm1, %v2136_v43, %v2138_v31  ;;  %v2394_v34 = vmul.f32 %v5655_v59, %v5603_v15  ;;  %v5657_v36 = vld [vmem:[#allocation79_spill] sm:$0xff] }
 0x8f6   : > { %v2147_v38 = vadd.f32 %v2143_v12, %v2125_v46  ;;  %v2437_v43 = vmul.f32 %v5657_v36, %v5600_v32 }
 0x8f9   : > { %2381 = vrot.lane.b32.xlu2 %v2371_v19, %s2989_s29  ;;  %2377 = vrot.lane.b32.xlu0 %v2369_v39, %s2989_s29 }
 0x8fa   : > { %2379 = vrot.lane.b32.xlu1 %v2370_v55, %s2989_s29  ;;  %v5659_v55 = vld [vmem:[#allocation86_spill] sm:$0xff] }
 0x8fb   : > { %v2204_v6 = vpop.permute.xlu2 %2203  ;;  %v2140_v42 = vpop.permute.xlu0 %2139 }
 0x8fc   : > { %v2142_v10 = vpop.permute.xlu1 %2141 }
 0x8fd   : > { %v2144_v31 = vsel %vm414_vm1, %v2140_v42, %v2142_v10  ;;  %v2438_v42 = vmul.f32 %v5657_v36, %v5603_v15  ;;  %v2457_v10 = vmul.f32 %v5659_v55, %v5599_v44  ;;  %v5665_v36 = vld [vmem:[#allocation104_spill] sm:$0xff] }
 0x8fe   : > { %v2148_v60 = vadd.f32 %v2144_v31, %v2126_v33  ;;  %v5658_v33 = vld [vmem:[#allocation80_spill] sm:$0xff] }
 0x8ff   : > { %v2435_v12 = vmul.f32 %v5658_v33, %v5600_v32 }
 0x901   : > { %2401 = vrot.lane.b32.xlu2 %v2392_v30, %s2990_s18  ;;  %2383 = vrot.lane.b32.xlu0 %v2372_v21, %s2989_s29 }
 0x902   : > { %2399 = vrot.lane.b32.xlu1 %v2391_v56, %s2990_s18 }
 0x903   : > { %v2224_v51 = vpop.permute.xlu2 %2223  ;;  %v2160_v22 = vpop.permute.xlu0 %2159 }
 0x904   : > { %v2165_v25 = vsel %vm414_vm1, %v2158_v11, %v2160_v22  ;;  %v2162_v35 = vpop.permute.xlu1 %2161 }
 0x905   : > { %v2169_v14 = vadd.f32 %v2165_v25, %v2147_v38  ;;  %v2166_v40 = vsel %vm414_vm1, %v2162_v35, %v2164_v20  ;;  %v2416_v20 = vmul.f32 %v5656_v28, %v3076_v58  ;;  %v2436_v38 = vmul.f32 %v5658_v33, %v5603_v15  ;;  %v5660_v25 = vld [vmem:[#allocation92_spill] sm:$0xff] }
 0x906   : > { %v2170_v49 = vadd.f32 %v2166_v40, %v2148_v60  ;;  %v2479_v35 = vmul.f32 %v5660_v25, %v5600_v32 }
 0x909   : > { %2421 = vrot.lane.b32.xlu2 %v2413_v29, %s2991_s27  ;;  %2403 = vrot.lane.b32.xlu0 %v2393_v61, %s2990_s18 }
 0x90a   : > { %2405 = vrot.lane.b32.xlu1 %v2394_v34, %s2990_s18  ;;  %v5662_v34 = vld [vmem:[#allocation91_spill] sm:$0xff] }
 0x90b   : > { %v2230_v11 = vpop.permute.xlu2 %2229  ;;  %v2180_v26 = vpop.permute.xlu0 %2179 }
 0x90c   : > { %v2182_v57 = vpop.permute.xlu1 %2181 }
 0x90d   : > { %v2187_v45 = vsel %vm587_vm2, %v2180_v26, %v2182_v57 }
 0x90e   : > { %v2191_v63 = vadd.f32 %v2187_v45, %v2169_v14  ;;  %v5661_v14 = vld [vmem:[#allocation85_spill] sm:$0xff] }
 0x90f   : > { %v2459_v40 = vmul.f32 %v5661_v14, %v5599_v44  ;;  %v2480_v44 = vmul.f32 %v5660_v25, %v5603_v15  ;;  %v2546_v25 = vmul.f32 %v5614_v53, %v5540_v47 }
 0x911   : > { %2427 = vrot.lane.b32.xlu2 %v2416_v20, %s2991_s27  ;;  %2423 = vrot.lane.b32.xlu0 %v2414_v24, %s2991_s27 }
 0x912   : > { %2425 = vrot.lane.b32.xlu1 %v2415_v54, %s2991_s27 }
 0x913   : > { %v2250_v5 = vpop.permute.xlu2 %2249  ;;  %v2186_v46 = vpop.permute.xlu0 %2185 }
 0x914   : > { %v2188_v3 = vsel %vm587_vm2, %v2184_v0, %v2186_v46  ;;  %v2202_v17 = vpop.permute.xlu1 %2201 }
 0x915   : > { %v2192_v23 = vadd.f32 %v2188_v3, %v2170_v49  ;;  %v2209_v9 = vsel %vm652_vm3, %v2202_v17, %v2204_v6  ;;  %v2458_v6 = vmul.f32 %v5659_v55, %v3076_v58  ;;  %v2460_v49 = vmul.f32 %v5661_v14, %v3076_v58 }
 0x916   : > { %v2213_v37 = vadd.f32 %v2209_v9, %v2191_v63  ;;  %v2481_v58 = vmul.f32 %v5662_v34, %v5600_v32  ;;  %v5664_v32 = vld [vmem:[#allocation98_spill] sm:$0xff] }
 0x917   : > { %v2501_v46 = vmul.f32 %v5664_v32, %v3205_v1  ;;  %v2502_v3 = vmul.f32 %v5664_v32, %v5540_v47 }
 0x919   : > { %2447 = vrot.lane.b32.xlu2 %v2437_v43, %s2991_s27  ;;  %2443 = vrot.lane.b32.xlu0 %v2435_v12, %s2991_s27  ;;  %v2524_v43 = vmul.f32 %v5665_v36, %v3173_v50  ;;  %v2523_v12 = vmul.f32 %v5665_v36, %v3207_v2 }
 0x91a   : > { %2445 = vrot.lane.b32.xlu1 %v2436_v38, %s2991_s27 }
 0x91b   : > { %v2270_v0 = vpop.permute.xlu2 %2269  ;;  %v2206_v16 = vpop.permute.xlu0 %2205 }
 0x91c   : > { %v2208_v19 = vpop.permute.xlu1 %2207 }
 0x91d   : > { %v2210_v48 = vsel %vm652_vm3, %v2206_v16, %v2208_v19 }
 0x91e   : > { %v2214_v39 = vadd.f32 %v2210_v48, %v2192_v23 }
 0x921   : > { %2467 = vrot.lane.b32.xlu2 %v2458_v6, %s2992_s4  ;;  %2449 = vrot.lane.b32.xlu0 %v2438_v42, %s2991_s27  ;;  %v2545_v6 = vmul.f32 %v5614_v53, %v3205_v1  ;;  %v5666_v42 = vld [vmem:[#allocation103_spill] sm:$0xff]  ;;  %v2569_v53 = vmul.f32 %v5619_v27, %v3207_v2 }
 0x922   : > { %2465 = vrot.lane.b32.xlu1 %v2457_v10, %s2992_s4  ;;  %v2525_v10 = vmul.f32 %v5666_v42, %v3207_v2 }
 0x923   : > { %v2290_v31 = vpop.permute.xlu2 %2289  ;;  %v2226_v60 = vpop.permute.xlu0 %2225 }
 0x924   : > { %v2231_v52 = vsel %vm652_vm3, %v2224_v51, %v2226_v60  ;;  %v2228_v30 = vpop.permute.xlu1 %2227  ;;  %v2526_v60 = vmul.f32 %v5666_v42, %v3173_v50 }
 0x925   : > { %v2235_v21 = vadd.f32 %v2231_v52, %v2213_v37  ;;  %v2232_v56 = vsel %vm652_vm3, %v2228_v30, %v2230_v11  ;;  %v2482_v11 = vmul.f32 %v5662_v34, %v5603_v15  ;;  %v5663_v15 = vld [vmem:[#allocation97_spill] sm:$0xff] }
 0x926   : > { %v2236_v22 = vadd.f32 %v2232_v56, %v2214_v39  ;;  %v2503_v54 = vmul.f32 %v5663_v15, %v3205_v1  ;;  %v2504_v33 = vmul.f32 %v5663_v15, %v5540_v47 }
 0x929   : > { %2487 = vrot.lane.b32.xlu2 %v2479_v35, %s2992_s4  ;;  %2469 = vrot.lane.b32.xlu0 %v2459_v40, %s2992_s4  ;;  %v2547_v35 = vmul.f32 %v5618_v41, %v3205_v1 }
 0x92a   : > { %2471 = vrot.lane.b32.xlu1 %v2460_v49, %s2992_s4 }
 0x92b   : > { %v2296_v51 = vpop.permute.xlu2 %2295  ;;  %v2246_v13 = vpop.permute.xlu0 %2245 }
 0x92c   : > { %v2248_v29 = vpop.permute.xlu1 %2247 }
 0x92d   : > { %v2253_v59 = vsel %vm717_vm4, %v2246_v13, %v2248_v29 }
 0x92e   : > { %v2257_v61 = vadd.f32 %v2253_v59, %v2235_v21 }
 0x931   : > { %2493 = vrot.lane.b32.xlu2 %v2482_v11, %s2992_s4  ;;  %2489 = vrot.lane.b32.xlu0 %v2480_v44, %s2992_s4 }
 0x932   : > { %2491 = vrot.lane.b32.xlu1 %v2481_v58, %s2992_s4 }
 0x933   : > { %v2316_v26 = vpop.permute.xlu2 %2315  ;;  %v2252_v57 = vpop.permute.xlu0 %2251 }
 0x934   : > { %v2254_v45 = vsel %vm717_vm4, %v2250_v5, %v2252_v57  ;;  %v2268_v63 = vpop.permute.xlu1 %2267  ;;  %v2590_v57 = vmul.f32 %v5621_v8, %v5540_v47 }
 0x935   : > { %v2258_v28 = vadd.f32 %v2254_v45, %v2236_v22  ;;  %v2275_v20 = vsel %vm717_vm4, %v2268_v63, %v2270_v0  ;;  %v2548_v22 = vmul.f32 %v5618_v41, %v5540_v47  ;;  %v2567_v41 = vmul.f32 %v5620_v18, %v3207_v2 }
 0x936   : > { %v2279_v24 = vadd.f32 %v2275_v20, %v2257_v61  ;;  %v2568_v61 = vmul.f32 %v5620_v18, %v3173_v50  ;;  %v2570_v2 = vmul.f32 %v5619_v27, %v3173_v50  ;;  %v2589_v18 = vmul.f32 %v5621_v8, %v3205_v1  ;;  %v2613_v50 = vld [vmem:[%s5181_s2] sm:$0xff] }
 0x937   : > { %v2591_v27 = vmul.f32 %v5623_v7, %v3205_v1  ;;  %v2592_v8 = vmul.f32 %v5623_v7, %v5540_v47 }
 0x939   : > { %2513 = vrot.lane.b32.xlu2 %v2503_v54, %s2990_s18  ;;  %2509 = vrot.lane.b32.xlu0 %v2501_v46, %s2990_s18 }
 0x93a   : > { %2511 = vrot.lane.b32.xlu1 %v2502_v3, %s2990_s18 }
 0x93b   : > { %v2336_v5 = vpop.permute.xlu2 %2335  ;;  %v2272_v17 = vpop.permute.xlu0 %2271 }
 0x93c   : > { %v2274_v23 = vpop.permute.xlu1 %2273 }
 0x93d   : > { %v2276_v9 = vsel %vm717_vm4, %v2272_v17, %v2274_v23  ;;  %v2614_v17 = vld [vmem:[%s5181_s2 + $0x8] sm:$0xff] }
 0x93e   : > { %v2280_v37 = vadd.f32 %v2276_v9, %v2258_v28 }
 0x941   : > { %2533 = vrot.lane.b32.xlu2 %v2524_v43, %s2991_s27  ;;  %2515 = vrot.lane.b32.xlu0 %v2504_v33, %s2990_s18 }
 0x942   : > { %2531 = vrot.lane.b32.xlu1 %v2523_v12, %s2991_s27 }
 0x943   : > { %v2356_v38 = vpop.permute.xlu2 %2355  ;;  %v2292_v0 = vpop.permute.xlu0 %2291 }
 0x944   : > { %v2297_v16 = vsel %vm587_vm2, %v2290_v31, %v2292_v0  ;;  %v2294_v19 = vpop.permute.xlu1 %2293 }
 0x945   : > { %v2301_v48 = vadd.f32 %v2297_v16, %v2279_v24  ;;  %v2298_v39 = vsel %vm587_vm2, %v2294_v19, %v2296_v51 }
 0x946   : > { %v2302_v55 = vadd.f32 %v2298_v39, %v2280_v37 }
 0x949   : > { %2553 = vrot.lane.b32.xlu2 %v2545_v6, %s2991_s27  ;;  %2535 = vrot.lane.b32.xlu0 %v2525_v10, %s2991_s27 }
 0x94a   : > { %2537 = vrot.lane.b32.xlu1 %v2526_v60, %s2991_s27 }
 0x94b   : > { %v2362_v31 = vpop.permute.xlu2 %2361  ;;  %v2312_v52 = vpop.permute.xlu0 %2311 }
 0x94c   : > { %v2314_v30 = vpop.permute.xlu1 %2313 }
 0x94d   : > { %v2319_v21 = vsel %vm652_vm3, %v2312_v52, %v2314_v30 }
 0x94e   : > { %v2323_v56 = vadd.f32 %v2319_v21, %v2301_v48 }
 0x951   : > { %2559 = vrot.lane.b32.xlu2 %v2548_v22, %s2991_s27  ;;  %2555 = vrot.lane.b32.xlu0 %v2546_v25, %s2991_s27 }
 0x952   : > { %2557 = vrot.lane.b32.xlu1 %v2547_v35, %s2991_s27 }
 0x953   : > { %v2382_v14 = vpop.permute.xlu2 %2381  ;;  %v2318_v40 = vpop.permute.xlu0 %2317 }
 0x954   : > { %v2320_v49 = vsel %vm652_vm3, %v2316_v26, %v2318_v40  ;;  %v2334_v51 = vpop.permute.xlu1 %2333 }
 0x955   : > { %v2324_v13 = vadd.f32 %v2320_v49, %v2302_v55  ;;  %v2341_v29 = vsel %vm652_vm3, %v2334_v51, %v2336_v5 }
 0x956   : > { %v2345_v59 = vadd.f32 %v2341_v29, %v2323_v56 }
 0x959   : > { %2579 = vrot.lane.b32.xlu2 %v2569_v53, %s2992_s4  ;;  %2575 = vrot.lane.b32.xlu0 %v2567_v41, %s2992_s4 }
 0x95a   : > { %2577 = vrot.lane.b32.xlu1 %v2568_v61, %s2992_s4 }
 0x95b   : > { %v2338_v34 = vpop.permute.xlu0 %2337  ;;  %v2402_v11 = vpop.permute.xlu2 %2401 }
 0x95c   : > { %v2340_v44 = vpop.permute.xlu1 %2339 }
 0x95d   : > { %v2342_v58 = vsel %vm652_vm3, %v2338_v34, %v2340_v44 }
 0x95e   : > { %v2346_v26 = vadd.f32 %v2342_v58, %v2324_v13 }
 0x961   : > { %2599 = vrot.lane.b32.xlu2 %v2590_v57, %s2992_s4  ;;  %2581 = vrot.lane.b32.xlu0 %v2570_v2, %s2992_s4 }
 0x962   : > { %2597 = vrot.lane.b32.xlu1 %v2589_v18, %s2992_s4 }
 0x963   : > { %v2358_v45 = vpop.permute.xlu0 %2357  ;;  %v2422_v15 = vpop.permute.xlu2 %2421 }
 0x964   : > { %v2363_v63 = vsel %vm717_vm4, %v2356_v38, %v2358_v45  ;;  %v2360_v28 = vpop.permute.xlu1 %2359 }
 0x965   : > { %v2367_v20 = vadd.f32 %v2363_v63, %v2345_v59  ;;  %v2364_v24 = vsel %vm717_vm4, %v2360_v28, %v2362_v31 }
 0x966   : > { %v2368_v54 = vadd.f32 %v2364_v24, %v2346_v26 }
 0x969   : > { %2617 = vperm.xlu2 %2875, %v2613_v50   ;;  %2601 = vrot.lane.b32.xlu0 %v2591_v27, %s2992_s4 }
 0x96a   : > { %2603 = vrot.lane.b32.xlu1 %v2592_v8, %s2992_s4 }
 0x96b   : > { %v2378_v32 = vpop.permute.xlu0 %2377  ;;  %v2428_v23 = vpop.permute.xlu2 %2427 }
 0x96c   : > { %v2380_v46 = vpop.permute.xlu1 %2379 }
 0x96d   : > { %v2385_v3 = vsel %vm717_vm4, %v2378_v32, %v2380_v46 }
 0x96e   : > { %v2389_v5 = vadd.f32 %v2385_v3, %v2367_v20 }
 0x971   : > { %2622 = vperm.xlu0 %2848, %v2614_v17  }
 0x973   : > { %v2384_v1 = vpop.permute.xlu0 %2383  ;;  %v2448_v43 = vpop.permute.xlu2 %2447 }
 0x974   : > { %v2386_v9 = vsel %vm717_vm4, %v2382_v14, %v2384_v1  ;;  %v2400_v47 = vpop.permute.xlu1 %2399 }
 0x975   : > { %v2390_v7 = vadd.f32 %v2386_v9, %v2368_v54  ;;  %v2407_v37 = vsel %vm910_vm5, %v2400_v47, %v2402_v11 }
 0x976   : > { %v2411_v36 = vadd.f32 %v2407_v37, %v2389_v5 }
 0x97b   : > { %v2404_v33 = vpop.permute.xlu0 %2403  ;;  %v2468_v19 = vpop.permute.xlu2 %2467 }
 0x97c   : > { %v2406_v12 = vpop.permute.xlu1 %2405 }
 0x97d   : > { %v2408_v38 = vsel %vm910_vm5, %v2404_v33, %v2406_v12 }
 0x97e   : > { %v2412_v0 = vadd.f32 %v2408_v38, %v2390_v7 }
 0x983   : > { %v2424_v16 = vpop.permute.xlu0 %2423  ;;  %v2488_v52 = vpop.permute.xlu2 %2487 }
 0x984   : > { %v2429_v48 = vsel %vm975_vm6, %v2422_v15, %v2424_v16  ;;  %v2426_v39 = vpop.permute.xlu1 %2425 }
 0x985   : > { %v2433_v55 = vadd.f32 %v2429_v48, %v2411_v36  ;;  %v2430_v6 = vsel %vm975_vm6, %v2426_v39, %v2428_v23 }
 0x986   : > { %v2434_v42 = vadd.f32 %v2430_v6, %v2412_v0 }
 0x98b   : > { %v2444_v10 = vpop.permute.xlu0 %2443  ;;  %v2494_v22 = vpop.permute.xlu2 %2493 }
 0x98c   : > { %v2446_v60 = vpop.permute.xlu1 %2445 }
 0x98d   : > { %v2451_v31 = vsel %vm975_vm6, %v2444_v10, %v2446_v60 }
 0x98e   : > { %v2455_v30 = vadd.f32 %v2451_v31, %v2433_v55 }
 0x993   : > { %v2450_v21 = vpop.permute.xlu0 %2449  ;;  %v2514_v14 = vpop.permute.xlu2 %2513 }
 0x994   : > { %v2466_v56 = vpop.permute.xlu1 %2465  ;;  %v2452_v24 = vsel %vm975_vm6, %v2448_v43, %v2450_v21 }
 0x995   : > { %v2473_v26 = vsel %vm1040_vm7, %v2466_v56, %v2468_v19  ;;  %v2456_v8 = vadd.f32 %v2452_v24, %v2434_v42 }
 0x996   : > { %v2477_v2 = vadd.f32 %v2473_v26, %v2455_v30 }
 0x99b   : > { %v2470_v25 = vpop.permute.xlu0 %2469  ;;  %v2534_v13 = vpop.permute.xlu2 %2533 }
 0x99c   : > { %v2472_v35 = vpop.permute.xlu1 %2471 }
 0x99d   : > { %v2474_v50 = vsel %vm1040_vm7, %v2470_v25, %v2472_v35 }
 0x99e   : > { %v2478_v5 = vadd.f32 %v2474_v50, %v2456_v8 }
 0x9a3   : > { %v2490_v40 = vpop.permute.xlu0 %2489  ;;  %v2554_v41 = vpop.permute.xlu2 %2553 }
 0x9a4   : > { %v2492_v49 = vpop.permute.xlu1 %2491  ;;  %v2495_v57 = vsel %vm1040_vm7, %v2488_v52, %v2490_v40 }
 0x9a5   : > { %v2499_v28 = vadd.f32 %v2495_v57, %v2477_v2  ;;  %v2496_v46 = vsel %vm1040_vm7, %v2492_v49, %v2494_v22 }
 0x9a6   : > { %v2500_v9 = vadd.f32 %v2496_v46, %v2478_v5 }
 0x9ab   : > { %v2510_v51 = vpop.permute.xlu0 %2509  ;;  %v2560_v11 = vpop.permute.xlu2 %2559 }
 0x9ac   : > { %v2512_v29 = vpop.permute.xlu1 %2511 }
 0x9ad   : > { %v2517_v45 = vsel %vm910_vm5, %v2510_v51, %v2512_v29 }
 0x9ae   : > { %v2521_v54 = vadd.f32 %v2517_v45, %v2499_v28 }
 0x9b3   : > { %v2516_v59 = vpop.permute.xlu0 %2515  ;;  %v2580_v18 = vpop.permute.xlu2 %2579 }
 0x9b4   : > { %v2532_v53 = vpop.permute.xlu1 %2531  ;;  %v2518_v23 = vsel %vm910_vm5, %v2514_v14, %v2516_v59 }
 0x9b5   : > { %v2539_v15 = vsel %vm975_vm6, %v2532_v53, %v2534_v13  ;;  %v2522_v33 = vadd.f32 %v2518_v23, %v2500_v9 }
 0x9b6   : > { %v2543_v32 = vadd.f32 %v2539_v15, %v2521_v54 }
 0x9bb   : > { %v2536_v61 = vpop.permute.xlu0 %2535  ;;  %v2600_v47 = vpop.permute.xlu2 %2599 }
 0x9bc   : > { %v2538_v34 = vpop.permute.xlu1 %2537 }
 0x9bd   : > { %v2540_v36 = vsel %vm975_vm6, %v2536_v61, %v2538_v34 }
 0x9be   : > { %v2544_v0 = vadd.f32 %v2540_v36, %v2522_v33 }
 0x9c3   : > { %v2556_v44 = vpop.permute.xlu0 %2555  ;;  %v2618_v31 = vpop.permute.xlu2 %2617 }
 0x9c4   : > { %v2558_v58 = vpop.permute.xlu1 %2557  ;;  %v2561_v27 = vsel %vm975_vm6, %v2554_v41, %v2556_v44 }
 0x9c5   : > { %v2565_v17 = vadd.f32 %v2561_v27, %v2543_v32  ;;  %v2562_v38 = vsel %vm975_vm6, %v2558_v58, %v2560_v11 }
 0x9c6   : > { %v2566_v48 = vadd.f32 %v2562_v38, %v2544_v0 }
 0x9cb   : > { %v2576_v63 = vpop.permute.xlu0 %2575 }
 0x9cc   : > { %v2578_v20 = vpop.permute.xlu1 %2577 }
 0x9cd   : > { %v2583_v3 = vsel %vm1040_vm7, %v2576_v63, %v2578_v20 }
 0x9ce   : > { %v2587_v7 = vadd.f32 %v2583_v3, %v2565_v17 }
 0x9d3   : > { %v2582_v1 = vpop.permute.xlu0 %2581 }
 0x9d4   : > { %v2598_v37 = vpop.permute.xlu1 %2597  ;;  %v2584_v19 = vsel %vm1040_vm7, %v2580_v18, %v2582_v1 }
 0x9d5   : > { %v2605_v43 = vsel %vm1040_vm7, %v2598_v37, %v2600_v47  ;;  %v2588_v55 = vadd.f32 %v2584_v19, %v2566_v48 }
 0x9d6   : > { %v2609_v12 = vadd.f32 %v2605_v43, %v2587_v7 }
 0x9d8   : > { %v2611_v16 = vmax.f32 %v4939_v62, %v2609_v12 }
 0x9da   : > { %v2625_v52 = vadd.f32 %v2618_v31, %v2611_v16 }
 0x9db   : > { %v2602_v39 = vpop.permute.xlu0 %2601 }
 0x9dc   : > { %v2604_v6 = vpop.permute.xlu1 %2603  ;;  %v2627_v56 = vmax.f32 %v2625_v52, 0.0 }
 0x9dd   : > { %v2606_v42 = vsel %vm1040_vm7, %v2602_v39, %v2604_v6 }
 0x9de   : > { %v2610_v10 = vadd.f32 %v2606_v42, %v2588_v55 }
 0x9e0   : > { %v2612_v60 = vmax.f32 %v4956_v4, %v2610_v10 }
 0x9e3   : > { %v2623_v30 = vpop.permute.xlu0 %2622 }
 0x9e4   : > { %v2626_v21 = vadd.f32 %v2623_v30, %v2612_v60 }
 0x9e6   : > { %v2628_v22 = vmax.f32 %v2626_v21, 0.0 }
 0x9e8   : > { %v2805_v62 = vpack.c.bf16 %v2628_v22, %v2627_v56 }
 0x9ea   : > { %2806 = vst [vmem:[%s167_s6] sm:$0xff] %v2805_v62  }
 0x9eb PF: > { %s13_s12 = sadd.s32 1, %s2982_s12  }
 0x9ec   : > { %p10_p4 = scmp.ge.s32.totalorder %s13_s12, 4  }
 0x9ee   :  { %12 = sbr.rel (!%p10_p4) target bundleno = 1 (0x1), region = 65 }

// kernel: image_embed_forward.3
= control target key start
LH: loop header
LB: loop body
LE: loop exit
PB: predicated region body
PF: predicated region fallthrough
CT: control target
= control target key end

     0   :  { %s5523_s12 = smov 0   ;;  %s7406_s0 = inlined_call_operand.vmem [shape: bf16[2,4,16,256], index: 0, kind: input, shape index: {}]   ;;  %s7407_s1 = inlined_call_operand.vmem [shape: bf16[25,32,16], index: 1, kind: input, shape index: {}]   ;;  %s7408_s2 = inlined_call_operand.vmem [shape: f32[32,1], index: 2, kind: input, shape index: {}]   ;;  %s7409_s3 = inlined_call_operand.vmem [shape: f32[2,32,128], index: 3, kind: output, shape index: {}]  }
   0x1 LB: > { %s4478_s13 = sadd.s32 4294967295, %s5492_s12   ;;  %p4482_p0 = scmp.ge.s32.totalorder %s5492_s12, 1  ;;  %s5492_s12 = sphi %s5523_s12, %s13_s12  }
   0x2   : > { %p137_p1 = scmp.lt.s32.totalorder %s5492_s12, 3 }
   0x4   : > { %p138_p2 = pnand %p4482_p0, %p137_p1 }
   0x6   : > { %141 = sbr.rel (%p138_p2) target bundleno = 1083 (0x43b), region = 32 }
   0xb   : > { %p161_p3 = scmp.lt.s32.totalorder %s4478_s13, 1  ;;  %s5494_s18 = smov 127   ;;  %v4898_v32 = vld [vmem:[%s7407_s1] sm:$0xff]   ;;  %vm398_vm0 = vcmask 130048   ;;  %v5098_v34 = vld [vmem:[%s7407_s1 + $0x10] sm:$0xff]   ;;  %v5097_v38 = vld [vmem:[%s7407_s1 + $0x8] sm:$0xff]  }
   0xc   : > { %s5495_s19 = smov 126   ;;  %s5496_s20 = smov 122   ;;  %v5634_v33 = vunpack.c.l.bf16 %v4898_v32  ;;  %v5647_v35 = vunpack.c.h.bf16 %v4898_v32  ;;  %v5649_v36 = vunpack.c.l.bf16 %v5098_v34  ;;  %v5659_v37 = vunpack.c.h.bf16 %v5098_v34  ;;  %v5099_v40 = vld [vmem:[%s7407_s1 + $0x18] sm:$0xff]   ;;  %v5106_v44 = vld [vmem:[%s7407_s1 + $0x50] sm:$0xff]   ;;  %v5104_v32 = vld [vmem:[%s7407_s1 + $0x40] sm:$0xff]  }
   0xd   : > { %s8149_s13 = smov (!%p161_p3, %s4478_s13), 1  ;;  %s5497_s21 = smov 120   ;;  %v5664_v39 = vunpack.c.l.bf16 %v5097_v38  ;;  %v5679_v41 = vunpack.c.l.bf16 %v5099_v40  ;;  %v5681_v42 = vunpack.c.h.bf16 %v5097_v38  ;;  %vm612_vm1 = vcmask 1031168   ;;  %v5107_v52 = vld [vmem:[%s7407_s1 + $0x58] sm:$0xff]  }
   0xe   : > { %s4895_s14 = sshll.u32 %s8149_s13, 6  ;;  %s5498_s22 = smov 121   ;;  %7704 = vst [vmem:[#allocation10_spill] sm:$0xff] %v5634_v33  ;;  %v5696_v47 = vunpack.c.h.bf16 %v5099_v40  ;;  %v5698_v48 = vunpack.c.l.bf16 %v5106_v44  ;;  %v5712_v50 = vunpack.c.h.bf16 %v5106_v44  ;;  %v5723_v53 = vunpack.c.l.bf16 %v5107_v52 }
   0xf   : > { %s5537_s17 = scalar_lea.vmem %s7406_s0, %s4895_s14  ;;  %7705 = vst [vmem:[#allocation11_spill] sm:$0xff] %v5647_v35  ;;  %s5499_s4 = smov 116   ;;  %vm493_vm2 = vcmask 1039360   ;;  %v5737_v63 = vunpack.c.h.bf16 %v5107_v52  ;;  %vm939_vm3 = vcmask 998400   ;;  %vm1169_vm4 = vcmask 982016  }
  0x10   : > { %v4488_v0 = vld [vmem:[%s5537_s17 + $0x18] sm:$0xff]  ;;  %v172_v1 = vld [vmem:[%s5537_s17 + $0x8] sm:$0xff]  ;;  %v4487_v6 = vld [vmem:[%s5537_s17 + $0x10] sm:$0xff]  ;;  %7706 = vst [vmem:[#allocation12_spill] sm:$0xff] %v5649_v36  ;;  %s5500_s5 = smov 115   ;;  %s5501_s8 = smov 114  }
  0x11   : > { %v5541_v2 = vunpack.c.l.bf16 %v4488_v0  ;;  %v183_v3 = vunpack.c.h.bf16 %v4488_v0  ;;  %v175_v4 = vunpack.c.l.bf16 %v172_v1  ;;  %v176_v5 = vunpack.c.h.bf16 %v172_v1  ;;  %v171_v7 = vld [vmem:[%s5537_s17] sm:$0xff]  ;;  %v4490_v15 = vld [vmem:[%s5537_s17 + $0x28] sm:$0xff]  ;;  %v4492_v24 = vld [vmem:[%s5537_s17 + $0x38] sm:$0xff]  ;;  %7707 = vst [vmem:[#allocation13_spill] sm:$0xff] %v5659_v37 }
  0x12   : > { %v5551_v10 = vunpack.c.l.bf16 %v4487_v6  ;;  %v173_v11 = vunpack.c.l.bf16 %v171_v7  ;;  %v181_v12 = vunpack.c.h.bf16 %v4487_v6  ;;  %v174_v13 = vunpack.c.h.bf16 %v171_v7  ;;  %v4489_v14 = vld [vmem:[%s5537_s17 + $0x20] sm:$0xff]  ;;  %v4491_v28 = vld [vmem:[%s5537_s17 + $0x30] sm:$0xff]  ;;  %7708 = vst [vmem:[#allocation14_spill] sm:$0xff] %v5664_v39 }
  0x13   : > { %v5546_v8 = vpack.i.bf16 %v183_v3, %v5541_v2  ;;  %v5548_v9 = vpack.i.bf16 %v176_v5, %v175_v4  ;;  %466 = vmatpush.msra.mxu1 %v175_v4  ;;  %425 = vmatpush.msra.mxu0 %v5541_v2  ;;  %v5559_v16 = vunpack.c.l.bf16 %v4490_v15  ;;  %v5564_v17 = vunpack.c.l.bf16 %v4489_v14  ;;  %7709 = vst [vmem:[#allocation15_spill] sm:$0xff] %v5679_v41  ;;  %v5100_v0 = vld [vmem:[%s7407_s1 + $0x20] sm:$0xff]   ;;  %v5102_v1 = vld [vmem:[%s7407_s1 + $0x30] sm:$0xff]  }
  0x14   : > { %v5568_v18 = vpack.i.bf16 %v181_v12, %v5551_v10  ;;  %v5570_v19 = vpack.i.bf16 %v174_v13, %v173_v11  ;;  %v190_v20 = vunpack.c.h.bf16 %v4490_v15  ;;  %v188_v22 = vunpack.c.h.bf16 %v4489_v14  ;;  %7710 = vst [vmem:[#allocation16_spill] sm:$0xff] %v5681_v42 }
  0x15   : > { %5174 = vrot.lane.b32.xlu1 %v5546_v8, %s5494_s18  ;;  %5164 = vrot.lane.b32.xlu0 %v5548_v9, %s5494_s18  ;;  %7696 = vst [vmem:[#allocation2_spill] sm:$0xff] %v5559_v16  ;;  %v5590_v25 = vunpack.c.l.bf16 %v4492_v24  ;;  %v197_v26 = vunpack.c.h.bf16 %v4492_v24  ;;  %v5602_v29 = vunpack.c.l.bf16 %v4491_v28  ;;  %v195_v30 = vunpack.c.h.bf16 %v4491_v28 }
  0x16   : > { %467 = vmatpush.msra.mxu1 %v173_v11  ;;  %426 = vmatpush.msra.mxu0 %v5551_v10  ;;  %7697 = vst [vmem:[#allocation3_spill] sm:$0xff] %v5564_v17  ;;  %v5574_v21 = vpack.i.bf16 %v190_v20, %v5559_v16  ;;  %v5583_v23 = vpack.i.bf16 %v188_v22, %v5564_v17  ;;  %v5749_v7 = vunpack.c.l.bf16 %v5100_v0  ;;  %v5780_v44 = vunpack.c.h.bf16 %v5102_v1 }
  0x17   : > { %5184 = vrot.lane.b32.xlu2 %v5548_v9, %s5495_s19  ;;  %7700 = vst [vmem:[#allocation6_spill] sm:$0xff] %v5590_v25  ;;  %v5595_v27 = vpack.i.bf16 %v197_v26, %v5590_v25  ;;  %v5607_v31 = vpack.i.bf16 %v195_v30, %v5602_v29  ;;  %4497 = vmatmul.msk.f32.vlgmr.msra.gmra.mxu1 %vm398_vm0, %v5634_v33  ;;  %vm1054_vm5 = vcmask 990208   ;;  %vm1512_vm6 = vcmask 949248  }
  0x18   : > { %688 = vmatpush.msrb.mxu1 %v5559_v16  ;;  %7698 = vst [vmem:[#allocation4_spill] sm:$0xff] %v5574_v21  ;;  %4493 = vmatmul.msk.f32.vlgmr.msra.gmra.mxu0 %vm398_vm0, %v5649_v36  ;;  %vm1627_vm7 = vcmask 941056   ;;  %vm1742_vm8 = vcmask 932864  }
  0x19   : > { %7699 = vst [vmem:[#allocation5_spill] sm:$0xff] %v5583_v23 }
  0x1a   : > { %689 = vmatpush.msrb.mxu1 %v5564_v17  ;;  %7701 = vst [vmem:[#allocation7_spill] sm:$0xff] %v5595_v27 }
  0x1b   : > { %7702 = vst [vmem:[#allocation8_spill] sm:$0xff] %v5602_v29 }
  0x1c   : > { %7703 = vst [vmem:[#allocation9_spill] sm:$0xff] %v5607_v31 }
  0x1d   : > { %5179 = vrot.lane.b32.xlu1 %v5568_v18, %s5494_s18  ;;  %5169 = vrot.lane.b32.xlu0 %v5570_v19, %s5494_s18  ;;  %7711 = vst [vmem:[#allocation17_spill] sm:$0xff] %v5696_v47 }
  0x1e   : > { %7712 = vst [vmem:[#allocation18_spill] sm:$0xff] %v5698_v48 }
  0x1f   : > { %5189 = vrot.lane.b32.xlu2 %v5574_v21, %s5494_s18  ;;  %4498 = vmatmul.msk.f32.gmra.mxu1 %vm398_vm0, %v5647_v35  ;;  %7713 = vst [vmem:[#allocation19_spill] sm:$0xff] %v5712_v50 }
  0x20   : > { %4494 = vmatmul.msk.f32.gmra.mxu0 %vm398_vm0, %v5659_v37  ;;  %7714 = vst [vmem:[#allocation20_spill] sm:$0xff] %v5723_v53 }
  0x21   : > { %7715 = vst [vmem:[#allocation21_spill] sm:$0xff] %v5737_v63 }
  0x22   : > { %7716 = vst [vmem:[#allocation22_spill] sm:$0xff] %v5749_v7 }
  0x23   : > { %7720 = vst [vmem:[#allocation26_spill] sm:$0xff] %v5780_v44 }
  0x25   : > { %5194 = vrot.lane.b32.xlu0 %v5570_v19, %s5495_s19  ;;  %5199 = vrot.lane.b32.xlu1 %v5583_v23, %s5494_s18 }
  0x27   : > { %5204 = vrot.lane.b32.xlu2 %v5548_v9, %s5496_s20  ;;  %4499 = vmatmul.msk.f32.gmra.mxu1 %vm398_vm0, %v5664_v39 }
  0x28   : > { %4495 = vmatmul.msk.f32.gmra.mxu0 %vm398_vm0, %v5679_v41 }
  0x2d   : > { %5209 = vrot.lane.b32.xlu0 %v5595_v27, %s5494_s18  ;;  %5214 = vrot.lane.b32.xlu1 %v5570_v19, %s5496_s20 }
  0x2f   : > { %5219 = vrot.lane.b32.xlu2 %v5546_v8, %s5496_s20  ;;  %4500 = vmatmul.msk.f32.gmra.mxu1 %vm398_vm0, %v5681_v42 }
  0x30   : > { %4496 = vmatmul.msk.f32.gmra.mxu0 %vm398_vm0, %v5696_v47 }
  0x35   : > { %5224 = vrot.lane.b32.xlu0 %v5607_v31, %s5494_s18  ;;  %5229 = vrot.lane.b32.xlu1 %v5574_v21, %s5495_s19 }
  0x37   : > { %5234 = vrot.lane.b32.xlu2 %v5568_v18, %s5496_s20  ;;  %4513 = vmatmul.msk.f32.vlgmr.msrb.gmra.mxu1 %vm398_vm0, %v5698_v48 }
  0x3d   : > { %5239 = vrot.lane.b32.xlu0 %v5583_v23, %s5495_s19  ;;  %5244 = vrot.lane.b32.xlu1 %v5548_v9, %s5497_s21 }
  0x3f   : > { %5249 = vrot.lane.b32.xlu2 %v5548_v9, %s5498_s22  ;;  %4514 = vmatmul.msk.f32.gmra.mxu1 %vm398_vm0, %v5712_v50 }
  0x45   : > { %5254 = vrot.lane.b32.xlu0 %v5570_v19, %s5497_s21  ;;  %5259 = vrot.lane.b32.xlu1 %v5574_v21, %s5496_s20 }
  0x47   : > { %5264 = vrot.lane.b32.xlu2 %v5570_v19, %s5498_s22  ;;  %4515 = vmatmul.msk.f32.gmra.mxu1 %vm398_vm0, %v5723_v53 }
  0x4d   : > { %5269 = vrot.lane.b32.xlu0 %v5546_v8, %s5498_s22  ;;  %5274 = vrot.lane.b32.xlu1 %v5583_v23, %s5496_s20 }
  0x4f   : > { %5279 = vrot.lane.b32.xlu2 %v5568_v18, %s5498_s22  ;;  %4516 = vmatmul.msk.f32.gmra.mxu1 %vm398_vm0, %v5737_v63 }
  0x55   : > { %5284 = vrot.lane.b32.xlu0 %v5595_v27, %s5498_s22  ;;  %5289 = vrot.lane.b32.xlu1 %v5595_v27, %s5496_s20 }
  0x57   : > { %5294 = vrot.lane.b32.xlu2 %v5607_v31, %s5498_s22 }
  0x5d   : > { %5299 = vrot.lane.b32.xlu0 %v5574_v21, %s5497_s21  ;;  %5304 = vrot.lane.b32.xlu1 %v5607_v31, %s5496_s20 }
  0x5f   : > { %5309 = vrot.lane.b32.xlu2 %v5574_v21, %s5498_s22 }
  0x65   : > { %5314 = vrot.lane.b32.xlu0 %v5583_v23, %s5497_s21  ;;  %5319 = vrot.lane.b32.xlu1 %v5583_v23, %s5498_s22 }
  0x67   : > { %5324 = vrot.lane.b32.xlu2 %v5548_v9, %s5500_s5 }
  0x6d   : > { %5329 = vrot.lane.b32.xlu0 %v5548_v9, %s5499_s4  ;;  %5334 = vrot.lane.b32.xlu1 %v5570_v19, %s5500_s5 }
  0x6f   : > { %5339 = vrot.lane.b32.xlu2 %v5546_v8, %s5500_s5 }
  0x71   : > { %v5185_v43 = vpop.permute.xlu2 %5184 }
  0x72   : > { %v5187_v45 = vunpack.i.h.bf16 %v5185_v43  ;;  %v5186_v46 = vunpack.i.l.bf16 %v5185_v43  ;;  %v5778_v43 = vunpack.c.h.bf16 %v5100_v0 }
  0x74   : > { %v5701_v49 = vsel %vm612_vm1, %v5186_v46, %v5187_v45  ;;  %7719 = vst [vmem:[#allocation25_spill] sm:$0xff] %v5778_v43 }
  0x75   : > { %5344 = vrot.lane.b32.xlu0 %v5570_v19, %s5499_s4  ;;  %5349 = vrot.lane.b32.xlu1 %v5546_v8, %s5499_s4 }
  0x76   : > { %643 = vmatpush.msrb.mxu0 %v5701_v49 }
  0x77   : > { %5354 = vrot.lane.b32.xlu2 %v5568_v18, %s5500_s5 }
  0x79   : > { %v5190_v51 = vpop.permute.xlu2 %5189 }
  0x7a   : > { %v5192_v3 = vunpack.i.h.bf16 %v5190_v51  ;;  %v5191_v4 = vunpack.i.l.bf16 %v5190_v51 }
  0x7c   : > { %v5760_v26 = vsel %vm493_vm2, %v5191_v4, %v5192_v3 }
  0x7d   : > { %5359 = vrot.lane.b32.xlu0 %v5568_v18, %s5499_s4  ;;  %5364 = vrot.lane.b32.xlu1 %v5548_v9, %s5501_s8  ;;  %v5751_v9 = vunpack.c.l.bf16 %v5102_v1 }
  0x7f   : > { %7717 = vst [vmem:[#allocation23_spill] sm:$0xff] %v5751_v9  ;;  %5369 = vrot.lane.b32.xlu2 %v5570_v19, %s5501_s8 }
  0x81   : > { %v5205_v60 = vpop.permute.xlu2 %5204 }
  0x82   : > { %v5207_v15 = vunpack.i.h.bf16 %v5205_v60  ;;  %v5206_v20 = vunpack.i.l.bf16 %v5205_v60  ;;  %v5103_v60 = vld [vmem:[%s7407_s1 + $0x38] sm:$0xff]  }
  0x83   : > { %v5816_v4 = vunpack.c.l.bf16 %v5103_v60 }
  0x84   : > { %v5771_v30 = vsel %vm939_vm3, %v5206_v20, %v5207_v15 }
  0x85   : > { %7718 = vst [vmem:[#allocation24_spill] sm:$0xff] %v5771_v30  ;;  %5374 = vrot.lane.b32.xlu0 %v5546_v8, %s5495_s19  ;;  %5379 = vrot.lane.b32.xlu1 %v5568_v18, %s5495_s19 }
  0x86   : > { %7723 = vst [vmem:[#allocation29_spill] sm:$0xff] %v5816_v4 }
  0x87   : > { %v5175_v54 = vpop.permute.xlu1 %5174  ;;  %v5165_v55 = vpop.permute.xlu0 %5164  ;;  %5384 = vrot.lane.b32.xlu2 %v5595_v27, %s5495_s19 }
  0x88   : > { %v5177_v56 = vunpack.i.h.bf16 %v5175_v54  ;;  %v5176_v57 = vunpack.i.l.bf16 %v5175_v54  ;;  %v5167_v58 = vunpack.i.h.bf16 %v5165_v55  ;;  %v5166_v59 = vunpack.i.l.bf16 %v5165_v55 }
  0x89   : > { %v5220_v28 = vpop.permute.xlu2 %5219  ;;  %v5784_v55 = vunpack.c.l.bf16 %v5104_v32 }
  0x8a   : > { %v5730_v61 = vsel %vm493_vm2, %v5166_v59, %v5167_v58  ;;  %v5733_v62 = vsel %vm493_vm2, %v5176_v57, %v5177_v56  ;;  %v5222_v34 = vunpack.i.h.bf16 %v5220_v28  ;;  %v5221_v38 = vunpack.i.l.bf16 %v5220_v28  ;;  %v5101_v59 = vld [vmem:[%s7407_s1 + $0x28] sm:$0xff]  }
  0x8b   : > { %524 = vmatpush.msra.mxu2 %v5730_v61  ;;  %585 = vmatpush.msra.mxu3 %v5733_v62  ;;  %7721 = vst [vmem:[#allocation27_spill] sm:$0xff] %v5784_v55  ;;  %v5814_v3 = vunpack.c.l.bf16 %v5101_v59 }
  0x8c   : > { %v5793_v58 = vsel %vm939_vm3, %v5221_v38, %v5222_v34  ;;  %v5105_v34 = vld [vmem:[%s7407_s1 + $0x48] sm:$0xff]  }
  0x8d   : > { %7722 = vst [vmem:[#allocation28_spill] sm:$0xff] %v5814_v3  ;;  %v5876_v23 = vunpack.c.h.bf16 %v5105_v34  ;;  %5389 = vrot.lane.b32.xlu0 %v5607_v31, %s5495_s19  ;;  %5394 = vrot.lane.b32.xlu1 %v5546_v8, %s5497_s21  ;;  %s4896_s19 = sshll.u32 %s8149_s13, 5 }
  0x8e   : > { %s7394_s27 = scalar_lea.vmem %s7409_s3, %s4896_s19 }
  0x8f   : > { %v5180_v5 = vpop.permute.xlu1 %5179  ;;  %v5170_v6 = vpop.permute.xlu0 %5169  ;;  %7731 = vst [vmem:[#allocation37_spill] sm:$0xff] %v5876_v23  ;;  %5399 = vrot.lane.b32.xlu2 %v5568_v18, %s5497_s21 }
  0x90   : > { %v5182_v11 = vunpack.i.h.bf16 %v5180_v5  ;;  %v5181_v12 = vunpack.i.l.bf16 %v5180_v5  ;;  %v5172_v13 = vunpack.i.h.bf16 %v5170_v6  ;;  %v5171_v14 = vunpack.i.l.bf16 %v5170_v6 }
  0x91   : > { %v5235_v0 = vpop.permute.xlu2 %5234 }
  0x92   : > { %v5754_v22 = vsel %vm493_vm2, %v5171_v14, %v5172_v13  ;;  %v5757_v24 = vsel %vm493_vm2, %v5181_v12, %v5182_v11  ;;  %v5820_v14 = vunpack.c.h.bf16 %v5104_v32  ;;  %v5237_v15 = vunpack.i.h.bf16 %v5235_v0 }
  0x93   : > { %525 = vmatpush.msra.mxu2 %v5754_v22  ;;  %586 = vmatpush.msra.mxu3 %v5757_v24  ;;  %v5236_v20 = vunpack.i.l.bf16 %v5235_v0 }
  0x94   : > { %4501 = vmatmul.msk.f32.vlgmr.msra.gmra.mxu2 %vm398_vm0, %v5749_v7  ;;  %4505 = vmatmul.msk.f32.vlgmr.msra.gmra.mxu3 %vm398_vm0, %v5751_v9  ;;  %7724 = vst [vmem:[#allocation30_spill] sm:$0xff] %v5820_v14 }
  0x95   : > { %733 = vmatpush.msrb.mxu2 %v5590_v25  ;;  %794 = vmatpush.msrb.mxu3 %v5760_v26  ;;  %v5837_v32 = vsel %vm939_vm3, %v5236_v20, %v5237_v15 }
  0x96   : > { %5404 = vrot.lane.b32.xlu0 %v5595_v27, %s5497_s21  ;;  %5409 = vrot.lane.b32.xlu1 %v5607_v31, %s5497_s21 }
  0x97   : > { %v5195_v40 = vpop.permute.xlu0 %5194  ;;  %v5200_v45 = vpop.permute.xlu1 %5199  ;;  %734 = vmatpush.msrb.mxu2 %v5602_v29  ;;  %5414 = vrot.lane.b32.xlu2 %v5546_v8, %s5501_s8 }
  0x98   : > { %v5197_v46 = vunpack.i.h.bf16 %v5195_v40  ;;  %v5196_v51 = vunpack.i.l.bf16 %v5195_v40  ;;  %v5202_v52 = vunpack.i.h.bf16 %v5200_v45  ;;  %v5201_v54 = vunpack.i.l.bf16 %v5200_v45 }
  0x99   : > { %970 = vmatpush.msra.mxu2 %v5771_v30  ;;  %v5250_v38 = vpop.permute.xlu2 %5249  ;;  %v5843_v45 = vunpack.c.h.bf16 %v5101_v59  ;;  %v5108_v59 = vld [vmem:[%s7407_s1 + $0x60] sm:$0xff]  }
  0x9a   : > { %v5787_v56 = vsel %vm612_vm1, %v5196_v51, %v5197_v46  ;;  %v5790_v57 = vsel %vm493_vm2, %v5201_v54, %v5202_v52  ;;  %v5845_v46 = vunpack.c.h.bf16 %v5103_v60  ;;  %v5110_v60 = vld [vmem:[%s7407_s1 + $0x70] sm:$0xff]   ;;  %v5872_v15 = vunpack.c.l.bf16 %v5108_v59 }
  0x9b   : > { %644 = vmatpush.msrb.mxu0 %v5787_v56  ;;  %795 = vmatpush.msrb.mxu3 %v5790_v57  ;;  %7726 = vst [vmem:[#allocation32_spill] sm:$0xff] %v5843_v45  ;;  %v5874_v20 = vunpack.c.l.bf16 %v5110_v60  ;;  %v5252_v30 = vunpack.i.h.bf16 %v5250_v38  ;;  %v5251_v21 = vunpack.i.l.bf16 %v5250_v38  ;;  %v7832_v8 = vld [vmem:[#allocation30_spill] sm:$0xff] }
  0x9c   : > { %4502 = vmatmul.msk.f32.gmra.mxu2 %vm398_vm0, %v5778_v43  ;;  %4506 = vmatmul.msk.f32.gmra.mxu3 %vm398_vm0, %v5780_v44  ;;  %7727 = vst [vmem:[#allocation33_spill] sm:$0xff] %v5845_v46 }
  0x9d   : > { %4509 = vmatmul.msk.f32.vlgmr.msrb.gmra.mxu0 %vm398_vm0, %v5784_v55  ;;  %1027 = vmatpush.msra.mxu3 %v5793_v58  ;;  %7729 = vst [vmem:[#allocation35_spill] sm:$0xff] %v5872_v15 }
  0x9e   : > { %7730 = vst [vmem:[#allocation36_spill] sm:$0xff] %v5874_v20  ;;  %5419 = vrot.lane.b32.xlu0 %v5568_v18, %s5501_s8 }
  0x9f   : > { %v5210_v1 = vpop.permute.xlu0 %5209  ;;  %v5215_v5 = vpop.permute.xlu1 %5214  ;;  %1028 = vmatpush.msra.mxu3 %v5837_v32 }
  0xa0   : > { %v5212_v6 = vunpack.i.h.bf16 %v5210_v1  ;;  %v5211_v11 = vunpack.i.l.bf16 %v5210_v1  ;;  %v5217_v12 = vunpack.i.h.bf16 %v5215_v5  ;;  %v5216_v13 = vunpack.i.l.bf16 %v5215_v5 }
  0xa1   : > { %v5847_v5 = vunpack.c.l.bf16 %v5105_v34 }
  0xa2   : > { %v5823_v28 = vsel %vm939_vm3, %v5216_v13, %v5217_v12  ;;  %v5826_v19 = vsel %vm493_vm2, %v5211_v11, %v5212_v6  ;;  %v5114_v12 = vld [vmem:[%s7407_s1 + $0x90] sm:$0xff]  }
  0xa3   : > { %7725 = vst [vmem:[#allocation31_spill] sm:$0xff] %v5823_v28  ;;  %971 = vmatpush.msra.mxu2 %v5823_v28  ;;  %855 = vmatpush.msra.mxu0 %v5826_v19  ;;  %v5878_v28 = vunpack.c.l.bf16 %v5114_v12 }
  0xa4   : > { %4503 = vmatmul.msk.f32.gmra.mxu2 %vm398_vm0, %v5814_v3  ;;  %4507 = vmatmul.msk.f32.gmra.mxu3 %vm398_vm0, %v5816_v4  ;;  %7728 = vst [vmem:[#allocation34_spill] sm:$0xff] %v5847_v5 }
  0xa5   : > { %4510 = vmatmul.msk.f32.gmra.mxu0 %vm398_vm0, %v5820_v14  ;;  %7732 = vst [vmem:[#allocation38_spill] sm:$0xff] %v5878_v28 }
  0xa7   : > { %v5225_v40 = vpop.permute.xlu0 %5224  ;;  %v5230_v51 = vpop.permute.xlu1 %5229 }
  0xa8   : > { %v5227_v52 = vunpack.i.h.bf16 %v5225_v40  ;;  %v5226_v54 = vunpack.i.l.bf16 %v5225_v40  ;;  %v5232_v0 = vunpack.i.h.bf16 %v5230_v51  ;;  %v5231_v1 = vunpack.i.l.bf16 %v5230_v51 }
  0xaa   : > { %v5850_v6 = vsel %vm612_vm1, %v5231_v1, %v5232_v0  ;;  %v5853_v11 = vsel %vm493_vm2, %v5226_v54, %v5227_v52  ;;  %v5265_v1 = vpop.permute.xlu2 %5264 }
  0xab   : > { %912 = vmatpush.msra.mxu1 %v5850_v6  ;;  %856 = vmatpush.msra.mxu0 %v5853_v11  ;;  %v5267_v34 = vunpack.i.h.bf16 %v5265_v1  ;;  %v5266_v38 = vunpack.i.l.bf16 %v5265_v1 }
  0xac   : > { %4504 = vmatmul.msk.f32.gmra.mxu2 %vm398_vm0, %v5843_v45  ;;  %4508 = vmatmul.msk.f32.gmra.mxu3 %vm398_vm0, %v5845_v46 }
  0xad   : > { %4511 = vmatmul.msk.f32.gmra.mxu0 %vm398_vm0, %v5847_v5 }
  0xaf   : > { %v5240_v13 = vpop.permute.xlu0 %5239  ;;  %v5245_v40 = vpop.permute.xlu1 %5244 }
  0xb0   : > { %v5242_v51 = vunpack.i.h.bf16 %v5240_v13  ;;  %v5241_v52 = vunpack.i.l.bf16 %v5240_v13  ;;  %v5247_v54 = vunpack.i.h.bf16 %v5245_v40  ;;  %v5246_v0 = vunpack.i.l.bf16 %v5245_v40  ;;  %v5112_v40 = vld [vmem:[%s7407_s1 + $0x80] sm:$0xff]  }
  0xb1   : > { %v5896_v13 = vsel %vm1054_vm5, %v5251_v21, %v5252_v30  ;;  %v5907_v21 = vunpack.c.l.bf16 %v5112_v40  ;;  %v5909_v30 = vunpack.c.h.bf16 %v5114_v12 }
  0xb2   : > { %v5881_v17 = vsel %vm612_vm1, %v5241_v52, %v5242_v51  ;;  %v5885_v16 = vsel %vm1169_vm4, %v5246_v0, %v5247_v54  ;;  %7734 = vst [vmem:[#allocation40_spill] sm:$0xff] %v5896_v13  ;;  %1085 = vmatpush.msrb.mxu0 %v5896_v13  ;;  %v5903_v52 = vunpack.c.h.bf16 %v5108_v59  ;;  %v5905_v54 = vunpack.c.h.bf16 %v5110_v60  ;;  %v5280_v50 = vpop.permute.xlu2 %5279 }
  0xb3   : > { %913 = vmatpush.msra.mxu1 %v5881_v17  ;;  %7733 = vst [vmem:[#allocation39_spill] sm:$0xff] %v5885_v16 }
  0xb4   : > { %4517 = vmatmul.msk.f32.vlgmr.msrb.gmra.mxu2 %vm398_vm0, %v5872_v15  ;;  %4521 = vmatmul.msk.f32.vlgmr.msrb.gmra.mxu3 %vm398_vm0, %v5874_v20  ;;  %7735 = vst [vmem:[#allocation41_spill] sm:$0xff] %v5903_v52  ;;  %v5912_v20 = vsel %vm1054_vm5, %v5266_v38, %v5267_v34  ;;  %v5282_v34 = vunpack.i.h.bf16 %v5280_v50  ;;  %v5281_v38 = vunpack.i.l.bf16 %v5280_v50 }
  0xb5   : > { %4512 = vmatmul.msk.f32.gmra.mxu0 %vm398_vm0, %v5876_v23  ;;  %4529 = vmatmul.msk.f32.vlgmr.msra.gmra.mxu1 %vm398_vm0, %v5878_v28  ;;  %7736 = vst [vmem:[#allocation42_spill] sm:$0xff] %v5905_v54 }
  0xb6   : > { %1200 = vmatpush.msrb.mxu2 %v5885_v16  ;;  %7737 = vst [vmem:[#allocation43_spill] sm:$0xff] %v5907_v21  ;;  %1086 = vmatpush.msrb.mxu0 %v5912_v20  ;;  %v5953_v50 = vsel %vm1054_vm5, %v5281_v38, %v5282_v34 }
  0xb7   : > { %v5255_v51 = vpop.permute.xlu0 %5254  ;;  %v5260_v0 = vpop.permute.xlu1 %5259  ;;  %7738 = vst [vmem:[#allocation44_spill] sm:$0xff] %v5909_v30 }
  0xb8   : > { %v5257_v28 = vunpack.i.h.bf16 %v5255_v51  ;;  %v5256_v63 = vunpack.i.l.bf16 %v5255_v51  ;;  %v5262_v1 = vunpack.i.h.bf16 %v5260_v0  ;;  %v5261_v53 = vunpack.i.l.bf16 %v5260_v0  ;;  %7739 = vst [vmem:[#allocation45_spill] sm:$0xff] %v5912_v20 }
  0xb9   : > { %7746 = vst [vmem:[#allocation52_spill] sm:$0xff] %v5953_v50 }
  0xba   : > { %v5915_v16 = vsel %vm1169_vm4, %v5256_v63, %v5257_v28  ;;  %v5918_v59 = vsel %vm939_vm3, %v5261_v53, %v5262_v1  ;;  %v5109_v53 = vld [vmem:[%s7407_s1 + $0x68] sm:$0xff]   ;;  %v5111_v63 = vld [vmem:[%s7407_s1 + $0x78] sm:$0xff]   ;;  %v5295_v46 = vpop.permute.xlu2 %5294 }
  0xbb   : > { %7740 = vst [vmem:[#allocation46_spill] sm:$0xff] %v5915_v16  ;;  %1201 = vmatpush.msrb.mxu2 %v5915_v16  ;;  %1257 = vmatpush.msrb.mxu3 %v5918_v59  ;;  %v5115_v28 = vld [vmem:[%s7407_s1 + $0x98] sm:$0xff]   ;;  %v5940_v1 = vunpack.c.l.bf16 %v5109_v53  ;;  %v5971_v38 = vunpack.c.h.bf16 %v5109_v53  ;;  %v5116_v53 = vld [vmem:[%s7407_s1 + $0xa0] sm:$0xff]  }
  0xbc   : > { %7741 = vst [vmem:[#allocation47_spill] sm:$0xff] %v5918_v59  ;;  %4518 = vmatmul.msk.f32.gmra.mxu2 %vm398_vm0, %v5903_v52  ;;  %4522 = vmatmul.msk.f32.gmra.mxu3 %vm398_vm0, %v5905_v54  ;;  %v5942_v59 = vunpack.c.l.bf16 %v5111_v63  ;;  %v5946_v54 = vunpack.c.l.bf16 %v5115_v28 }
  0xbd   : > { %4525 = vmatmul.msk.f32.vlgmr.msra.gmra.mxu0 %vm398_vm0, %v5907_v21  ;;  %4530 = vmatmul.msk.f32.gmra.mxu1 %vm398_vm0, %v5909_v30  ;;  %7742 = vst [vmem:[#allocation48_spill] sm:$0xff] %v5940_v1  ;;  %v5944_v30 = vunpack.c.h.bf16 %v5112_v40 }
  0xbe   : > { %7743 = vst [vmem:[#allocation49_spill] sm:$0xff] %v5942_v59 }
  0xbf   : > { %v5270_v60 = vpop.permute.xlu0 %5269  ;;  %v5275_v12 = vpop.permute.xlu1 %5274  ;;  %7744 = vst [vmem:[#allocation50_spill] sm:$0xff] %v5944_v30 }
  0xc0   : > { %v5272_v51 = vunpack.i.h.bf16 %v5270_v60  ;;  %v5271_v0 = vunpack.i.l.bf16 %v5270_v60  ;;  %7745 = vst [vmem:[#allocation51_spill] sm:$0xff] %v5946_v54  ;;  %v5277_v52 = vunpack.i.h.bf16 %v5275_v12  ;;  %v5276_v16 = vunpack.i.l.bf16 %v5275_v12  ;;  %v5113_v60 = vld [vmem:[%s7407_s1 + $0x88] sm:$0xff]  }
  0xc1   : > { %7748 = vst [vmem:[#allocation54_spill] sm:$0xff] %v5971_v38 }
  0xc2   : > { %v5949_v21 = vsel %vm1054_vm5, %v5271_v0, %v5272_v51  ;;  %v5964_v40 = vsel %vm939_vm3, %v5276_v16, %v5277_v52  ;;  %v5973_v51 = vunpack.c.h.bf16 %v5111_v63  ;;  %v5975_v0 = vunpack.c.l.bf16 %v5113_v60  ;;  %v5310_v16 = vpop.permute.xlu2 %5309  ;;  %v5118_v63 = vld [vmem:[%s7407_s1 + $0xb0] sm:$0xff]  }
  0xc3   : > { %1142 = vmatpush.msrb.mxu1 %v5949_v21  ;;  %7747 = vst [vmem:[#allocation53_spill] sm:$0xff] %v5964_v40  ;;  %1258 = vmatpush.msrb.mxu3 %v5964_v40  ;;  %v5312_v52 = vunpack.i.h.bf16 %v5310_v16 }
  0xc4   : > { %4519 = vmatmul.msk.f32.gmra.mxu2 %vm398_vm0, %v5940_v1  ;;  %4523 = vmatmul.msk.f32.gmra.mxu3 %vm398_vm0, %v5942_v59  ;;  %7749 = vst [vmem:[#allocation55_spill] sm:$0xff] %v5973_v51  ;;  %v5311_v59 = vunpack.i.l.bf16 %v5310_v16  ;;  %v5122_v16 = vld [vmem:[%s7407_s1 + $0xd0] sm:$0xff]   ;;  %v6002_v1 = vunpack.c.l.bf16 %v5118_v63 }
  0xc5   : > { %4526 = vmatmul.msk.f32.gmra.mxu0 %vm398_vm0, %v5944_v30  ;;  %4531 = vmatmul.msk.f32.gmra.mxu1 %vm398_vm0, %v5946_v54  ;;  %7750 = vst [vmem:[#allocation56_spill] sm:$0xff] %v5975_v0  ;;  %v5977_v54 = vunpack.c.h.bf16 %v5115_v28  ;;  %v6004_v30 = vunpack.c.h.bf16 %v5113_v60  ;;  %v6006_v15 = vunpack.c.l.bf16 %v5122_v16 }
  0xc6   : > { %1143 = vmatpush.msrb.mxu1 %v5953_v50  ;;  %v5994_v28 = vsel %vm1054_vm5, %v5311_v59, %v5312_v52  ;;  %7754 = vst [vmem:[#allocation60_spill] sm:$0xff] %v6002_v1  ;;  %v5297_v59 = vunpack.i.h.bf16 %v5295_v46  ;;  %v5296_v52 = vunpack.i.l.bf16 %v5295_v46 }
  0xc7   : > { %v5285_v12 = vpop.permute.xlu0 %5284  ;;  %v5290_v34 = vpop.permute.xlu1 %5289  ;;  %7751 = vst [vmem:[#allocation57_spill] sm:$0xff] %v5977_v54 }
  0xc8   : > { %7752 = vst [vmem:[#allocation58_spill] sm:$0xff] %v5994_v28  ;;  %1371 = vmatpush.msra.mxu1 %v5994_v28  ;;  %v5287_v40 = vunpack.i.h.bf16 %v5285_v12  ;;  %v5292_v48 = vunpack.i.h.bf16 %v5290_v34  ;;  %v5291_v23 = vunpack.i.l.bf16 %v5290_v34 }
  0xc9   : > { %7755 = vst [vmem:[#allocation61_spill] sm:$0xff] %v6004_v30 }
  0xca   : > { %7756 = vst [vmem:[#allocation62_spill] sm:$0xff] %v6006_v15 }
  0xcc   : > { %4520 = vmatmul.msk.f32.gmra.mxu2 %vm398_vm0, %v5971_v38  ;;  %4524 = vmatmul.msk.f32.gmra.mxu3 %vm398_vm0, %v5973_v51  ;;  %v5286_v51 = vunpack.i.l.bf16 %v5285_v12  ;;  %v6020_v12 = vsel %vm1054_vm5, %v5296_v52, %v5297_v59  ;;  %v6036_v59 = vunpack.c.h.bf16 %v5118_v63 }
  0xcd   : > { %4527 = vmatmul.msk.f32.gmra.mxu0 %vm398_vm0, %v5975_v0  ;;  %4532 = vmatmul.msk.f32.gmra.mxu1 %vm398_vm0, %v5977_v54  ;;  %v6000_v0 = vunpack.c.l.bf16 %v5116_v53  ;;  %7758 = vst [vmem:[#allocation64_spill] sm:$0xff] %v6020_v12 }
  0xce   : > { %v6009_v28 = vsel %vm1054_vm5, %v5286_v51, %v5287_v40  ;;  %v6027_v40 = vsel %vm939_vm3, %v5291_v23, %v5292_v48  ;;  %7762 = vst [vmem:[#allocation68_spill] sm:$0xff] %v6036_v59  ;;  %v6041_v23 = vunpack.c.h.bf16 %v5122_v16 }
  0xcf   : > { %v5300_v54 = vpop.permute.xlu0 %5299  ;;  %v5305_v38 = vpop.permute.xlu1 %5304  ;;  %7753 = vst [vmem:[#allocation59_spill] sm:$0xff] %v6000_v0  ;;  %1314 = vmatpush.msra.mxu0 %v6027_v40 }
  0xd0   : > { %v5302_v4 = vunpack.i.h.bf16 %v5300_v54  ;;  %v5301_v45 = vunpack.i.l.bf16 %v5300_v54  ;;  %7757 = vst [vmem:[#allocation63_spill] sm:$0xff] %v6009_v28  ;;  %v5307_v46 = vunpack.i.h.bf16 %v5305_v38  ;;  %v5306_v60 = vunpack.i.l.bf16 %v5305_v38  ;;  %v5120_v54 = vld [vmem:[%s7407_s1 + $0xc0] sm:$0xff]  }
  0xd1   : > { %7759 = vst [vmem:[#allocation65_spill] sm:$0xff] %v6027_v40  ;;  %v6034_v38 = vunpack.c.h.bf16 %v5116_v53 }
  0xd2   : > { %v6030_v34 = vsel %vm1169_vm4, %v5301_v45, %v5302_v4  ;;  %7764 = vst [vmem:[#allocation70_spill] sm:$0xff] %v6041_v23  ;;  %v6044_v48 = vsel %vm939_vm3, %v5306_v60, %v5307_v46  ;;  %v5117_v45 = vld [vmem:[%s7407_s1 + $0xa8] sm:$0xff]   ;;  %v5325_v60 = vpop.permute.xlu2 %5324 }
  0xd3   : > { %7760 = vst [vmem:[#allocation66_spill] sm:$0xff] %v6030_v34  ;;  %1315 = vmatpush.msra.mxu0 %v6044_v48  ;;  %v6074_v16 = vunpack.c.l.bf16 %v5117_v45 }
  0xd4   : > { %4533 = vmatmul.msk.f32.vlgmr.msra.gmra.mxu2 %vm398_vm0, %v6000_v0  ;;  %4537 = vmatmul.msk.f32.vlgmr.msra.gmra.mxu3 %vm398_vm0, %v6002_v1  ;;  %7761 = vst [vmem:[#allocation67_spill] sm:$0xff] %v6034_v38 }
  0xd5   : > { %4528 = vmatmul.msk.f32.gmra.mxu0 %vm398_vm0, %v6004_v30  ;;  %4545 = vmatmul.msk.f32.vlgmr.msrb.gmra.mxu1 %vm398_vm0, %v6006_v15  ;;  %7765 = vst [vmem:[#allocation71_spill] sm:$0xff] %v6044_v48  ;;  %v5326_v48 = vunpack.i.l.bf16 %v5325_v60 }
  0xd6   : > { %1428 = vmatpush.msra.mxu2 %v6009_v28  ;;  %1485 = vmatpush.msra.mxu3 %v6030_v34  ;;  %v6039_v28 = vunpack.c.l.bf16 %v5120_v54  ;;  %7767 = vst [vmem:[#allocation73_spill] sm:$0xff] %v6074_v16 }
  0xd7   : > { %v5315_v51 = vpop.permute.xlu0 %5314  ;;  %v5320_v1 = vpop.permute.xlu1 %5319 }
  0xd8   : > { %v5322_v52 = vunpack.i.h.bf16 %v5320_v1  ;;  %v5321_v15 = vunpack.i.l.bf16 %v5320_v1  ;;  %1429 = vmatpush.msra.mxu2 %v6020_v12  ;;  %7763 = vst [vmem:[#allocation69_spill] sm:$0xff] %v6039_v28  ;;  %v5123_v1 = vld [vmem:[%s7407_s1 + $0xd8] sm:$0xff]   ;;  %v6082_v12 = vpop.f32.mrf.mxu1 }
  0xda   : > { %v6047_v4 = vsel %vm1054_vm5, %v5321_v15, %v5322_v52  ;;  %v5119_v15 = vld [vmem:[%s7407_s1 + $0xb8] sm:$0xff]   ;;  %v5317_v52 = vunpack.i.h.bf16 %v5315_v51 }
  0xdb   : > { %7766 = vst [vmem:[#allocation72_spill] sm:$0xff] %v6047_v4  ;;  %1372 = vmatpush.msra.mxu1 %v6047_v4  ;;  %v6076_v46 = vunpack.c.l.bf16 %v5119_v15 }
  0xdc   : > { %4534 = vmatmul.msk.f32.gmra.mxu2 %vm398_vm0, %v6034_v38  ;;  %4538 = vmatmul.msk.f32.gmra.mxu3 %vm398_vm0, %v6036_v59  ;;  %v6078_v59 = vunpack.c.h.bf16 %v5120_v54  ;;  %v6080_v38 = vunpack.c.l.bf16 %v5123_v1  ;;  %v5121_v54 = vld [vmem:[%s7407_s1 + $0xc8] sm:$0xff]  }
  0xdd   : > { %4541 = vmatmul.msk.f32.vlgmr.msrb.gmra.mxu0 %vm398_vm0, %v6039_v28  ;;  %4546 = vmatmul.msk.f32.gmra.mxu1 %vm398_vm0, %v6041_v23  ;;  %7768 = vst [vmem:[#allocation74_spill] sm:$0xff] %v6076_v46  ;;  %v5316_v23 = vunpack.i.l.bf16 %v5315_v51  ;;  %v6103_v28 = vunpack.c.h.bf16 %v5119_v15  ;;  %v6105_v30 = vunpack.c.l.bf16 %v5121_v54  ;;  %v6132_v15 = vunpack.c.h.bf16 %v5121_v54 }
  0xde   : > { %7769 = vst [vmem:[#allocation75_spill] sm:$0xff] %v6078_v59 }
  0xdf   : > { %v6068_v53 = vpop.permute.xlu0 %5329  ;;  %v6070_v63 = vpop.permute.xlu1 %5334  ;;  %7770 = vst [vmem:[#allocation76_spill] sm:$0xff] %v6080_v38  ;;  %v6093_v51 = vsel %vm1169_vm4, %v5316_v23, %v5317_v52  ;;  %v6107_v23 = vunpack.c.h.bf16 %v5123_v1 }
  0xe0   : > { %7771 = vst [vmem:[#allocation77_spill] sm:$0xff] %v6093_v51  ;;  %1486 = vmatpush.msra.mxu3 %v6093_v51  ;;  %v5124_v51 = vld [vmem:[%s7407_s1 + $0xe0] sm:$0xff]   ;;  %v5332_v54 = vunpack.i.h.bf16 %v6068_v53  ;;  %v5336_v44 = vunpack.i.l.bf16 %v6070_v63  ;;  %v5331_v3 = vunpack.i.l.bf16 %v6068_v53 }
  0xe1   : > { %7773 = vst [vmem:[#allocation79_spill] sm:$0xff] %v6103_v28  ;;  %v6134_v1 = vunpack.c.l.bf16 %v5124_v51 }
  0xe2   : > { %7774 = vst [vmem:[#allocation80_spill] sm:$0xff] %v6105_v30 }
  0xe3   : > { %7775 = vst [vmem:[#allocation81_spill] sm:$0xff] %v6107_v23 }
  0xe4   : > { %4535 = vmatmul.msk.f32.gmra.mxu2 %vm398_vm0, %v6074_v16  ;;  %4539 = vmatmul.msk.f32.gmra.mxu3 %vm398_vm0, %v6076_v46  ;;  %v6101_v46 = vunpack.c.h.bf16 %v5117_v45  ;;  %v5126_v45 = vld [vmem:[%s7407_s1 + $0xf0] sm:$0xff]   ;;  %7777 = vst [vmem:[#allocation83_spill] sm:$0xff] %v6132_v15 }
  0xe5   : > { %4542 = vmatmul.msk.f32.gmra.mxu0 %vm398_vm0, %v6078_v59  ;;  %4547 = vmatmul.msk.f32.gmra.mxu1 %vm398_vm0, %v6080_v38  ;;  %v5340_v38 = vpop.permute.xlu2 %5339  ;;  %7778 = vst [vmem:[#allocation84_spill] sm:$0xff] %v6134_v1 }
  0xe6   : > { %7772 = vst [vmem:[#allocation78_spill] sm:$0xff] %v6101_v46  ;;  %v5341_v42 = vunpack.i.l.bf16 %v5340_v38 }
  0xe7   : > { %v6099_v34 = vpop.permute.xlu0 %5344  ;;  %v5350_v16 = vpop.permute.xlu1 %5349 }
  0xe8   : > { %v5352_v59 = vunpack.i.h.bf16 %v5350_v16  ;;  %v5351_v0 = vunpack.i.l.bf16 %v5350_v16  ;;  %v5346_v14 = vunpack.i.l.bf16 %v6099_v34 }
  0xea   : > { %v6110_v52 = vsel %vm1512_vm6, %v5351_v0, %v5352_v59  ;;  %v5130_v0 = vld [vmem:[%s7407_s1 + $0x110] sm:$0xff]   ;;  %v6126_v59 = vpop.f32.mrf.mxu1 }
  0xeb   : > { %7776 = vst [vmem:[#allocation82_spill] sm:$0xff] %v6110_v52  ;;  %1600 = vmatpush.msrb.mxu1 %v6110_v52  ;;  %v5327_v52 = vunpack.i.h.bf16 %v5325_v60  ;;  %v6149_v60 = vpop.f32.mrf.mxu0 }
  0xec   : > { %4536 = vmatmul.msk.f32.gmra.mxu2 %vm398_vm0, %v6101_v46  ;;  %4540 = vmatmul.msk.f32.gmra.mxu3 %vm398_vm0, %v6103_v28  ;;  %v6136_v28 = vunpack.c.l.bf16 %v5126_v45  ;;  %v6138_v46 = vunpack.c.l.bf16 %v5130_v0 }
  0xed   : > { %4543 = vmatmul.msk.f32.gmra.mxu0 %vm398_vm0, %v6105_v30  ;;  %4548 = vmatmul.msk.f32.gmra.mxu1 %vm398_vm0, %v6107_v23  ;;  %v5342_v30 = vunpack.i.h.bf16 %v5340_v38  ;;  %v5355_v5 = vpop.permute.xlu2 %5354  ;;  %v5337_v23 = vunpack.i.h.bf16 %v6070_v63  ;;  %v6153_v38 = vsel %vm1627_vm7, %v5326_v48, %v5327_v52 }
  0xee   : > { %7779 = vst [vmem:[#allocation85_spill] sm:$0xff] %v6136_v28  ;;  %v5357_v20 = vunpack.i.h.bf16 %v5355_v5  ;;  %v5356_v13 = vunpack.i.l.bf16 %v5355_v5  ;;  %v5128_v5 = vld [vmem:[%s7407_s1 + $0x100] sm:$0xff]  }
  0xef   : > { %v5360_v16 = vpop.permute.xlu0 %5359  ;;  %7780 = vst [vmem:[#allocation86_spill] sm:$0xff] %v6138_v46 }
  0xf0   : > { %v5362_v40 = vunpack.i.h.bf16 %v5360_v16  ;;  %v5361_v4 = vunpack.i.l.bf16 %v5360_v16  ;;  %7782 = vst [vmem:[#allocation88_spill] sm:$0xff] %v6153_v38  ;;  %v5347_v16 = vunpack.i.h.bf16 %v6099_v34  ;;  %v6172_v34 = vsel %vm1627_vm7, %v5336_v44, %v5337_v23 }
  0xf1   : > { %7784 = vst [vmem:[#allocation90_spill] sm:$0xff] %v6172_v34  ;;  %v6189_v44 = vunpack.c.h.bf16 %v5126_v45  ;;  %v6191_v23 = vunpack.c.l.bf16 %v5128_v5  ;;  %v5127_v45 = vld [vmem:[%s7407_s1 + $0xf8] sm:$0xff]  }
  0xf2   : > { %v6147_v39 = vsel %vm1512_vm6, %v5361_v4, %v5362_v40  ;;  %v6162_v40 = vsel %vm1627_vm7, %v5341_v42, %v5342_v30  ;;  %v6175_v48 = vpop.f32.mrf.mxu1  ;;  %v6179_v42 = vsel %vm1627_vm7, %v5356_v13, %v5357_v20  ;;  %v5365_v30 = vpop.permute.xlu1 %5364  ;;  %v6182_v4 = vsel %vm1512_vm6, %v5331_v3, %v5332_v54 }
  0xf3   : > { %7781 = vst [vmem:[#allocation87_spill] sm:$0xff] %v6147_v39  ;;  %1601 = vmatpush.msrb.mxu1 %v6147_v39  ;;  %v5367_v53 = vunpack.i.h.bf16 %v5365_v30  ;;  %v5366_v63 = vunpack.i.l.bf16 %v5365_v30  ;;  %1543 = vmatpush.msrb.mxu0 %v6182_v4  ;;  %v6195_v3 = vsel %vm1512_vm6, %v5346_v14, %v5347_v16  ;;  %v6197_v13 = vunpack.c.h.bf16 %v5130_v0  ;;  %v6208_v14 = vpop.f32.mrf.mxu0  ;;  %v5131_v16 = vld [vmem:[%s7407_s1 + $0x118] sm:$0xff]  }
  0xf4   : > { %4549 = vmatmul.msk.f32.vlgmr.msrb.gmra.mxu2 %vm398_vm0, %v6134_v1  ;;  %4553 = vmatmul.msk.f32.vlgmr.msrb.gmra.mxu3 %vm398_vm0, %v6136_v28  ;;  %7783 = vst [vmem:[#allocation89_spill] sm:$0xff] %v6162_v40 }
  0xf5   : > { %4544 = vmatmul.msk.f32.gmra.mxu0 %vm398_vm0, %v6132_v15  ;;  %4561 = vmatmul.msk.f32.vlgmr.msra.gmra.mxu1 %vm398_vm0, %v6138_v46  ;;  %7785 = vst [vmem:[#allocation91_spill] sm:$0xff] %v6179_v42  ;;  %v5370_v20 = vpop.permute.xlu2 %5369  ;;  %v6259_v46 = vunpack.c.h.bf16 %v5131_v16 }
  0xf6   : > { %1806 = vmatpush.msra.mxu1 %v5730_v61  ;;  %1658 = vmatpush.msrb.mxu2 %v6153_v38  ;;  %7786 = vst [vmem:[#allocation92_spill] sm:$0xff] %v6182_v4  ;;  %v6187_v61 = vunpack.c.h.bf16 %v5124_v51  ;;  %v5372_v52 = vunpack.i.h.bf16 %v5370_v20  ;;  %v5371_v54 = vunpack.i.l.bf16 %v5370_v20  ;;  %v5125_v51 = vld [vmem:[%s7407_s1 + $0xe8] sm:$0xff]   ;;  %v6236_v20 = vunpack.c.h.bf16 %v5128_v5 }
  0xf7   : > { %1715 = vmatpush.msrb.mxu3 %v6162_v40  ;;  %7788 = vst [vmem:[#allocation94_spill] sm:$0xff] %v6189_v44  ;;  %1544 = vmatpush.msrb.mxu0 %v6195_v3  ;;  %v6229_v30 = vunpack.c.l.bf16 %v5125_v51  ;;  %v5129_v5 = vld [vmem:[%s7407_s1 + $0x108] sm:$0xff]   ;;  %v6255_v4 = vunpack.c.h.bf16 %v5127_v45 }
  0xf8   : > { %1807 = vmatpush.msra.mxu1 %v5754_v22  ;;  %7787 = vst [vmem:[#allocation93_spill] sm:$0xff] %v6187_v61  ;;  %1659 = vmatpush.msrb.mxu2 %v6172_v34  ;;  %v6202_v22 = vsel %vm1742_vm8, %v5366_v63, %v5367_v53  ;;  %v6221_v0 = vsel %vm1742_vm8, %v5371_v54, %v5372_v52  ;;  %v6231_v53 = vunpack.c.l.bf16 %v5127_v45  ;;  %v6238_v52 = vunpack.c.l.bf16 %v5131_v16  ;;  %v5134_v45 = vld [vmem:[%s7407_s1 + $0x130] sm:$0xff]  }
  0xf9   : > { %7789 = vst [vmem:[#allocation95_spill] sm:$0xff] %v6191_v23  ;;  %1716 = vmatpush.msrb.mxu3 %v6179_v42  ;;  %v5138_v16 = vld [vmem:[%s7407_s1 + $0x150] sm:$0xff]  }
  0xfa   : > { %7790 = vst [vmem:[#allocation96_spill] sm:$0xff] %v6195_v3  ;;  %v6233_v63 = vpop.f32.mrf.mxu1  ;;  %v6253_v3 = vunpack.c.h.bf16 %v5125_v51  ;;  %v5132_v51 = vld [vmem:[%s7407_s1 + $0x120] sm:$0xff]  }
  0xfb   : > { %7791 = vst [vmem:[#allocation97_spill] sm:$0xff] %v6197_v13  ;;  %v6248_v54 = vpop.f32.mrf.mxu0 }
  0xfc   : > { %7792 = vst [vmem:[#allocation98_spill] sm:$0xff] %v6202_v22  ;;  %4550 = vmatmul.msk.f32.gmra.mxu2 %vm398_vm0, %v6187_v61  ;;  %4554 = vmatmul.msk.f32.gmra.mxu3 %vm398_vm0, %v6189_v44  ;;  %v6288_v44 = vunpack.c.l.bf16 %v5138_v16 }
  0xfd   : > { %4557 = vmatmul.msk.f32.vlgmr.msra.gmra.mxu0 %vm398_vm0, %v6191_v23  ;;  %4562 = vmatmul.msk.f32.gmra.mxu1 %vm398_vm0, %v6197_v13  ;;  %7793 = vst [vmem:[#allocation99_spill] sm:$0xff] %v6221_v0  ;;  %v6257_v13 = vunpack.c.l.bf16 %v5129_v5 }
  0xfe   : > { %1773 = vmatpush.msra.mxu0 %v6202_v22  ;;  %7794 = vst [vmem:[#allocation100_spill] sm:$0xff] %v6229_v30  ;;  %v5380_v22 = vpop.permute.xlu1 %5379 }
  0xff   : > { %7795 = vst [vmem:[#allocation101_spill] sm:$0xff] %v6231_v53  ;;  %v5381_v28 = vunpack.i.l.bf16 %v5380_v22 }
 0x100   : > { %1774 = vmatpush.msra.mxu0 %v6221_v0  ;;  %7796 = vst [vmem:[#allocation102_spill] sm:$0xff] %v6236_v20 }
 0x101   : > { %7797 = vst [vmem:[#allocation103_spill] sm:$0xff] %v6238_v52 }
 0x102   : > { %7798 = vst [vmem:[#allocation104_spill] sm:$0xff] %v6253_v3 }
 0x103   : > { %7799 = vst [vmem:[#allocation105_spill] sm:$0xff] %v6255_v4 }
 0x104   : > { %4551 = vmatmul.msk.f32.gmra.mxu2 %vm398_vm0, %v6229_v30  ;;  %4555 = vmatmul.msk.f32.gmra.mxu3 %vm398_vm0, %v6231_v53  ;;  %7800 = vst [vmem:[#allocation106_spill] sm:$0xff] %v6257_v13  ;;  %v6261_v53 = vpop.f32.mrf.mxu1 }
 0x105   : > { %4558 = vmatmul.msk.f32.gmra.mxu0 %vm398_vm0, %v6236_v20  ;;  %4563 = vmatmul.msk.f32.gmra.mxu1 %vm398_vm0, %v6238_v52  ;;  %7801 = vst [vmem:[#allocation107_spill] sm:$0xff] %v6259_v46  ;;  %v6280_v52 = vpop.f32.mrf.mxu0  ;;  %v5382_v20 = vunpack.i.h.bf16 %v5380_v22  ;;  %v470_v22 = vadd.f32 %v6082_v12, %v6149_v60  ;;  %v6314_v12 = vunpack.c.h.bf16 %v5134_v45  ;;  %v6318_v60 = vunpack.c.h.bf16 %v5138_v16 }
 0x106   : > { %7805 = vst [vmem:[#allocation111_spill] sm:$0xff] %v6288_v44 }
 0x107   : > { %7807 = vst [vmem:[#allocation113_spill] sm:$0xff] %v6314_v12 }
 0x108   : > { %7809 = vst [vmem:[#allocation115_spill] sm:$0xff] %v6318_v60 }
 0x10c   : > { %4552 = vmatmul.msk.f32.gmra.mxu2 %vm398_vm0, %v6253_v3  ;;  %4556 = vmatmul.msk.f32.gmra.mxu3 %vm398_vm0, %v6255_v4  ;;  %v6282_v4 = vunpack.c.l.bf16 %v5132_v51  ;;  %v6284_v3 = vunpack.c.l.bf16 %v5134_v45  ;;  %v6295_v42 = vpop.f32.mrf.mxu1 }
 0x10d   : > { %4559 = vmatmul.msk.f32.gmra.mxu0 %vm398_vm0, %v6257_v13  ;;  %4564 = vmatmul.msk.f32.gmra.mxu1 %vm398_vm0, %v6259_v46  ;;  %v5375_v13 = vpop.permute.xlu0 %5374  ;;  %v6286_v46 = vunpack.c.h.bf16 %v5129_v5 }
 0x10e   : > { %7802 = vst [vmem:[#allocation108_spill] sm:$0xff] %v6282_v4  ;;  %v5377_v30 = vunpack.i.h.bf16 %v5375_v13  ;;  %v5376_v0 = vunpack.i.l.bf16 %v5375_v13  ;;  %v1924_v13 = vsel %vm612_vm1, %v5381_v28, %v5382_v20  ;;  %v6312_v20 = vunpack.c.h.bf16 %v5132_v51  ;;  %v5139_v51 = vld [vmem:[%s7407_s1 + $0x158] sm:$0xff]  }
 0x10f   : > { %7803 = vst [vmem:[#allocation109_spill] sm:$0xff] %v6284_v3 }
 0x110   : > { %7804 = vst [vmem:[#allocation110_spill] sm:$0xff] %v6286_v46  ;;  %v1925_v61 = vsel %vm612_vm1, %v5376_v0, %v5377_v30  ;;  %v5136_v0 = vld [vmem:[%s7407_s1 + $0x140] sm:$0xff]  }
 0x111   : > { %7806 = vst [vmem:[#allocation112_spill] sm:$0xff] %v6312_v20 }
 0x114   : > { %4565 = vmatmul.msk.f32.vlgmr.msra.gmra.mxu2 %vm398_vm0, %v6282_v4  ;;  %4569 = vmatmul.msk.f32.vlgmr.msra.gmra.mxu3 %vm398_vm0, %v6284_v3  ;;  %v6341_v45 = vpop.f32.mrf.mxu1 }
 0x115   : > { %4560 = vmatmul.msk.f32.gmra.mxu0 %vm398_vm0, %v6286_v46  ;;  %4577 = vmatmul.msk.f32.vlgmr.msrb.gmra.mxu1 %vm398_vm0, %v6288_v44 }
 0x116   : > { %1864 = vmatpush.msra.mxu3 %v5733_v62  ;;  %1942 = vmatpush.msrb.mxu1 %v1925_v61  ;;  %v6316_v62 = vunpack.c.l.bf16 %v5136_v0 }
 0x117   : > { %v588_v30 = vpop.f32.mrf.mxu3  ;;  %v527_v5 = vpop.f32.mrf.mxu2  ;;  %1835 = vmatpush.msra.mxu2 %v5541_v2  ;;  %v5133_v2 = vld [vmem:[%s7407_s1 + $0x128] sm:$0xff]  }
 0x118   : > { %1865 = vmatpush.msra.mxu3 %v5757_v24  ;;  %v539_v28 = vadd.f32 %v527_v5, %v470_v22  ;;  %1943 = vmatpush.msrb.mxu1 %v1924_v13  ;;  %7808 = vst [vmem:[#allocation114_spill] sm:$0xff] %v6316_v62  ;;  %v473_v24 = vadd.f32 %v6126_v59, %v6208_v14  ;;  %v6350_v59 = vunpack.c.l.bf16 %v5139_v51 }
 0x119   : > { %1836 = vmatpush.msra.mxu2 %v5551_v10  ;;  %v5135_v10 = vld [vmem:[%s7407_s1 + $0x138] sm:$0xff]  }
 0x11a   : > { %v600_v61 = vadd.f32 %v588_v30, %v539_v28  ;;  %v646_v44 = vpop.f32.mrf.mxu0  ;;  %v6344_v30 = vunpack.c.l.bf16 %v5133_v2  ;;  %v6346_v5 = vunpack.c.l.bf16 %v5135_v10  ;;  %v6348_v28 = vunpack.c.h.bf16 %v5136_v0  ;;  %7813 = vst [vmem:[#allocation119_spill] sm:$0xff] %v6350_v59  ;;  %v5137_v0 = vld [vmem:[%s7407_s1 + $0x148] sm:$0xff]  }
 0x11b   : > { %v6397_v31 = vunpack.c.h.bf16 %v5137_v0 }
 0x11c   : > { %4566 = vmatmul.msk.f32.gmra.mxu2 %vm398_vm0, %v6312_v20  ;;  %4570 = vmatmul.msk.f32.gmra.mxu3 %vm398_vm0, %v6314_v12  ;;  %7810 = vst [vmem:[#allocation116_spill] sm:$0xff] %v6344_v30 }
 0x11d   : > { %4573 = vmatmul.msk.f32.vlgmr.msrb.gmra.mxu0 %vm398_vm0, %v6316_v62  ;;  %4578 = vmatmul.msk.f32.gmra.mxu1 %vm398_vm0, %v6318_v60  ;;  %7811 = vst [vmem:[#allocation117_spill] sm:$0xff] %v6346_v5  ;;  %v6371_v60 = vunpack.c.h.bf16 %v5135_v10  ;;  %v5142_v10 = vld [vmem:[%s7407_s1 + $0x170] sm:$0xff]  }
 0x11e   : > { %1897 = vmatpush.msrb.mxu0 %v5701_v49  ;;  %7812 = vst [vmem:[#allocation118_spill] sm:$0xff] %v6348_v28 }
 0x11f   : > { %v530_v16 = vpop.f32.mrf.mxu2  ;;  %v591_v13 = vpop.f32.mrf.mxu3  ;;  %7815 = vst [vmem:[#allocation121_spill] sm:$0xff] %v6371_v60 }
 0x120   : > { %1898 = vmatpush.msrb.mxu0 %v5787_v56  ;;  %v540_v22 = vadd.f32 %v530_v16, %v473_v24  ;;  %v476_v56 = vadd.f32 %v6175_v48, %v6248_v54  ;;  %v6375_v48 = vunpack.c.h.bf16 %v5139_v51  ;;  %v479_v51 = vadd.f32 %v6233_v63, %v6280_v52  ;;  %7820 = vst [vmem:[#allocation126_spill] sm:$0xff] %v6397_v31 }
 0x122   : > { %v601_v49 = vadd.f32 %v591_v13, %v540_v22  ;;  %v649_v14 = vpop.f32.mrf.mxu0  ;;  %v6369_v22 = vunpack.c.h.bf16 %v5133_v2  ;;  %7817 = vst [vmem:[#allocation123_spill] sm:$0xff] %v6375_v48  ;;  %v5140_v2 = vld [vmem:[%s7407_s1 + $0x160] sm:$0xff]  }
 0x124   : > { %4567 = vmatmul.msk.f32.gmra.mxu2 %vm398_vm0, %v6344_v30  ;;  %4571 = vmatmul.msk.f32.gmra.mxu3 %vm398_vm0, %v6346_v5  ;;  %7814 = vst [vmem:[#allocation120_spill] sm:$0xff] %v6369_v22  ;;  %v6373_v5 = vunpack.c.l.bf16 %v5137_v0 }
 0x125   : > { %4574 = vmatmul.msk.f32.gmra.mxu0 %vm398_vm0, %v6348_v28  ;;  %4579 = vmatmul.msk.f32.gmra.mxu1 %vm398_vm0, %v6350_v59  ;;  %v700_v59 = vpop.f32.mrf.mxu1 }
 0x126   : > { %7816 = vst [vmem:[#allocation122_spill] sm:$0xff] %v6373_v5 }
 0x127   : > { %v533_v24 = vpop.f32.mrf.mxu2  ;;  %v594_v16 = vpop.f32.mrf.mxu3 }
 0x128   : > { %v541_v13 = vadd.f32 %v533_v24, %v476_v56 }
 0x12a   : > { %v602_v54 = vadd.f32 %v594_v16, %v541_v13  ;;  %v652_v12 = vpop.f32.mrf.mxu0  ;;  %v6393_v13 = vunpack.c.l.bf16 %v5140_v2 }
 0x12c   : > { %4568 = vmatmul.msk.f32.gmra.mxu2 %vm398_vm0, %v6369_v22  ;;  %4572 = vmatmul.msk.f32.gmra.mxu3 %vm398_vm0, %v6371_v60  ;;  %7818 = vst [vmem:[#allocation124_spill] sm:$0xff] %v6393_v13  ;;  %v6395_v60 = vunpack.c.l.bf16 %v5142_v10 }
 0x12d   : > { %4575 = vmatmul.msk.f32.gmra.mxu0 %vm398_vm0, %v6373_v5  ;;  %4580 = vmatmul.msk.f32.gmra.mxu1 %vm398_vm0, %v6375_v48  ;;  %v658_v48 = vadd.f32 %v646_v44, %v600_v61 }
 0x12e   : > { %7819 = vst [vmem:[#allocation125_spill] sm:$0xff] %v6395_v60 }
 0x12f   : > { %v597_v56 = vpop.f32.mrf.mxu3  ;;  %v536_v24 = vpop.f32.mrf.mxu2  ;;  %v703_v63 = vadd.f32 %v6261_v53, %v658_v48  ;;  %v6418_v53 = vunpack.c.h.bf16 %v5140_v2 }
 0x130   : > { %v542_v16 = vadd.f32 %v536_v24, %v479_v51 }
 0x131   : > { %7821 = vst [vmem:[#allocation127_spill] sm:$0xff] %v6418_v53 }
 0x132   : > { %v603_v27 = vadd.f32 %v597_v56, %v542_v16  ;;  %v655_v22 = vpop.f32.mrf.mxu0  ;;  %v915_v5 = vpop.f32.mrf.mxu1 }
 0x134   : > { %v661_v30 = vadd.f32 %v655_v22, %v603_v27  ;;  %4581 = vmatmul.msk.f32.vlgmr.msrb.gmra.mxu2 %vm398_vm0, %v6393_v13  ;;  %4585 = vmatmul.msk.f32.vlgmr.msrb.gmra.mxu3 %vm398_vm0, %v6395_v60  ;;  %v5144_v27 = vld [vmem:[%s7407_s1 + $0x180] sm:$0xff]   ;;  %v659_v22 = vadd.f32 %v649_v14, %v601_v49  ;;  %v5141_v49 = vld [vmem:[%s7407_s1 + $0x168] sm:$0xff]   ;;  %v5143_v14 = vld [vmem:[%s7407_s1 + $0x178] sm:$0xff]  }
 0x135   : > { %4576 = vmatmul.msk.f32.gmra.mxu0 %vm398_vm0, %v6397_v31  ;;  %4593 = vmatmul.msk.f32.vlgmr.msra.gmra.mxu1 %vm398_vm0, %v5649_v36 }
 0x136   : > { %v6408_v52 = vadd.f32 %v700_v59, %v661_v30  ;;  %2008 = vmatpush.msrb.mxu3 %v5760_v26  ;;  %2074 = vmatpush.msra.mxu1 %v5850_v6  ;;  %v6420_v30 = vunpack.c.h.bf16 %v5142_v10  ;;  %v6422_v59 = vunpack.c.l.bf16 %v5144_v27  ;;  %v704_v2 = vadd.f32 %v6295_v42, %v659_v22 }
 0x137   : > { %v736_v44 = vpop.f32.mrf.mxu2  ;;  %v797_v61 = vpop.f32.mrf.mxu3  ;;  %1975 = vmatpush.msrb.mxu2 %v5590_v25 }
 0x138   : > { %2009 = vmatpush.msrb.mxu3 %v5790_v57  ;;  %2075 = vmatpush.msra.mxu1 %v5881_v17  ;;  %v748_v0 = vadd.f32 %v736_v44, %v703_v63  ;;  %7822 = vst [vmem:[#allocation128_spill] sm:$0xff] %v6420_v30 }
 0x139   : > { %7823 = vst [vmem:[#allocation129_spill] sm:$0xff] %v6422_v59  ;;  %1976 = vmatpush.msrb.mxu2 %v5602_v29 }
 0x13a   : > { %v809_v48 = vadd.f32 %v797_v61, %v748_v0  ;;  %v858_v51 = vpop.f32.mrf.mxu0  ;;  %v918_v56 = vpop.f32.mrf.mxu1  ;;  %v6446_v61 = vunpack.c.l.bf16 %v5141_v49  ;;  %v6448_v0 = vunpack.c.l.bf16 %v5143_v14 }
 0x13c   : > { %v870_v24 = vadd.f32 %v858_v51, %v809_v48  ;;  %4582 = vmatmul.msk.f32.gmra.mxu2 %vm398_vm0, %v6418_v53  ;;  %4586 = vmatmul.msk.f32.gmra.mxu3 %vm398_vm0, %v6420_v30  ;;  %7824 = vst [vmem:[#allocation130_spill] sm:$0xff] %v6448_v0  ;;  %v6450_v48 = vunpack.c.h.bf16 %v5144_v27  ;;  %v660_v51 = vadd.f32 %v652_v12, %v602_v54  ;;  %v5145_v12 = vld [vmem:[%s7407_s1 + $0x188] sm:$0xff]  }
 0x13d   : > { %4589 = vmatmul.msk.f32.vlgmr.msra.gmra.mxu0 %vm398_vm0, %v6422_v59  ;;  %4594 = vmatmul.msk.f32.gmra.mxu1 %vm398_vm0, %v5659_v37 }
 0x13e   : > { %v6440_v10 = vadd.f32 %v915_v5, %v870_v24  ;;  %2041 = vmatpush.msra.mxu0 %v5826_v19  ;;  %7825 = vst [vmem:[#allocation131_spill] sm:$0xff] %v6450_v48  ;;  %v705_v18 = vadd.f32 %v6341_v45, %v660_v51 }
 0x13f   : > { %v739_v16 = vpop.f32.mrf.mxu2  ;;  %v800_v63 = vpop.f32.mrf.mxu3 }
 0x140   : > { %2042 = vmatpush.msra.mxu0 %v5853_v11  ;;  %v749_v44 = vadd.f32 %v739_v16, %v704_v2 }
 0x142   : > { %v810_v42 = vadd.f32 %v800_v63, %v749_v44  ;;  %v861_v5 = vpop.f32.mrf.mxu0  ;;  %v921_v22 = vpop.f32.mrf.mxu1  ;;  %v6464_v63 = vunpack.c.h.bf16 %v5141_v49  ;;  %v6466_v44 = vunpack.c.h.bf16 %v5143_v14 }
 0x144   : > { %v871_v24 = vadd.f32 %v861_v5, %v810_v42  ;;  %4583 = vmatmul.msk.f32.gmra.mxu2 %vm398_vm0, %v6446_v61  ;;  %4587 = vmatmul.msk.f32.gmra.mxu3 %vm398_vm0, %v6448_v0  ;;  %7826 = vst [vmem:[#allocation132_spill] sm:$0xff] %v6464_v63  ;;  %v6468_v42 = vunpack.c.l.bf16 %v5145_v12 }
 0x145   : > { %4590 = vmatmul.msk.f32.gmra.mxu0 %vm398_vm0, %v6450_v48  ;;  %4595 = vmatmul.msk.f32.gmra.mxu1 %vm398_vm0, %v5679_v41  ;;  %7827 = vst [vmem:[#allocation133_spill] sm:$0xff] %v6466_v44 }
 0x146   : > { %v928_v27 = vadd.f32 %v918_v56, %v871_v24  ;;  %7828 = vst [vmem:[#allocation134_spill] sm:$0xff] %v6468_v42  ;;  %v5385_v56 = vpop.permute.xlu2 %5384 }
 0x147   : > { %v742_v54 = vpop.f32.mrf.mxu2  ;;  %v803_v2 = vpop.f32.mrf.mxu3  ;;  %v5387_v24 = vunpack.i.h.bf16 %v5385_v56 }
 0x148   : > { %v750_v16 = vadd.f32 %v742_v54, %v705_v18  ;;  %v6479_v18 = vunpack.c.h.bf16 %v5145_v12  ;;  %v5390_v54 = vpop.permute.xlu0 %5389 }
 0x149   : > { %v5391_v0 = vunpack.i.l.bf16 %v5390_v54 }
 0x14a   : > { %v811_v5 = vadd.f32 %v803_v2, %v750_v16  ;;  %v864_v37 = vpop.f32.mrf.mxu0  ;;  %v924_v36 = vpop.f32.mrf.mxu1  ;;  %7829 = vst [vmem:[#allocation135_spill] sm:$0xff] %v6479_v18 }
 0x14c   : > { %v872_v41 = vadd.f32 %v864_v37, %v811_v5  ;;  %4584 = vmatmul.msk.f32.gmra.mxu2 %vm398_vm0, %v6464_v63  ;;  %4588 = vmatmul.msk.f32.gmra.mxu3 %vm398_vm0, %v6466_v44  ;;  %v5386_v37 = vunpack.i.l.bf16 %v5385_v56  ;;  %v5392_v44 = vunpack.i.h.bf16 %v5390_v54 }
 0x14d   : > { %4591 = vmatmul.msk.f32.gmra.mxu0 %vm398_vm0, %v6468_v42  ;;  %4596 = vmatmul.msk.f32.gmra.mxu1 %vm398_vm0, %v5696_v47 }
 0x14e   : > { %v929_v45 = vadd.f32 %v921_v22, %v872_v41  ;;  %v6486_v41 = vsel %vm612_vm1, %v5386_v37, %v5387_v24  ;;  %v6495_v22 = vsel %vm612_vm1, %v5391_v0, %v5392_v44  ;;  %v7834_v37 = vld [vmem:[#allocation45_spill] sm:$0xff] }
 0x14f   : > { %v745_v49 = vpop.f32.mrf.mxu2  ;;  %v806_v14 = vpop.f32.mrf.mxu3  ;;  %7830 = vst [vmem:[#allocation136_spill] sm:$0xff] %v6486_v41 }
 0x150   : > { %v751_v51 = vadd.f32 %v745_v49, %v6408_v52  ;;  %7831 = vst [vmem:[#allocation137_spill] sm:$0xff] %v6495_v22 }
 0x152   : > { %v812_v2 = vadd.f32 %v806_v14, %v751_v51  ;;  %v867_v16 = vpop.f32.mrf.mxu0  ;;  %v1145_v5 = vpop.f32.mrf.mxu1 }
 0x154   : > { %v873_v63 = vadd.f32 %v867_v16, %v812_v2  ;;  %4597 = vmatmul.msk.f32.vlgmr.msra.gmra.mxu2 %vm398_vm0, %v5634_v33  ;;  %4601 = vmatmul.msk.f32.vlgmr.msra.gmra.mxu3 %vm398_vm0, %v5749_v7 }
 0x155   : > { %4592 = vmatmul.msk.f32.gmra.mxu0 %vm398_vm0, %v6479_v18  ;;  %4609 = vmatmul.msk.f32.vlgmr.msrb.gmra.mxu1 %vm398_vm0, %v5784_v55  ;;  %v7841_v55 = vld [vmem:[#allocation29_spill] sm:$0xff] }
 0x156   : > { %v930_v52 = vadd.f32 %v924_v36, %v873_v63  ;;  %2152 = vmatpush.msra.mxu3 %v5793_v58  ;;  %2218 = vmatpush.msrb.mxu1 %v5949_v21 }
 0x157   : > { %v973_v12 = vpop.f32.mrf.mxu2  ;;  %v1030_v56 = vpop.f32.mrf.mxu3  ;;  %2119 = vmatpush.msra.mxu2 %v6486_v41 }
 0x158   : > { %2153 = vmatpush.msra.mxu3 %v5837_v32  ;;  %2219 = vmatpush.msrb.mxu1 %v5953_v50  ;;  %v985_v36 = vadd.f32 %v973_v12, %v6440_v10  ;;  %v7833_v10 = vld [vmem:[#allocation40_spill] sm:$0xff] }
 0x159   : > { %2120 = vmatpush.msra.mxu2 %v6495_v22 }
 0x15a   : > { %v1042_v63 = vadd.f32 %v1030_v56, %v985_v36  ;;  %v1088_v49 = vpop.f32.mrf.mxu0  ;;  %v1148_v14 = vpop.f32.mrf.mxu1  ;;  %v7835_v36 = vld [vmem:[#allocation14_spill] sm:$0xff] }
 0x15c   : > { %v1100_v0 = vadd.f32 %v1088_v49, %v1042_v63  ;;  %4598 = vmatmul.msk.f32.gmra.mxu2 %vm398_vm0, %v5647_v35  ;;  %4602 = vmatmul.msk.f32.gmra.mxu3 %vm398_vm0, %v5778_v43  ;;  %v7836_v63 = vld [vmem:[#allocation28_spill] sm:$0xff]  ;;  %v7837_v49 = vld [vmem:[#allocation26_spill] sm:$0xff] }
 0x15d   : > { %4605 = vmatmul.msk.f32.vlgmr.msrb.gmra.mxu0 %vm398_vm0, %v5751_v9  ;;  %4610 = vmatmul.msk.f32.gmra.mxu1 %vm398_vm0, %v7832_v8  ;;  %v7840_v8 = vld [vmem:[#allocation32_spill] sm:$0xff] }
 0x15e   : > { %v1157_v44 = vadd.f32 %v1145_v5, %v1100_v0  ;;  %2185 = vmatpush.msrb.mxu0 %v7833_v10  ;;  %v7838_v5 = vld [vmem:[#allocation34_spill] sm:$0xff] }
 0x15f   : > { %v976_v51 = vpop.f32.mrf.mxu2  ;;  %v1033_v24 = vpop.f32.mrf.mxu3 }
 0x160   : > { %2186 = vmatpush.msrb.mxu0 %v7834_v37  ;;  %v986_v54 = vadd.f32 %v976_v51, %v928_v27 }
 0x162   : > { %v1043_v2 = vadd.f32 %v1033_v24, %v986_v54  ;;  %v1091_v16 = vpop.f32.mrf.mxu0  ;;  %v1151_v12 = vpop.f32.mrf.mxu1 }
 0x164   : > { %v1101_v56 = vadd.f32 %v1091_v16, %v1043_v2  ;;  %4599 = vmatmul.msk.f32.gmra.mxu2 %vm398_vm0, %v7835_v36  ;;  %4603 = vmatmul.msk.f32.gmra.mxu3 %vm398_vm0, %v7836_v63  ;;  %v7839_v16 = vld [vmem:[#allocation16_spill] sm:$0xff]  ;;  %v7842_v63 = vld [vmem:[#allocation37_spill] sm:$0xff] }
 0x165   : > { %4606 = vmatmul.msk.f32.gmra.mxu0 %vm398_vm0, %v7837_v49  ;;  %4611 = vmatmul.msk.f32.gmra.mxu1 %vm398_vm0, %v7838_v5  ;;  %v7843_v49 = vld [vmem:[#allocation18_spill] sm:$0xff] }
 0x166   : > { %v1158_v0 = vadd.f32 %v1148_v14, %v1101_v56 }
 0x167   : > { %v979_v22 = vpop.f32.mrf.mxu2  ;;  %v1036_v41 = vpop.f32.mrf.mxu3 }
 0x168   : > { %v987_v27 = vadd.f32 %v979_v22, %v929_v45 }
 0x16a   : > { %v1044_v51 = vadd.f32 %v1036_v41, %v987_v27  ;;  %v1094_v24 = vpop.f32.mrf.mxu0  ;;  %v1154_v54 = vpop.f32.mrf.mxu1 }
 0x16b   : > { %v5395_v41 = vpop.permute.xlu1 %5394 }
 0x16c   : > { %v1102_v2 = vadd.f32 %v1094_v24, %v1044_v51  ;;  %4600 = vmatmul.msk.f32.gmra.mxu2 %vm398_vm0, %v7839_v16  ;;  %4604 = vmatmul.msk.f32.gmra.mxu3 %vm398_vm0, %v7840_v8  ;;  %v5397_v22 = vunpack.i.h.bf16 %v5395_v41  ;;  %v5396_v27 = vunpack.i.l.bf16 %v5395_v41  ;;  %v5400_v51 = vpop.permute.xlu2 %5399 }
 0x16d   : > { %4607 = vmatmul.msk.f32.gmra.mxu0 %vm398_vm0, %v7841_v55  ;;  %4612 = vmatmul.msk.f32.gmra.mxu1 %vm398_vm0, %v7842_v63  ;;  %v5402_v43 = vunpack.i.h.bf16 %v5400_v51  ;;  %v5401_v36 = vunpack.i.l.bf16 %v5400_v51  ;;  %v7844_v55 = vld [vmem:[#allocation35_spill] sm:$0xff] }
 0x16e   : > { %v1159_v14 = vadd.f32 %v1151_v12, %v1102_v2  ;;  %v6535_v12 = vsel %vm1169_vm4, %v5396_v27, %v5397_v22  ;;  %v7851_v22 = vld [vmem:[#allocation46_spill] sm:$0xff]  ;;  %v7852_v27 = vld [vmem:[#allocation72_spill] sm:$0xff] }
 0x16f   : > { %v1039_v56 = vpop.f32.mrf.mxu3  ;;  %v982_v5 = vpop.f32.mrf.mxu2  ;;  %7845 = vst [vmem:[#allocation40_spill] sm:$0xff] %v6535_v12 }
 0x170   : > { %v988_v45 = vadd.f32 %v982_v5, %v930_v52  ;;  %v7846_v52 = vld [vmem:[#allocation33_spill] sm:$0xff]  ;;  %v7847_v5 = vld [vmem:[#allocation43_spill] sm:$0xff] }
 0x172   : > { %v1045_v24 = vadd.f32 %v1039_v56, %v988_v45  ;;  %v1097_v47 = vpop.f32.mrf.mxu0  ;;  %v1374_v16 = vpop.f32.mrf.mxu1  ;;  %v7848_v56 = vld [vmem:[#allocation39_spill] sm:$0xff]  ;;  %v7849_v45 = vld [vmem:[#allocation58_spill] sm:$0xff] }
 0x174   : > { %v1103_v8 = vadd.f32 %v1097_v47, %v1045_v24  ;;  %4613 = vmatmul.msk.f32.vlgmr.msrb.gmra.mxu2 %vm398_vm0, %v7843_v49  ;;  %4617 = vmatmul.msk.f32.vlgmr.msrb.gmra.mxu3 %vm398_vm0, %v7844_v55  ;;  %v6544_v47 = vsel %vm1169_vm4, %v5401_v36, %v5402_v43  ;;  %v7853_v55 = vld [vmem:[#allocation19_spill] sm:$0xff]  ;;  %v7854_v43 = vld [vmem:[#allocation41_spill] sm:$0xff]  ;;  %v7855_v36 = vld [vmem:[#allocation36_spill] sm:$0xff] }
 0x175   : > { %4608 = vmatmul.msk.f32.gmra.mxu0 %vm398_vm0, %v7846_v52  ;;  %4625 = vmatmul.msk.f32.vlgmr.msra.gmra.mxu1 %vm398_vm0, %v7847_v5  ;;  %7850 = vst [vmem:[#allocation45_spill] sm:$0xff] %v6544_v47  ;;  %v7859_v49 = vld [vmem:[#allocation20_spill] sm:$0xff] }
 0x176   : > { %v1160_v2 = vadd.f32 %v1154_v54, %v1103_v8  ;;  %2251 = vmatpush.msrb.mxu2 %v7848_v56  ;;  %2362 = vmatpush.msra.mxu1 %v7849_v45 }
 0x177   : > { %v1203_v41 = vpop.f32.mrf.mxu2  ;;  %v1260_v51 = vpop.f32.mrf.mxu3  ;;  %2296 = vmatpush.msrb.mxu3 %v6535_v12  ;;  %v7856_v12 = vld [vmem:[#allocation50_spill] sm:$0xff] }
 0x178   : > { %2252 = vmatpush.msrb.mxu2 %v7851_v22  ;;  %2363 = vmatpush.msra.mxu1 %v7852_v27  ;;  %v1215_v24 = vadd.f32 %v1203_v41, %v1157_v44  ;;  %v7857_v44 = vld [vmem:[#allocation65_spill] sm:$0xff] }
 0x179   : > { %2297 = vmatpush.msrb.mxu3 %v6544_v47 }
 0x17a   : > { %v1272_v5 = vadd.f32 %v1260_v51, %v1215_v24  ;;  %v1317_v8 = vpop.f32.mrf.mxu0  ;;  %v1377_v54 = vpop.f32.mrf.mxu1  ;;  %v7858_v24 = vld [vmem:[#allocation71_spill] sm:$0xff] }
 0x17c   : > { %v1329_v63 = vadd.f32 %v1317_v8, %v1272_v5  ;;  %4614 = vmatmul.msk.f32.gmra.mxu2 %vm398_vm0, %v7853_v55  ;;  %4618 = vmatmul.msk.f32.gmra.mxu3 %vm398_vm0, %v7854_v43  ;;  %v7860_v43 = vld [vmem:[#allocation48_spill] sm:$0xff] }
 0x17d   : > { %4621 = vmatmul.msk.f32.vlgmr.msra.gmra.mxu0 %vm398_vm0, %v7855_v36  ;;  %4626 = vmatmul.msk.f32.gmra.mxu1 %vm398_vm0, %v7856_v12  ;;  %v7861_v36 = vld [vmem:[#allocation42_spill] sm:$0xff] }
 0x17e   : > { %v1386_v27 = vadd.f32 %v1374_v16, %v1329_v63  ;;  %2329 = vmatpush.msra.mxu0 %v7857_v44  ;;  %v7862_v63 = vld [vmem:[#allocation56_spill] sm:$0xff] }
 0x17f   : > { %v1206_v41 = vpop.f32.mrf.mxu2  ;;  %v1263_v51 = vpop.f32.mrf.mxu3 }
 0x180   : > { %2330 = vmatpush.msra.mxu0 %v7858_v24  ;;  %v1216_v5 = vadd.f32 %v1206_v41, %v1158_v0  ;;  %v7877_v24 = vld [vmem:[#allocation44_spill] sm:$0xff] }
 0x182   : > { %v1273_v8 = vadd.f32 %v1263_v51, %v1216_v5  ;;  %v1320_v47 = vpop.f32.mrf.mxu0  ;;  %v1380_v55 = vpop.f32.mrf.mxu1 }
 0x184   : > { %v1330_v45 = vadd.f32 %v1320_v47, %v1273_v8  ;;  %4615 = vmatmul.msk.f32.gmra.mxu2 %vm398_vm0, %v7859_v49  ;;  %4619 = vmatmul.msk.f32.gmra.mxu3 %vm398_vm0, %v7860_v43  ;;  %v7863_v8 = vld [vmem:[#allocation21_spill] sm:$0xff]  ;;  %v7864_v49 = vld [vmem:[#allocation54_spill] sm:$0xff] }
 0x185   : > { %4622 = vmatmul.msk.f32.gmra.mxu0 %vm398_vm0, %v7861_v36  ;;  %4627 = vmatmul.msk.f32.gmra.mxu1 %vm398_vm0, %v7862_v63  ;;  %v7865_v43 = vld [vmem:[#allocation49_spill] sm:$0xff] }
 0x186   : > { %v1387_v16 = vadd.f32 %v1377_v54, %v1330_v45  ;;  %v7866_v36 = vld [vmem:[#allocation61_spill] sm:$0xff] }
 0x187   : > { %v1209_v12 = vpop.f32.mrf.mxu2  ;;  %v1266_v52 = vpop.f32.mrf.mxu3 }
 0x188   : > { %v1217_v0 = vadd.f32 %v1209_v12, %v1159_v14 }
 0x18a   : > { %v1274_v41 = vadd.f32 %v1266_v52, %v1217_v0  ;;  %v1323_v51 = vpop.f32.mrf.mxu0  ;;  %v1383_v5 = vpop.f32.mrf.mxu1 }
 0x18c   : > { %v1331_v47 = vadd.f32 %v1323_v51, %v1274_v41  ;;  %4616 = vmatmul.msk.f32.gmra.mxu2 %vm398_vm0, %v7863_v8  ;;  %4620 = vmatmul.msk.f32.gmra.mxu3 %vm398_vm0, %v7864_v49  ;;  %v7867_v51 = vld [vmem:[#allocation38_spill] sm:$0xff]  ;;  %v7868_v8 = vld [vmem:[#allocation59_spill] sm:$0xff] }
 0x18d   : > { %4623 = vmatmul.msk.f32.gmra.mxu0 %vm398_vm0, %v7865_v43  ;;  %4628 = vmatmul.msk.f32.gmra.mxu1 %vm398_vm0, %v7866_v36  ;;  %v7869_v49 = vld [vmem:[#allocation55_spill] sm:$0xff]  ;;  %v7870_v43 = vld [vmem:[#allocation69_spill] sm:$0xff] }
 0x18e   : > { %v1388_v45 = vadd.f32 %v1380_v55, %v1331_v47  ;;  %v7871_v47 = vld [vmem:[#allocation63_spill] sm:$0xff] }
 0x18f   : > { %v1212_v54 = vpop.f32.mrf.mxu2  ;;  %v1269_v63 = vpop.f32.mrf.mxu3 }
 0x190   : > { %v1218_v14 = vadd.f32 %v1212_v54, %v1160_v2  ;;  %v7872_v2 = vld [vmem:[#allocation66_spill] sm:$0xff] }
 0x192   : > { %v1275_v12 = vadd.f32 %v1269_v63, %v1218_v14  ;;  %v1326_v52 = vpop.f32.mrf.mxu0  ;;  %v1603_v0 = vpop.f32.mrf.mxu1  ;;  %v7873_v63 = vld [vmem:[#allocation82_spill] sm:$0xff] }
 0x194   : > { %v1332_v41 = vadd.f32 %v1326_v52, %v1275_v12  ;;  %4629 = vmatmul.msk.f32.vlgmr.msra.gmra.mxu2 %vm398_vm0, %v7867_v51  ;;  %4633 = vmatmul.msk.f32.vlgmr.msra.gmra.mxu3 %vm398_vm0, %v7868_v8  ;;  %v7874_v12 = vld [vmem:[#allocation64_spill] sm:$0xff]  ;;  %v7875_v52 = vld [vmem:[#allocation77_spill] sm:$0xff]  ;;  %v5405_v8 = vpop.permute.xlu0 %5404 }
 0x195   : > { %4624 = vmatmul.msk.f32.gmra.mxu0 %vm398_vm0, %v7869_v49  ;;  %4641 = vmatmul.msk.f32.vlgmr.msrb.gmra.mxu1 %vm398_vm0, %v7870_v43  ;;  %v5407_v51 = vunpack.i.h.bf16 %v5405_v8  ;;  %v5406_v49 = vunpack.i.l.bf16 %v5405_v8  ;;  %v5410_v43 = vpop.permute.xlu1 %5409  ;;  %v7880_v8 = vld [vmem:[#allocation75_spill] sm:$0xff] }
 0x196   : > { %v1389_v55 = vadd.f32 %v1383_v5, %v1332_v41  ;;  %2395 = vmatpush.msra.mxu2 %v7871_v47  ;;  %2428 = vmatpush.msra.mxu3 %v7872_v2  ;;  %v5412_v7 = vunpack.i.h.bf16 %v5410_v43  ;;  %v5411_v2 = vunpack.i.l.bf16 %v5410_v43 }
 0x197   : > { %2506 = vmatpush.msrb.mxu1 %v7873_v63  ;;  %v1431_v54 = vpop.f32.mrf.mxu2  ;;  %v1488_v14 = vpop.f32.mrf.mxu3  ;;  %v6591_v63 = vsel %vm1169_vm4, %v5406_v49, %v5407_v51 }
 0x198   : > { %2396 = vmatpush.msra.mxu2 %v7874_v12  ;;  %2429 = vmatpush.msra.mxu3 %v7875_v52  ;;  %v1443_v36 = vadd.f32 %v1431_v54, %v1386_v27  ;;  %7876 = vst [vmem:[#allocation138_spill] sm:$0xff] %v6591_v63  ;;  %v7878_v52 = vld [vmem:[#allocation67_spill] sm:$0xff]  ;;  %v7879_v27 = vld [vmem:[#allocation60_spill] sm:$0xff] }
 0x199   : > { %2507 = vmatpush.msrb.mxu1 %v6147_v39  ;;  %v7883_v39 = vld [vmem:[#allocation73_spill] sm:$0xff] }
 0x19a   : > { %v1500_v5 = vadd.f32 %v1488_v14, %v1443_v36  ;;  %v1546_v41 = vpop.f32.mrf.mxu0  ;;  %v1606_v47 = vpop.f32.mrf.mxu1  ;;  %v6602_v36 = vsel %vm1169_vm4, %v5411_v2, %v5412_v7  ;;  %v7884_v7 = vld [vmem:[#allocation68_spill] sm:$0xff] }
 0x19b   : > { %7881 = vst [vmem:[#allocation139_spill] sm:$0xff] %v6602_v36 }
 0x19c   : > { %v1558_v35 = vadd.f32 %v1546_v41, %v1500_v5  ;;  %4630 = vmatmul.msk.f32.gmra.mxu2 %vm398_vm0, %v7877_v24  ;;  %4634 = vmatmul.msk.f32.gmra.mxu3 %vm398_vm0, %v7878_v52  ;;  %v7882_v24 = vld [vmem:[#allocation51_spill] sm:$0xff] }
 0x19d   : > { %4637 = vmatmul.msk.f32.vlgmr.msrb.gmra.mxu0 %vm398_vm0, %v7879_v27  ;;  %4642 = vmatmul.msk.f32.gmra.mxu1 %vm398_vm0, %v7880_v8  ;;  %v7888_v8 = vld [vmem:[#allocation74_spill] sm:$0xff] }
 0x19e   : > { %v1615_v43 = vadd.f32 %v1603_v0, %v1558_v35  ;;  %2473 = vmatpush.msrb.mxu0 %v6591_v63  ;;  %v7885_v35 = vld [vmem:[#allocation80_spill] sm:$0xff]  ;;  %v7887_v63 = vld [vmem:[#allocation78_spill] sm:$0xff] }
 0x19f   : > { %v1434_v49 = vpop.f32.mrf.mxu2  ;;  %v1491_v51 = vpop.f32.mrf.mxu3  ;;  %v7889_v27 = vld [vmem:[#allocation62_spill] sm:$0xff] }
 0x1a0   : > { %v1444_v54 = vadd.f32 %v1434_v49, %v1387_v16  ;;  %2474 = vmatpush.msrb.mxu0 %v6602_v36 }
 0x1a2   : > { %v1501_v14 = vadd.f32 %v1491_v51, %v1444_v54  ;;  %v1549_v5 = vpop.f32.mrf.mxu0  ;;  %v1609_v41 = vpop.f32.mrf.mxu1 }
 0x1a4   : > { %v1559_v52 = vadd.f32 %v1549_v5, %v1501_v14  ;;  %4631 = vmatmul.msk.f32.gmra.mxu2 %vm398_vm0, %v7882_v24  ;;  %4635 = vmatmul.msk.f32.gmra.mxu3 %vm398_vm0, %v7883_v39  ;;  %v7886_v5 = vld [vmem:[#allocation57_spill] sm:$0xff] }
 0x1a5   : > { %4638 = vmatmul.msk.f32.gmra.mxu0 %vm398_vm0, %v7884_v7  ;;  %4643 = vmatmul.msk.f32.gmra.mxu1 %vm398_vm0, %v7885_v35 }
 0x1a6   : > { %v1616_v0 = vadd.f32 %v1606_v47, %v1559_v52 }
 0x1a7   : > { %v1437_v16 = vpop.f32.mrf.mxu2  ;;  %v1494_v2 = vpop.f32.mrf.mxu3 }
 0x1a8   : > { %v1445_v49 = vadd.f32 %v1437_v16, %v1388_v45  ;;  %v5415_v16 = vpop.permute.xlu2 %5414 }
 0x1a9   : > { %v5417_v39 = vunpack.i.h.bf16 %v5415_v16 }
 0x1aa   : > { %v1502_v51 = vadd.f32 %v1494_v2, %v1445_v49  ;;  %v1552_v54 = vpop.f32.mrf.mxu0  ;;  %v1612_v36 = vpop.f32.mrf.mxu1 }
 0x1ab   : > { %v5420_v2 = vpop.permute.xlu0 %5419 }
 0x1ac   : > { %v1560_v14 = vadd.f32 %v1552_v54, %v1502_v51  ;;  %4632 = vmatmul.msk.f32.gmra.mxu2 %vm398_vm0, %v7886_v5  ;;  %4636 = vmatmul.msk.f32.gmra.mxu3 %vm398_vm0, %v7887_v63  ;;  %v5416_v5 = vunpack.i.l.bf16 %v5415_v16  ;;  %v5422_v24 = vunpack.i.h.bf16 %v5420_v2  ;;  %v5421_v63 = vunpack.i.l.bf16 %v5420_v2  ;;  %v7896_v2 = vld [vmem:[#allocation70_spill] sm:$0xff] }
 0x1ad   : > { %4639 = vmatmul.msk.f32.gmra.mxu0 %vm398_vm0, %v7888_v8  ;;  %4644 = vmatmul.msk.f32.gmra.mxu1 %vm398_vm0, %v6132_v15  ;;  %v7904_v15 = vld [vmem:[#allocation76_spill] sm:$0xff] }
 0x1ae   : > { %v1617_v47 = vadd.f32 %v1609_v41, %v1560_v14  ;;  %v6629_v41 = vsel %vm1742_vm8, %v5416_v5, %v5417_v39  ;;  %v6638_v14 = vsel %vm1742_vm8, %v5421_v63, %v5422_v24  ;;  %v7893_v39 = vld [vmem:[#allocation91_spill] sm:$0xff]  ;;  %v7897_v24 = vld [vmem:[#allocation93_spill] sm:$0xff] }
 0x1af   : > { %v1440_v52 = vpop.f32.mrf.mxu2  ;;  %v1497_v35 = vpop.f32.mrf.mxu3  ;;  %7890 = vst [vmem:[#allocation62_spill] sm:$0xff] %v6629_v41  ;;  %v7898_v63 = vld [vmem:[#allocation85_spill] sm:$0xff] }
 0x1b0   : > { %v1446_v45 = vadd.f32 %v1440_v52, %v1389_v55  ;;  %v7891_v55 = vld [vmem:[#allocation79_spill] sm:$0xff]  ;;  %7892 = vst [vmem:[#allocation140_spill] sm:$0xff] %v6638_v14 }
 0x1b2   : > { %v1503_v49 = vadd.f32 %v1497_v35, %v1446_v45  ;;  %v1555_v51 = vpop.f32.mrf.mxu0  ;;  %v6622_v54 = vpop.f32.mrf.mxu1 }
 0x1b4   : > { %v1561_v7 = vadd.f32 %v1555_v51, %v1503_v49  ;;  %4645 = vmatmul.msk.f32.vlgmr.msrb.gmra.mxu2 %vm398_vm0, %v7889_v27  ;;  %4649 = vmatmul.msk.f32.vlgmr.msrb.gmra.mxu3 %vm398_vm0, %v6134_v1  ;;  %v7899_v49 = vld [vmem:[#allocation102_spill] sm:$0xff] }
 0x1b5   : > { %4640 = vmatmul.msk.f32.gmra.mxu0 %vm398_vm0, %v7891_v55  ;;  %4657 = vmatmul.msk.f32.vlgmr.msra.gmra.mxu1 %vm398_vm0, %v6191_v23 }
 0x1b6   : > { %v1618_v35 = vadd.f32 %v1612_v36, %v1561_v7  ;;  %2539 = vmatpush.msrb.mxu2 %v6153_v38  ;;  %2572 = vmatpush.msrb.mxu3 %v6162_v40 }
 0x1b7   : > { %v1661_v52 = vpop.f32.mrf.mxu2  ;;  %v1718_v45 = vpop.f32.mrf.mxu3  ;;  %2650 = vmatpush.msra.mxu1 %v6629_v41 }
 0x1b8   : > { %2540 = vmatpush.msrb.mxu2 %v6172_v34  ;;  %2573 = vmatpush.msrb.mxu3 %v7893_v39  ;;  %v1673_v5 = vadd.f32 %v1661_v52, %v1615_v43  ;;  %v7900_v43 = vld [vmem:[#allocation98_spill] sm:$0xff] }
 0x1b9   : > { %2651 = vmatpush.msra.mxu1 %v6638_v14 }
 0x1ba   : > { %v6644_v16 = vadd.f32 %v1718_v45, %v1673_v5  ;;  %v6646_v36 = vpop.f32.mrf.mxu0  ;;  %v1812_v7 = vpop.f32.mrf.mxu1  ;;  %v7901_v45 = vld [vmem:[#allocation99_spill] sm:$0xff] }
 0x1bb   : > { %7895 = vst [vmem:[#allocation142_spill] sm:$0xff] %v6646_v36  ;;  %v7906_v36 = vld [vmem:[#allocation94_spill] sm:$0xff] }
 0x1bc   : > { %7894 = vst [vmem:[#allocation141_spill] sm:$0xff] %v6644_v16  ;;  %4646 = vmatmul.msk.f32.gmra.mxu2 %vm398_vm0, %v7896_v2  ;;  %4650 = vmatmul.msk.f32.gmra.mxu3 %vm398_vm0, %v7897_v24  ;;  %v7905_v24 = vld [vmem:[#allocation100_spill] sm:$0xff] }
 0x1bd   : > { %4653 = vmatmul.msk.f32.vlgmr.msra.gmra.mxu0 %vm398_vm0, %v7898_v63  ;;  %4658 = vmatmul.msk.f32.gmra.mxu1 %vm398_vm0, %v7899_v49  ;;  %v7907_v49 = vld [vmem:[#allocation106_spill] sm:$0xff] }
 0x1be   : > { %2605 = vmatpush.msra.mxu0 %v7900_v43 }
 0x1bf   : > { %v1664_v51 = vpop.f32.mrf.mxu2  ;;  %v1721_v52 = vpop.f32.mrf.mxu3 }
 0x1c0   : > { %2606 = vmatpush.msra.mxu0 %v7901_v45  ;;  %v1674_v5 = vadd.f32 %v1664_v51, %v1616_v0 }
 0x1c2   : > { %v6658_v14 = vadd.f32 %v1721_v52, %v1674_v5  ;;  %v6660_v41 = vpop.f32.mrf.mxu0  ;;  %v1815_v23 = vpop.f32.mrf.mxu1 }
 0x1c3   : > { %7903 = vst [vmem:[#allocation143_spill] sm:$0xff] %v6660_v41  ;;  %v7910_v41 = vld [vmem:[#allocation81_spill] sm:$0xff] }
 0x1c4   : > { %7902 = vst [vmem:[#allocation70_spill] sm:$0xff] %v6658_v14  ;;  %4647 = vmatmul.msk.f32.gmra.mxu2 %vm398_vm0, %v7904_v15  ;;  %4651 = vmatmul.msk.f32.gmra.mxu3 %vm398_vm0, %v7905_v24  ;;  %v7911_v14 = vld [vmem:[#allocation104_spill] sm:$0xff]  ;;  %v7912_v24 = vld [vmem:[#allocation101_spill] sm:$0xff] }
 0x1c5   : > { %4654 = vmatmul.msk.f32.gmra.mxu0 %vm398_vm0, %v7906_v36  ;;  %4659 = vmatmul.msk.f32.gmra.mxu1 %vm398_vm0, %v7907_v49 }
 0x1c7   : > { %v1667_v16 = vpop.f32.mrf.mxu2  ;;  %v1724_v1 = vpop.f32.mrf.mxu3 }
 0x1c8   : > { %v1675_v0 = vadd.f32 %v1667_v16, %v1617_v47 }
 0x1ca   : > { %v6670_v51 = vadd.f32 %v1724_v1, %v1675_v0  ;;  %v6672_v52 = vpop.f32.mrf.mxu0  ;;  %v6674_v5 = vpop.f32.mrf.mxu1 }
 0x1cb   : > { %7909 = vst [vmem:[#allocation144_spill] sm:$0xff] %v6672_v52 }
 0x1cc   : > { %7908 = vst [vmem:[#allocation76_spill] sm:$0xff] %v6670_v51  ;;  %4648 = vmatmul.msk.f32.gmra.mxu2 %vm398_vm0, %v7910_v41  ;;  %4652 = vmatmul.msk.f32.gmra.mxu3 %vm398_vm0, %v7911_v14  ;;  %v7915_v51 = vld [vmem:[#allocation86_spill] sm:$0xff]  ;;  %v7916_v14 = vld [vmem:[#allocation105_spill] sm:$0xff] }
 0x1cd   : > { %4655 = vmatmul.msk.f32.gmra.mxu0 %vm398_vm0, %v7912_v24  ;;  %4660 = vmatmul.msk.f32.gmra.mxu1 %vm398_vm0, %v6286_v46  ;;  %v7918_v46 = vld [vmem:[#allocation3_spill] sm:$0xff] }
 0x1cf   : > { %v1670_v49 = vpop.f32.mrf.mxu2  ;;  %v1727_v47 = vpop.f32.mrf.mxu3 }
 0x1d0   : > { %v1676_v1 = vadd.f32 %v1670_v49, %v1618_v35 }
 0x1d2   : > { %v6684_v16 = vadd.f32 %v1727_v47, %v1676_v1  ;;  %v6686_v0 = vpop.f32.mrf.mxu0  ;;  %v1945_v52 = vpop.f32.mrf.mxu1  ;;  %v7917_v47 = vld [vmem:[#allocation2_spill] sm:$0xff] }
 0x1d3   : > { %7914 = vst [vmem:[#allocation146_spill] sm:$0xff] %v6686_v0 }
 0x1d4   : > { %7913 = vst [vmem:[#allocation145_spill] sm:$0xff] %v6684_v16  ;;  %4661 = vmatmul.msk.f32.vlgmr.msra.gmra.mxu2 %vm398_vm0, %v7915_v51  ;;  %4665 = vmatmul.msk.f32.vlgmr.msra.gmra.mxu3 %vm398_vm0, %v6282_v4  ;;  %v7919_v51 = vld [vmem:[#allocation97_spill] sm:$0xff] }
 0x1d5   : > { %4656 = vmatmul.msk.f32.gmra.mxu0 %vm398_vm0, %v7916_v14  ;;  %4673 = vmatmul.msk.f32.vlgmr.msrb.gmra.mxu1 %vm398_vm0, %v6316_v62 }
 0x1d6   : > { %2778 = vmatpush.msrb.mxu1 %v5826_v19  ;;  %2687 = vmatpush.msra.mxu2 %v5590_v25  ;;  %v7922_v25 = vld [vmem:[#allocation113_spill] sm:$0xff] }
 0x1d7   : > { %v1838_v35 = vpop.f32.mrf.mxu2  ;;  %v1867_v49 = vpop.f32.mrf.mxu3  ;;  %2716 = vmatpush.msra.mxu3 %v7917_v47 }
 0x1d8   : > { %2779 = vmatpush.msrb.mxu1 %v5853_v11  ;;  %v1839_v1 = vadd.f32 %v1838_v35, %v6622_v54  ;;  %2688 = vmatpush.msra.mxu2 %v5602_v29  ;;  %v7920_v29 = vld [vmem:[#allocation103_spill] sm:$0xff] }
 0x1d9   : > { %2717 = vmatpush.msra.mxu3 %v7918_v46 }
 0x1da   : > { %v1879_v4 = vadd.f32 %v1867_v49, %v1839_v1  ;;  %v1900_v0 = vpop.f32.mrf.mxu0  ;;  %v1948_v16 = vpop.f32.mrf.mxu1 }
 0x1dc   : > { %v1912_v62 = vadd.f32 %v1900_v0, %v1879_v4  ;;  %4662 = vmatmul.msk.f32.gmra.mxu2 %vm398_vm0, %v7919_v51  ;;  %4666 = vmatmul.msk.f32.gmra.mxu3 %vm398_vm0, %v6312_v20  ;;  %v7921_v20 = vld [vmem:[#allocation116_spill] sm:$0xff] }
 0x1dd   : > { %4669 = vmatmul.msk.f32.vlgmr.msrb.gmra.mxu0 %vm398_vm0, %v6284_v3  ;;  %4674 = vmatmul.msk.f32.gmra.mxu1 %vm398_vm0, %v6348_v28 }
 0x1de   : > { %v1957_v54 = vadd.f32 %v1945_v52, %v1912_v62  ;;  %2745 = vmatpush.msrb.mxu0 %v5760_v26  ;;  %v7923_v62 = vld [vmem:[#allocation122_spill] sm:$0xff] }
 0x1df   : > { %v1841_v46 = vpop.f32.mrf.mxu2  ;;  %v1870_v35 = vpop.f32.mrf.mxu3 }
 0x1e0   : > { %2746 = vmatpush.msrb.mxu0 %v5790_v57  ;;  %v1842_v4 = vadd.f32 %v1841_v46, %v1812_v7  ;;  %v7924_v46 = vld [vmem:[#allocation4_spill] sm:$0xff] }
 0x1e1   : > { %5424 = vrot.lane.b32.xlu1 %v7924_v46, %s5499_s4 }
 0x1e2   : > { %v1880_v0 = vadd.f32 %v1870_v35, %v1842_v4  ;;  %v1903_v49 = vpop.f32.mrf.mxu0  ;;  %v1951_v47 = vpop.f32.mrf.mxu1 }
 0x1e4   : > { %v1913_v1 = vadd.f32 %v1903_v49, %v1880_v0  ;;  %4663 = vmatmul.msk.f32.gmra.mxu2 %vm398_vm0, %v7920_v29  ;;  %4667 = vmatmul.msk.f32.gmra.mxu3 %vm398_vm0, %v7921_v20  ;;  %v7925_v29 = vld [vmem:[#allocation107_spill] sm:$0xff]  ;;  %v7926_v20 = vld [vmem:[#allocation120_spill] sm:$0xff] }
 0x1e5   : > { %4670 = vmatmul.msk.f32.gmra.mxu0 %vm398_vm0, %v7922_v25  ;;  %4675 = vmatmul.msk.f32.gmra.mxu1 %vm398_vm0, %v7923_v62  ;;  %v7927_v25 = vld [vmem:[#allocation117_spill] sm:$0xff] }
 0x1e6   : > { %v1958_v52 = vadd.f32 %v1948_v16, %v1913_v1 }
 0x1e7   : > { %v1844_v28 = vpop.f32.mrf.mxu2  ;;  %v1873_v51 = vpop.f32.mrf.mxu3 }
 0x1e8   : > { %v1845_v7 = vadd.f32 %v1844_v28, %v1815_v23  ;;  %v7928_v28 = vld [vmem:[#allocation7_spill] sm:$0xff] }
 0x1e9   : > { %5434 = vrot.lane.b32.xlu0 %v7928_v28, %s5499_s4 }
 0x1ea   : > { %v1881_v35 = vadd.f32 %v1873_v51, %v1845_v7  ;;  %v1906_v4 = vpop.f32.mrf.mxu0  ;;  %v1954_v0 = vpop.f32.mrf.mxu1  ;;  %v7929_v7 = vld [vmem:[#allocation9_spill] sm:$0xff] }
 0x1eb   : > { %5439 = vrot.lane.b32.xlu1 %v7929_v7, %s5499_s4 }
 0x1ec   : > { %v1914_v49 = vadd.f32 %v1906_v4, %v1881_v35  ;;  %4664 = vmatmul.msk.f32.gmra.mxu2 %vm398_vm0, %v7925_v29  ;;  %4668 = vmatmul.msk.f32.gmra.mxu3 %vm398_vm0, %v7926_v20  ;;  %v7930_v29 = vld [vmem:[#allocation111_spill] sm:$0xff] }
 0x1ed   : > { %4671 = vmatmul.msk.f32.gmra.mxu0 %vm398_vm0, %v7927_v25  ;;  %4676 = vmatmul.msk.f32.gmra.mxu1 %vm398_vm0, %v6397_v31  ;;  %v7935_v31 = vld [vmem:[#allocation115_spill] sm:$0xff] }
 0x1ee   : > { %v1959_v23 = vadd.f32 %v1951_v47, %v1914_v49  ;;  %v7931_v47 = vld [vmem:[#allocation121_spill] sm:$0xff]  ;;  %v7932_v49 = vld [vmem:[#allocation24_spill] sm:$0xff] }
 0x1ef   : > { %v1847_v51 = vpop.f32.mrf.mxu2  ;;  %v1876_v16 = vpop.f32.mrf.mxu3 }
 0x1f0   : > { %v1848_v1 = vadd.f32 %v1847_v51, %v6674_v5 }
 0x1f1   : > { %5449 = vrot.lane.b32.xlu0 %v7924_v46, %s5500_s5 }
 0x1f2   : > { %v1882_v35 = vadd.f32 %v1876_v16, %v1848_v1  ;;  %v1909_v4 = vpop.f32.mrf.mxu0  ;;  %v2077_v62 = vpop.f32.mrf.mxu1  ;;  %v7933_v1 = vld [vmem:[#allocation31_spill] sm:$0xff] }
 0x1f4   : > { %v1915_v20 = vadd.f32 %v1909_v4, %v1882_v35  ;;  %4677 = vmatmul.msk.f32.vlgmr.msrb.gmra.mxu2 %vm398_vm0, %v7930_v29  ;;  %4681 = vmatmul.msk.f32.vlgmr.msrb.gmra.mxu3 %vm398_vm0, %v6393_v13  ;;  %v7936_v13 = vld [vmem:[#allocation119_spill] sm:$0xff] }
 0x1f5   : > { %4672 = vmatmul.msk.f32.gmra.mxu0 %vm398_vm0, %v7931_v47  ;;  %4689 = vmatmul.msk.f32.vlgmr.msra.gmra.mxu1 %vm398_vm0, %v6422_v59 }
 0x1f6   : > { %v1960_v5 = vadd.f32 %v1954_v0, %v1915_v20  ;;  %2811 = vmatpush.msrb.mxu2 %v5850_v6  ;;  %2844 = vmatpush.msrb.mxu3 %v7932_v49  ;;  %v7934_v20 = vld [vmem:[#allocation5_spill] sm:$0xff] }
 0x1f7   : > { %2910 = vmatpush.msra.mxu1 %v7833_v10  ;;  %v1978_v51 = vpop.f32.mrf.mxu2  ;;  %v2011_v16 = vpop.f32.mrf.mxu3  ;;  %5454 = vrot.lane.b32.xlu1 %v7934_v20, %s5501_s8 }
 0x1f8   : > { %2812 = vmatpush.msrb.mxu2 %v5881_v17  ;;  %2845 = vmatpush.msrb.mxu3 %v7933_v1  ;;  %v1990_v35 = vadd.f32 %v1978_v51, %v1957_v54 }
 0x1f9   : > { %2911 = vmatpush.msra.mxu1 %v7834_v37  ;;  %5464 = vrot.lane.b32.xlu0 %v7928_v28, %s5500_s5 }
 0x1fa   : > { %v2023_v0 = vadd.f32 %v2011_v16, %v1990_v35  ;;  %v2044_v4 = vpop.f32.mrf.mxu0  ;;  %v2080_v49 = vpop.f32.mrf.mxu1  ;;  %5429 = vrot.lane.b32.xlu2 %v7934_v20, %s5499_s4 }
 0x1fc   : > { %v2056_v59 = vadd.f32 %v2044_v4, %v2023_v0  ;;  %4678 = vmatmul.msk.f32.gmra.mxu2 %vm398_vm0, %v7935_v31  ;;  %4682 = vmatmul.msk.f32.gmra.mxu3 %vm398_vm0, %v6418_v53 }
 0x1fd   : > { %4685 = vmatmul.msk.f32.vlgmr.msra.gmra.mxu0 %vm398_vm0, %v6395_v60  ;;  %4690 = vmatmul.msk.f32.gmra.mxu1 %vm398_vm0, %v6450_v48  ;;  %v7939_v48 = vld [vmem:[#allocation130_spill] sm:$0xff] }
 0x1fe   : > { %v2089_v54 = vadd.f32 %v2077_v62, %v2056_v59  ;;  %2877 = vmatpush.msra.mxu0 %v5793_v58 }
 0x1ff   : > { %v1981_v51 = vpop.f32.mrf.mxu2  ;;  %v2014_v16 = vpop.f32.mrf.mxu3  ;;  %5469 = vrot.lane.b32.xlu1 %v7929_v7, %s5500_s5  ;;  %v7938_v7 = vld [vmem:[#allocation132_spill] sm:$0xff] }
 0x200   : > { %2878 = vmatpush.msra.mxu0 %v5837_v32  ;;  %v1991_v1 = vadd.f32 %v1981_v51, %v1958_v52 }
 0x202   : > { %v2024_v35 = vadd.f32 %v2014_v16, %v1991_v1  ;;  %v2047_v0 = vpop.f32.mrf.mxu0  ;;  %v2083_v4 = vpop.f32.mrf.mxu1  ;;  %5444 = vrot.lane.b32.xlu2 %v7924_v46, %s5501_s8  ;;  %v7969_v46 = vld [vmem:[#allocation42_spill] sm:$0xff] }
 0x204   : > { %v2057_v53 = vadd.f32 %v2047_v0, %v2024_v35  ;;  %4679 = vmatmul.msk.f32.gmra.mxu2 %vm398_vm0, %v7936_v13  ;;  %4683 = vmatmul.msk.f32.gmra.mxu3 %vm398_vm0, %v6446_v61  ;;  %v7937_v0 = vld [vmem:[#allocation123_spill] sm:$0xff] }
 0x205   : > { %4686 = vmatmul.msk.f32.gmra.mxu0 %vm398_vm0, %v6420_v30  ;;  %4691 = vmatmul.msk.f32.gmra.mxu1 %vm398_vm0, %v6468_v42 }
 0x206   : > { %v2090_v59 = vadd.f32 %v2080_v49, %v2057_v53 }
 0x207   : > { %v1984_v62 = vpop.f32.mrf.mxu2  ;;  %v2017_v52 = vpop.f32.mrf.mxu3 }
 0x208   : > { %v1992_v51 = vadd.f32 %v1984_v62, %v1959_v23 }
 0x20a   : > { %v2025_v16 = vadd.f32 %v2017_v52, %v1992_v51  ;;  %v2050_v1 = vpop.f32.mrf.mxu0  ;;  %v2086_v28 = vpop.f32.mrf.mxu1  ;;  %5459 = vrot.lane.b32.xlu2 %v7934_v20, %s5500_s5 }
 0x20c   : > { %v2058_v35 = vadd.f32 %v2050_v1, %v2025_v16  ;;  %4680 = vmatmul.msk.f32.gmra.mxu2 %vm398_vm0, %v7937_v0  ;;  %4684 = vmatmul.msk.f32.gmra.mxu3 %vm398_vm0, %v7938_v7  ;;  %v7940_v1 = vld [vmem:[#allocation12_spill] sm:$0xff]  ;;  %v7941_v7 = vld [vmem:[#allocation133_spill] sm:$0xff] }
 0x20d   : > { %4687 = vmatmul.msk.f32.gmra.mxu0 %vm398_vm0, %v7939_v48  ;;  %4692 = vmatmul.msk.f32.gmra.mxu1 %vm398_vm0, %v6479_v18  ;;  %v7945_v18 = vld [vmem:[#allocation22_spill] sm:$0xff] }
 0x20e   : > { %v2091_v53 = vadd.f32 %v2083_v4, %v2058_v35 }
 0x20f   : > { %v1987_v49 = vpop.f32.mrf.mxu2  ;;  %v2020_v42 = vpop.f32.mrf.mxu3 }
 0x210   : > { %v1993_v23 = vadd.f32 %v1987_v49, %v1960_v5  ;;  %v7942_v49 = vld [vmem:[#allocation71_spill] sm:$0xff] }
 0x212   : > { %v2026_v62 = vadd.f32 %v2020_v42, %v1993_v23  ;;  %v2053_v52 = vpop.f32.mrf.mxu0  ;;  %v2221_v51 = vpop.f32.mrf.mxu1 }
 0x214   : > { %v2059_v16 = vadd.f32 %v2053_v52, %v2026_v62  ;;  %4693 = vmatmul.msk.f32.vlgmr.msra.gmra.mxu2 %vm398_vm0, %v7940_v1  ;;  %4697 = vmatmul.msk.f32.vlgmr.msra.gmra.mxu3 %vm398_vm0, %v5634_v33  ;;  %v7946_v33 = vld [vmem:[#allocation26_spill] sm:$0xff] }
 0x215   : > { %4688 = vmatmul.msk.f32.gmra.mxu0 %vm398_vm0, %v7941_v7  ;;  %4705 = vmatmul.msk.f32.vlgmr.msrb.gmra.mxu1 %vm398_vm0, %v5751_v9 }
 0x216   : > { %v2092_v4 = vadd.f32 %v2086_v28, %v2059_v16  ;;  %2943 = vmatpush.msra.mxu2 %v5949_v21  ;;  %2976 = vmatpush.msra.mxu3 %v7848_v56  ;;  %v7943_v28 = vld [vmem:[#allocation13_spill] sm:$0xff]  ;;  %v7944_v16 = vld [vmem:[#allocation11_spill] sm:$0xff] }
 0x217   : > { %3042 = vmatpush.msrb.mxu1 %v7857_v44  ;;  %v2122_v42 = vpop.f32.mrf.mxu2  ;;  %v2155_v5 = vpop.f32.mrf.mxu3  ;;  %v7949_v44 = vld [vmem:[#allocation15_spill] sm:$0xff]  ;;  %v7951_v56 = vld [vmem:[#allocation25_spill] sm:$0xff] }
 0x218   : > { %2944 = vmatpush.msra.mxu2 %v5953_v50  ;;  %2977 = vmatpush.msra.mxu3 %v7851_v22  ;;  %v2134_v35 = vadd.f32 %v2122_v42, %v2089_v54  ;;  %v7947_v54 = vld [vmem:[#allocation47_spill] sm:$0xff] }
 0x219   : > { %3043 = vmatpush.msrb.mxu1 %v7942_v49 }
 0x21a   : > { %v2167_v23 = vadd.f32 %v2155_v5, %v2134_v35  ;;  %v2188_v62 = vpop.f32.mrf.mxu0  ;;  %v2224_v52 = vpop.f32.mrf.mxu1  ;;  %v7948_v35 = vld [vmem:[#allocation53_spill] sm:$0xff] }
 0x21c   : > { %v2200_v9 = vadd.f32 %v2188_v62, %v2167_v23  ;;  %4694 = vmatmul.msk.f32.gmra.mxu2 %vm398_vm0, %v7943_v28  ;;  %4698 = vmatmul.msk.f32.gmra.mxu3 %vm398_vm0, %v7944_v16  ;;  %v7950_v16 = vld [vmem:[#allocation14_spill] sm:$0xff] }
 0x21d   : > { %4701 = vmatmul.msk.f32.vlgmr.msrb.gmra.mxu0 %vm398_vm0, %v7945_v18  ;;  %4706 = vmatmul.msk.f32.gmra.mxu1 %vm398_vm0, %v7946_v33  ;;  %v7954_v33 = vld [vmem:[#allocation16_spill] sm:$0xff] }
 0x21e   : > { %v2233_v22 = vadd.f32 %v2221_v51, %v2200_v9  ;;  %3009 = vmatpush.msrb.mxu0 %v7947_v54  ;;  %v7952_v9 = vld [vmem:[#allocation29_spill] sm:$0xff] }
 0x21f   : > { %v2125_v42 = vpop.f32.mrf.mxu2  ;;  %v2158_v5 = vpop.f32.mrf.mxu3 }
 0x220   : > { %3010 = vmatpush.msrb.mxu0 %v7948_v35  ;;  %v2135_v23 = vadd.f32 %v2125_v42, %v2090_v59 }
 0x222   : > { %v2168_v62 = vadd.f32 %v2158_v5, %v2135_v23  ;;  %v2191_v49 = vpop.f32.mrf.mxu0  ;;  %v2227_v28 = vpop.f32.mrf.mxu1 }
 0x224   : > { %v2201_v50 = vadd.f32 %v2191_v49, %v2168_v62  ;;  %4695 = vmatmul.msk.f32.gmra.mxu2 %vm398_vm0, %v7949_v44  ;;  %4699 = vmatmul.msk.f32.gmra.mxu3 %vm398_vm0, %v7950_v16  ;;  %v7953_v62 = vld [vmem:[#allocation17_spill] sm:$0xff]  ;;  %v7955_v16 = vld [vmem:[#allocation28_spill] sm:$0xff] }
 0x225   : > { %4702 = vmatmul.msk.f32.gmra.mxu0 %vm398_vm0, %v7951_v56  ;;  %4707 = vmatmul.msk.f32.gmra.mxu1 %vm398_vm0, %v7952_v9 }
 0x226   : > { %v2234_v51 = vadd.f32 %v2224_v52, %v2201_v50  ;;  %v7956_v50 = vld [vmem:[#allocation33_spill] sm:$0xff] }
 0x227   : > { %v2128_v54 = vpop.f32.mrf.mxu2  ;;  %v2161_v35 = vpop.f32.mrf.mxu3 }
 0x228   : > { %v2136_v59 = vadd.f32 %v2128_v54, %v2091_v53 }
 0x22a   : > { %v2169_v49 = vadd.f32 %v2161_v35, %v2136_v59  ;;  %v2194_v42 = vpop.f32.mrf.mxu0  ;;  %v2230_v5 = vpop.f32.mrf.mxu1 }
 0x22c   : > { %v2202_v23 = vadd.f32 %v2194_v42, %v2169_v49  ;;  %4696 = vmatmul.msk.f32.gmra.mxu2 %vm398_vm0, %v7953_v62  ;;  %4700 = vmatmul.msk.f32.gmra.mxu3 %vm398_vm0, %v7954_v33  ;;  %v7957_v42 = vld [vmem:[#allocation27_spill] sm:$0xff]  ;;  %v7958_v62 = vld [vmem:[#allocation18_spill] sm:$0xff]  ;;  %v7959_v33 = vld [vmem:[#allocation32_spill] sm:$0xff] }
 0x22d   : > { %4703 = vmatmul.msk.f32.gmra.mxu0 %vm398_vm0, %v7955_v16  ;;  %4708 = vmatmul.msk.f32.gmra.mxu1 %vm398_vm0, %v7956_v50  ;;  %v7960_v16 = vld [vmem:[#allocation36_spill] sm:$0xff] }
 0x22e   : > { %v2235_v53 = vadd.f32 %v2227_v28, %v2202_v23  ;;  %v7961_v23 = vld [vmem:[#allocation58_spill] sm:$0xff]  ;;  %v7965_v50 = vld [vmem:[#allocation96_spill] sm:$0xff] }
 0x22f   : > { %v2131_v52 = vpop.f32.mrf.mxu2  ;;  %v2164_v54 = vpop.f32.mrf.mxu3 }
 0x230   : > { %v2137_v9 = vadd.f32 %v2131_v52, %v2092_v4  ;;  %v7962_v4 = vld [vmem:[#allocation63_spill] sm:$0xff] }
 0x232   : > { %v2170_v35 = vadd.f32 %v2164_v54, %v2137_v9  ;;  %v2197_v59 = vpop.f32.mrf.mxu0  ;;  %v2365_v44 = vpop.f32.mrf.mxu1  ;;  %v7963_v9 = vld [vmem:[#allocation92_spill] sm:$0xff] }
 0x234   : > { %v2203_v49 = vadd.f32 %v2197_v59, %v2170_v35  ;;  %4709 = vmatmul.msk.f32.vlgmr.msrb.gmra.mxu2 %vm398_vm0, %v7957_v42  ;;  %4713 = vmatmul.msk.f32.vlgmr.msrb.gmra.mxu3 %vm398_vm0, %v7958_v62  ;;  %v7964_v35 = vld [vmem:[#allocation72_spill] sm:$0xff]  ;;  %v7996_v42 = vld [vmem:[#allocation69_spill] sm:$0xff] }
 0x235   : > { %4704 = vmatmul.msk.f32.gmra.mxu0 %vm398_vm0, %v7959_v33  ;;  %4721 = vmatmul.msk.f32.vlgmr.msra.gmra.mxu1 %vm398_vm0, %v7960_v16 }
 0x236   : > { %v2236_v28 = vadd.f32 %v2230_v5, %v2203_v49  ;;  %3075 = vmatpush.msrb.mxu2 %v7961_v23  ;;  %3108 = vmatpush.msrb.mxu3 %v7962_v4  ;;  %v7966_v23 = vld [vmem:[#allocation30_spill] sm:$0xff]  ;;  %v7968_v4 = vld [vmem:[#allocation35_spill] sm:$0xff] }
 0x237   : > { %3174 = vmatpush.msra.mxu1 %v7963_v9  ;;  %v2254_v52 = vpop.f32.mrf.mxu2  ;;  %v2299_v54 = vpop.f32.mrf.mxu3  ;;  %v7967_v9 = vld [vmem:[#allocation19_spill] sm:$0xff] }
 0x238   : > { %3076 = vmatpush.msrb.mxu2 %v7964_v35  ;;  %3109 = vmatpush.msrb.mxu3 %v7874_v12  ;;  %v2266_v59 = vadd.f32 %v2254_v52, %v2233_v22  ;;  %v7970_v22 = vld [vmem:[#allocation66_spill] sm:$0xff] }
 0x239   : > { %3175 = vmatpush.msra.mxu1 %v7965_v50  ;;  %v7972_v35 = vld [vmem:[#allocation34_spill] sm:$0xff] }
 0x23a   : > { %v2311_v16 = vadd.f32 %v2299_v54, %v2266_v59  ;;  %v2332_v5 = vpop.f32.mrf.mxu0  ;;  %v2368_v49 = vpop.f32.mrf.mxu1 }
 0x23c   : > { %v2344_v62 = vadd.f32 %v2332_v5, %v2311_v16  ;;  %4710 = vmatmul.msk.f32.gmra.mxu2 %vm398_vm0, %v7966_v23  ;;  %4714 = vmatmul.msk.f32.gmra.mxu3 %vm398_vm0, %v7967_v9  ;;  %v7971_v16 = vld [vmem:[#allocation77_spill] sm:$0xff] }
 0x23d   : > { %4717 = vmatmul.msk.f32.vlgmr.msra.gmra.mxu0 %vm398_vm0, %v7968_v4  ;;  %4722 = vmatmul.msk.f32.gmra.mxu1 %vm398_vm0, %v7969_v46  ;;  %v7973_v4 = vld [vmem:[#allocation20_spill] sm:$0xff] }
 0x23e   : > { %v2377_v12 = vadd.f32 %v2365_v44, %v2344_v62  ;;  %3141 = vmatpush.msra.mxu0 %v7970_v22  ;;  %v7974_v44 = vld [vmem:[#allocation41_spill] sm:$0xff]  ;;  %v7979_v22 = vld [vmem:[#allocation55_spill] sm:$0xff] }
 0x23f   : > { %v2257_v50 = vpop.f32.mrf.mxu2  ;;  %v2302_v52 = vpop.f32.mrf.mxu3  ;;  %v7975_v62 = vld [vmem:[#allocation49_spill] sm:$0xff] }
 0x240   : > { %3142 = vmatpush.msra.mxu0 %v7971_v16  ;;  %v2267_v54 = vadd.f32 %v2257_v50, %v2234_v51 }
 0x242   : > { %v2312_v59 = vadd.f32 %v2302_v52, %v2267_v54  ;;  %v2335_v5 = vpop.f32.mrf.mxu0  ;;  %v2371_v9 = vpop.f32.mrf.mxu1 }
 0x244   : > { %v2345_v23 = vadd.f32 %v2335_v5, %v2312_v59  ;;  %4711 = vmatmul.msk.f32.gmra.mxu2 %vm398_vm0, %v7972_v35  ;;  %4715 = vmatmul.msk.f32.gmra.mxu3 %vm398_vm0, %v7973_v4  ;;  %v7976_v5 = vld [vmem:[#allocation37_spill] sm:$0xff]  ;;  %v7978_v4 = vld [vmem:[#allocation48_spill] sm:$0xff] }
 0x245   : > { %4718 = vmatmul.msk.f32.gmra.mxu0 %vm398_vm0, %v7974_v44  ;;  %4723 = vmatmul.msk.f32.gmra.mxu1 %vm398_vm0, %v7975_v62  ;;  %v7977_v35 = vld [vmem:[#allocation21_spill] sm:$0xff] }
 0x246   : > { %v2378_v20 = vadd.f32 %v2368_v49, %v2345_v23 }
 0x247   : > { %v2260_v46 = vpop.f32.mrf.mxu2  ;;  %v2305_v16 = vpop.f32.mrf.mxu3 }
 0x248   : > { %v2268_v51 = vadd.f32 %v2260_v46, %v2235_v53 }
 0x24a   : > { %v2313_v50 = vadd.f32 %v2305_v16, %v2268_v51  ;;  %v2338_v52 = vpop.f32.mrf.mxu0  ;;  %v2374_v54 = vpop.f32.mrf.mxu1 }
 0x24c   : > { %v2346_v59 = vadd.f32 %v2338_v52, %v2313_v50  ;;  %4712 = vmatmul.msk.f32.gmra.mxu2 %vm398_vm0, %v7976_v5  ;;  %4716 = vmatmul.msk.f32.gmra.mxu3 %vm398_vm0, %v7977_v35  ;;  %v7980_v52 = vld [vmem:[#allocation43_spill] sm:$0xff]  ;;  %v7981_v5 = vld [vmem:[#allocation38_spill] sm:$0xff] }
 0x24d   : > { %4719 = vmatmul.msk.f32.gmra.mxu0 %vm398_vm0, %v7978_v4  ;;  %4724 = vmatmul.msk.f32.gmra.mxu1 %vm398_vm0, %v7979_v22  ;;  %v7982_v35 = vld [vmem:[#allocation54_spill] sm:$0xff]  ;;  %v7983_v4 = vld [vmem:[#allocation60_spill] sm:$0xff] }
 0x24e   : > { %v2379_v23 = vadd.f32 %v2371_v9, %v2346_v59  ;;  %v7984_v59 = vld [vmem:[#allocation82_spill] sm:$0xff] }
 0x24f   : > { %v2263_v49 = vpop.f32.mrf.mxu2  ;;  %v2308_v62 = vpop.f32.mrf.mxu3 }
 0x250   : > { %v2269_v53 = vadd.f32 %v2263_v49, %v2236_v28  ;;  %v7985_v49 = vld [vmem:[#allocation87_spill] sm:$0xff] }
 0x252   : > { %v2314_v46 = vadd.f32 %v2308_v62, %v2269_v53  ;;  %v2341_v16 = vpop.f32.mrf.mxu0  ;;  %v2509_v51 = vpop.f32.mrf.mxu1 }
 0x254   : > { %v2347_v50 = vadd.f32 %v2341_v16, %v2314_v46  ;;  %4725 = vmatmul.msk.f32.vlgmr.msra.gmra.mxu2 %vm398_vm0, %v7980_v52  ;;  %4729 = vmatmul.msk.f32.vlgmr.msra.gmra.mxu3 %vm398_vm0, %v7981_v5  ;;  %v7987_v5 = vld [vmem:[#allocation44_spill] sm:$0xff] }
 0x255   : > { %4720 = vmatmul.msk.f32.gmra.mxu0 %vm398_vm0, %v7982_v35  ;;  %4737 = vmatmul.msk.f32.vlgmr.msrb.gmra.mxu1 %vm398_vm0, %v7983_v4  ;;  %v6884_v4 = vpop.permute.xlu1 %5424 }
 0x256   : > { %v2380_v9 = vadd.f32 %v2374_v54, %v2347_v50  ;;  %3207 = vmatpush.msra.mxu2 %v7984_v59  ;;  %3240 = vmatpush.msra.mxu3 %v6153_v38  ;;  %v7986_v50 = vld [vmem:[#allocation50_spill] sm:$0xff]  ;;  %v7990_v38 = vld [vmem:[#allocation56_spill] sm:$0xff]  ;;  %v7991_v59 = vld [vmem:[#allocation51_spill] sm:$0xff]  ;;  %v5426_v44 = vunpack.i.l.bf16 %v6884_v4 }
 0x257   : > { %3306 = vmatpush.msrb.mxu1 %v7900_v43  ;;  %v2398_v28 = vpop.f32.mrf.mxu2  ;;  %v2431_v62 = vpop.f32.mrf.mxu3  ;;  %v7988_v43 = vld [vmem:[#allocation59_spill] sm:$0xff] }
 0x258   : > { %3208 = vmatpush.msra.mxu2 %v7985_v49  ;;  %3241 = vmatpush.msra.mxu3 %v6172_v34  ;;  %v2410_v53 = vadd.f32 %v2398_v28, %v2377_v12  ;;  %v7989_v49 = vld [vmem:[#allocation68_spill] sm:$0xff] }
 0x259   : > { %3307 = vmatpush.msrb.mxu1 %v7901_v45 }
 0x25a   : > { %v2443_v46 = vadd.f32 %v2431_v62, %v2410_v53  ;;  %v2476_v16 = vpop.f32.mrf.mxu0  ;;  %v2512_v22 = vpop.f32.mrf.mxu1 }
 0x25c   : > { %v2488_v54 = vadd.f32 %v2476_v16, %v2443_v46  ;;  %4726 = vmatmul.msk.f32.gmra.mxu2 %vm398_vm0, %v7986_v50  ;;  %4730 = vmatmul.msk.f32.gmra.mxu3 %vm398_vm0, %v7987_v5  ;;  %v5435_v46 = vpop.permute.xlu0 %5434 }
 0x25d   : > { %4733 = vmatmul.msk.f32.vlgmr.msrb.gmra.mxu0 %vm398_vm0, %v7988_v43  ;;  %4738 = vmatmul.msk.f32.gmra.mxu1 %vm398_vm0, %v7989_v49  ;;  %v5440_v5 = vpop.permute.xlu1 %5439 }
 0x25e   : > { %v6894_v12 = vadd.f32 %v2509_v51, %v2488_v54  ;;  %3273 = vmatpush.msrb.mxu0 %v6162_v40  ;;  %v7992_v51 = vld [vmem:[#allocation67_spill] sm:$0xff]  ;;  %v7994_v40 = vld [vmem:[#allocation57_spill] sm:$0xff] }
 0x25f   : > { %v2401_v28 = vpop.f32.mrf.mxu2  ;;  %v2434_v62 = vpop.f32.mrf.mxu3 }
 0x260   : > { %3274 = vmatpush.msrb.mxu0 %v7893_v39  ;;  %v2411_v53 = vadd.f32 %v2401_v28, %v2378_v20 }
 0x262   : > { %v2444_v16 = vadd.f32 %v2434_v62, %v2411_v53  ;;  %v2479_v50 = vpop.f32.mrf.mxu0  ;;  %v2515_v45 = vpop.f32.mrf.mxu1 }
 0x264   : > { %v2489_v34 = vadd.f32 %v2479_v50, %v2444_v16  ;;  %4727 = vmatmul.msk.f32.gmra.mxu2 %vm398_vm0, %v7990_v38  ;;  %4731 = vmatmul.msk.f32.gmra.mxu3 %vm398_vm0, %v7991_v59  ;;  %v6908_v53 = vpop.permute.xlu0 %5449  ;;  %v7993_v59 = vld [vmem:[#allocation61_spill] sm:$0xff] }
 0x265   : > { %4734 = vmatmul.msk.f32.gmra.mxu0 %vm398_vm0, %v7992_v51  ;;  %4739 = vmatmul.msk.f32.gmra.mxu1 %vm398_vm0, %v7888_v8  ;;  %v7995_v8 = vld [vmem:[#allocation73_spill] sm:$0xff] }
 0x266   : > { %v6906_v54 = vadd.f32 %v2512_v22, %v2489_v34 }
 0x267   : > { %v2404_v20 = vpop.f32.mrf.mxu2  ;;  %v2437_v28 = vpop.f32.mrf.mxu3 }
 0x268   : > { %v2412_v62 = vadd.f32 %v2404_v20, %v2379_v23  ;;  %v5437_v20 = vunpack.i.h.bf16 %v5435_v46 }
 0x269   : > { %v6910_v38 = vpop.permute.xlu1 %5454 }
 0x26a   : > { %v2445_v50 = vadd.f32 %v2437_v28, %v2412_v62  ;;  %v2482_v16 = vpop.f32.mrf.mxu0  ;;  %v2518_v49 = vpop.f32.mrf.mxu1  ;;  %v5436_v28 = vunpack.i.l.bf16 %v5435_v46 }
 0x26c   : > { %v2490_v39 = vadd.f32 %v2482_v16, %v2445_v50  ;;  %4728 = vmatmul.msk.f32.gmra.mxu2 %vm398_vm0, %v7993_v59  ;;  %4732 = vmatmul.msk.f32.gmra.mxu3 %vm398_vm0, %v7994_v40  ;;  %v5442_v50 = vunpack.i.h.bf16 %v5440_v5  ;;  %v5441_v16 = vunpack.i.l.bf16 %v5440_v5  ;;  %v5465_v51 = vpop.permute.xlu0 %5464 }
 0x26d   : > { %4735 = vmatmul.msk.f32.gmra.mxu0 %vm398_vm0, %v7995_v8  ;;  %4740 = vmatmul.msk.f32.gmra.mxu1 %vm398_vm0, %v7891_v55  ;;  %v5467_v40 = vunpack.i.h.bf16 %v5465_v51  ;;  %v5466_v35 = vunpack.i.l.bf16 %v5465_v51  ;;  %v5427_v8 = vunpack.i.h.bf16 %v6884_v4  ;;  %v7997_v51 = vld [vmem:[#allocation78_spill] sm:$0xff] }
 0x26e   : > { %v6920_v34 = vadd.f32 %v2515_v45, %v2490_v39  ;;  %v6925_v39 = vsel %vm1512_vm6, %v5436_v28, %v5437_v20  ;;  %v6939_v4 = vsel %vm1512_vm6, %v5441_v16, %v5442_v50  ;;  %v7999_v50 = vld [vmem:[#allocation84_spill] sm:$0xff]  ;;  %v8001_v16 = vld [vmem:[#allocation142_spill] sm:$0xff] }
 0x26f   : > { %v2407_v22 = vpop.f32.mrf.mxu2  ;;  %v2440_v23 = vpop.f32.mrf.mxu3  ;;  %v6932_v46 = vsel %vm1627_vm7, %v5466_v35, %v5467_v40 }
 0x270   : > { %v2413_v62 = vadd.f32 %v2407_v22, %v2380_v9  ;;  %v3334_v22 = vsel %vm1512_vm6, %v5426_v44, %v5427_v8 }
 0x271   : > { %v5470_v55 = vpop.permute.xlu1 %5469 }
 0x272   : > { %v2446_v59 = vadd.f32 %v2440_v23, %v2413_v62  ;;  %v2485_v43 = vpop.f32.mrf.mxu0  ;;  %v2653_v52 = vpop.f32.mrf.mxu1  ;;  %v5472_v5 = vunpack.i.h.bf16 %v5470_v55  ;;  %v5471_v9 = vunpack.i.l.bf16 %v5470_v55  ;;  %v7998_v62 = vld [vmem:[#allocation75_spill] sm:$0xff] }
 0x274   : > { %v2491_v45 = vadd.f32 %v2485_v43, %v2446_v59  ;;  %4741 = vmatmul.msk.f32.vlgmr.msrb.gmra.mxu2 %vm398_vm0, %v7996_v42  ;;  %4745 = vmatmul.msk.f32.vlgmr.msrb.gmra.mxu3 %vm398_vm0, %v7889_v27  ;;  %v6944_v59 = vsel %vm1627_vm7, %v5471_v9, %v5472_v5 }
 0x275   : > { %4736 = vmatmul.msk.f32.gmra.mxu0 %vm398_vm0, %v7997_v51  ;;  %4753 = vmatmul.msk.f32.vlgmr.msra.gmra.mxu1 %vm398_vm0, %v7898_v63  ;;  %v8004_v63 = vld [vmem:[#allocation80_spill] sm:$0xff] }
 0x276   : > { %v2524_v43 = vadd.f32 %v2518_v49, %v2491_v45  ;;  %3396 = vmatpush.msrb.mxu3 %v6925_v39  ;;  %3486 = vmatpush.msra.mxu1 %v6932_v46 }
 0x277   : > { %v2542_v55 = vpop.f32.mrf.mxu2  ;;  %v2575_v40 = vpop.f32.mrf.mxu3  ;;  %3351 = vmatpush.msrb.mxu2 %v3334_v22 }
 0x278   : > { %v2554_v35 = vadd.f32 %v2542_v55, %v6894_v12  ;;  %3397 = vmatpush.msrb.mxu3 %v6939_v4  ;;  %3487 = vmatpush.msra.mxu1 %v6944_v59  ;;  %v8000_v12 = vld [vmem:[#allocation141_spill] sm:$0xff] }
 0x279   : > { %v6960_v8 = vadd.f32 %v8001_v16, %v8000_v12  ;;  %v8005_v12 = vld [vmem:[#allocation93_spill] sm:$0xff]  ;;  %v8007_v16 = vld [vmem:[#allocation143_spill] sm:$0xff] }
 0x27a   : > { %v2587_v23 = vadd.f32 %v2575_v40, %v2554_v35  ;;  %v2608_v49 = vpop.f32.mrf.mxu0  ;;  %v2656_v20 = vpop.f32.mrf.mxu1 }
 0x27b   : > { %8002 = vst [vmem:[#allocation2_spill] sm:$0xff] %v6960_v8 }
 0x27c   : > { %v2620_v28 = vadd.f32 %v2608_v49, %v2587_v23  ;;  %4742 = vmatmul.msk.f32.gmra.mxu2 %vm398_vm0, %v7998_v62  ;;  %4746 = vmatmul.msk.f32.gmra.mxu3 %vm398_vm0, %v7896_v2  ;;  %v5430_v23 = vpop.permute.xlu2 %5429 }
 0x27d   : > { %4749 = vmatmul.msk.f32.vlgmr.msra.gmra.mxu0 %vm398_vm0, %v7999_v50  ;;  %4754 = vmatmul.msk.f32.gmra.mxu1 %vm398_vm0, %v7906_v36 }
 0x27e   : > { %v6962_v44 = vadd.f32 %v2653_v52, %v2620_v28  ;;  %v5432_v52 = vunpack.i.h.bf16 %v5430_v23  ;;  %v5431_v28 = vunpack.i.l.bf16 %v5430_v23 }
 0x27f   : > { %v2545_v45 = vpop.f32.mrf.mxu2  ;;  %v2578_v5 = vpop.f32.mrf.mxu3 }
 0x280   : > { %8003 = vst [vmem:[#allocation3_spill] sm:$0xff] %v6962_v44  ;;  %v2555_v55 = vadd.f32 %v2545_v45, %v6906_v54  ;;  %v8006_v54 = vld [vmem:[#allocation70_spill] sm:$0xff] }
 0x281   : > { %v6977_v45 = vadd.f32 %v8007_v16, %v8006_v54  ;;  %v5451_v54 = vunpack.i.l.bf16 %v6908_v53 }
 0x282   : > { %v2588_v40 = vadd.f32 %v2578_v5, %v2555_v55  ;;  %v2611_v35 = vpop.f32.mrf.mxu0  ;;  %v2659_v22 = vpop.f32.mrf.mxu1  ;;  %v3333_v55 = vsel %vm1512_vm6, %v5431_v28, %v5432_v52 }
 0x283   : > { %8008 = vst [vmem:[#allocation4_spill] sm:$0xff] %v6977_v45  ;;  %3352 = vmatpush.msrb.mxu2 %v3333_v55 }
 0x284   : > { %v2621_v49 = vadd.f32 %v2611_v35, %v2588_v40  ;;  %4743 = vmatmul.msk.f32.gmra.mxu2 %vm398_vm0, %v8004_v63  ;;  %4747 = vmatmul.msk.f32.gmra.mxu3 %vm398_vm0, %v7904_v15  ;;  %v5445_v23 = vpop.permute.xlu2 %5444 }
 0x285   : > { %4750 = vmatmul.msk.f32.gmra.mxu0 %vm398_vm0, %v8005_v12  ;;  %4755 = vmatmul.msk.f32.gmra.mxu1 %vm398_vm0, %v7912_v24  ;;  %v5452_v24 = vunpack.i.h.bf16 %v6908_v53 }
 0x286   : > { %v6979_v5 = vadd.f32 %v2656_v20, %v2621_v49  ;;  %v8010_v20 = vld [vmem:[#allocation83_spill] sm:$0xff]  ;;  %v8011_v49 = vld [vmem:[#allocation100_spill] sm:$0xff] }
 0x287   : > { %v2548_v40 = vpop.f32.mrf.mxu2  ;;  %v2581_v35 = vpop.f32.mrf.mxu3 }
 0x288   : > { %8009 = vst [vmem:[#allocation24_spill] sm:$0xff] %v6979_v5  ;;  %v2556_v9 = vadd.f32 %v2548_v40, %v6920_v34  ;;  %v8012_v34 = vld [vmem:[#allocation76_spill] sm:$0xff]  ;;  %v7004_v40 = vsel %vm1627_vm7, %v5451_v54, %v5452_v24  ;;  %v5446_v5 = vunpack.i.l.bf16 %v5445_v23 }
 0x289   : > { %3441 = vmatpush.msra.mxu0 %v7004_v40  ;;  %v8018_v54 = vld [vmem:[#allocation104_spill] sm:$0xff] }
 0x28a   : > { %v2589_v36 = vadd.f32 %v2581_v35, %v2556_v9  ;;  %v2614_v44 = vpop.f32.mrf.mxu0  ;;  %v2662_v8 = vpop.f32.mrf.mxu1  ;;  %v8013_v9 = vld [vmem:[#allocation144_spill] sm:$0xff]  ;;  %v5457_v35 = vunpack.i.h.bf16 %v6910_v38 }
 0x28b   : > { %v6997_v52 = vadd.f32 %v8013_v9, %v8012_v34 }
 0x28c   : > { %v2622_v16 = vadd.f32 %v2614_v44, %v2589_v36  ;;  %4744 = vmatmul.msk.f32.gmra.mxu2 %vm398_vm0, %v8010_v20  ;;  %4748 = vmatmul.msk.f32.gmra.mxu3 %vm398_vm0, %v7910_v41  ;;  %v8016_v41 = vld [vmem:[#allocation95_spill] sm:$0xff]  ;;  %v8028_v44 = vld [vmem:[#allocation8_spill] sm:$0xff] }
 0x28d   : > { %4751 = vmatmul.msk.f32.gmra.mxu0 %vm398_vm0, %v8011_v49  ;;  %4756 = vmatmul.msk.f32.gmra.mxu1 %vm398_vm0, %v7916_v14  ;;  %8014 = vst [vmem:[#allocation31_spill] sm:$0xff] %v6997_v52  ;;  %v5456_v14 = vunpack.i.l.bf16 %v6910_v38  ;;  %v8019_v38 = vld [vmem:[#allocation145_spill] sm:$0xff] }
 0x28e   : > { %v6999_v28 = vadd.f32 %v2659_v22, %v2622_v16  ;;  %v5447_v16 = vunpack.i.h.bf16 %v5445_v23 }
 0x28f   : > { %v2551_v53 = vpop.f32.mrf.mxu2  ;;  %v2584_v36 = vpop.f32.mrf.mxu3 }
 0x290   : > { %8015 = vst [vmem:[#allocation5_spill] sm:$0xff] %v6999_v28  ;;  %v2557_v55 = vadd.f32 %v2551_v53, %v2524_v43  ;;  %v8017_v43 = vld [vmem:[#allocation86_spill] sm:$0xff]  ;;  %v7014_v24 = vsel %vm1742_vm8, %v5446_v5, %v5447_v16 }
 0x291   : > { %v8020_v53 = vld [vmem:[#allocation146_spill] sm:$0xff] }
 0x292   : > { %v2590_v34 = vadd.f32 %v2584_v36, %v2557_v55  ;;  %v2617_v9 = vpop.f32.mrf.mxu0  ;;  %v2781_v22 = vpop.f32.mrf.mxu1  ;;  %v7022_v36 = vadd.f32 %v8020_v53, %v8019_v38  ;;  %v7029_v55 = vsel %vm1742_vm8, %v5456_v14, %v5457_v35  ;;  %v8023_v38 = vld [vmem:[#allocation102_spill] sm:$0xff]  ;;  %v8024_v53 = vld [vmem:[#allocation97_spill] sm:$0xff] }
 0x294   : > { %v2623_v45 = vadd.f32 %v2617_v9, %v2590_v34  ;;  %4757 = vmatmul.msk.f32.vlgmr.msra.gmra.mxu2 %vm398_vm0, %v8016_v41  ;;  %4761 = vmatmul.msk.f32.vlgmr.msra.gmra.mxu3 %vm398_vm0, %v8017_v43  ;;  %8021 = vst [vmem:[#allocation115_spill] sm:$0xff] %v7022_v36 }
 0x295   : > { %4752 = vmatmul.msk.f32.gmra.mxu0 %vm398_vm0, %v8018_v54  ;;  %4769 = vmatmul.msk.f32.vlgmr.msrb.gmra.mxu1 %vm398_vm0, %v6284_v3 }
 0x296   : > { %v7024_v23 = vadd.f32 %v2662_v8, %v2623_v45  ;;  %3568 = vmatpush.msra.mxu3 %v5760_v26  ;;  %3626 = vmatpush.msrb.mxu1 %v5826_v19  ;;  %v5460_v26 = vpop.permute.xlu2 %5459 }
 0x297   : > { %v2690_v5 = vpop.f32.mrf.mxu2  ;;  %v2719_v34 = vpop.f32.mrf.mxu3  ;;  %3531 = vmatpush.msra.mxu2 %v7014_v24  ;;  %v5462_v16 = vunpack.i.h.bf16 %v5460_v26  ;;  %v5461_v14 = vunpack.i.l.bf16 %v5460_v26  ;;  %v8027_v26 = vld [vmem:[#allocation6_spill] sm:$0xff] }
 0x298   : > { %8022 = vst [vmem:[#allocation119_spill] sm:$0xff] %v7024_v23  ;;  %3569 = vmatpush.msra.mxu3 %v5790_v57  ;;  %3627 = vmatpush.msrb.mxu1 %v5853_v11  ;;  %v2720_v8 = vadd.f32 %v2719_v34, %v2690_v5  ;;  %v8025_v11 = vld [vmem:[#allocation108_spill] sm:$0xff]  ;;  %v8026_v5 = vld [vmem:[#allocation113_spill] sm:$0xff] }
 0x299   : > { %3532 = vmatpush.msra.mxu2 %v7029_v55  ;;  %v7042_v9 = vsel %vm1627_vm7, %v5461_v14, %v5462_v16  ;;  %v8029_v14 = vld [vmem:[#allocation106_spill] sm:$0xff] }
 0x29a   : > { %v2748_v45 = vpop.f32.mrf.mxu0  ;;  %v2784_v19 = vpop.f32.mrf.mxu1  ;;  %3442 = vmatpush.msra.mxu0 %v7042_v9 }
 0x29b   : > { %v2760_v35 = vadd.f32 %v2748_v45, %v2720_v8 }
 0x29c   : > { %4758 = vmatmul.msk.f32.gmra.mxu2 %vm398_vm0, %v8023_v38  ;;  %4762 = vmatmul.msk.f32.gmra.mxu3 %vm398_vm0, %v8024_v53 }
 0x29d   : > { %v2793_v57 = vadd.f32 %v2781_v22, %v2760_v35  ;;  %4765 = vmatmul.msk.f32.vlgmr.msrb.gmra.mxu0 %vm398_vm0, %v8025_v11  ;;  %4770 = vmatmul.msk.f32.gmra.mxu1 %vm398_vm0, %v8026_v5  ;;  %v8030_v22 = vld [vmem:[#allocation103_spill] sm:$0xff]  ;;  %v8031_v5 = vld [vmem:[#allocation112_spill] sm:$0xff] }
 0x29e   : > { %3597 = vmatpush.msrb.mxu0 %v8027_v26 }
 0x29f   : > { %v2693_v34 = vpop.f32.mrf.mxu2  ;;  %v2722_v8 = vpop.f32.mrf.mxu3 }
 0x2a0   : > { %v2723_v45 = vadd.f32 %v2722_v8, %v2693_v34  ;;  %3598 = vmatpush.msrb.mxu0 %v8028_v44 }
 0x2a2   : > { %v2751_v3 = vpop.f32.mrf.mxu0  ;;  %v2787_v23 = vpop.f32.mrf.mxu1 }
 0x2a3   : > { %v2761_v16 = vadd.f32 %v2751_v3, %v2723_v45  ;;  %v8032_v3 = vld [vmem:[#allocation110_spill] sm:$0xff]  ;;  %v8033_v45 = vld [vmem:[#allocation107_spill] sm:$0xff] }
 0x2a4   : > { %4759 = vmatmul.msk.f32.gmra.mxu2 %vm398_vm0, %v8029_v14  ;;  %4763 = vmatmul.msk.f32.gmra.mxu3 %vm398_vm0, %v8030_v22 }
 0x2a5   : > { %v2794_v35 = vadd.f32 %v2784_v19, %v2761_v16  ;;  %4766 = vmatmul.msk.f32.gmra.mxu0 %vm398_vm0, %v8031_v5  ;;  %4771 = vmatmul.msk.f32.gmra.mxu1 %vm398_vm0, %v7927_v25  ;;  %v8034_v19 = vld [vmem:[#allocation116_spill] sm:$0xff] }
 0x2a7   : > { %v2696_v26 = vpop.f32.mrf.mxu2  ;;  %v2725_v34 = vpop.f32.mrf.mxu3 }
 0x2a8   : > { %v2726_v8 = vadd.f32 %v2725_v34, %v2696_v26 }
 0x2aa   : > { %v2754_v44 = vpop.f32.mrf.mxu0  ;;  %v2790_v36 = vpop.f32.mrf.mxu1 }
 0x2ab   : > { %v2762_v28 = vadd.f32 %v2754_v44, %v2726_v8  ;;  %v8035_v8 = vld [vmem:[#allocation114_spill] sm:$0xff] }
 0x2ac   : > { %4760 = vmatmul.msk.f32.gmra.mxu2 %vm398_vm0, %v8032_v3  ;;  %4764 = vmatmul.msk.f32.gmra.mxu3 %vm398_vm0, %v8033_v45 }
 0x2ad   : > { %v2795_v22 = vadd.f32 %v2787_v23, %v2762_v28  ;;  %4767 = vmatmul.msk.f32.gmra.mxu0 %vm398_vm0, %v8034_v19  ;;  %4772 = vmatmul.msk.f32.gmra.mxu1 %vm398_vm0, %v7931_v47  ;;  %v8036_v28 = vld [vmem:[#allocation120_spill] sm:$0xff] }
 0x2ae   : > { %v8037_v23 = vld [vmem:[#allocation136_spill] sm:$0xff] }
 0x2af   : > { %v2699_v16 = vpop.f32.mrf.mxu2  ;;  %v2728_v25 = vpop.f32.mrf.mxu3 }
 0x2b0   : > { %v2729_v52 = vadd.f32 %v2728_v25, %v2699_v16  ;;  %v8038_v16 = vld [vmem:[#allocation137_spill] sm:$0xff] }
 0x2b2   : > { %v2757_v26 = vpop.f32.mrf.mxu0  ;;  %v2913_v34 = vpop.f32.mrf.mxu1 }
 0x2b3   : > { %v2763_v53 = vadd.f32 %v2757_v26, %v2729_v52 }
 0x2b4   : > { %4773 = vmatmul.msk.f32.vlgmr.msrb.gmra.mxu2 %vm398_vm0, %v8035_v8  ;;  %4777 = vmatmul.msk.f32.vlgmr.msrb.gmra.mxu3 %vm398_vm0, %v7930_v29 }
 0x2b5   : > { %v2796_v44 = vadd.f32 %v2790_v36, %v2763_v53  ;;  %4768 = vmatmul.msk.f32.gmra.mxu0 %vm398_vm0, %v8036_v28  ;;  %4785 = vmatmul.msk.f32.vlgmr.msra.gmra.mxu1 %vm398_vm0, %v6395_v60  ;;  %v8039_v60 = vld [vmem:[#allocation118_spill] sm:$0xff] }
 0x2b6   : > { %3659 = vmatpush.msrb.mxu2 %v5850_v6  ;;  %3692 = vmatpush.msrb.mxu3 %v8037_v23  ;;  %v8040_v6 = vld [vmem:[#allocation124_spill] sm:$0xff] }
 0x2b7   : > { %3758 = vmatpush.msra.mxu1 %v7833_v10  ;;  %v2814_v25 = vpop.f32.mrf.mxu2  ;;  %v2847_v52 = vpop.f32.mrf.mxu3 }
 0x2b8   : > { %3660 = vmatpush.msrb.mxu2 %v5881_v17  ;;  %3693 = vmatpush.msrb.mxu3 %v8038_v16  ;;  %v2826_v26 = vadd.f32 %v2814_v25, %v2793_v57 }
 0x2b9   : > { %3759 = vmatpush.msra.mxu1 %v7834_v37 }
 0x2ba   : > { %v2859_v36 = vadd.f32 %v2847_v52, %v2826_v26  ;;  %v2880_v53 = vpop.f32.mrf.mxu0  ;;  %v2916_v47 = vpop.f32.mrf.mxu1  ;;  %v8041_v26 = vld [vmem:[#allocation122_spill] sm:$0xff] }
 0x2bc   : > { %v2892_v29 = vadd.f32 %v2880_v53, %v2859_v36  ;;  %4774 = vmatmul.msk.f32.gmra.mxu2 %vm398_vm0, %v8039_v60  ;;  %4778 = vmatmul.msk.f32.gmra.mxu3 %vm398_vm0, %v7935_v31  ;;  %v8042_v36 = vld [vmem:[#allocation127_spill] sm:$0xff] }
 0x2bd   : > { %4781 = vmatmul.msk.f32.vlgmr.msra.gmra.mxu0 %vm398_vm0, %v8040_v6  ;;  %4786 = vmatmul.msk.f32.gmra.mxu1 %vm398_vm0, %v6420_v30 }
 0x2be   : > { %v2925_v17 = vadd.f32 %v2913_v34, %v2892_v29  ;;  %3725 = vmatpush.msra.mxu0 %v5793_v58 }
 0x2bf   : > { %v2817_v10 = vpop.f32.mrf.mxu2  ;;  %v2850_v37 = vpop.f32.mrf.mxu3 }
 0x2c0   : > { %3726 = vmatpush.msra.mxu0 %v5837_v32  ;;  %v2827_v57 = vadd.f32 %v2817_v10, %v2794_v35 }
 0x2c2   : > { %v2860_v23 = vadd.f32 %v2850_v37, %v2827_v57  ;;  %v2883_v25 = vpop.f32.mrf.mxu0  ;;  %v2919_v52 = vpop.f32.mrf.mxu1  ;;  %v8043_v57 = vld [vmem:[#allocation126_spill] sm:$0xff] }
 0x2c4   : > { %v2893_v16 = vadd.f32 %v2883_v25, %v2860_v23  ;;  %4775 = vmatmul.msk.f32.gmra.mxu2 %vm398_vm0, %v8041_v26  ;;  %4779 = vmatmul.msk.f32.gmra.mxu3 %vm398_vm0, %v7936_v13 }
 0x2c5   : > { %4782 = vmatmul.msk.f32.gmra.mxu0 %vm398_vm0, %v8042_v36  ;;  %4787 = vmatmul.msk.f32.gmra.mxu1 %vm398_vm0, %v7939_v48 }
 0x2c6   : > { %v2926_v29 = vadd.f32 %v2916_v47, %v2893_v16 }
 0x2c7   : > { %v2820_v58 = vpop.f32.mrf.mxu2  ;;  %v2853_v32 = vpop.f32.mrf.mxu3 }
 0x2c8   : > { %v2828_v35 = vadd.f32 %v2820_v58, %v2795_v22 }
 0x2ca   : > { %v2861_v34 = vadd.f32 %v2853_v32, %v2828_v35  ;;  %v2886_v53 = vpop.f32.mrf.mxu0  ;;  %v2922_v10 = vpop.f32.mrf.mxu1 }
 0x2cc   : > { %v2894_v37 = vadd.f32 %v2886_v53, %v2861_v34  ;;  %4776 = vmatmul.msk.f32.gmra.mxu2 %vm398_vm0, %v8043_v57  ;;  %4780 = vmatmul.msk.f32.gmra.mxu3 %vm398_vm0, %v7937_v0  ;;  %v8044_v34 = vld [vmem:[#allocation129_spill] sm:$0xff]  ;;  %v8045_v53 = vld [vmem:[#allocation132_spill] sm:$0xff] }
 0x2cd   : > { %4783 = vmatmul.msk.f32.gmra.mxu0 %vm398_vm0, %v6446_v61  ;;  %4788 = vmatmul.msk.f32.gmra.mxu1 %vm398_vm0, %v7941_v7 }
 0x2ce   : > { %v2927_v47 = vadd.f32 %v2919_v52, %v2894_v37  ;;  %v8047_v37 = vld [vmem:[#allocation65_spill] sm:$0xff] }
 0x2cf   : > { %v2823_v23 = vpop.f32.mrf.mxu2  ;;  %v2856_v25 = vpop.f32.mrf.mxu3 }
 0x2d0   : > { %v2829_v22 = vadd.f32 %v2823_v23, %v2796_v44  ;;  %v8046_v44 = vld [vmem:[#allocation39_spill] sm:$0xff] }
 0x2d2   : > { %v2862_v16 = vadd.f32 %v2856_v25, %v2829_v22  ;;  %v2889_v58 = vpop.f32.mrf.mxu0  ;;  %v3045_v32 = vpop.f32.mrf.mxu1  ;;  %v8048_v22 = vld [vmem:[#allocation52_spill] sm:$0xff] }
 0x2d4   : > { %v2895_v35 = vadd.f32 %v2889_v58, %v2862_v16  ;;  %4789 = vmatmul.msk.f32.vlgmr.msra.gmra.mxu2 %vm398_vm0, %v8044_v34  ;;  %4793 = vmatmul.msk.f32.vlgmr.msra.gmra.mxu3 %vm398_vm0, %v7940_v1  ;;  %v8049_v16 = vld [vmem:[#allocation46_spill] sm:$0xff]  ;;  %v8050_v58 = vld [vmem:[#allocation71_spill] sm:$0xff] }
 0x2d5   : > { %4784 = vmatmul.msk.f32.gmra.mxu0 %vm398_vm0, %v8045_v53  ;;  %4801 = vmatmul.msk.f32.vlgmr.msrb.gmra.mxu1 %vm398_vm0, %v7945_v18 }
 0x2d6   : > { %v2928_v52 = vadd.f32 %v2922_v10, %v2895_v35  ;;  %3791 = vmatpush.msra.mxu2 %v5949_v21  ;;  %3824 = vmatpush.msra.mxu3 %v8046_v44  ;;  %v8051_v10 = vld [vmem:[#allocation131_spill] sm:$0xff]  ;;  %v8052_v21 = vld [vmem:[#allocation13_spill] sm:$0xff]  ;;  %v8053_v35 = vld [vmem:[#allocation10_spill] sm:$0xff] }
 0x2d7   : > { %3890 = vmatpush.msrb.mxu1 %v8047_v37  ;;  %v2946_v23 = vpop.f32.mrf.mxu2  ;;  %v2979_v25 = vpop.f32.mrf.mxu3 }
 0x2d8   : > { %3792 = vmatpush.msra.mxu2 %v8048_v22  ;;  %3825 = vmatpush.msra.mxu3 %v8049_v16  ;;  %v2958_v1 = vadd.f32 %v2946_v23, %v2925_v17  ;;  %v8054_v17 = vld [vmem:[#allocation40_spill] sm:$0xff] }
 0x2d9   : > { %3891 = vmatpush.msrb.mxu1 %v8050_v58  ;;  %v8056_v58 = vld [vmem:[#allocation134_spill] sm:$0xff] }
 0x2da   : > { %v2991_v7 = vadd.f32 %v2979_v25, %v2958_v1  ;;  %v3012_v48 = vpop.f32.mrf.mxu0  ;;  %v3048_v30 = vpop.f32.mrf.mxu1  ;;  %v8055_v25 = vld [vmem:[#allocation45_spill] sm:$0xff] }
 0x2dc   : > { %v3024_v18 = vadd.f32 %v3012_v48, %v2991_v7  ;;  %4790 = vmatmul.msk.f32.gmra.mxu2 %vm398_vm0, %v8051_v10  ;;  %4794 = vmatmul.msk.f32.gmra.mxu3 %vm398_vm0, %v8052_v21  ;;  %v8057_v21 = vld [vmem:[#allocation15_spill] sm:$0xff] }
 0x2dd   : > { %4797 = vmatmul.msk.f32.vlgmr.msrb.gmra.mxu0 %vm398_vm0, %v8053_v35  ;;  %4802 = vmatmul.msk.f32.gmra.mxu1 %vm398_vm0, %v7951_v56  ;;  %v8058_v35 = vld [vmem:[#allocation11_spill] sm:$0xff]  ;;  %v8059_v56 = vld [vmem:[#allocation28_spill] sm:$0xff] }
 0x2de   : > { %v3057_v44 = vadd.f32 %v3045_v32, %v3024_v18  ;;  %3857 = vmatpush.msrb.mxu0 %v8054_v17 }
 0x2df   : > { %v2949_v37 = vpop.f32.mrf.mxu2  ;;  %v2982_v23 = vpop.f32.mrf.mxu3 }
 0x2e0   : > { %3858 = vmatpush.msrb.mxu0 %v8055_v25  ;;  %v2959_v48 = vadd.f32 %v2949_v37, %v2926_v29 }
 0x2e2   : > { %v2992_v7 = vadd.f32 %v2982_v23, %v2959_v48  ;;  %v3015_v22 = vpop.f32.mrf.mxu0  ;;  %v3051_v16 = vpop.f32.mrf.mxu1 }
 0x2e4   : > { %v3025_v1 = vadd.f32 %v3015_v22, %v2992_v7  ;;  %4791 = vmatmul.msk.f32.gmra.mxu2 %vm398_vm0, %v8056_v58  ;;  %4795 = vmatmul.msk.f32.gmra.mxu3 %vm398_vm0, %v8057_v21  ;;  %v8060_v7 = vld [vmem:[#allocation135_spill] sm:$0xff]  ;;  %v8061_v22 = vld [vmem:[#allocation17_spill] sm:$0xff]  ;;  %v8062_v21 = vld [vmem:[#allocation14_spill] sm:$0xff] }
 0x2e5   : > { %4798 = vmatmul.msk.f32.gmra.mxu0 %vm398_vm0, %v8058_v35  ;;  %4803 = vmatmul.msk.f32.gmra.mxu1 %vm398_vm0, %v8059_v56 }
 0x2e6   : > { %v3058_v32 = vadd.f32 %v3048_v30, %v3025_v1 }
 0x2e7   : > { %v2952_v18 = vpop.f32.mrf.mxu2  ;;  %v2985_v17 = vpop.f32.mrf.mxu3 }
 0x2e8   : > { %v2960_v29 = vadd.f32 %v2952_v18, %v2927_v47 }
 0x2ea   : > { %v2993_v37 = vadd.f32 %v2985_v17, %v2960_v29  ;;  %v3018_v23 = vpop.f32.mrf.mxu0  ;;  %v3054_v25 = vpop.f32.mrf.mxu1  ;;  %v8063_v29 = vld [vmem:[#allocation9_spill] sm:$0xff] }
 0x2eb   : > { %5479 = vrot.lane.b32.xlu0 %v8063_v29, %s5501_s8 }
 0x2ec   : > { %v3026_v48 = vadd.f32 %v3018_v23, %v2993_v37  ;;  %4792 = vmatmul.msk.f32.gmra.mxu2 %vm398_vm0, %v8060_v7  ;;  %4796 = vmatmul.msk.f32.gmra.mxu3 %vm398_vm0, %v8061_v22  ;;  %v8064_v23 = vld [vmem:[#allocation23_spill] sm:$0xff] }
 0x2ed   : > { %4799 = vmatmul.msk.f32.gmra.mxu0 %vm398_vm0, %v8062_v21  ;;  %4804 = vmatmul.msk.f32.gmra.mxu1 %vm398_vm0, %v7959_v33  ;;  %v8065_v22 = vld [vmem:[#allocation27_spill] sm:$0xff]  ;;  %v8066_v21 = vld [vmem:[#allocation16_spill] sm:$0xff] }
 0x2ee   : > { %v3059_v30 = vadd.f32 %v3051_v16, %v3026_v48  ;;  %v8067_v33 = vld [vmem:[#allocation35_spill] sm:$0xff]  ;;  %v8068_v16 = vld [vmem:[#allocation58_spill] sm:$0xff] }
 0x2ef   : > { %v2955_v1 = vpop.f32.mrf.mxu2  ;;  %v2988_v35 = vpop.f32.mrf.mxu3  ;;  %v8069_v48 = vld [vmem:[#allocation63_spill] sm:$0xff] }
 0x2f0   : > { %v2961_v47 = vadd.f32 %v2955_v1, %v2928_v52  ;;  %v8070_v1 = vld [vmem:[#allocation138_spill] sm:$0xff] }
 0x2f2   : > { %v2994_v56 = vadd.f32 %v2988_v35, %v2961_v47  ;;  %v3021_v18 = vpop.f32.mrf.mxu0  ;;  %v3177_v17 = vpop.f32.mrf.mxu1 }
 0x2f4   : > { %v3027_v37 = vadd.f32 %v3021_v18, %v2994_v56  ;;  %4805 = vmatmul.msk.f32.vlgmr.msrb.gmra.mxu2 %vm398_vm0, %v8064_v23  ;;  %4809 = vmatmul.msk.f32.vlgmr.msrb.gmra.mxu3 %vm398_vm0, %v8065_v22  ;;  %v8071_v56 = vld [vmem:[#allocation72_spill] sm:$0xff]  ;;  %v8073_v23 = vld [vmem:[#allocation139_spill] sm:$0xff] }
 0x2f5   : > { %4800 = vmatmul.msk.f32.gmra.mxu0 %vm398_vm0, %v8066_v21  ;;  %4817 = vmatmul.msk.f32.vlgmr.msra.gmra.mxu1 %vm398_vm0, %v8067_v33  ;;  %v8072_v18 = vld [vmem:[#allocation64_spill] sm:$0xff]  ;;  %v8075_v33 = vld [vmem:[#allocation26_spill] sm:$0xff] }
 0x2f6   : > { %v3060_v52 = vadd.f32 %v3054_v25, %v3027_v37  ;;  %3923 = vmatpush.msrb.mxu2 %v8068_v16  ;;  %3956 = vmatpush.msrb.mxu3 %v8069_v48  ;;  %v8074_v25 = vld [vmem:[#allocation7_spill] sm:$0xff]  ;;  %v8076_v16 = vld [vmem:[#allocation30_spill] sm:$0xff] }
 0x2f7   : > { %4022 = vmatpush.msra.mxu1 %v8070_v1  ;;  %v3078_v35 = vpop.f32.mrf.mxu2  ;;  %v3111_v47 = vpop.f32.mrf.mxu3  ;;  %5474 = vrot.lane.b32.xlu2 %v8074_v25, %s5501_s8  ;;  %v8077_v48 = vld [vmem:[#allocation18_spill] sm:$0xff]  ;;  %v8078_v1 = vld [vmem:[#allocation41_spill] sm:$0xff] }
 0x2f8   : > { %3924 = vmatpush.msrb.mxu2 %v8071_v56  ;;  %3957 = vmatpush.msrb.mxu3 %v8072_v18  ;;  %v3090_v29 = vadd.f32 %v3078_v35, %v3057_v44  ;;  %v8079_v35 = vld [vmem:[#allocation66_spill] sm:$0xff]  ;;  %v8080_v18 = vld [vmem:[#allocation77_spill] sm:$0xff] }
 0x2f9   : > { %4023 = vmatpush.msra.mxu1 %v8073_v23 }
 0x2fa   : > { %v3123_v22 = vadd.f32 %v3111_v47, %v3090_v29  ;;  %v3144_v21 = vpop.f32.mrf.mxu0  ;;  %v3180_v7 = vpop.f32.mrf.mxu1 }
 0x2fc   : > { %v3156_v37 = vadd.f32 %v3144_v21, %v3123_v22  ;;  %4806 = vmatmul.msk.f32.gmra.mxu2 %vm398_vm0, %v8075_v33  ;;  %4810 = vmatmul.msk.f32.gmra.mxu3 %vm398_vm0, %v8076_v16  ;;  %v8081_v33 = vld [vmem:[#allocation29_spill] sm:$0xff]  ;;  %v8082_v16 = vld [vmem:[#allocation34_spill] sm:$0xff] }
 0x2fd   : > { %4813 = vmatmul.msk.f32.vlgmr.msra.gmra.mxu0 %vm398_vm0, %v8077_v48  ;;  %4818 = vmatmul.msk.f32.gmra.mxu1 %vm398_vm0, %v8078_v1  ;;  %v8083_v48 = vld [vmem:[#allocation19_spill] sm:$0xff] }
 0x2fe   : > { %v3189_v44 = vadd.f32 %v3177_v17, %v3156_v37  ;;  %3989 = vmatpush.msra.mxu0 %v8079_v35  ;;  %v8084_v17 = vld [vmem:[#allocation48_spill] sm:$0xff] }
 0x2ff   : > { %v3081_v47 = vpop.f32.mrf.mxu2  ;;  %v3114_v56 = vpop.f32.mrf.mxu3 }
 0x300   : > { %3990 = vmatpush.msra.mxu0 %v8080_v18  ;;  %v3091_v29 = vadd.f32 %v3081_v47, %v3058_v32 }
 0x302   : > { %v3124_v23 = vadd.f32 %v3114_v56, %v3091_v29  ;;  %v3147_v22 = vpop.f32.mrf.mxu0  ;;  %v3183_v21 = vpop.f32.mrf.mxu1 }
 0x304   : > { %v3157_v25 = vadd.f32 %v3147_v22, %v3124_v23  ;;  %4807 = vmatmul.msk.f32.gmra.mxu2 %vm398_vm0, %v8081_v33  ;;  %4811 = vmatmul.msk.f32.gmra.mxu3 %vm398_vm0, %v8082_v16  ;;  %v8085_v23 = vld [vmem:[#allocation33_spill] sm:$0xff]  ;;  %v8087_v33 = vld [vmem:[#allocation20_spill] sm:$0xff]  ;;  %v8088_v16 = vld [vmem:[#allocation54_spill] sm:$0xff] }
 0x305   : > { %4814 = vmatmul.msk.f32.gmra.mxu0 %vm398_vm0, %v8083_v48  ;;  %4819 = vmatmul.msk.f32.gmra.mxu1 %vm398_vm0, %v8084_v17  ;;  %v8086_v22 = vld [vmem:[#allocation37_spill] sm:$0xff] }
 0x306   : > { %v3190_v37 = vadd.f32 %v3180_v7, %v3157_v25 }
 0x307   : > { %v3084_v1 = vpop.f32.mrf.mxu2  ;;  %v3117_v35 = vpop.f32.mrf.mxu3 }
 0x308   : > { %v3092_v32 = vadd.f32 %v3084_v1, %v3059_v30 }
 0x30a   : > { %v3125_v47 = vadd.f32 %v3117_v35, %v3092_v32  ;;  %v3150_v56 = vpop.f32.mrf.mxu0  ;;  %v3186_v18 = vpop.f32.mrf.mxu1 }
 0x30c   : > { %v3158_v29 = vadd.f32 %v3150_v56, %v3125_v47  ;;  %4808 = vmatmul.msk.f32.gmra.mxu2 %vm398_vm0, %v8085_v23  ;;  %4812 = vmatmul.msk.f32.gmra.mxu3 %vm398_vm0, %v8086_v22  ;;  %v8089_v47 = vld [vmem:[#allocation36_spill] sm:$0xff]  ;;  %v8090_v56 = vld [vmem:[#allocation43_spill] sm:$0xff]  ;;  %v8091_v23 = vld [vmem:[#allocation21_spill] sm:$0xff] }
 0x30d   : > { %4815 = vmatmul.msk.f32.gmra.mxu0 %vm398_vm0, %v8087_v33  ;;  %4820 = vmatmul.msk.f32.gmra.mxu1 %vm398_vm0, %v8088_v16  ;;  %v8092_v22 = vld [vmem:[#allocation59_spill] sm:$0xff]  ;;  %v8095_v33 = vld [vmem:[#allocation98_spill] sm:$0xff] }
 0x30e   : > { %v3191_v7 = vadd.f32 %v3183_v21, %v3158_v29  ;;  %v8093_v29 = vld [vmem:[#allocation82_spill] sm:$0xff] }
 0x30f   : > { %v3087_v25 = vpop.f32.mrf.mxu2  ;;  %v3120_v48 = vpop.f32.mrf.mxu3 }
 0x310   : > { %v3093_v30 = vadd.f32 %v3087_v25, %v3060_v52  ;;  %v8094_v52 = vld [vmem:[#allocation88_spill] sm:$0xff] }
 0x312   : > { %v3126_v17 = vadd.f32 %v3120_v48, %v3093_v30  ;;  %v3153_v1 = vpop.f32.mrf.mxu0  ;;  %v3309_v35 = vpop.f32.mrf.mxu1  ;;  %v8096_v48 = vld [vmem:[#allocation87_spill] sm:$0xff]  ;;  %v8097_v30 = vld [vmem:[#allocation90_spill] sm:$0xff] }
 0x314   : > { %v3159_v32 = vadd.f32 %v3153_v1, %v3126_v17  ;;  %4821 = vmatmul.msk.f32.vlgmr.msra.gmra.mxu2 %vm398_vm0, %v8089_v47  ;;  %4825 = vmatmul.msk.f32.vlgmr.msra.gmra.mxu3 %vm398_vm0, %v8090_v56  ;;  %v8098_v1 = vld [vmem:[#allocation99_spill] sm:$0xff] }
 0x315   : > { %4816 = vmatmul.msk.f32.gmra.mxu0 %vm398_vm0, %v8091_v23  ;;  %4833 = vmatmul.msk.f32.vlgmr.msrb.gmra.mxu1 %vm398_vm0, %v8092_v22 }
 0x316   : > { %v3192_v21 = vadd.f32 %v3186_v18, %v3159_v32  ;;  %4055 = vmatpush.msra.mxu2 %v8093_v29  ;;  %4088 = vmatpush.msra.mxu3 %v8094_v52  ;;  %v8099_v18 = vld [vmem:[#allocation42_spill] sm:$0xff]  ;;  %v8102_v52 = vld [vmem:[#allocation67_spill] sm:$0xff] }
 0x317   : > { %4154 = vmatpush.msrb.mxu1 %v8095_v33  ;;  %v3210_v16 = vpop.f32.mrf.mxu2  ;;  %v3243_v25 = vpop.f32.mrf.mxu3  ;;  %v8100_v32 = vld [vmem:[#allocation50_spill] sm:$0xff] }
 0x318   : > { %4056 = vmatpush.msra.mxu2 %v8096_v48  ;;  %4089 = vmatpush.msra.mxu3 %v8097_v30  ;;  %v3222_v17 = vadd.f32 %v3210_v16, %v3189_v44  ;;  %v8101_v29 = vld [vmem:[#allocation38_spill] sm:$0xff]  ;;  %v8103_v44 = vld [vmem:[#allocation89_spill] sm:$0xff]  ;;  %v8104_v48 = vld [vmem:[#allocation91_spill] sm:$0xff] }
 0x319   : > { %4155 = vmatpush.msrb.mxu1 %v8098_v1 }
 0x31a   : > { %v3255_v47 = vadd.f32 %v3243_v25, %v3222_v17  ;;  %v3276_v56 = vpop.f32.mrf.mxu0  ;;  %v3312_v23 = vpop.f32.mrf.mxu1 }
 0x31c   : > { %v3288_v22 = vadd.f32 %v3276_v56, %v3255_v47  ;;  %4822 = vmatmul.msk.f32.gmra.mxu2 %vm398_vm0, %v8099_v18  ;;  %4826 = vmatmul.msk.f32.gmra.mxu3 %vm398_vm0, %v8100_v32  ;;  %v8105_v18 = vld [vmem:[#allocation49_spill] sm:$0xff]  ;;  %v8106_v32 = vld [vmem:[#allocation56_spill] sm:$0xff] }
 0x31d   : > { %4829 = vmatmul.msk.f32.vlgmr.msrb.gmra.mxu0 %vm398_vm0, %v8101_v29  ;;  %4834 = vmatmul.msk.f32.gmra.mxu1 %vm398_vm0, %v8102_v52  ;;  %v8107_v29 = vld [vmem:[#allocation44_spill] sm:$0xff] }
 0x31e   : > { %v3321_v33 = vadd.f32 %v3309_v35, %v3288_v22  ;;  %4121 = vmatpush.msrb.mxu0 %v8103_v44  ;;  %v8108_v35 = vld [vmem:[#allocation73_spill] sm:$0xff] }
 0x31f   : > { %v3213_v16 = vpop.f32.mrf.mxu2  ;;  %v3246_v25 = vpop.f32.mrf.mxu3 }
 0x320   : > { %4122 = vmatpush.msrb.mxu0 %v8104_v48  ;;  %v3223_v30 = vadd.f32 %v3213_v16, %v3190_v37 }
 0x322   : > { %v3256_v17 = vadd.f32 %v3246_v25, %v3223_v30  ;;  %v3279_v1 = vpop.f32.mrf.mxu0  ;;  %v3315_v47 = vpop.f32.mrf.mxu1 }
 0x324   : > { %v3289_v56 = vadd.f32 %v3279_v1, %v3256_v17  ;;  %4823 = vmatmul.msk.f32.gmra.mxu2 %vm398_vm0, %v8105_v18  ;;  %4827 = vmatmul.msk.f32.gmra.mxu3 %vm398_vm0, %v8106_v32  ;;  %v8109_v17 = vld [vmem:[#allocation55_spill] sm:$0xff]  ;;  %v8110_v1 = vld [vmem:[#allocation61_spill] sm:$0xff] }
 0x325   : > { %4830 = vmatmul.msk.f32.gmra.mxu0 %vm398_vm0, %v8107_v29  ;;  %4835 = vmatmul.msk.f32.gmra.mxu1 %vm398_vm0, %v8108_v35  ;;  %v8111_v18 = vld [vmem:[#allocation51_spill] sm:$0xff] }
 0x326   : > { %v3322_v22 = vadd.f32 %v3312_v23, %v3289_v56 }
 0x327   : > { %v3216_v52 = vpop.f32.mrf.mxu2  ;;  %v3249_v44 = vpop.f32.mrf.mxu3 }
 0x328   : > { %v3224_v37 = vadd.f32 %v3216_v52, %v3191_v7 }
 0x32a   : > { %v3257_v16 = vadd.f32 %v3249_v44, %v3224_v37  ;;  %v3282_v25 = vpop.f32.mrf.mxu0  ;;  %v3318_v48 = vpop.f32.mrf.mxu1  ;;  %v8112_v37 = vld [vmem:[#allocation60_spill] sm:$0xff] }
 0x32c   : > { %v3290_v30 = vadd.f32 %v3282_v25, %v3257_v16  ;;  %4824 = vmatmul.msk.f32.gmra.mxu2 %vm398_vm0, %v8109_v17  ;;  %4828 = vmatmul.msk.f32.gmra.mxu3 %vm398_vm0, %v8110_v1  ;;  %v8113_v16 = vld [vmem:[#allocation57_spill] sm:$0xff] }
 0x32d   : > { %4831 = vmatmul.msk.f32.gmra.mxu0 %vm398_vm0, %v8111_v18  ;;  %4836 = vmatmul.msk.f32.gmra.mxu1 %vm398_vm0, %v7997_v51 }
 0x32e   : > { %v3323_v23 = vadd.f32 %v3315_v47, %v3290_v30  ;;  %v8114_v47 = vld [vmem:[#allocation62_spill] sm:$0xff]  ;;  %v8115_v30 = vld [vmem:[#allocation140_spill] sm:$0xff] }
 0x32f   : > { %v3219_v56 = vpop.f32.mrf.mxu2  ;;  %v3252_v32 = vpop.f32.mrf.mxu3 }
 0x330   : > { %v3225_v7 = vadd.f32 %v3219_v56, %v3192_v21 }
 0x332   : > { %v3258_v29 = vadd.f32 %v3252_v32, %v3225_v7  ;;  %v3285_v35 = vpop.f32.mrf.mxu0  ;;  %v3489_v52 = vpop.f32.mrf.mxu1 }
 0x334   : > { %v3291_v44 = vadd.f32 %v3285_v35, %v3258_v29  ;;  %4837 = vmatmul.msk.f32.vlgmr.msrb.gmra.mxu2 %vm398_vm0, %v8112_v37  ;;  %4841 = vmatmul.msk.f32.vlgmr.msrb.gmra.mxu3 %vm398_vm0, %v7996_v42  ;;  %v8117_v29 = vld [vmem:[#allocation74_spill] sm:$0xff] }
 0x335   : > { %4832 = vmatmul.msk.f32.gmra.mxu0 %vm398_vm0, %v8113_v16  ;;  %4849 = vmatmul.msk.f32.vlgmr.msra.gmra.mxu1 %vm398_vm0, %v7999_v50 }
 0x336   : > { %v3324_v51 = vadd.f32 %v3318_v48, %v3291_v44  ;;  %4187 = vmatpush.msrb.mxu2 %v8114_v47  ;;  %4220 = vmatpush.msrb.mxu3 %v6925_v39  ;;  %v8116_v48 = vld [vmem:[#allocation68_spill] sm:$0xff]  ;;  %v8118_v44 = vld [vmem:[#allocation79_spill] sm:$0xff] }
 0x337   : > { %4286 = vmatpush.msra.mxu1 %v6932_v46  ;;  %v3354_v21 = vpop.f32.mrf.mxu2  ;;  %v3399_v25 = vpop.f32.mrf.mxu3 }
 0x338   : > { %4188 = vmatpush.msrb.mxu2 %v8115_v30  ;;  %4221 = vmatpush.msrb.mxu3 %v6939_v4  ;;  %v3366_v42 = vadd.f32 %v3354_v21, %v3321_v33 }
 0x339   : > { %4287 = vmatpush.msra.mxu1 %v6944_v59 }
 0x33a   : > { %v3411_v17 = vadd.f32 %v3399_v25, %v3366_v42  ;;  %v3444_v1 = vpop.f32.mrf.mxu0  ;;  %v3492_v18 = vpop.f32.mrf.mxu1  ;;  %v8119_v25 = vld [vmem:[#allocation85_spill] sm:$0xff] }
 0x33c   : > { %v3456_v50 = vadd.f32 %v3444_v1, %v3411_v17  ;;  %4838 = vmatmul.msk.f32.gmra.mxu2 %vm398_vm0, %v8116_v48  ;;  %4842 = vmatmul.msk.f32.gmra.mxu3 %vm398_vm0, %v7998_v62 }
 0x33d   : > { %4845 = vmatmul.msk.f32.vlgmr.msra.gmra.mxu0 %vm398_vm0, %v7889_v27  ;;  %4850 = vmatmul.msk.f32.gmra.mxu1 %vm398_vm0, %v8005_v12 }
 0x33e   : > { %v3501_v39 = vadd.f32 %v3489_v52, %v3456_v50  ;;  %4253 = vmatpush.msra.mxu0 %v7004_v40 }
 0x33f   : > { %v3357_v46 = vpop.f32.mrf.mxu2  ;;  %v3402_v4 = vpop.f32.mrf.mxu3 }
 0x340   : > { %4254 = vmatpush.msra.mxu0 %v7042_v9  ;;  %v3367_v59 = vadd.f32 %v3357_v46, %v3322_v22 }
 0x342   : > { %v3412_v33 = vadd.f32 %v3402_v4, %v3367_v59  ;;  %v3447_v56 = vpop.f32.mrf.mxu0  ;;  %v3495_v32 = vpop.f32.mrf.mxu1 }
 0x344   : > { %v3457_v7 = vadd.f32 %v3447_v56, %v3412_v33  ;;  %4839 = vmatmul.msk.f32.gmra.mxu2 %vm398_vm0, %v8117_v29  ;;  %4843 = vmatmul.msk.f32.gmra.mxu3 %vm398_vm0, %v8004_v63  ;;  %v8124_v33 = vld [vmem:[#allocation94_spill] sm:$0xff] }
 0x345   : > { %4846 = vmatmul.msk.f32.gmra.mxu0 %vm398_vm0, %v7896_v2  ;;  %4851 = vmatmul.msk.f32.gmra.mxu1 %vm398_vm0, %v8011_v49 }
 0x346   : > { %v3502_v27 = vadd.f32 %v3492_v18, %v3457_v7  ;;  %v8126_v7 = vld [vmem:[#allocation24_spill] sm:$0xff] }
 0x347   : > { %v3360_v62 = vpop.f32.mrf.mxu2  ;;  %v3405_v12 = vpop.f32.mrf.mxu3 }
 0x348   : > { %v3368_v40 = vadd.f32 %v3360_v62, %v3323_v23 }
 0x34a   : > { %v3413_v9 = vadd.f32 %v3405_v12, %v3368_v40  ;;  %v3450_v22 = vpop.f32.mrf.mxu0  ;;  %v3498_v35 = vpop.f32.mrf.mxu1 }
 0x34c   : > { %v3458_v52 = vadd.f32 %v3450_v22, %v3413_v9  ;;  %4840 = vmatmul.msk.f32.gmra.mxu2 %vm398_vm0, %v8118_v44  ;;  %4844 = vmatmul.msk.f32.gmra.mxu3 %vm398_vm0, %v8010_v20  ;;  %v8128_v22 = vld [vmem:[#allocation101_spill] sm:$0xff] }
 0x34d   : > { %4847 = vmatmul.msk.f32.gmra.mxu0 %vm398_vm0, %v7904_v15  ;;  %4852 = vmatmul.msk.f32.gmra.mxu1 %vm398_vm0, %v8018_v54  ;;  %v8120_v15 = vld [vmem:[#allocation81_spill] sm:$0xff] }
 0x34e   : > { %v3503_v2 = vadd.f32 %v3495_v32, %v3458_v52  ;;  %v8125_v32 = vld [vmem:[#allocation4_spill] sm:$0xff] }
 0x34f   : > { %v3363_v63 = vpop.f32.mrf.mxu2  ;;  %v3408_v49 = vpop.f32.mrf.mxu3  ;;  %v8127_v29 = vmax.f32 %v8125_v32, %v8126_v7 }
 0x350   : > { %v3369_v23 = vadd.f32 %v3363_v63, %v3324_v51 }
 0x351   : > { %v5475_v20 = vpop.permute.xlu2 %5474 }
 0x352   : > { %v3414_v37 = vadd.f32 %v3408_v49, %v3369_v23  ;;  %v3453_v16 = vpop.f32.mrf.mxu0  ;;  %v3629_v47 = vpop.f32.mrf.mxu1  ;;  %v5477_v51 = vunpack.i.h.bf16 %v5475_v20  ;;  %v5476_v30 = vunpack.i.l.bf16 %v5475_v20  ;;  %v8130_v23 = vld [vmem:[#allocation31_spill] sm:$0xff] }
 0x353   : > { %v8134_v20 = vld [vmem:[#allocation103_spill] sm:$0xff] }
 0x354   : > { %v3459_v21 = vadd.f32 %v3453_v16, %v3414_v37  ;;  %4853 = vmatmul.msk.f32.vlgmr.msra.gmra.mxu2 %vm398_vm0, %v8119_v25  ;;  %4857 = vmatmul.msk.f32.vlgmr.msra.gmra.mxu3 %vm398_vm0, %v8016_v41  ;;  %v4347_v18 = vsel %vm1742_vm8, %v5476_v30, %v5477_v51  ;;  %v8121_v41 = vld [vmem:[#allocation2_spill] sm:$0xff]  ;;  %v8131_v37 = vld [vmem:[#allocation5_spill] sm:$0xff] }
 0x355   : > { %4319 = vmatpush.msra.mxu2 %v7014_v24  ;;  %4848 = vmatmul.msk.f32.gmra.mxu0 %vm398_vm0, %v8120_v15  ;;  %v8122_v24 = vld [vmem:[#allocation3_spill] sm:$0xff]  ;;  %v8132_v16 = vmax.f32 %v8130_v23, %v8131_v37  ;;  %v8133_v15 = vld [vmem:[#allocation105_spill] sm:$0xff] }
 0x356   : > { %v3504_v54 = vadd.f32 %v3498_v35, %v3459_v21  ;;  %4865 = vmatmul.msk.f32.vlgmr.msrb.gmra.mxu1 %vm398_vm0, %v8025_v11  ;;  %4364 = vmatpush.msra.mxu3 %v4347_v18  ;;  %v8123_v50 = vmax.f32 %v8121_v41, %v8122_v24 }
 0x357   : > { %4320 = vmatpush.msra.mxu2 %v7029_v55  ;;  %v3534_v42 = vpop.f32.mrf.mxu2  ;;  %v3571_v17 = vpop.f32.mrf.mxu3 }
 0x358   : > { %v3546_v1 = vadd.f32 %v3534_v42, %v3501_v39  ;;  %v8135_v42 = vld [vmem:[#allocation115_spill] sm:$0xff] }
 0x35a   : > { %v7285_v48 = vmax.f32 %v8123_v50, %v3546_v1  ;;  %v3600_v46 = vpop.f32.mrf.mxu0  ;;  %v3632_v4 = vpop.f32.mrf.mxu1 }
 0x35b   : > { %v3601_v59 = vadd.f32 %v3600_v46, %v3571_v17  ;;  %v8136_v17 = vld [vmem:[#allocation119_spill] sm:$0xff]  ;;  %v8138_v46 = vld [vmem:[#allocation109_spill] sm:$0xff] }
 0x35c   : > { %4854 = vmatmul.msk.f32.gmra.mxu2 %vm398_vm0, %v8124_v33  ;;  %4858 = vmatmul.msk.f32.gmra.mxu3 %vm398_vm0, %v8023_v38  ;;  %v8137_v1 = vmax.f32 %v8135_v42, %v8136_v17 }
 0x35d   : > { %v3641_v55 = vadd.f32 %v3629_v47, %v3601_v59  ;;  %4861 = vmatmul.msk.f32.vlgmr.msrb.gmra.mxu0 %vm398_vm0, %v8017_v43  ;;  %v5480_v43 = vpop.permute.xlu0 %5479 }
 0x35e   : > { %4866 = vmatmul.msk.f32.gmra.mxu1 %vm398_vm0, %v8031_v5  ;;  %v8129_v5 = vld [vmem:[#allocation97_spill] sm:$0xff]  ;;  %v5481_v35 = vunpack.i.l.bf16 %v5480_v43 }
 0x35f   : > { %v3537_v11 = vpop.f32.mrf.mxu2  ;;  %v3574_v39 = vpop.f32.mrf.mxu3 }
 0x360   : > { %v3547_v56 = vadd.f32 %v3537_v11, %v3502_v27  ;;  %v5482_v27 = vunpack.i.h.bf16 %v5480_v43 }
 0x362   : > { %v7298_v62 = vmax.f32 %v8127_v29, %v3547_v56  ;;  %v3603_v12 = vpop.f32.mrf.mxu0  ;;  %v3635_v40 = vpop.f32.mrf.mxu1  ;;  %v4346_v63 = vsel %vm1742_vm8, %v5481_v35, %v5482_v27  ;;  %v8139_v56 = vld [vmem:[#allocation113_spill] sm:$0xff]  ;;  %v4387_v35 = vld [vmem:[%s7408_s2] sm:$0xff] }
 0x363   : > { %v3604_v9 = vadd.f32 %v3603_v12, %v3574_v39  ;;  %4365 = vmatpush.msra.mxu3 %v4346_v63 }
 0x364   : > { %4855 = vmatmul.msk.f32.gmra.mxu2 %vm398_vm0, %v8128_v22  ;;  %4859 = vmatmul.msk.f32.gmra.mxu3 %vm398_vm0, %v8029_v14 }
 0x365   : > { %v3642_v38 = vadd.f32 %v3632_v4, %v3604_v9  ;;  %4862 = vmatmul.msk.f32.gmra.mxu0 %vm398_vm0, %v8129_v5  ;;  %v8141_v9 = vld [vmem:[#allocation117_spill] sm:$0xff] }
 0x366   : > { %4867 = vmatmul.msk.f32.gmra.mxu1 %vm398_vm0, %v8034_v19 }
 0x367   : > { %v3540_v52 = vpop.f32.mrf.mxu2  ;;  %v3577_v44 = vpop.f32.mrf.mxu3 }
 0x368   : > { %v3548_v49 = vadd.f32 %v3540_v52, %v3503_v2  ;;  %v5502_v52 = vmov 0  }
 0x369   : > { %5483 = vset.pattern.permute.xlu1 %v5502_v52  ;;  %5485 = vset.pattern.permute.xlu0 %v5502_v52 }
 0x36a   : > { %v7312_v14 = vmax.f32 %v8132_v16, %v3548_v49  ;;  %v3606_v47 = vpop.f32.mrf.mxu0  ;;  %v3638_v21 = vpop.f32.mrf.mxu1  ;;  %4393 = vperm.xlu1 %5483, %v4387_v35   ;;  %5484 = vset.pattern.permute.xlu2 %v5502_v52 }
 0x36b   : > { %v3607_v25 = vadd.f32 %v3606_v47, %v3577_v44  ;;  %v8142_v44 = vld [vmem:[#allocation121_spill] sm:$0xff] }
 0x36c   : > { %4856 = vmatmul.msk.f32.gmra.mxu2 %vm398_vm0, %v8133_v15  ;;  %4860 = vmatmul.msk.f32.gmra.mxu3 %vm398_vm0, %v8032_v3  ;;  %v8143_v47 = vld [vmem:[#allocation125_spill] sm:$0xff] }
 0x36d   : > { %v3643_v19 = vadd.f32 %v3635_v40, %v3607_v25  ;;  %4863 = vmatmul.msk.f32.gmra.mxu0 %vm398_vm0, %v8134_v20  ;;  %v4390_v20 = vld [vmem:[%s7408_s2 + $0x18] sm:$0xff] }
 0x36e   : > { %4868 = vmatmul.msk.f32.gmra.mxu1 %vm398_vm0, %v8036_v28 }
 0x36f   : > { %v3543_v2 = vpop.f32.mrf.mxu2  ;;  %v3580_v51 = vpop.f32.mrf.mxu3 }
 0x370   : > { %v3549_v30 = vadd.f32 %v3543_v2, %v3504_v54  ;;  %v4389_v2 = vld [vmem:[%s7408_s2 + $0x10] sm:$0xff] }
 0x371   : > { %4403 = vperm.xlu0 %5485, %v4389_v2  }
 0x372   : > { %v7325_v18 = vmax.f32 %v8137_v1, %v3549_v30  ;;  %v3609_v41 = vpop.f32.mrf.mxu0  ;;  %v3761_v24 = vpop.f32.mrf.mxu1  ;;  %4408 = vperm.xlu1 %5483, %v4390_v20  }
 0x373   : > { %v3610_v50 = vadd.f32 %v3609_v41, %v3580_v51  ;;  %v8144_v51 = vld [vmem:[#allocation128_spill] sm:$0xff] }
 0x374   : > { %4869 = vmatmul.msk.f32.vlgmr.msrb.gmra.mxu2 %vm398_vm0, %v8138_v46  ;;  %4873 = vmatmul.msk.f32.vlgmr.msrb.gmra.mxu3 %vm398_vm0, %v8035_v8  ;;  %v8140_v8 = vld [vmem:[#allocation111_spill] sm:$0xff]  ;;  %v8145_v46 = vld [vmem:[#allocation130_spill] sm:$0xff] }
 0x375   : > { %v3644_v3 = vadd.f32 %v3638_v21, %v3610_v50  ;;  %4864 = vmatmul.msk.f32.gmra.mxu0 %vm398_vm0, %v8033_v45 }
 0x376   : > { %4881 = vmatmul.msk.f32.vlgmr.msra.gmra.mxu1 %vm398_vm0, %v8040_v6 }
 0x377   : > { %v3662_v28 = vpop.f32.mrf.mxu2  ;;  %v3695_v54 = vpop.f32.mrf.mxu3 }
 0x378   : > { %v3674_v4 = vadd.f32 %v3662_v28, %v3641_v55 }
 0x37a   : > { %v3707_v59 = vadd.f32 %v3695_v54, %v3674_v4  ;;  %v3728_v33 = vpop.f32.mrf.mxu0  ;;  %v3764_v11 = vpop.f32.mrf.mxu1 }
 0x37c   : > { %v3740_v39 = vadd.f32 %v3728_v33, %v3707_v59  ;;  %4870 = vmatmul.msk.f32.gmra.mxu2 %vm398_vm0, %v8139_v56  ;;  %4874 = vmatmul.msk.f32.gmra.mxu3 %vm398_vm0, %v8039_v60  ;;  %v8146_v56 = vld [vmem:[#allocation133_spill] sm:$0xff] }
 0x37d   : > { %4877 = vmatmul.msk.f32.vlgmr.msra.gmra.mxu0 %vm398_vm0, %v8140_v8  ;;  %v8147_v8 = vld [vmem:[#allocation135_spill] sm:$0xff] }
 0x37e   : > { %v3773_v45 = vadd.f32 %v3761_v24, %v3740_v39  ;;  %4882 = vmatmul.msk.f32.gmra.mxu1 %vm398_vm0, %v8042_v36 }
 0x37f   : > { %v3665_v6 = vpop.f32.mrf.mxu2  ;;  %v3698_v32 = vpop.f32.mrf.mxu3 }
 0x380   : > { %v3675_v55 = vadd.f32 %v3665_v6, %v3642_v38 }
 0x382   : > { %v3708_v7 = vadd.f32 %v3698_v32, %v3675_v55  ;;  %v3731_v29 = vpop.f32.mrf.mxu0  ;;  %v3767_v12 = vpop.f32.mrf.mxu1 }
 0x384   : > { %v3741_v40 = vadd.f32 %v3731_v29, %v3708_v7  ;;  %4871 = vmatmul.msk.f32.gmra.mxu2 %vm398_vm0, %v8141_v9  ;;  %4875 = vmatmul.msk.f32.gmra.mxu3 %vm398_vm0, %v8041_v26 }
 0x385   : > { %4878 = vmatmul.msk.f32.gmra.mxu0 %vm398_vm0, %v7935_v31 }
 0x386   : > { %v3774_v60 = vadd.f32 %v3764_v11, %v3741_v40  ;;  %4883 = vmatmul.msk.f32.gmra.mxu1 %vm398_vm0, %v6446_v61  ;;  %v4388_v11 = vld [vmem:[%s7408_s2 + $0x8] sm:$0xff] }
 0x387   : > { %v3668_v36 = vpop.f32.mrf.mxu2  ;;  %v3701_v22 = vpop.f32.mrf.mxu3  ;;  %4398 = vperm.xlu2 %5484, %v4388_v11  }
 0x388   : > { %v3676_v43 = vadd.f32 %v3668_v36, %v3643_v19 }
 0x38a   : > { %v3709_v38 = vadd.f32 %v3701_v22, %v3676_v43  ;;  %v3734_v5 = vpop.f32.mrf.mxu0  ;;  %v3770_v27 = vpop.f32.mrf.mxu1 }
 0x38c   : > { %v3742_v26 = vadd.f32 %v3734_v5, %v3709_v38  ;;  %4872 = vmatmul.msk.f32.gmra.mxu2 %vm398_vm0, %v8142_v44  ;;  %4876 = vmatmul.msk.f32.gmra.mxu3 %vm398_vm0, %v8043_v57 }
 0x38d   : > { %4879 = vmatmul.msk.f32.gmra.mxu0 %vm398_vm0, %v7936_v13 }
 0x38e   : > { %v3775_v31 = vadd.f32 %v3767_v12, %v3742_v26  ;;  %4884 = vmatmul.msk.f32.gmra.mxu1 %vm398_vm0, %v8045_v53 }
 0x38f   : > { %v3671_v61 = vpop.f32.mrf.mxu2  ;;  %v3704_v63 = vpop.f32.mrf.mxu3 }
 0x390   : > { %v3677_v49 = vadd.f32 %v3671_v61, %v3644_v3 }
 0x392   : > { %v3710_v23 = vadd.f32 %v3704_v63, %v3677_v49  ;;  %v3737_v37 = vpop.f32.mrf.mxu0  ;;  %v3893_v57 = vpop.f32.mrf.mxu1 }
 0x394   : > { %v3743_v16 = vadd.f32 %v3737_v37, %v3710_v23  ;;  %4885 = vmatmul.msk.f32.vlgmr.msra.gmra.mxu2 %vm398_vm0, %v8143_v47  ;;  %4889 = vmatmul.msk.f32.vlgmr.msra.gmra.mxu3 %vm398_vm0, %v8044_v34 }
 0x395   : > { %4880 = vmatmul.msk.f32.gmra.mxu0 %vm398_vm0, %v7937_v0 }
 0x396   : > { %v3776_v13 = vadd.f32 %v3770_v27, %v3743_v16 }
 0x397   : > { %v3794_v21 = vpop.f32.mrf.mxu2  ;;  %v3827_v53 = vpop.f32.mrf.mxu3 }
 0x398   : > { %v3806_v25 = vadd.f32 %v3794_v21, %v3773_v45 }
 0x39a   : > { %v3839_v15 = vadd.f32 %v3827_v53, %v3806_v25  ;;  %v3860_v19 = vpop.f32.mrf.mxu0  ;;  %v3896_v30 = vpop.f32.mrf.mxu1 }
 0x39c   : > { %v3872_v34 = vadd.f32 %v3860_v19, %v3839_v15  ;;  %4886 = vmatmul.msk.f32.gmra.mxu2 %vm398_vm0, %v8144_v51  ;;  %4890 = vmatmul.msk.f32.gmra.mxu3 %vm398_vm0, %v8051_v10 }
 0x39e   : > { %v3905_v0 = vadd.f32 %v3893_v57, %v3872_v34 }
 0x39f   : > { %v3797_v42 = vpop.f32.mrf.mxu2  ;;  %v3830_v17 = vpop.f32.mrf.mxu3 }
 0x3a0   : > { %v3807_v1 = vadd.f32 %v3797_v42, %v3774_v60 }
 0x3a2   : > { %v3840_v41 = vadd.f32 %v3830_v17, %v3807_v1  ;;  %v3863_v24 = vpop.f32.mrf.mxu0  ;;  %v3899_v59 = vpop.f32.mrf.mxu1 }
 0x3a4   : > { %v3873_v50 = vadd.f32 %v3863_v24, %v3840_v41  ;;  %4887 = vmatmul.msk.f32.gmra.mxu2 %vm398_vm0, %v8145_v46  ;;  %4891 = vmatmul.msk.f32.gmra.mxu3 %vm398_vm0, %v8056_v58 }
 0x3a6   : > { %v3906_v3 = vadd.f32 %v3896_v30, %v3873_v50 }
 0x3a7   : > { %v3800_v28 = vpop.f32.mrf.mxu2  ;;  %v3833_v54 = vpop.f32.mrf.mxu3 }
 0x3a8   : > { %v3808_v4 = vadd.f32 %v3800_v28, %v3775_v31 }
 0x3aa   : > { %v3841_v10 = vadd.f32 %v3833_v54, %v3808_v4  ;;  %v3866_v33 = vpop.f32.mrf.mxu0  ;;  %v3902_v29 = vpop.f32.mrf.mxu1 }
 0x3ac   : > { %v3874_v39 = vadd.f32 %v3866_v33, %v3841_v10  ;;  %4888 = vmatmul.msk.f32.gmra.mxu2 %vm398_vm0, %v8146_v56  ;;  %4892 = vmatmul.msk.f32.gmra.mxu3 %vm398_vm0, %v8147_v8 }
 0x3ae   : > { %v3907_v58 = vadd.f32 %v3899_v59, %v3874_v39 }
 0x3af   : > { %v3803_v45 = vpop.f32.mrf.mxu2  ;;  %v3836_v6 = vpop.f32.mrf.mxu3 }
 0x3b0   : > { %v3809_v32 = vadd.f32 %v3803_v45, %v3776_v13 }
 0x3b2   : > { %v3842_v55 = vadd.f32 %v3836_v6, %v3809_v32  ;;  %v3869_v7 = vpop.f32.mrf.mxu0  ;;  %v4025_v38 = vpop.f32.mrf.mxu1 }
 0x3b4   : > { %v3875_v12 = vadd.f32 %v3869_v7, %v3842_v55 }
 0x3b6   : > { %v3908_v40 = vadd.f32 %v3902_v29, %v3875_v12 }
 0x3b7   : > { %v3926_v9 = vpop.f32.mrf.mxu2  ;;  %v3959_v60 = vpop.f32.mrf.mxu3 }
 0x3b8   : > { %v3938_v36 = vadd.f32 %v3926_v9, %v3905_v0 }
 0x3ba   : > { %v3971_v22 = vadd.f32 %v3959_v60, %v3938_v36  ;;  %v3992_v43 = vpop.f32.mrf.mxu0  ;;  %v4028_v44 = vpop.f32.mrf.mxu1 }
 0x3bc   : > { %v4004_v24 = vadd.f32 %v3992_v43, %v3971_v22 }
 0x3be   : > { %v4037_v28 = vadd.f32 %v4025_v38, %v4004_v24 }
 0x3bf   : > { %v3929_v5 = vpop.f32.mrf.mxu2  ;;  %v3962_v27 = vpop.f32.mrf.mxu3 }
 0x3c0   : > { %v3939_v35 = vadd.f32 %v3929_v5, %v3906_v3 }
 0x3c2   : > { %v3972_v52 = vadd.f32 %v3962_v27, %v3939_v35  ;;  %v3995_v26 = vpop.f32.mrf.mxu0  ;;  %v4031_v47 = vpop.f32.mrf.mxu1 }
 0x3c4   : > { %v4005_v4 = vadd.f32 %v3995_v26, %v3972_v52 }
 0x3c6   : > { %v4038_v39 = vadd.f32 %v4028_v44, %v4005_v4 }
 0x3c7   : > { %v3932_v31 = vpop.f32.mrf.mxu2  ;;  %v3965_v61 = vpop.f32.mrf.mxu3 }
 0x3c8   : > { %v3940_v63 = vadd.f32 %v3932_v31, %v3907_v58 }
 0x3ca   : > { %v3973_v49 = vadd.f32 %v3965_v61, %v3940_v63  ;;  %v3998_v23 = vpop.f32.mrf.mxu0  ;;  %v4034_v15 = vpop.f32.mrf.mxu1 }
 0x3cc   : > { %v4006_v45 = vadd.f32 %v3998_v23, %v3973_v49 }
 0x3ce   : > { %v4039_v12 = vadd.f32 %v4031_v47, %v4006_v45 }
 0x3cf   : > { %v3935_v37 = vpop.f32.mrf.mxu2  ;;  %v3968_v16 = vpop.f32.mrf.mxu3 }
 0x3d0   : > { %v3941_v57 = vadd.f32 %v3935_v37, %v3908_v40 }
 0x3d2   : > { %v3974_v13 = vadd.f32 %v3968_v16, %v3941_v57  ;;  %v4001_v21 = vpop.f32.mrf.mxu0 }
 0x3d3   : > { %v4157_v34 = vpop.f32.mrf.mxu1 }
 0x3d4   : > { %v4007_v22 = vadd.f32 %v4001_v21, %v3974_v13 }
 0x3d6   : > { %v4040_v52 = vadd.f32 %v4034_v15, %v4007_v22 }
 0x3d7   : > { %v4058_v53 = vpop.f32.mrf.mxu2  ;;  %v4091_v25 = vpop.f32.mrf.mxu3 }
 0x3d8   : > { %v4070_v54 = vadd.f32 %v4058_v53, %v4037_v28 }
 0x3da   : > { %v4124_v2 = vpop.f32.mrf.mxu0  ;;  %v4103_v11 = vadd.f32 %v4091_v25, %v4070_v54 }
 0x3db   : > { %v4160_v42 = vpop.f32.mrf.mxu1 }
 0x3dc   : > { %v4136_v8 = vadd.f32 %v4124_v2, %v4103_v11 }
 0x3de   : > { %v4169_v55 = vadd.f32 %v4157_v34, %v4136_v8 }
 0x3df   : > { %v4061_v19 = vpop.f32.mrf.mxu2  ;;  %v4094_v20 = vpop.f32.mrf.mxu3 }
 0x3e0   : > { %v4071_v58 = vadd.f32 %v4061_v19, %v4038_v39 }
 0x3e1   : > { %v4399_v28 = vpop.permute.xlu2 %4398 }
 0x3e2   : > { %v4127_v30 = vpop.f32.mrf.mxu0  ;;  %v4104_v7 = vadd.f32 %v4094_v20, %v4071_v58  ;;  %v4394_v20 = vpop.permute.xlu1 %4393 }
 0x3e3   : > { %v4163_v3 = vpop.f32.mrf.mxu1 }
 0x3e4   : > { %v4137_v9 = vadd.f32 %v4127_v30, %v4104_v7 }
 0x3e6   : > { %v4170_v27 = vadd.f32 %v4160_v42, %v4137_v9 }
 0x3e7   : > { %v4064_v51 = vpop.f32.mrf.mxu2  ;;  %v4097_v0 = vpop.f32.mrf.mxu3 }
 0x3e8   : > { %v4072_v60 = vadd.f32 %v4064_v51, %v4039_v12 }
 0x3ea   : > { %v4130_v41 = vpop.f32.mrf.mxu0  ;;  %v4105_v35 = vadd.f32 %v4097_v0, %v4072_v60  ;;  %v4409_v22 = vpop.permute.xlu1 %4408 }
 0x3eb   : > { %v4166_v56 = vpop.f32.mrf.mxu1 }
 0x3ec   : > { %v4138_v61 = vadd.f32 %v4130_v41, %v4105_v35 }
 0x3ee   : > { %v4171_v57 = vadd.f32 %v4163_v3, %v4138_v61 }
 0x3ef   : > { %v4067_v17 = vpop.f32.mrf.mxu2  ;;  %v4100_v1 = vpop.f32.mrf.mxu3 }
 0x3f0   : > { %v4073_v63 = vadd.f32 %v4067_v17, %v4040_v52 }
 0x3f2   : > { %v4133_v59 = vpop.f32.mrf.mxu0  ;;  %v4106_v53 = vadd.f32 %v4100_v1, %v4073_v63 }
 0x3f3   : > { %v4289_v36 = vpop.f32.mrf.mxu1 }
 0x3f4   : > { %v4139_v2 = vadd.f32 %v4133_v59, %v4106_v53 }
 0x3f6   : > { %v4172_v1 = vadd.f32 %v4166_v56, %v4139_v2 }
 0x3f7   : > { %v4190_v50 = vpop.f32.mrf.mxu2  ;;  %v4223_v46 = vpop.f32.mrf.mxu3 }
 0x3f8   : > { %v4202_v40 = vadd.f32 %v4190_v50, %v4169_v55 }
 0x3fa   : > { %v4256_v29 = vpop.f32.mrf.mxu0  ;;  %v4235_v43 = vadd.f32 %v4223_v46, %v4202_v40 }
 0x3fb   : > { %v4292_v37 = vpop.f32.mrf.mxu1 }
 0x3fc   : > { %v4268_v26 = vadd.f32 %v4256_v29, %v4235_v43 }
 0x3fe   : > { %v4301_v49 = vadd.f32 %v4289_v36, %v4268_v26 }
 0x3ff   : > { %v4193_v10 = vpop.f32.mrf.mxu2  ;;  %v4226_v33 = vpop.f32.mrf.mxu3 }
 0x400   : > { %v4203_v44 = vadd.f32 %v4193_v10, %v4170_v27 }
 0x402   : > { %v4259_v31 = vpop.f32.mrf.mxu0  ;;  %v4236_v23 = vadd.f32 %v4226_v33, %v4203_v44 }
 0x403   : > { %v4295_v50 = vpop.f32.mrf.mxu1 }
 0x404   : > { %v4269_v21 = vadd.f32 %v4259_v31, %v4236_v23 }
 0x406   : > { %v4302_v51 = vadd.f32 %v4292_v37, %v4269_v21 }
 0x407   : > { %v4196_v6 = vpop.f32.mrf.mxu2  ;;  %v4229_v32 = vpop.f32.mrf.mxu3 }
 0x408   : > { %v4204_v25 = vadd.f32 %v4196_v6, %v4171_v57 }
 0x40a   : > { %v4262_v15 = vpop.f32.mrf.mxu0  ;;  %v4237_v0 = vadd.f32 %v4229_v32, %v4204_v25  ;;  %v4404_v32 = vpop.permute.xlu0 %4403 }
 0x40b   : > { %v4298_v6 = vpop.f32.mrf.mxu1 }
 0x40c   : > { %v4270_v46 = vadd.f32 %v4262_v15, %v4237_v0 }
 0x40e   : > { %v4303_v4 = vadd.f32 %v4295_v50, %v4270_v46 }
 0x40f   : > { %v4199_v38 = vpop.f32.mrf.mxu2  ;;  %v4232_v5 = vpop.f32.mrf.mxu3 }
 0x410   : > { %v4205_v3 = vadd.f32 %v4199_v38, %v4172_v1 }
 0x412   : > { %v4238_v59 = vadd.f32 %v4232_v5, %v4205_v3  ;;  %v4265_v10 = vpop.f32.mrf.mxu0 }
 0x414   : > { %v4271_v58 = vadd.f32 %v4265_v10, %v4238_v59 }
 0x416   : > { %v4304_v7 = vadd.f32 %v4298_v6, %v4271_v58 }
 0x417   : > { %v4322_v16 = vpop.f32.mrf.mxu2  ;;  %v4367_v47 = vpop.f32.mrf.mxu3 }
 0x418   : > { %v4334_v13 = vadd.f32 %v4322_v16, %v4301_v49 }
 0x41a   : > { %v4379_v19 = vadd.f32 %v4367_v47, %v4334_v13 }
 0x41c   : > { %v4383_v34 = vmax.f32 %v7285_v48, %v4379_v19 }
 0x41e   : > { %v4411_v30 = vadd.f32 %v4394_v20, %v4383_v34 }
 0x41f   : > { %v4325_v42 = vpop.f32.mrf.mxu2  ;;  %v4370_v17 = vpop.f32.mrf.mxu3 }
 0x420   : > { %v4415_v41 = vmax.f32 %v4411_v30, 0.0  ;;  %v4335_v24 = vadd.f32 %v4325_v42, %v4302_v51 }
 0x422   : > { %4419 = vst [vmem:[%s7394_s27] sm:$0xff] %v4415_v41  ;;  %v4380_v48 = vadd.f32 %v4370_v17, %v4335_v24 }
 0x424   : > { %v4384_v54 = vmax.f32 %v7298_v62, %v4380_v48 }
 0x426   : > { %v4412_v33 = vadd.f32 %v4399_v28, %v4384_v54 }
 0x427   : > { %v4328_v11 = vpop.f32.mrf.mxu2  ;;  %v4373_v39 = vpop.f32.mrf.mxu3 }
 0x428   : > { %v4416_v8 = vmax.f32 %v4412_v33, 0.0  ;;  %v4336_v56 = vadd.f32 %v4328_v11, %v4303_v4 }
 0x42a   : > { %4420 = vst [vmem:[%s7394_s27 + $0x8] sm:$0xff] %v4416_v8  ;;  %v4381_v45 = vadd.f32 %v4373_v39, %v4336_v56 }
 0x42c   : > { %v4385_v55 = vmax.f32 %v7312_v14, %v4381_v45 }
 0x42e   : > { %v4413_v29 = vadd.f32 %v4404_v32, %v4385_v55 }
 0x42f   : > { %v4331_v62 = vpop.f32.mrf.mxu2  ;;  %v4376_v12 = vpop.f32.mrf.mxu3 }
 0x430   : > { %v4417_v40 = vmax.f32 %v4413_v29, 0.0  ;;  %v4337_v9 = vadd.f32 %v4331_v62, %v4304_v7 }
 0x432   : > { %4421 = vst [vmem:[%s7394_s27 + $0x10] sm:$0xff] %v4417_v40  ;;  %v4382_v60 = vadd.f32 %v4376_v12, %v4337_v9 }
 0x434   : > { %v4386_v36 = vmax.f32 %v7325_v18, %v4382_v60 }
 0x436   : > { %v4414_v43 = vadd.f32 %v4409_v22, %v4386_v36 }
 0x438   : > { %v4418_v38 = vmax.f32 %v4414_v43, 0.0 }
 0x43a   : > { %4422 = vst [vmem:[%s7394_s27 + $0x18] sm:$0xff] %v4418_v38 }
 0x43b PF: > { %s13_s12 = sadd.s32 1, %s5492_s12  }
 0x43c   : > { %p10_p4 = scmp.ge.s32.totalorder %s13_s12, 4  }
 0x43e   :  { %12 = sbr.rel (!%p10_p4) target bundleno = 1 (0x1), region = 65 }

</bundles_post_ra>
